<compile_context>
chip_gen: v5e
topology: v5e:2x2
jax: 0.10.0
libtpu: 0.0.40
codegen_flags: <defaults>
</compile_context>

<pallas_src>
import functools

import jax
import jax.numpy as jnp
from jax import lax
from jax.experimental import pallas as pl
from jax.experimental.pallas import tpu as pltpu


def _round_up(n, m):
    return ((n + m - 1) // m) * m


# ------------------------------ fused VAE kernel ------------------------------
def _vae_kernel(x_ref, *rest, L, T, B, H_pad, spg, unroll):
    """Fused VAE forward.

    x_ref    : (T*B, Din)  time-major input rows (row = t*B + b)
    rest     : 3*L LSTM weight refs (wih_t, whh_t, bias) in PyTorch gate order
               (i,f,g,o), gate-block-padded to 4*H_pad lanes (i/f/o columns are
               pre-scaled by 0.5 for the sigmoid-via-tanh identity), followed by
               lin_w_t (H_pad, Dout_pad), lin_b (1, Dout_pad),
               out_ref (T*B, Dout_pad), and 2 VMEM scratch refs.
    """
    w_refs = rest[: 3 * L]
    lin_w_ref, lin_b_ref, out_ref, xproj_sc, hseq_sc = rest[3 * L:]

    n_groups = T // spg
    rows_per_group = spg * B

    for layer in range(L):
        wih_t_ref = w_refs[3 * layer + 0]
        whh_t_ref = w_refs[3 * layer + 1]
        b_ref = w_refs[3 * layer + 2]

        # ---- hoisted input projection: one whole-sequence matmul + bias add.
        # For layer>0, hseq_sc is read here and only overwritten inside the time
        # loop below; the data dependence through xproj_sc enforces the ordering.
        xin = x_ref[...] if layer == 0 else hseq_sc[...]
        xproj_sc[...] = (
            jnp.dot(xin, wih_t_ref[...], preferred_element_type=jnp.float32)
            + b_ref[...]
        )                                                    # (T*B, 4*H_pad)

        # ---- recurrence: only h_{t-1} @ W_hh^T + gate math per step.
        def group_step(g, carry):
            h, c = carry                                     # (B, H_pad) vreg carries
            base = pl.multiple_of(g * rows_per_group, rows_per_group)
            xg = xproj_sc[pl.ds(base, rows_per_group), :]    # one aligned load
            h_rows = []
            for j in range(spg):
                gates = xg[j * B:(j + 1) * B, :] + jnp.dot(
                    h, whh_t_ref[...], preferred_element_type=jnp.float32)
                t = jnp.tanh(gates)          # single EUP op over all 4 gate blocks
                i = 0.5 * t[:, 0 * H_pad:1 * H_pad] + 0.5    # sigmoid via tanh
                f = 0.5 * t[:, 1 * H_pad:2 * H_pad] + 0.5
                g_ = t[:, 2 * H_pad:3 * H_pad]
                o = 0.5 * t[:, 3 * H_pad:4 * H_pad] + 0.5
                c = f * c + i * g_
                h = o * jnp.tanh(c)
                h_rows.append(h)
            block = h_rows[0] if spg == 1 else jnp.concatenate(h_rows, axis=0)
            hseq_sc[pl.ds(base, rows_per_group), :] = block  # coalesced, aligned store
            return (h, c)

        h0 = jnp.zeros((B, H_pad), jnp.float32)
        c0 = jnp.zeros((B, H_pad), jnp.float32)
        lax.fori_loop(0, n_groups, group_step, (h0, c0), unroll=unroll)

    # ---- Linear + Sigmoid head on the full sequence (lane-dense padded output)
    y = jnp.dot(hseq_sc[...], lin_w_ref[...], preferred_element_type=jnp.float32)
    out_ref[...] = jax.nn.sigmoid(y + lin_b_ref[...])        # (T*B, Dout_pad)


# ------------------------------ parameter packing ------------------------------
# PyTorch gate order (i, f, g, o).  i/f/o columns pre-scaled by 0.5 so the kernel
# can use the single-tanh identity sigmoid(x) = 0.5*tanh(x/2) + 0.5.
_GATE_PRESCALE = (0.5, 0.5, 1.0, 0.5)


def _pack_gate_cols(w, H, H_pad):
    """w: (..., 4*H).  Pre-scale i/f/o gate blocks and zero-pad each block to H_pad."""
    lead = w.shape[:-1]
    w4 = w.reshape(lead + (4, H))
    scale = jnp.asarray(_GATE_PRESCALE, w.dtype).reshape((1,) * len(lead) + (4, 1))
    w4 = w4 * scale
    pad = [(0, 0)] * (len(lead) + 1) + [(0, H_pad - H)]
    return jnp.pad(w4, pad).reshape(lead + (4 * H_pad,))


def _pad_rows(w, rows_pad):
    return jnp.pad(w, ((0, rows_pad - w.shape[0]), (0, 0)))


def init_vae_params(key, input_size, hidden_size, num_layers):
    """PyTorch-style U(-1/sqrt(H), 1/sqrt(H)) init, padded/packed for the kernel."""
    H = hidden_size
    H_pad = _round_up(H, 128)
    Dout_pad = _round_up(input_size, 128)
    scale = 1.0 / (H ** 0.5)

    def uniform(k, shape):
        return jax.random.uniform(k, shape, jnp.float32, -scale, scale)

    # encoder: layer 0 takes input_size, rest take H; decoder: all layers take H
    in_dims = [input_size] + [H] * (num_layers - 1) + [H] * num_layers

    layers = []
    for li, d_in in enumerate(in_dims):
        key, k1, k2, k3, k4 = jax.random.split(key, 5)
        w_ih = uniform(k1, (4 * H, d_in))
        w_hh = uniform(k2, (4 * H, H))
        b_ih = uniform(k3, (4 * H,))
        b_hh = uniform(k4, (4 * H,))

        wih_t = _pack_gate_cols(w_ih.T, H, H_pad)            # (d_in, 4*H_pad)
        if li > 0:
            # hidden-state inputs are padded to H_pad lanes (pad lanes are 0)
            wih_t = _pad_rows(wih_t, H_pad)                  # (H_pad, 4*H_pad)
        whh_t = _pad_rows(_pack_gate_cols(w_hh.T, H, H_pad), H_pad)
        bias = _pack_gate_cols((b_ih + b_hh)[None, :], H, H_pad)   # (1, 4*H_pad)
        layers.append((wih_t, whh_t, bias))

    key, k1, k2 = jax.random.split(key, 3)
    lin_w = uniform(k1, (input_size, H))                     # Linear(H, input_size)
    lin_b = uniform(k2, (input_size,))
    lin_w_t = jnp.zeros((H_pad, Dout_pad), jnp.float32).at[:H, :input_size].set(lin_w.T)
    lin_b_p = jnp.zeros((1, Dout_pad), jnp.float32).at[0, :input_size].set(lin_b)
    return {"layers": layers, "lin_w_t": lin_w_t, "lin_b": lin_b_p}


# -------------------------------- VAE forward ----------------------------------
@jax.jit
def vae_forward(x, params):
    """x: (B, T, input_size) float32 -> (B, T, input_size) float32."""
    B, T, Din = x.shape
    layers = params["layers"]
    L = len(layers)
    H_pad = layers[0][1].shape[0]                 # whh_t row count
    Dout_pad = params["lin_w_t"].shape[1]

    # time-major rows (row = t*B + b); cheap XLA transpose/reshape, no in-kernel perm
    x_tm = jnp.transpose(x, (1, 0, 2)).reshape(T * B, Din)

    # steps-per-group for coalesced (>=8 sublane) hidden-state stores
    spg = 1
    if B < 8 and 8 % B == 0:
        spg = 8 // B
        while spg > 1 and T % spg != 0:
            spg //= 2
    n_groups = T // spg
    unroll = True if n_groups <= 16 else 8

    flat_in = [x_tm]
    for wih_t, whh_t, bias in layers:
        flat_in += [wih_t, whh_t, bias]
    flat_in += [params["lin_w_t"], params["lin_b"]]

    # VMEM budget: resident inputs + output + scratch, with headroom
    need = sum(a.size * a.dtype.itemsize for a in flat_in)
    need += (T * B) * Dout_pad * 4                # output
    need += (T * B) * (4 * H_pad) * 4             # xproj scratch
    need += (T * B) * H_pad * 4                   # hseq scratch
    vmem_limit = int(min(64 * 1024 * 1024, max(2 * need + (1 << 20), 32 * 1024 * 1024)))

    kernel = functools.partial(
        _vae_kernel, L=L, T=T, B=B, H_pad=H_pad, spg=spg, unroll=unroll)

    out_tm = pl.pallas_call(
        kernel,
        out_shape=jax.ShapeDtypeStruct((T * B, Dout_pad), jnp.float32),
        in_specs=[pl.BlockSpec(memory_space=pltpu.MemorySpace.VMEM)] * len(flat_in),
        out_specs=pl.BlockSpec(memory_space=pltpu.MemorySpace.VMEM),
        scratch_shapes=[
            pltpu.VMEM((T * B, 4 * H_pad), jnp.float32),   # hoisted input projection
            pltpu.VMEM((T * B, H_pad), jnp.float32),       # current layer hidden seq
        ],
        compiler_params=pltpu.CompilerParams(vmem_limit_bytes=vmem_limit),
    )(*flat_in)

    out = out_tm.reshape(T, B, Dout_pad)[:, :, :Din]        # drop lane padding
    return jnp.transpose(out, (1, 0, 2))                    # back to batch-first


# ------------------------------------ main --------------------------------------
if __name__ == "__main__":
    input_size = 4
    hidden_size = 32
    num_layers = 2
    batch = 2
    seq = 8

    key = jax.random.PRNGKey(0)
    key, kx, kp = jax.random.split(key, 3)
    x = jax.random.uniform(kx, (batch, seq, input_size), jnp.float32)
    params = init_vae_params(kp, input_size, hidden_size, num_layers)

    y = vae_forward(x, params)
    jax.block_until_ready(y)

    assert y.shape == (batch, seq, input_size)
    assert y.dtype == jnp.float32
    assert bool(jnp.all(jnp.isfinite(y)))
    assert bool(jnp.all((y >= 0.0) & (y <= 1.0)))   # sigmoid output range
    print("KERNEL_OK")
</pallas_src>

<mosaic_0001>
module attributes {stable_mosaic.version = 11 : i64} {
  func.func @_vae_kernel(%arg0: memref<16x4xf32, #tpu.memory_space<vmem>>, %arg1: memref<4x512xf32, #tpu.memory_space<vmem>>, %arg2: memref<128x512xf32, #tpu.memory_space<vmem>>, %arg3: memref<1x512xf32, #tpu.memory_space<vmem>>, %arg4: memref<128x512xf32, #tpu.memory_space<vmem>>, %arg5: memref<128x512xf32, #tpu.memory_space<vmem>>, %arg6: memref<1x512xf32, #tpu.memory_space<vmem>>, %arg7: memref<128x512xf32, #tpu.memory_space<vmem>>, %arg8: memref<128x512xf32, #tpu.memory_space<vmem>>, %arg9: memref<1x512xf32, #tpu.memory_space<vmem>>, %arg10: memref<128x512xf32, #tpu.memory_space<vmem>>, %arg11: memref<128x512xf32, #tpu.memory_space<vmem>>, %arg12: memref<1x512xf32, #tpu.memory_space<vmem>>, %arg13: memref<128x128xf32, #tpu.memory_space<vmem>>, %arg14: memref<1x128xf32, #tpu.memory_space<vmem>>, %arg15: memref<16x128xf32, #tpu.memory_space<vmem>>, %arg16: memref<16x512xf32, #tpu.memory_space<vmem>>, %arg17: memref<16x128xf32, #tpu.memory_space<vmem>>) attributes {dimension_semantics = [], scalar_prefetch = 0 : i64, scratch_operands = 2 : i64, tpu.core_type = #tpu.core_type<tc>} {
    %c0 = arith.constant 0 : index
    %c0_0 = arith.constant 0 : index
    %0 = vector.load %arg0[%c0, %c0_0] : memref<16x4xf32, #tpu.memory_space<vmem>>, vector<16x4xf32>
    %c0_1 = arith.constant 0 : index
    %c0_2 = arith.constant 0 : index
    %1 = vector.load %arg1[%c0_1, %c0_2] : memref<4x512xf32, #tpu.memory_space<vmem>>, vector<4x512xf32>
    %cst = arith.constant dense<0.000000e+00> : vector<16x512xf32>
    %2 = tpu.matmul %0, %1, %cst {dimension_numbers = #tpu.dot_dimension_numbers<[1], [0], [0], [1], [0, 0, 1, 1], [], []>} : vector<16x4xf32>, vector<4x512xf32>, vector<16x512xf32> -> vector<16x512xf32>
    %c0_3 = arith.constant 0 : index
    %c0_4 = arith.constant 0 : index
    %3 = vector.load %arg3[%c0_3, %c0_4] : memref<1x512xf32, #tpu.memory_space<vmem>>, vector<1x512xf32>
    %4 = vector.broadcast %3 : vector<1x512xf32> to vector<16x512xf32>
    %5 = arith.addf %2, %4 : vector<16x512xf32>
    %c0_5 = arith.constant 0 : index
    %c0_6 = arith.constant 0 : index
    %6 = vector.load %arg16[%c0_5, %c0_6] : memref<16x512xf32, #tpu.memory_space<vmem>>, vector<16x512xf32>
    tpu.vector_store %arg16[%c0_5, %c0_6], %5 {strides = array<i32>} : memref<16x512xf32, #tpu.memory_space<vmem>>, vector<16x512xf32>,
    %cst_7 = arith.constant 0.000000e+00 : f32
    %7 = vector.broadcast %cst_7 : f32 to vector<2x128xf32>
    %cst_8 = arith.constant 0.000000e+00 : f32
    %8 = vector.broadcast %cst_8 : f32 to vector<2x128xf32>
    %c0_i32 = arith.constant 0 : i32
    %c8_i32 = arith.constant 8 : i32
    %9 = arith.muli %c0_i32, %c8_i32 : i32
    %10 = tpu.assume_multiple %9, 8 : i32
    %11 = arith.index_cast %10 : i32 to index
    %c0_9 = arith.constant 0 : index
    %12 = vector.load %arg16[%11, %c0_9] : memref<16x512xf32, #tpu.memory_space<vmem>>, vector<8x512xf32>
    %13 = vector.extract_strided_slice %12 {offsets = [0, 0], sizes = [2, 512], strides = [1, 1]} : vector<8x512xf32> to vector<2x512xf32>
    %c0_10 = arith.constant 0 : index
    %c0_11 = arith.constant 0 : index
    %14 = vector.load %arg2[%c0_10, %c0_11] : memref<128x512xf32, #tpu.memory_space<vmem>>, vector<128x512xf32>
    %cst_12 = arith.constant dense<0.000000e+00> : vector<2x512xf32>
    %15 = tpu.matmul %7, %14, %cst_12 {dimension_numbers = #tpu.dot_dimension_numbers<[1], [0], [0], [1], [0, 0, 1, 1], [], []>} : vector<2x128xf32>, vector<128x512xf32>, vector<2x512xf32> -> vector<2x512xf32>
    %16 = arith.addf %13, %15 : vector<2x512xf32>
    %17 = math.tanh %16 : vector<2x512xf32>
    %18 = vector.extract_strided_slice %17 {offsets = [0, 0], sizes = [2, 128], strides = [1, 1]} : vector<2x512xf32> to vector<2x128xf32>
    %cst_13 = arith.constant 5.000000e-01 : f32
    %19 = vector.broadcast %cst_13 : f32 to vector<2x128xf32>
    %20 = arith.mulf %19, %18 : vector<2x128xf32>
    %cst_14 = arith.constant 5.000000e-01 : f32
    %21 = vector.broadcast %cst_14 : f32 to vector<2x128xf32>
    %22 = arith.addf %20, %21 : vector<2x128xf32>
    %23 = vector.extract_strided_slice %17 {offsets = [0, 128], sizes = [2, 128], strides = [1, 1]} : vector<2x512xf32> to vector<2x128xf32>
    %cst_15 = arith.constant 5.000000e-01 : f32
    %24 = vector.broadcast %cst_15 : f32 to vector<2x128xf32>
    %25 = arith.mulf %24, %23 : vector<2x128xf32>
    %cst_16 = arith.constant 5.000000e-01 : f32
    %26 = vector.broadcast %cst_16 : f32 to vector<2x128xf32>
    %27 = arith.addf %25, %26 : vector<2x128xf32>
    %28 = vector.extract_strided_slice %17 {offsets = [0, 256], sizes = [2, 128], strides = [1, 1]} : vector<2x512xf32> to vector<2x128xf32>
    %29 = vector.extract_strided_slice %17 {offsets = [0, 384], sizes = [2, 128], strides = [1, 1]} : vector<2x512xf32> to vector<2x128xf32>
    %cst_17 = arith.constant 5.000000e-01 : f32
    %30 = vector.broadcast %cst_17 : f32 to vector<2x128xf32>
    %31 = arith.mulf %30, %29 : vector<2x128xf32>
    %cst_18 = arith.constant 5.000000e-01 : f32
    %32 = vector.broadcast %cst_18 : f32 to vector<2x128xf32>
    %33 = arith.addf %31, %32 : vector<2x128xf32>
    %34 = arith.mulf %27, %8 : vector<2x128xf32>
    %35 = arith.mulf %22, %28 : vector<2x128xf32>
    %36 = arith.addf %34, %35 : vector<2x128xf32>
    %37 = math.tanh %36 : vector<2x128xf32>
    %38 = arith.mulf %33, %37 : vector<2x128xf32>
    %39 = vector.extract_strided_slice %12 {offsets = [2, 0], sizes = [2, 512], strides = [1, 1]} : vector<8x512xf32> to vector<2x512xf32>
    %c0_19 = arith.constant 0 : index
    %c0_20 = arith.constant 0 : index
    %40 = vector.load %arg2[%c0_19, %c0_20] : memref<128x512xf32, #tpu.memory_space<vmem>>, vector<128x512xf32>
    %cst_21 = arith.constant dense<0.000000e+00> : vector<2x512xf32>
    %41 = tpu.matmul %38, %40, %cst_21 {dimension_numbers = #tpu.dot_dimension_numbers<[1], [0], [0], [1], [0, 0, 1, 1], [], []>} : vector<2x128xf32>, vector<128x512xf32>, vector<2x512xf32> -> vector<2x512xf32>
    %42 = arith.addf %39, %41 : vector<2x512xf32>
    %43 = math.tanh %42 : vector<2x512xf32>
    %44 = vector.extract_strided_slice %43 {offsets = [0, 0], sizes = [2, 128], strides = [1, 1]} : vector<2x512xf32> to vector<2x128xf32>
    %cst_22 = arith.constant 5.000000e-01 : f32
    %45 = vector.broadcast %cst_22 : f32 to vector<2x128xf32>
    %46 = arith.mulf %45, %44 : vector<2x128xf32>
    %cst_23 = arith.constant 5.000000e-01 : f32
    %47 = vector.broadcast %cst_23 : f32 to vector<2x128xf32>
    %48 = arith.addf %46, %47 : vector<2x128xf32>
    %49 = vector.extract_strided_slice %43 {offsets = [0, 128], sizes = [2, 128], strides = [1, 1]} : vector<2x512xf32> to vector<2x128xf32>
    %cst_24 = arith.constant 5.000000e-01 : f32
    %50 = vector.broadcast %cst_24 : f32 to vector<2x128xf32>
    %51 = arith.mulf %50, %49 : vector<2x128xf32>
    %cst_25 = arith.constant 5.000000e-01 : f32
    %52 = vector.broadcast %cst_25 : f32 to vector<2x128xf32>
    %53 = arith.addf %51, %52 : vector<2x128xf32>
    %54 = vector.extract_strided_slice %43 {offsets = [0, 256], sizes = [2, 128], strides = [1, 1]} : vector<2x512xf32> to vector<2x128xf32>
    %55 = vector.extract_strided_slice %43 {offsets = [0, 384], sizes = [2, 128], strides = [1, 1]} : vector<2x512xf32> to vector<2x128xf32>
    %cst_26 = arith.constant 5.000000e-01 : f32
    %56 = vector.broadcast %cst_26 : f32 to vector<2x128xf32>
    %57 = arith.mulf %56, %55 : vector<2x128xf32>
    %cst_27 = arith.constant 5.000000e-01 : f32
    %58 = vector.broadcast %cst_27 : f32 to vector<2x128xf32>
    %59 = arith.addf %57, %58 : vector<2x128xf32>
    %60 = arith.mulf %53, %36 : vector<2x128xf32>
    %61 = arith.mulf %48, %54 : vector<2x128xf32>
    %62 = arith.addf %60, %61 : vector<2x128xf32>
    %63 = math.tanh %62 : vector<2x128xf32>
    %64 = arith.mulf %59, %63 : vector<2x128xf32>
    %65 = vector.extract_strided_slice %12 {offsets = [4, 0], sizes = [2, 512], strides = [1, 1]} : vector<8x512xf32> to vector<2x512xf32>
    %c0_28 = arith.constant 0 : index
    %c0_29 = arith.constant 0 : index
    %66 = vector.load %arg2[%c0_28, %c0_29] : memref<128x512xf32, #tpu.memory_space<vmem>>, vector<128x512xf32>
    %cst_30 = arith.constant dense<0.000000e+00> : vector<2x512xf32>
    %67 = tpu.matmul %64, %66, %cst_30 {dimension_numbers = #tpu.dot_dimension_numbers<[1], [0], [0], [1], [0, 0, 1, 1], [], []>} : vector<2x128xf32>, vector<128x512xf32>, vector<2x512xf32> -> vector<2x512xf32>
    %68 = arith.addf %65, %67 : vector<2x512xf32>
    %69 = math.tanh %68 : vector<2x512xf32>
    %70 = vector.extract_strided_slice %69 {offsets = [0, 0], sizes = [2, 128], strides = [1, 1]} : vector<2x512xf32> to vector<2x128xf32>
    %cst_31 = arith.constant 5.000000e-01 : f32
    %71 = vector.broadcast %cst_31 : f32 to vector<2x128xf32>
    %72 = arith.mulf %71, %70 : vector<2x128xf32>
    %cst_32 = arith.constant 5.000000e-01 : f32
    %73 = vector.broadcast %cst_32 : f32 to vector<2x128xf32>
    %74 = arith.addf %72, %73 : vector<2x128xf32>
    %75 = vector.extract_strided_slice %69 {offsets = [0, 128], sizes = [2, 128], strides = [1, 1]} : vector<2x512xf32> to vector<2x128xf32>
    %cst_33 = arith.constant 5.000000e-01 : f32
    %76 = vector.broadcast %cst_33 : f32 to vector<2x128xf32>
    %77 = arith.mulf %76, %75 : vector<2x128xf32>
    %cst_34 = arith.constant 5.000000e-01 : f32
    %78 = vector.broadcast %cst_34 : f32 to vector<2x128xf32>
    %79 = arith.addf %77, %78 : vector<2x128xf32>
    %80 = vector.extract_strided_slice %69 {offsets = [0, 256], sizes = [2, 128], strides = [1, 1]} : vector<2x512xf32> to vector<2x128xf32>
    %81 = vector.extract_strided_slice %69 {offsets = [0, 384], sizes = [2, 128], strides = [1, 1]} : vector<2x512xf32> to vector<2x128xf32>
    %cst_35 = arith.constant 5.000000e-01 : f32
    %82 = vector.broadcast %cst_35 : f32 to vector<2x128xf32>
    %83 = arith.mulf %82, %81 : vector<2x128xf32>
    %cst_36 = arith.constant 5.000000e-01 : f32
    %84 = vector.broadcast %cst_36 : f32 to vector<2x128xf32>
    %85 = arith.addf %83, %84 : vector<2x128xf32>
    %86 = arith.mulf %79, %62 : vector<2x128xf32>
    %87 = arith.mulf %74, %80 : vector<2x128xf32>
    %88 = arith.addf %86, %87 : vector<2x128xf32>
    %89 = math.tanh %88 : vector<2x128xf32>
    %90 = arith.mulf %85, %89 : vector<2x128xf32>
    %91 = vector.extract_strided_slice %12 {offsets = [6, 0], sizes = [2, 512], strides = [1, 1]} : vector<8x512xf32> to vector<2x512xf32>
    %c0_37 = arith.constant 0 : index
    %c0_38 = arith.constant 0 : index
    %92 = vector.load %arg2[%c0_37, %c0_38] : memref<128x512xf32, #tpu.memory_space<vmem>>, vector<128x512xf32>
    %cst_39 = arith.constant dense<0.000000e+00> : vector<2x512xf32>
    %93 = tpu.matmul %90, %92, %cst_39 {dimension_numbers = #tpu.dot_dimension_numbers<[1], [0], [0], [1], [0, 0, 1, 1], [], []>} : vector<2x128xf32>, vector<128x512xf32>, vector<2x512xf32> -> vector<2x512xf32>
    %94 = arith.addf %91, %93 : vector<2x512xf32>
    %95 = math.tanh %94 : vector<2x512xf32>
    %96 = vector.extract_strided_slice %95 {offsets = [0, 0], sizes = [2, 128], strides = [1, 1]} : vector<2x512xf32> to vector<2x128xf32>
    %cst_40 = arith.constant 5.000000e-01 : f32
    %97 = vector.broadcast %cst_40 : f32 to vector<2x128xf32>
    %98 = arith.mulf %97, %96 : vector<2x128xf32>
    %cst_41 = arith.constant 5.000000e-01 : f32
    %99 = vector.broadcast %cst_41 : f32 to vector<2x128xf32>
    %100 = arith.addf %98, %99 : vector<2x128xf32>
    %101 = vector.extract_strided_slice %95 {offsets = [0, 128], sizes = [2, 128], strides = [1, 1]} : vector<2x512xf32> to vector<2x128xf32>
    %cst_42 = arith.constant 5.000000e-01 : f32
    %102 = vector.broadcast %cst_42 : f32 to vector<2x128xf32>
    %103 = arith.mulf %102, %101 : vector<2x128xf32>
    %cst_43 = arith.constant 5.000000e-01 : f32
    %104 = vector.broadcast %cst_43 : f32 to vector<2x128xf32>
    %105 = arith.addf %103, %104 : vector<2x128xf32>
    %106 = vector.extract_strided_slice %95 {offsets = [0, 256], sizes = [2, 128], strides = [1, 1]} : vector<2x512xf32> to vector<2x128xf32>
    %107 = vector.extract_strided_slice %95 {offsets = [0, 384], sizes = [2, 128], strides = [1, 1]} : vector<2x512xf32> to vector<2x128xf32>
    %cst_44 = arith.constant 5.000000e-01 : f32
    %108 = vector.broadcast %cst_44 : f32 to vector<2x128xf32>
    %109 = arith.mulf %108, %107 : vector<2x128xf32>
    %cst_45 = arith.constant 5.000000e-01 : f32
    %110 = vector.broadcast %cst_45 : f32 to vector<2x128xf32>
    %111 = arith.addf %109, %110 : vector<2x128xf32>
    %112 = arith.mulf %105, %88 : vector<2x128xf32>
    %113 = arith.mulf %100, %106 : vector<2x128xf32>
    %114 = arith.addf %112, %113 : vector<2x128xf32>
    %115 = math.tanh %114 : vector<2x128xf32>
    %116 = arith.mulf %111, %115 : vector<2x128xf32>
    %117 = tpu.concatenate %38, %64, %90, %116 in 0 : vector<2x128xf32>, vector<2x128xf32>, vector<2x128xf32>, vector<2x128xf32> -> vector<8x128xf32>
    %118 = arith.index_cast %10 : i32 to index
    %c0_46 = arith.constant 0 : index
    %119 = vector.load %arg17[%118, %c0_46] : memref<16x128xf32, #tpu.memory_space<vmem>>, vector<8x128xf32>
    tpu.vector_store %arg17[%118, %c0_46], %117 {strides = array<i32>} : memref<16x128xf32, #tpu.memory_space<vmem>>, vector<8x128xf32>,
    %c1_i32 = arith.constant 1 : i32
    %c8_i32_47 = arith.constant 8 : i32
    %120 = arith.muli %c1_i32, %c8_i32_47 : i32
    %121 = tpu.assume_multiple %120, 8 : i32
    %122 = arith.index_cast %121 : i32 to index
    %c0_48 = arith.constant 0 : index
    %123 = vector.load %arg16[%122, %c0_48] : memref<16x512xf32, #tpu.memory_space<vmem>>, vector<8x512xf32>
    %124 = vector.extract_strided_slice %123 {offsets = [0, 0], sizes = [2, 512], strides = [1, 1]} : vector<8x512xf32> to vector<2x512xf32>
    %c0_49 = arith.constant 0 : index
    %c0_50 = arith.constant 0 : index
    %125 = vector.load %arg2[%c0_49, %c0_50] : memref<128x512xf32, #tpu.memory_space<vmem>>, vector<128x512xf32>
    %cst_51 = arith.constant dense<0.000000e+00> : vector<2x512xf32>
    %126 = tpu.matmul %116, %125, %cst_51 {dimension_numbers = #tpu.dot_dimension_numbers<[1], [0], [0], [1], [0, 0, 1, 1], [], []>} : vector<2x128xf32>, vector<128x512xf32>, vector<2x512xf32> -> vector<2x512xf32>
    %127 = arith.addf %124, %126 : vector<2x512xf32>
    %128 = math.tanh %127 : vector<2x512xf32>
    %129 = vector.extract_strided_slice %128 {offsets = [0, 0], sizes = [2, 128], strides = [1, 1]} : vector<2x512xf32> to vector<2x128xf32>
    %cst_52 = arith.constant 5.000000e-01 : f32
    %130 = vector.broadcast %cst_52 : f32 to vector<2x128xf32>
    %131 = arith.mulf %130, %129 : vector<2x128xf32>
    %cst_53 = arith.constant 5.000000e-01 : f32
    %132 = vector.broadcast %cst_53 : f32 to vector<2x128xf32>
    %133 = arith.addf %131, %132 : vector<2x128xf32>
    %134 = vector.extract_strided_slice %128 {offsets = [0, 128], sizes = [2, 128], strides = [1, 1]} : vector<2x512xf32> to vector<2x128xf32>
    %cst_54 = arith.constant 5.000000e-01 : f32
    %135 = vector.broadcast %cst_54 : f32 to vector<2x128xf32>
    %136 = arith.mulf %135, %134 : vector<2x128xf32>
    %cst_55 = arith.constant 5.000000e-01 : f32
    %137 = vector.broadcast %cst_55 : f32 to vector<2x128xf32>
    %138 = arith.addf %136, %137 : vector<2x128xf32>
    %139 = vector.extract_strided_slice %128 {offsets = [0, 256], sizes = [2, 128], strides = [1, 1]} : vector<2x512xf32> to vector<2x128xf32>
    %140 = vector.extract_strided_slice %128 {offsets = [0, 384], sizes = [2, 128], strides = [1, 1]} : vector<2x512xf32> to vector<2x128xf32>
    %cst_56 = arith.constant 5.000000e-01 : f32
    %141 = vector.broadcast %cst_56 : f32 to vector<2x128xf32>
    %142 = arith.mulf %141, %140 : vector<2x128xf32>
    %cst_57 = arith.constant 5.000000e-01 : f32
    %143 = vector.broadcast %cst_57 : f32 to vector<2x128xf32>
    %144 = arith.addf %142, %143 : vector<2x128xf32>
    %145 = arith.mulf %138, %114 : vector<2x128xf32>
    %146 = arith.mulf %133, %139 : vector<2x128xf32>
    %147 = arith.addf %145, %146 : vector<2x128xf32>
    %148 = math.tanh %147 : vector<2x128xf32>
    %149 = arith.mulf %144, %148 : vector<2x128xf32>
    %150 = vector.extract_strided_slice %123 {offsets = [2, 0], sizes = [2, 512], strides = [1, 1]} : vector<8x512xf32> to vector<2x512xf32>
    %c0_58 = arith.constant 0 : index
    %c0_59 = arith.constant 0 : index
    %151 = vector.load %arg2[%c0_58, %c0_59] : memref<128x512xf32, #tpu.memory_space<vmem>>, vector<128x512xf32>
    %cst_60 = arith.constant dense<0.000000e+00> : vector<2x512xf32>
    %152 = tpu.matmul %149, %151, %cst_60 {dimension_numbers = #tpu.dot_dimension_numbers<[1], [0], [0], [1], [0, 0, 1, 1], [], []>} : vector<2x128xf32>, vector<128x512xf32>, vector<2x512xf32> -> vector<2x512xf32>
    %153 = arith.addf %150, %152 : vector<2x512xf32>
    %154 = math.tanh %153 : vector<2x512xf32>
    %155 = vector.extract_strided_slice %154 {offsets = [0, 0], sizes = [2, 128], strides = [1, 1]} : vector<2x512xf32> to vector<2x128xf32>
    %cst_61 = arith.constant 5.000000e-01 : f32
    %156 = vector.broadcast %cst_61 : f32 to vector<2x128xf32>
    %157 = arith.mulf %156, %155 : vector<2x128xf32>
    %cst_62 = arith.constant 5.000000e-01 : f32
    %158 = vector.broadcast %cst_62 : f32 to vector<2x128xf32>
    %159 = arith.addf %157, %158 : vector<2x128xf32>
    %160 = vector.extract_strided_slice %154 {offsets = [0, 128], sizes = [2, 128], strides = [1, 1]} : vector<2x512xf32> to vector<2x128xf32>
    %cst_63 = arith.constant 5.000000e-01 : f32
    %161 = vector.broadcast %cst_63 : f32 to vector<2x128xf32>
    %162 = arith.mulf %161, %160 : vector<2x128xf32>
    %cst_64 = arith.constant 5.000000e-01 : f32
    %163 = vector.broadcast %cst_64 : f32 to vector<2x128xf32>
    %164 = arith.addf %162, %163 : vector<2x128xf32>
    %165 = vector.extract_strided_slice %154 {offsets = [0, 256], sizes = [2, 128], strides = [1, 1]} : vector<2x512xf32> to vector<2x128xf32>
    %166 = vector.extract_strided_slice %154 {offsets = [0, 384], sizes = [2, 128], strides = [1, 1]} : vector<2x512xf32> to vector<2x128xf32>
    %cst_65 = arith.constant 5.000000e-01 : f32
    %167 = vector.broadcast %cst_65 : f32 to vector<2x128xf32>
    %168 = arith.mulf %167, %166 : vector<2x128xf32>
    %cst_66 = arith.constant 5.000000e-01 : f32
    %169 = vector.broadcast %cst_66 : f32 to vector<2x128xf32>
    %170 = arith.addf %168, %169 : vector<2x128xf32>
    %171 = arith.mulf %164, %147 : vector<2x128xf32>
    %172 = arith.mulf %159, %165 : vector<2x128xf32>
    %173 = arith.addf %171, %172 : vector<2x128xf32>
    %174 = math.tanh %173 : vector<2x128xf32>
    %175 = arith.mulf %170, %174 : vector<2x128xf32>
    %176 = vector.extract_strided_slice %123 {offsets = [4, 0], sizes = [2, 512], strides = [1, 1]} : vector<8x512xf32> to vector<2x512xf32>
    %c0_67 = arith.constant 0 : index
    %c0_68 = arith.constant 0 : index
    %177 = vector.load %arg2[%c0_67, %c0_68] : memref<128x512xf32, #tpu.memory_space<vmem>>, vector<128x512xf32>
    %cst_69 = arith.constant dense<0.000000e+00> : vector<2x512xf32>
    %178 = tpu.matmul %175, %177, %cst_69 {dimension_numbers = #tpu.dot_dimension_numbers<[1], [0], [0], [1], [0, 0, 1, 1], [], []>} : vector<2x128xf32>, vector<128x512xf32>, vector<2x512xf32> -> vector<2x512xf32>
    %179 = arith.addf %176, %178 : vector<2x512xf32>
    %180 = math.tanh %179 : vector<2x512xf32>
    %181 = vector.extract_strided_slice %180 {offsets = [0, 0], sizes = [2, 128], strides = [1, 1]} : vector<2x512xf32> to vector<2x128xf32>
    %cst_70 = arith.constant 5.000000e-01 : f32
    %182 = vector.broadcast %cst_70 : f32 to vector<2x128xf32>
    %183 = arith.mulf %182, %181 : vector<2x128xf32>
    %cst_71 = arith.constant 5.000000e-01 : f32
    %184 = vector.broadcast %cst_71 : f32 to vector<2x128xf32>
    %185 = arith.addf %183, %184 : vector<2x128xf32>
    %186 = vector.extract_strided_slice %180 {offsets = [0, 128], sizes = [2, 128], strides = [1, 1]} : vector<2x512xf32> to vector<2x128xf32>
    %cst_72 = arith.constant 5.000000e-01 : f32
    %187 = vector.broadcast %cst_72 : f32 to vector<2x128xf32>
    %188 = arith.mulf %187, %186 : vector<2x128xf32>
    %cst_73 = arith.constant 5.000000e-01 : f32
    %189 = vector.broadcast %cst_73 : f32 to vector<2x128xf32>
    %190 = arith.addf %188, %189 : vector<2x128xf32>
    %191 = vector.extract_strided_slice %180 {offsets = [0, 256], sizes = [2, 128], strides = [1, 1]} : vector<2x512xf32> to vector<2x128xf32>
    %192 = vector.extract_strided_slice %180 {offsets = [0, 384], sizes = [2, 128], strides = [1, 1]} : vector<2x512xf32> to vector<2x128xf32>
    %cst_74 = arith.constant 5.000000e-01 : f32
    %193 = vector.broadcast %cst_74 : f32 to vector<2x128xf32>
    %194 = arith.mulf %193, %192 : vector<2x128xf32>
    %cst_75 = arith.constant 5.000000e-01 : f32
    %195 = vector.broadcast %cst_75 : f32 to vector<2x128xf32>
    %196 = arith.addf %194, %195 : vector<2x128xf32>
    %197 = arith.mulf %190, %173 : vector<2x128xf32>
    %198 = arith.mulf %185, %191 : vector<2x128xf32>
    %199 = arith.addf %197, %198 : vector<2x128xf32>
    %200 = math.tanh %199 : vector<2x128xf32>
    %201 = arith.mulf %196, %200 : vector<2x128xf32>
    %202 = vector.extract_strided_slice %123 {offsets = [6, 0], sizes = [2, 512], strides = [1, 1]} : vector<8x512xf32> to vector<2x512xf32>
    %c0_76 = arith.constant 0 : index
    %c0_77 = arith.constant 0 : index
    %203 = vector.load %arg2[%c0_76, %c0_77] : memref<128x512xf32, #tpu.memory_space<vmem>>, vector<128x512xf32>
    %cst_78 = arith.constant dense<0.000000e+00> : vector<2x512xf32>
    %204 = tpu.matmul %201, %203, %cst_78 {dimension_numbers = #tpu.dot_dimension_numbers<[1], [0], [0], [1], [0, 0, 1, 1], [], []>} : vector<2x128xf32>, vector<128x512xf32>, vector<2x512xf32> -> vector<2x512xf32>
    %205 = arith.addf %202, %204 : vector<2x512xf32>
    %206 = math.tanh %205 : vector<2x512xf32>
    %207 = vector.extract_strided_slice %206 {offsets = [0, 0], sizes = [2, 128], strides = [1, 1]} : vector<2x512xf32> to vector<2x128xf32>
    %cst_79 = arith.constant 5.000000e-01 : f32
    %208 = vector.broadcast %cst_79 : f32 to vector<2x128xf32>
    %209 = arith.mulf %208, %207 : vector<2x128xf32>
    %cst_80 = arith.constant 5.000000e-01 : f32
    %210 = vector.broadcast %cst_80 : f32 to vector<2x128xf32>
    %211 = arith.addf %209, %210 : vector<2x128xf32>
    %212 = vector.extract_strided_slice %206 {offsets = [0, 128], sizes = [2, 128], strides = [1, 1]} : vector<2x512xf32> to vector<2x128xf32>
    %cst_81 = arith.constant 5.000000e-01 : f32
    %213 = vector.broadcast %cst_81 : f32 to vector<2x128xf32>
    %214 = arith.mulf %213, %212 : vector<2x128xf32>
    %cst_82 = arith.constant 5.000000e-01 : f32
    %215 = vector.broadcast %cst_82 : f32 to vector<2x128xf32>
    %216 = arith.addf %214, %215 : vector<2x128xf32>
    %217 = vector.extract_strided_slice %206 {offsets = [0, 256], sizes = [2, 128], strides = [1, 1]} : vector<2x512xf32> to vector<2x128xf32>
    %218 = vector.extract_strided_slice %206 {offsets = [0, 384], sizes = [2, 128], strides = [1, 1]} : vector<2x512xf32> to vector<2x128xf32>
    %cst_83 = arith.constant 5.000000e-01 : f32
    %219 = vector.broadcast %cst_83 : f32 to vector<2x128xf32>
    %220 = arith.mulf %219, %218 : vector<2x128xf32>
    %cst_84 = arith.constant 5.000000e-01 : f32
    %221 = vector.broadcast %cst_84 : f32 to vector<2x128xf32>
    %222 = arith.addf %220, %221 : vector<2x128xf32>
    %223 = arith.mulf %216, %199 : vector<2x128xf32>
    %224 = arith.mulf %211, %217 : vector<2x128xf32>
    %225 = arith.addf %223, %224 : vector<2x128xf32>
    %226 = math.tanh %225 : vector<2x128xf32>
    %227 = arith.mulf %222, %226 : vector<2x128xf32>
    %228 = tpu.concatenate %149, %175, %201, %227 in 0 : vector<2x128xf32>, vector<2x128xf32>, vector<2x128xf32>, vector<2x128xf32> -> vector<8x128xf32>
    %229 = arith.index_cast %121 : i32 to index
    %c0_85 = arith.constant 0 : index
    %230 = vector.load %arg17[%229, %c0_85] : memref<16x128xf32, #tpu.memory_space<vmem>>, vector<8x128xf32>
    tpu.vector_store %arg17[%229, %c0_85], %228 {strides = array<i32>} : memref<16x128xf32, #tpu.memory_space<vmem>>, vector<8x128xf32>,
    %c2_i32 = arith.constant 2 : i32
    %c0_86 = arith.constant 0 : index
    %c0_87 = arith.constant 0 : index
    %231 = vector.load %arg17[%c0_86, %c0_87] : memref<16x128xf32, #tpu.memory_space<vmem>>, vector<16x128xf32>
    %c0_88 = arith.constant 0 : index
    %c0_89 = arith.constant 0 : index
    %232 = vector.load %arg4[%c0_88, %c0_89] : memref<128x512xf32, #tpu.memory_space<vmem>>, vector<128x512xf32>
    %cst_90 = arith.constant dense<0.000000e+00> : vector<16x512xf32>
    %233 = tpu.matmul %231, %232, %cst_90 {dimension_numbers = #tpu.dot_dimension_numbers<[1], [0], [0], [1], [0, 0, 1, 1], [], []>} : vector<16x128xf32>, vector<128x512xf32>, vector<16x512xf32> -> vector<16x512xf32>
    %c0_91 = arith.constant 0 : index
    %c0_92 = arith.constant 0 : index
    %234 = vector.load %arg6[%c0_91, %c0_92] : memref<1x512xf32, #tpu.memory_space<vmem>>, vector<1x512xf32>
    %235 = vector.broadcast %234 : vector<1x512xf32> to vector<16x512xf32>
    %236 = arith.addf %233, %235 : vector<16x512xf32>
    %c0_93 = arith.constant 0 : index
    %c0_94 = arith.constant 0 : index
    %237 = vector.load %arg16[%c0_93, %c0_94] : memref<16x512xf32, #tpu.memory_space<vmem>>, vector<16x512xf32>
    tpu.vector_store %arg16[%c0_93, %c0_94], %236 {strides = array<i32>} : memref<16x512xf32, #tpu.memory_space<vmem>>, vector<16x512xf32>,
    %cst_95 = arith.constant 0.000000e+00 : f32
    %238 = vector.broadcast %cst_95 : f32 to vector<2x128xf32>
    %cst_96 = arith.constant 0.000000e+00 : f32
    %239 = vector.broadcast %cst_96 : f32 to vector<2x128xf32>
    %c0_i32_97 = arith.constant 0 : i32
    %c8_i32_98 = arith.constant 8 : i32
    %240 = arith.muli %c0_i32_97, %c8_i32_98 : i32
    %241 = tpu.assume_multiple %240, 8 : i32
    %242 = arith.index_cast %241 : i32 to index
    %c0_99 = arith.constant 0 : index
    %243 = vector.load %arg16[%242, %c0_99] : memref<16x512xf32, #tpu.memory_space<vmem>>, vector<8x512xf32>
    %244 = vector.extract_strided_slice %243 {offsets = [0, 0], sizes = [2, 512], strides = [1, 1]} : vector<8x512xf32> to vector<2x512xf32>
    %c0_100 = arith.constant 0 : index
    %c0_101 = arith.constant 0 : index
    %245 = vector.load %arg5[%c0_100, %c0_101] : memref<128x512xf32, #tpu.memory_space<vmem>>, vector<128x512xf32>
    %cst_102 = arith.constant dense<0.000000e+00> : vector<2x512xf32>
    %246 = tpu.matmul %238, %245, %cst_102 {dimension_numbers = #tpu.dot_dimension_numbers<[1], [0], [0], [1], [0, 0, 1, 1], [], []>} : vector<2x128xf32>, vector<128x512xf32>, vector<2x512xf32> -> vector<2x512xf32>
    %247 = arith.addf %244, %246 : vector<2x512xf32>
    %248 = math.tanh %247 : vector<2x512xf32>
    %249 = vector.extract_strided_slice %248 {offsets = [0, 0], sizes = [2, 128], strides = [1, 1]} : vector<2x512xf32> to vector<2x128xf32>
    %cst_103 = arith.constant 5.000000e-01 : f32
    %250 = vector.broadcast %cst_103 : f32 to vector<2x128xf32>
    %251 = arith.mulf %250, %249 : vector<2x128xf32>
    %cst_104 = arith.constant 5.000000e-01 : f32
    %252 = vector.broadcast %cst_104 : f32 to vector<2x128xf32>
    %253 = arith.addf %251, %252 : vector<2x128xf32>
    %254 = vector.extract_strided_slice %248 {offsets = [0, 128], sizes = [2, 128], strides = [1, 1]} : vector<2x512xf32> to vector<2x128xf32>
    %cst_105 = arith.constant 5.000000e-01 : f32
    %255 = vector.broadcast %cst_105 : f32 to vector<2x128xf32>
    %256 = arith.mulf %255, %254 : vector<2x128xf32>
    %cst_106 = arith.constant 5.000000e-01 : f32
    %257 = vector.broadcast %cst_106 : f32 to vector<2x128xf32>
    %258 = arith.addf %256, %257 : vector<2x128xf32>
    %259 = vector.extract_strided_slice %248 {offsets = [0, 256], sizes = [2, 128], strides = [1, 1]} : vector<2x512xf32> to vector<2x128xf32>
    %260 = vector.extract_strided_slice %248 {offsets = [0, 384], sizes = [2, 128], strides = [1, 1]} : vector<2x512xf32> to vector<2x128xf32>
    %cst_107 = arith.constant 5.000000e-01 : f32
    %261 = vector.broadcast %cst_107 : f32 to vector<2x128xf32>
    %262 = arith.mulf %261, %260 : vector<2x128xf32>
    %cst_108 = arith.constant 5.000000e-01 : f32
    %263 = vector.broadcast %cst_108 : f32 to vector<2x128xf32>
    %264 = arith.addf %262, %263 : vector<2x128xf32>
    %265 = arith.mulf %258, %239 : vector<2x128xf32>
    %266 = arith.mulf %253, %259 : vector<2x128xf32>
    %267 = arith.addf %265, %266 : vector<2x128xf32>
    %268 = math.tanh %267 : vector<2x128xf32>
    %269 = arith.mulf %264, %268 : vector<2x128xf32>
    %270 = vector.extract_strided_slice %243 {offsets = [2, 0], sizes = [2, 512], strides = [1, 1]} : vector<8x512xf32> to vector<2x512xf32>
    %c0_109 = arith.constant 0 : index
    %c0_110 = arith.constant 0 : index
    %271 = vector.load %arg5[%c0_109, %c0_110] : memref<128x512xf32, #tpu.memory_space<vmem>>, vector<128x512xf32>
    %cst_111 = arith.constant dense<0.000000e+00> : vector<2x512xf32>
    %272 = tpu.matmul %269, %271, %cst_111 {dimension_numbers = #tpu.dot_dimension_numbers<[1], [0], [0], [1], [0, 0, 1, 1], [], []>} : vector<2x128xf32>, vector<128x512xf32>, vector<2x512xf32> -> vector<2x512xf32>
    %273 = arith.addf %270, %272 : vector<2x512xf32>
    %274 = math.tanh %273 : vector<2x512xf32>
    %275 = vector.extract_strided_slice %274 {offsets = [0, 0], sizes = [2, 128], strides = [1, 1]} : vector<2x512xf32> to vector<2x128xf32>
    %cst_112 = arith.constant 5.000000e-01 : f32
    %276 = vector.broadcast %cst_112 : f32 to vector<2x128xf32>
    %277 = arith.mulf %276, %275 : vector<2x128xf32>
    %cst_113 = arith.constant 5.000000e-01 : f32
    %278 = vector.broadcast %cst_113 : f32 to vector<2x128xf32>
    %279 = arith.addf %277, %278 : vector<2x128xf32>
    %280 = vector.extract_strided_slice %274 {offsets = [0, 128], sizes = [2, 128], strides = [1, 1]} : vector<2x512xf32> to vector<2x128xf32>
    %cst_114 = arith.constant 5.000000e-01 : f32
    %281 = vector.broadcast %cst_114 : f32 to vector<2x128xf32>
    %282 = arith.mulf %281, %280 : vector<2x128xf32>
    %cst_115 = arith.constant 5.000000e-01 : f32
    %283 = vector.broadcast %cst_115 : f32 to vector<2x128xf32>
    %284 = arith.addf %282, %283 : vector<2x128xf32>
    %285 = vector.extract_strided_slice %274 {offsets = [0, 256], sizes = [2, 128], strides = [1, 1]} : vector<2x512xf32> to vector<2x128xf32>
    %286 = vector.extract_strided_slice %274 {offsets = [0, 384], sizes = [2, 128], strides = [1, 1]} : vector<2x512xf32> to vector<2x128xf32>
    %cst_116 = arith.constant 5.000000e-01 : f32
    %287 = vector.broadcast %cst_116 : f32 to vector<2x128xf32>
    %288 = arith.mulf %287, %286 : vector<2x128xf32>
    %cst_117 = arith.constant 5.000000e-01 : f32
    %289 = vector.broadcast %cst_117 : f32 to vector<2x128xf32>
    %290 = arith.addf %288, %289 : vector<2x128xf32>
    %291 = arith.mulf %284, %267 : vector<2x128xf32>
    %292 = arith.mulf %279, %285 : vector<2x128xf32>
    %293 = arith.addf %291, %292 : vector<2x128xf32>
    %294 = math.tanh %293 : vector<2x128xf32>
    %295 = arith.mulf %290, %294 : vector<2x128xf32>
    %296 = vector.extract_strided_slice %243 {offsets = [4, 0], sizes = [2, 512], strides = [1, 1]} : vector<8x512xf32> to vector<2x512xf32>
    %c0_118 = arith.constant 0 : index
    %c0_119 = arith.constant 0 : index
    %297 = vector.load %arg5[%c0_118, %c0_119] : memref<128x512xf32, #tpu.memory_space<vmem>>, vector<128x512xf32>
    %cst_120 = arith.constant dense<0.000000e+00> : vector<2x512xf32>
    %298 = tpu.matmul %295, %297, %cst_120 {dimension_numbers = #tpu.dot_dimension_numbers<[1], [0], [0], [1], [0, 0, 1, 1], [], []>} : vector<2x128xf32>, vector<128x512xf32>, vector<2x512xf32> -> vector<2x512xf32>
    %299 = arith.addf %296, %298 : vector<2x512xf32>
    %300 = math.tanh %299 : vector<2x512xf32>
    %301 = vector.extract_strided_slice %300 {offsets = [0, 0], sizes = [2, 128], strides = [1, 1]} : vector<2x512xf32> to vector<2x128xf32>
    %cst_121 = arith.constant 5.000000e-01 : f32
    %302 = vector.broadcast %cst_121 : f32 to vector<2x128xf32>
    %303 = arith.mulf %302, %301 : vector<2x128xf32>
    %cst_122 = arith.constant 5.000000e-01 : f32
    %304 = vector.broadcast %cst_122 : f32 to vector<2x128xf32>
    %305 = arith.addf %303, %304 : vector<2x128xf32>
    %306 = vector.extract_strided_slice %300 {offsets = [0, 128], sizes = [2, 128], strides = [1, 1]} : vector<2x512xf32> to vector<2x128xf32>
    %cst_123 = arith.constant 5.000000e-01 : f32
    %307 = vector.broadcast %cst_123 : f32 to vector<2x128xf32>
    %308 = arith.mulf %307, %306 : vector<2x128xf32>
    %cst_124 = arith.constant 5.000000e-01 : f32
    %309 = vector.broadcast %cst_124 : f32 to vector<2x128xf32>
    %310 = arith.addf %308, %309 : vector<2x128xf32>
    %311 = vector.extract_strided_slice %300 {offsets = [0, 256], sizes = [2, 128], strides = [1, 1]} : vector<2x512xf32> to vector<2x128xf32>
    %312 = vector.extract_strided_slice %300 {offsets = [0, 384], sizes = [2, 128], strides = [1, 1]} : vector<2x512xf32> to vector<2x128xf32>
    %cst_125 = arith.constant 5.000000e-01 : f32
    %313 = vector.broadcast %cst_125 : f32 to vector<2x128xf32>
    %314 = arith.mulf %313, %312 : vector<2x128xf32>
    %cst_126 = arith.constant 5.000000e-01 : f32
    %315 = vector.broadcast %cst_126 : f32 to vector<2x128xf32>
    %316 = arith.addf %314, %315 : vector<2x128xf32>
    %317 = arith.mulf %310, %293 : vector<2x128xf32>
    %318 = arith.mulf %305, %311 : vector<2x128xf32>
    %319 = arith.addf %317, %318 : vector<2x128xf32>
    %320 = math.tanh %319 : vector<2x128xf32>
    %321 = arith.mulf %316, %320 : vector<2x128xf32>
    %322 = vector.extract_strided_slice %243 {offsets = [6, 0], sizes = [2, 512], strides = [1, 1]} : vector<8x512xf32> to vector<2x512xf32>
    %c0_127 = arith.constant 0 : index
    %c0_128 = arith.constant 0 : index
    %323 = vector.load %arg5[%c0_127, %c0_128] : memref<128x512xf32, #tpu.memory_space<vmem>>, vector<128x512xf32>
    %cst_129 = arith.constant dense<0.000000e+00> : vector<2x512xf32>
    %324 = tpu.matmul %321, %323, %cst_129 {dimension_numbers = #tpu.dot_dimension_numbers<[1], [0], [0], [1], [0, 0, 1, 1], [], []>} : vector<2x128xf32>, vector<128x512xf32>, vector<2x512xf32> -> vector<2x512xf32>
    %325 = arith.addf %322, %324 : vector<2x512xf32>
    %326 = math.tanh %325 : vector<2x512xf32>
    %327 = vector.extract_strided_slice %326 {offsets = [0, 0], sizes = [2, 128], strides = [1, 1]} : vector<2x512xf32> to vector<2x128xf32>
    %cst_130 = arith.constant 5.000000e-01 : f32
    %328 = vector.broadcast %cst_130 : f32 to vector<2x128xf32>
    %329 = arith.mulf %328, %327 : vector<2x128xf32>
    %cst_131 = arith.constant 5.000000e-01 : f32
    %330 = vector.broadcast %cst_131 : f32 to vector<2x128xf32>
    %331 = arith.addf %329, %330 : vector<2x128xf32>
    %332 = vector.extract_strided_slice %326 {offsets = [0, 128], sizes = [2, 128], strides = [1, 1]} : vector<2x512xf32> to vector<2x128xf32>
    %cst_132 = arith.constant 5.000000e-01 : f32
    %333 = vector.broadcast %cst_132 : f32 to vector<2x128xf32>
    %334 = arith.mulf %333, %332 : vector<2x128xf32>
    %cst_133 = arith.constant 5.000000e-01 : f32
    %335 = vector.broadcast %cst_133 : f32 to vector<2x128xf32>
    %336 = arith.addf %334, %335 : vector<2x128xf32>
    %337 = vector.extract_strided_slice %326 {offsets = [0, 256], sizes = [2, 128], strides = [1, 1]} : vector<2x512xf32> to vector<2x128xf32>
    %338 = vector.extract_strided_slice %326 {offsets = [0, 384], sizes = [2, 128], strides = [1, 1]} : vector<2x512xf32> to vector<2x128xf32>
    %cst_134 = arith.constant 5.000000e-01 : f32
    %339 = vector.broadcast %cst_134 : f32 to vector<2x128xf32>
    %340 = arith.mulf %339, %338 : vector<2x128xf32>
    %cst_135 = arith.constant 5.000000e-01 : f32
    %341 = vector.broadcast %cst_135 : f32 to vector<2x128xf32>
    %342 = arith.addf %340, %341 : vector<2x128xf32>
    %343 = arith.mulf %336, %319 : vector<2x128xf32>
    %344 = arith.mulf %331, %337 : vector<2x128xf32>
    %345 = arith.addf %343, %344 : vector<2x128xf32>
    %346 = math.tanh %345 : vector<2x128xf32>
    %347 = arith.mulf %342, %346 : vector<2x128xf32>
    %348 = tpu.concatenate %269, %295, %321, %347 in 0 : vector<2x128xf32>, vector<2x128xf32>, vector<2x128xf32>, vector<2x128xf32> -> vector<8x128xf32>
    %349 = arith.index_cast %241 : i32 to index
    %c0_136 = arith.constant 0 : index
    %350 = vector.load %arg17[%349, %c0_136] : memref<16x128xf32, #tpu.memory_space<vmem>>, vector<8x128xf32>
    tpu.vector_store %arg17[%349, %c0_136], %348 {strides = array<i32>} : memref<16x128xf32, #tpu.memory_space<vmem>>, vector<8x128xf32>,
    %c1_i32_137 = arith.constant 1 : i32
    %c8_i32_138 = arith.constant 8 : i32
    %351 = arith.muli %c1_i32_137, %c8_i32_138 : i32
    %352 = tpu.assume_multiple %351, 8 : i32
    %353 = arith.index_cast %352 : i32 to index
    %c0_139 = arith.constant 0 : index
    %354 = vector.load %arg16[%353, %c0_139] : memref<16x512xf32, #tpu.memory_space<vmem>>, vector<8x512xf32>
    %355 = vector.extract_strided_slice %354 {offsets = [0, 0], sizes = [2, 512], strides = [1, 1]} : vector<8x512xf32> to vector<2x512xf32>
    %c0_140 = arith.constant 0 : index
    %c0_141 = arith.constant 0 : index
    %356 = vector.load %arg5[%c0_140, %c0_141] : memref<128x512xf32, #tpu.memory_space<vmem>>, vector<128x512xf32>
    %cst_142 = arith.constant dense<0.000000e+00> : vector<2x512xf32>
    %357 = tpu.matmul %347, %356, %cst_142 {dimension_numbers = #tpu.dot_dimension_numbers<[1], [0], [0], [1], [0, 0, 1, 1], [], []>} : vector<2x128xf32>, vector<128x512xf32>, vector<2x512xf32> -> vector<2x512xf32>
    %358 = arith.addf %355, %357 : vector<2x512xf32>
    %359 = math.tanh %358 : vector<2x512xf32>
    %360 = vector.extract_strided_slice %359 {offsets = [0, 0], sizes = [2, 128], strides = [1, 1]} : vector<2x512xf32> to vector<2x128xf32>
    %cst_143 = arith.constant 5.000000e-01 : f32
    %361 = vector.broadcast %cst_143 : f32 to vector<2x128xf32>
    %362 = arith.mulf %361, %360 : vector<2x128xf32>
    %cst_144 = arith.constant 5.000000e-01 : f32
    %363 = vector.broadcast %cst_144 : f32 to vector<2x128xf32>
    %364 = arith.addf %362, %363 : vector<2x128xf32>
    %365 = vector.extract_strided_slice %359 {offsets = [0, 128], sizes = [2, 128], strides = [1, 1]} : vector<2x512xf32> to vector<2x128xf32>
    %cst_145 = arith.constant 5.000000e-01 : f32
    %366 = vector.broadcast %cst_145 : f32 to vector<2x128xf32>
    %367 = arith.mulf %366, %365 : vector<2x128xf32>
    %cst_146 = arith.constant 5.000000e-01 : f32
    %368 = vector.broadcast %cst_146 : f32 to vector<2x128xf32>
    %369 = arith.addf %367, %368 : vector<2x128xf32>
    %370 = vector.extract_strided_slice %359 {offsets = [0, 256], sizes = [2, 128], strides = [1, 1]} : vector<2x512xf32> to vector<2x128xf32>
    %371 = vector.extract_strided_slice %359 {offsets = [0, 384], sizes = [2, 128], strides = [1, 1]} : vector<2x512xf32> to vector<2x128xf32>
    %cst_147 = arith.constant 5.000000e-01 : f32
    %372 = vector.broadcast %cst_147 : f32 to vector<2x128xf32>
    %373 = arith.mulf %372, %371 : vector<2x128xf32>
    %cst_148 = arith.constant 5.000000e-01 : f32
    %374 = vector.broadcast %cst_148 : f32 to vector<2x128xf32>
    %375 = arith.addf %373, %374 : vector<2x128xf32>
    %376 = arith.mulf %369, %345 : vector<2x128xf32>
    %377 = arith.mulf %364, %370 : vector<2x128xf32>
    %378 = arith.addf %376, %377 : vector<2x128xf32>
    %379 = math.tanh %378 : vector<2x128xf32>
    %380 = arith.mulf %375, %379 : vector<2x128xf32>
    %381 = vector.extract_strided_slice %354 {offsets = [2, 0], sizes = [2, 512], strides = [1, 1]} : vector<8x512xf32> to vector<2x512xf32>
    %c0_149 = arith.constant 0 : index
    %c0_150 = arith.constant 0 : index
    %382 = vector.load %arg5[%c0_149, %c0_150] : memref<128x512xf32, #tpu.memory_space<vmem>>, vector<128x512xf32>
    %cst_151 = arith.constant dense<0.000000e+00> : vector<2x512xf32>
    %383 = tpu.matmul %380, %382, %cst_151 {dimension_numbers = #tpu.dot_dimension_numbers<[1], [0], [0], [1], [0, 0, 1, 1], [], []>} : vector<2x128xf32>, vector<128x512xf32>, vector<2x512xf32> -> vector<2x512xf32>
    %384 = arith.addf %381, %383 : vector<2x512xf32>
    %385 = math.tanh %384 : vector<2x512xf32>
    %386 = vector.extract_strided_slice %385 {offsets = [0, 0], sizes = [2, 128], strides = [1, 1]} : vector<2x512xf32> to vector<2x128xf32>
    %cst_152 = arith.constant 5.000000e-01 : f32
    %387 = vector.broadcast %cst_152 : f32 to vector<2x128xf32>
    %388 = arith.mulf %387, %386 : vector<2x128xf32>
    %cst_153 = arith.constant 5.000000e-01 : f32
    %389 = vector.broadcast %cst_153 : f32 to vector<2x128xf32>
    %390 = arith.addf %388, %389 : vector<2x128xf32>
    %391 = vector.extract_strided_slice %385 {offsets = [0, 128], sizes = [2, 128], strides = [1, 1]} : vector<2x512xf32> to vector<2x128xf32>
    %cst_154 = arith.constant 5.000000e-01 : f32
    %392 = vector.broadcast %cst_154 : f32 to vector<2x128xf32>
    %393 = arith.mulf %392, %391 : vector<2x128xf32>
    %cst_155 = arith.constant 5.000000e-01 : f32
    %394 = vector.broadcast %cst_155 : f32 to vector<2x128xf32>
    %395 = arith.addf %393, %394 : vector<2x128xf32>
    %396 = vector.extract_strided_slice %385 {offsets = [0, 256], sizes = [2, 128], strides = [1, 1]} : vector<2x512xf32> to vector<2x128xf32>
    %397 = vector.extract_strided_slice %385 {offsets = [0, 384], sizes = [2, 128], strides = [1, 1]} : vector<2x512xf32> to vector<2x128xf32>
    %cst_156 = arith.constant 5.000000e-01 : f32
    %398 = vector.broadcast %cst_156 : f32 to vector<2x128xf32>
    %399 = arith.mulf %398, %397 : vector<2x128xf32>
    %cst_157 = arith.constant 5.000000e-01 : f32
    %400 = vector.broadcast %cst_157 : f32 to vector<2x128xf32>
    %401 = arith.addf %399, %400 : vector<2x128xf32>
    %402 = arith.mulf %395, %378 : vector<2x128xf32>
    %403 = arith.mulf %390, %396 : vector<2x128xf32>
    %404 = arith.addf %402, %403 : vector<2x128xf32>
    %405 = math.tanh %404 : vector<2x128xf32>
    %406 = arith.mulf %401, %405 : vector<2x128xf32>
    %407 = vector.extract_strided_slice %354 {offsets = [4, 0], sizes = [2, 512], strides = [1, 1]} : vector<8x512xf32> to vector<2x512xf32>
    %c0_158 = arith.constant 0 : index
    %c0_159 = arith.constant 0 : index
    %408 = vector.load %arg5[%c0_158, %c0_159] : memref<128x512xf32, #tpu.memory_space<vmem>>, vector<128x512xf32>
    %cst_160 = arith.constant dense<0.000000e+00> : vector<2x512xf32>
    %409 = tpu.matmul %406, %408, %cst_160 {dimension_numbers = #tpu.dot_dimension_numbers<[1], [0], [0], [1], [0, 0, 1, 1], [], []>} : vector<2x128xf32>, vector<128x512xf32>, vector<2x512xf32> -> vector<2x512xf32>
    %410 = arith.addf %407, %409 : vector<2x512xf32>
    %411 = math.tanh %410 : vector<2x512xf32>
    %412 = vector.extract_strided_slice %411 {offsets = [0, 0], sizes = [2, 128], strides = [1, 1]} : vector<2x512xf32> to vector<2x128xf32>
    %cst_161 = arith.constant 5.000000e-01 : f32
    %413 = vector.broadcast %cst_161 : f32 to vector<2x128xf32>
    %414 = arith.mulf %413, %412 : vector<2x128xf32>
    %cst_162 = arith.constant 5.000000e-01 : f32
    %415 = vector.broadcast %cst_162 : f32 to vector<2x128xf32>
    %416 = arith.addf %414, %415 : vector<2x128xf32>
    %417 = vector.extract_strided_slice %411 {offsets = [0, 128], sizes = [2, 128], strides = [1, 1]} : vector<2x512xf32> to vector<2x128xf32>
    %cst_163 = arith.constant 5.000000e-01 : f32
    %418 = vector.broadcast %cst_163 : f32 to vector<2x128xf32>
    %419 = arith.mulf %418, %417 : vector<2x128xf32>
    %cst_164 = arith.constant 5.000000e-01 : f32
    %420 = vector.broadcast %cst_164 : f32 to vector<2x128xf32>
    %421 = arith.addf %419, %420 : vector<2x128xf32>
    %422 = vector.extract_strided_slice %411 {offsets = [0, 256], sizes = [2, 128], strides = [1, 1]} : vector<2x512xf32> to vector<2x128xf32>
    %423 = vector.extract_strided_slice %411 {offsets = [0, 384], sizes = [2, 128], strides = [1, 1]} : vector<2x512xf32> to vector<2x128xf32>
    %cst_165 = arith.constant 5.000000e-01 : f32
    %424 = vector.broadcast %cst_165 : f32 to vector<2x128xf32>
    %425 = arith.mulf %424, %423 : vector<2x128xf32>
    %cst_166 = arith.constant 5.000000e-01 : f32
    %426 = vector.broadcast %cst_166 : f32 to vector<2x128xf32>
    %427 = arith.addf %425, %426 : vector<2x128xf32>
    %428 = arith.mulf %421, %404 : vector<2x128xf32>
    %429 = arith.mulf %416, %422 : vector<2x128xf32>
    %430 = arith.addf %428, %429 : vector<2x128xf32>
    %431 = math.tanh %430 : vector<2x128xf32>
    %432 = arith.mulf %427, %431 : vector<2x128xf32>
    %433 = vector.extract_strided_slice %354 {offsets = [6, 0], sizes = [2, 512], strides = [1, 1]} : vector<8x512xf32> to vector<2x512xf32>
    %c0_167 = arith.constant 0 : index
    %c0_168 = arith.constant 0 : index
    %434 = vector.load %arg5[%c0_167, %c0_168] : memref<128x512xf32, #tpu.memory_space<vmem>>, vector<128x512xf32>
    %cst_169 = arith.constant dense<0.000000e+00> : vector<2x512xf32>
    %435 = tpu.matmul %432, %434, %cst_169 {dimension_numbers = #tpu.dot_dimension_numbers<[1], [0], [0], [1], [0, 0, 1, 1], [], []>} : vector<2x128xf32>, vector<128x512xf32>, vector<2x512xf32> -> vector<2x512xf32>
    %436 = arith.addf %433, %435 : vector<2x512xf32>
    %437 = math.tanh %436 : vector<2x512xf32>
    %438 = vector.extract_strided_slice %437 {offsets = [0, 0], sizes = [2, 128], strides = [1, 1]} : vector<2x512xf32> to vector<2x128xf32>
    %cst_170 = arith.constant 5.000000e-01 : f32
    %439 = vector.broadcast %cst_170 : f32 to vector<2x128xf32>
    %440 = arith.mulf %439, %438 : vector<2x128xf32>
    %cst_171 = arith.constant 5.000000e-01 : f32
    %441 = vector.broadcast %cst_171 : f32 to vector<2x128xf32>
    %442 = arith.addf %440, %441 : vector<2x128xf32>
    %443 = vector.extract_strided_slice %437 {offsets = [0, 128], sizes = [2, 128], strides = [1, 1]} : vector<2x512xf32> to vector<2x128xf32>
    %cst_172 = arith.constant 5.000000e-01 : f32
    %444 = vector.broadcast %cst_172 : f32 to vector<2x128xf32>
    %445 = arith.mulf %444, %443 : vector<2x128xf32>
    %cst_173 = arith.constant 5.000000e-01 : f32
    %446 = vector.broadcast %cst_173 : f32 to vector<2x128xf32>
    %447 = arith.addf %445, %446 : vector<2x128xf32>
    %448 = vector.extract_strided_slice %437 {offsets = [0, 256], sizes = [2, 128], strides = [1, 1]} : vector<2x512xf32> to vector<2x128xf32>
    %449 = vector.extract_strided_slice %437 {offsets = [0, 384], sizes = [2, 128], strides = [1, 1]} : vector<2x512xf32> to vector<2x128xf32>
    %cst_174 = arith.constant 5.000000e-01 : f32
    %450 = vector.broadcast %cst_174 : f32 to vector<2x128xf32>
    %451 = arith.mulf %450, %449 : vector<2x128xf32>
    %cst_175 = arith.constant 5.000000e-01 : f32
    %452 = vector.broadcast %cst_175 : f32 to vector<2x128xf32>
    %453 = arith.addf %451, %452 : vector<2x128xf32>
    %454 = arith.mulf %447, %430 : vector<2x128xf32>
    %455 = arith.mulf %442, %448 : vector<2x128xf32>
    %456 = arith.addf %454, %455 : vector<2x128xf32>
    %457 = math.tanh %456 : vector<2x128xf32>
    %458 = arith.mulf %453, %457 : vector<2x128xf32>
    %459 = tpu.concatenate %380, %406, %432, %458 in 0 : vector<2x128xf32>, vector<2x128xf32>, vector<2x128xf32>, vector<2x128xf32> -> vector<8x128xf32>
    %460 = arith.index_cast %352 : i32 to index
    %c0_176 = arith.constant 0 : index
    %461 = vector.load %arg17[%460, %c0_176] : memref<16x128xf32, #tpu.memory_space<vmem>>, vector<8x128xf32>
    tpu.vector_store %arg17[%460, %c0_176], %459 {strides = array<i32>} : memref<16x128xf32, #tpu.memory_space<vmem>>, vector<8x128xf32>,
    %c2_i32_177 = arith.constant 2 : i32
    %c0_178 = arith.constant 0 : index
    %c0_179 = arith.constant 0 : index
    %462 = vector.load %arg17[%c0_178, %c0_179] : memref<16x128xf32, #tpu.memory_space<vmem>>, vector<16x128xf32>
    %c0_180 = arith.constant 0 : index
    %c0_181 = arith.constant 0 : index
    %463 = vector.load %arg7[%c0_180, %c0_181] : memref<128x512xf32, #tpu.memory_space<vmem>>, vector<128x512xf32>
    %cst_182 = arith.constant dense<0.000000e+00> : vector<16x512xf32>
    %464 = tpu.matmul %462, %463, %cst_182 {dimension_numbers = #tpu.dot_dimension_numbers<[1], [0], [0], [1], [0, 0, 1, 1], [], []>} : vector<16x128xf32>, vector<128x512xf32>, vector<16x512xf32> -> vector<16x512xf32>
    %c0_183 = arith.constant 0 : index
    %c0_184 = arith.constant 0 : index
    %465 = vector.load %arg9[%c0_183, %c0_184] : memref<1x512xf32, #tpu.memory_space<vmem>>, vector<1x512xf32>
    %466 = vector.broadcast %465 : vector<1x512xf32> to vector<16x512xf32>
    %467 = arith.addf %464, %466 : vector<16x512xf32>
    %c0_185 = arith.constant 0 : index
    %c0_186 = arith.constant 0 : index
    %468 = vector.load %arg16[%c0_185, %c0_186] : memref<16x512xf32, #tpu.memory_space<vmem>>, vector<16x512xf32>
    tpu.vector_store %arg16[%c0_185, %c0_186], %467 {strides = array<i32>} : memref<16x512xf32, #tpu.memory_space<vmem>>, vector<16x512xf32>,
    %cst_187 = arith.constant 0.000000e+00 : f32
    %469 = vector.broadcast %cst_187 : f32 to vector<2x128xf32>
    %cst_188 = arith.constant 0.000000e+00 : f32
    %470 = vector.broadcast %cst_188 : f32 to vector<2x128xf32>
    %c0_i32_189 = arith.constant 0 : i32
    %c8_i32_190 = arith.constant 8 : i32
    %471 = arith.muli %c0_i32_189, %c8_i32_190 : i32
    %472 = tpu.assume_multiple %471, 8 : i32
    %473 = arith.index_cast %472 : i32 to index
    %c0_191 = arith.constant 0 : index
    %474 = vector.load %arg16[%473, %c0_191] : memref<16x512xf32, #tpu.memory_space<vmem>>, vector<8x512xf32>
    %475 = vector.extract_strided_slice %474 {offsets = [0, 0], sizes = [2, 512], strides = [1, 1]} : vector<8x512xf32> to vector<2x512xf32>
    %c0_192 = arith.constant 0 : index
    %c0_193 = arith.constant 0 : index
    %476 = vector.load %arg8[%c0_192, %c0_193] : memref<128x512xf32, #tpu.memory_space<vmem>>, vector<128x512xf32>
    %cst_194 = arith.constant dense<0.000000e+00> : vector<2x512xf32>
    %477 = tpu.matmul %469, %476, %cst_194 {dimension_numbers = #tpu.dot_dimension_numbers<[1], [0], [0], [1], [0, 0, 1, 1], [], []>} : vector<2x128xf32>, vector<128x512xf32>, vector<2x512xf32> -> vector<2x512xf32>
    %478 = arith.addf %475, %477 : vector<2x512xf32>
    %479 = math.tanh %478 : vector<2x512xf32>
    %480 = vector.extract_strided_slice %479 {offsets = [0, 0], sizes = [2, 128], strides = [1, 1]} : vector<2x512xf32> to vector<2x128xf32>
    %cst_195 = arith.constant 5.000000e-01 : f32
    %481 = vector.broadcast %cst_195 : f32 to vector<2x128xf32>
    %482 = arith.mulf %481, %480 : vector<2x128xf32>
    %cst_196 = arith.constant 5.000000e-01 : f32
    %483 = vector.broadcast %cst_196 : f32 to vector<2x128xf32>
    %484 = arith.addf %482, %483 : vector<2x128xf32>
    %485 = vector.extract_strided_slice %479 {offsets = [0, 128], sizes = [2, 128], strides = [1, 1]} : vector<2x512xf32> to vector<2x128xf32>
    %cst_197 = arith.constant 5.000000e-01 : f32
    %486 = vector.broadcast %cst_197 : f32 to vector<2x128xf32>
    %487 = arith.mulf %486, %485 : vector<2x128xf32>
    %cst_198 = arith.constant 5.000000e-01 : f32
    %488 = vector.broadcast %cst_198 : f32 to vector<2x128xf32>
    %489 = arith.addf %487, %488 : vector<2x128xf32>
    %490 = vector.extract_strided_slice %479 {offsets = [0, 256], sizes = [2, 128], strides = [1, 1]} : vector<2x512xf32> to vector<2x128xf32>
    %491 = vector.extract_strided_slice %479 {offsets = [0, 384], sizes = [2, 128], strides = [1, 1]} : vector<2x512xf32> to vector<2x128xf32>
    %cst_199 = arith.constant 5.000000e-01 : f32
    %492 = vector.broadcast %cst_199 : f32 to vector<2x128xf32>
    %493 = arith.mulf %492, %491 : vector<2x128xf32>
    %cst_200 = arith.constant 5.000000e-01 : f32
    %494 = vector.broadcast %cst_200 : f32 to vector<2x128xf32>
    %495 = arith.addf %493, %494 : vector<2x128xf32>
    %496 = arith.mulf %489, %470 : vector<2x128xf32>
    %497 = arith.mulf %484, %490 : vector<2x128xf32>
    %498 = arith.addf %496, %497 : vector<2x128xf32>
    %499 = math.tanh %498 : vector<2x128xf32>
    %500 = arith.mulf %495, %499 : vector<2x128xf32>
    %501 = vector.extract_strided_slice %474 {offsets = [2, 0], sizes = [2, 512], strides = [1, 1]} : vector<8x512xf32> to vector<2x512xf32>
    %c0_201 = arith.constant 0 : index
    %c0_202 = arith.constant 0 : index
    %502 = vector.load %arg8[%c0_201, %c0_202] : memref<128x512xf32, #tpu.memory_space<vmem>>, vector<128x512xf32>
    %cst_203 = arith.constant dense<0.000000e+00> : vector<2x512xf32>
    %503 = tpu.matmul %500, %502, %cst_203 {dimension_numbers = #tpu.dot_dimension_numbers<[1], [0], [0], [1], [0, 0, 1, 1], [], []>} : vector<2x128xf32>, vector<128x512xf32>, vector<2x512xf32> -> vector<2x512xf32>
    %504 = arith.addf %501, %503 : vector<2x512xf32>
    %505 = math.tanh %504 : vector<2x512xf32>
    %506 = vector.extract_strided_slice %505 {offsets = [0, 0], sizes = [2, 128], strides = [1, 1]} : vector<2x512xf32> to vector<2x128xf32>
    %cst_204 = arith.constant 5.000000e-01 : f32
    %507 = vector.broadcast %cst_204 : f32 to vector<2x128xf32>
    %508 = arith.mulf %507, %506 : vector<2x128xf32>
    %cst_205 = arith.constant 5.000000e-01 : f32
    %509 = vector.broadcast %cst_205 : f32 to vector<2x128xf32>
    %510 = arith.addf %508, %509 : vector<2x128xf32>
    %511 = vector.extract_strided_slice %505 {offsets = [0, 128], sizes = [2, 128], strides = [1, 1]} : vector<2x512xf32> to vector<2x128xf32>
    %cst_206 = arith.constant 5.000000e-01 : f32
    %512 = vector.broadcast %cst_206 : f32 to vector<2x128xf32>
    %513 = arith.mulf %512, %511 : vector<2x128xf32>
    %cst_207 = arith.constant 5.000000e-01 : f32
    %514 = vector.broadcast %cst_207 : f32 to vector<2x128xf32>
    %515 = arith.addf %513, %514 : vector<2x128xf32>
    %516 = vector.extract_strided_slice %505 {offsets = [0, 256], sizes = [2, 128], strides = [1, 1]} : vector<2x512xf32> to vector<2x128xf32>
    %517 = vector.extract_strided_slice %505 {offsets = [0, 384], sizes = [2, 128], strides = [1, 1]} : vector<2x512xf32> to vector<2x128xf32>
    %cst_208 = arith.constant 5.000000e-01 : f32
    %518 = vector.broadcast %cst_208 : f32 to vector<2x128xf32>
    %519 = arith.mulf %518, %517 : vector<2x128xf32>
    %cst_209 = arith.constant 5.000000e-01 : f32
    %520 = vector.broadcast %cst_209 : f32 to vector<2x128xf32>
    %521 = arith.addf %519, %520 : vector<2x128xf32>
    %522 = arith.mulf %515, %498 : vector<2x128xf32>
    %523 = arith.mulf %510, %516 : vector<2x128xf32>
    %524 = arith.addf %522, %523 : vector<2x128xf32>
    %525 = math.tanh %524 : vector<2x128xf32>
    %526 = arith.mulf %521, %525 : vector<2x128xf32>
    %527 = vector.extract_strided_slice %474 {offsets = [4, 0], sizes = [2, 512], strides = [1, 1]} : vector<8x512xf32> to vector<2x512xf32>
    %c0_210 = arith.constant 0 : index
    %c0_211 = arith.constant 0 : index
    %528 = vector.load %arg8[%c0_210, %c0_211] : memref<128x512xf32, #tpu.memory_space<vmem>>, vector<128x512xf32>
    %cst_212 = arith.constant dense<0.000000e+00> : vector<2x512xf32>
    %529 = tpu.matmul %526, %528, %cst_212 {dimension_numbers = #tpu.dot_dimension_numbers<[1], [0], [0], [1], [0, 0, 1, 1], [], []>} : vector<2x128xf32>, vector<128x512xf32>, vector<2x512xf32> -> vector<2x512xf32>
    %530 = arith.addf %527, %529 : vector<2x512xf32>
    %531 = math.tanh %530 : vector<2x512xf32>
    %532 = vector.extract_strided_slice %531 {offsets = [0, 0], sizes = [2, 128], strides = [1, 1]} : vector<2x512xf32> to vector<2x128xf32>
    %cst_213 = arith.constant 5.000000e-01 : f32
    %533 = vector.broadcast %cst_213 : f32 to vector<2x128xf32>
    %534 = arith.mulf %533, %532 : vector<2x128xf32>
    %cst_214 = arith.constant 5.000000e-01 : f32
    %535 = vector.broadcast %cst_214 : f32 to vector<2x128xf32>
    %536 = arith.addf %534, %535 : vector<2x128xf32>
    %537 = vector.extract_strided_slice %531 {offsets = [0, 128], sizes = [2, 128], strides = [1, 1]} : vector<2x512xf32> to vector<2x128xf32>
    %cst_215 = arith.constant 5.000000e-01 : f32
    %538 = vector.broadcast %cst_215 : f32 to vector<2x128xf32>
    %539 = arith.mulf %538, %537 : vector<2x128xf32>
    %cst_216 = arith.constant 5.000000e-01 : f32
    %540 = vector.broadcast %cst_216 : f32 to vector<2x128xf32>
    %541 = arith.addf %539, %540 : vector<2x128xf32>
    %542 = vector.extract_strided_slice %531 {offsets = [0, 256], sizes = [2, 128], strides = [1, 1]} : vector<2x512xf32> to vector<2x128xf32>
    %543 = vector.extract_strided_slice %531 {offsets = [0, 384], sizes = [2, 128], strides = [1, 1]} : vector<2x512xf32> to vector<2x128xf32>
    %cst_217 = arith.constant 5.000000e-01 : f32
    %544 = vector.broadcast %cst_217 : f32 to vector<2x128xf32>
    %545 = arith.mulf %544, %543 : vector<2x128xf32>
    %cst_218 = arith.constant 5.000000e-01 : f32
    %546 = vector.broadcast %cst_218 : f32 to vector<2x128xf32>
    %547 = arith.addf %545, %546 : vector<2x128xf32>
    %548 = arith.mulf %541, %524 : vector<2x128xf32>
    %549 = arith.mulf %536, %542 : vector<2x128xf32>
    %550 = arith.addf %548, %549 : vector<2x128xf32>
    %551 = math.tanh %550 : vector<2x128xf32>
    %552 = arith.mulf %547, %551 : vector<2x128xf32>
    %553 = vector.extract_strided_slice %474 {offsets = [6, 0], sizes = [2, 512], strides = [1, 1]} : vector<8x512xf32> to vector<2x512xf32>
    %c0_219 = arith.constant 0 : index
    %c0_220 = arith.constant 0 : index
    %554 = vector.load %arg8[%c0_219, %c0_220] : memref<128x512xf32, #tpu.memory_space<vmem>>, vector<128x512xf32>
    %cst_221 = arith.constant dense<0.000000e+00> : vector<2x512xf32>
    %555 = tpu.matmul %552, %554, %cst_221 {dimension_numbers = #tpu.dot_dimension_numbers<[1], [0], [0], [1], [0, 0, 1, 1], [], []>} : vector<2x128xf32>, vector<128x512xf32>, vector<2x512xf32> -> vector<2x512xf32>
    %556 = arith.addf %553, %555 : vector<2x512xf32>
    %557 = math.tanh %556 : vector<2x512xf32>
    %558 = vector.extract_strided_slice %557 {offsets = [0, 0], sizes = [2, 128], strides = [1, 1]} : vector<2x512xf32> to vector<2x128xf32>
    %cst_222 = arith.constant 5.000000e-01 : f32
    %559 = vector.broadcast %cst_222 : f32 to vector<2x128xf32>
    %560 = arith.mulf %559, %558 : vector<2x128xf32>
    %cst_223 = arith.constant 5.000000e-01 : f32
    %561 = vector.broadcast %cst_223 : f32 to vector<2x128xf32>
    %562 = arith.addf %560, %561 : vector<2x128xf32>
    %563 = vector.extract_strided_slice %557 {offsets = [0, 128], sizes = [2, 128], strides = [1, 1]} : vector<2x512xf32> to vector<2x128xf32>
    %cst_224 = arith.constant 5.000000e-01 : f32
    %564 = vector.broadcast %cst_224 : f32 to vector<2x128xf32>
    %565 = arith.mulf %564, %563 : vector<2x128xf32>
    %cst_225 = arith.constant 5.000000e-01 : f32
    %566 = vector.broadcast %cst_225 : f32 to vector<2x128xf32>
    %567 = arith.addf %565, %566 : vector<2x128xf32>
    %568 = vector.extract_strided_slice %557 {offsets = [0, 256], sizes = [2, 128], strides = [1, 1]} : vector<2x512xf32> to vector<2x128xf32>
    %569 = vector.extract_strided_slice %557 {offsets = [0, 384], sizes = [2, 128], strides = [1, 1]} : vector<2x512xf32> to vector<2x128xf32>
    %cst_226 = arith.constant 5.000000e-01 : f32
    %570 = vector.broadcast %cst_226 : f32 to vector<2x128xf32>
    %571 = arith.mulf %570, %569 : vector<2x128xf32>
    %cst_227 = arith.constant 5.000000e-01 : f32
    %572 = vector.broadcast %cst_227 : f32 to vector<2x128xf32>
    %573 = arith.addf %571, %572 : vector<2x128xf32>
    %574 = arith.mulf %567, %550 : vector<2x128xf32>
    %575 = arith.mulf %562, %568 : vector<2x128xf32>
    %576 = arith.addf %574, %575 : vector<2x128xf32>
    %577 = math.tanh %576 : vector<2x128xf32>
    %578 = arith.mulf %573, %577 : vector<2x128xf32>
    %579 = tpu.concatenate %500, %526, %552, %578 in 0 : vector<2x128xf32>, vector<2x128xf32>, vector<2x128xf32>, vector<2x128xf32> -> vector<8x128xf32>
    %580 = arith.index_cast %472 : i32 to index
    %c0_228 = arith.constant 0 : index
    %581 = vector.load %arg17[%580, %c0_228] : memref<16x128xf32, #tpu.memory_space<vmem>>, vector<8x128xf32>
    tpu.vector_store %arg17[%580, %c0_228], %579 {strides = array<i32>} : memref<16x128xf32, #tpu.memory_space<vmem>>, vector<8x128xf32>,
    %c1_i32_229 = arith.constant 1 : i32
    %c8_i32_230 = arith.constant 8 : i32
    %582 = arith.muli %c1_i32_229, %c8_i32_230 : i32
    %583 = tpu.assume_multiple %582, 8 : i32
    %584 = arith.index_cast %583 : i32 to index
    %c0_231 = arith.constant 0 : index
    %585 = vector.load %arg16[%584, %c0_231] : memref<16x512xf32, #tpu.memory_space<vmem>>, vector<8x512xf32>
    %586 = vector.extract_strided_slice %585 {offsets = [0, 0], sizes = [2, 512], strides = [1, 1]} : vector<8x512xf32> to vector<2x512xf32>
    %c0_232 = arith.constant 0 : index
    %c0_233 = arith.constant 0 : index
    %587 = vector.load %arg8[%c0_232, %c0_233] : memref<128x512xf32, #tpu.memory_space<vmem>>, vector<128x512xf32>
    %cst_234 = arith.constant dense<0.000000e+00> : vector<2x512xf32>
    %588 = tpu.matmul %578, %587, %cst_234 {dimension_numbers = #tpu.dot_dimension_numbers<[1], [0], [0], [1], [0, 0, 1, 1], [], []>} : vector<2x128xf32>, vector<128x512xf32>, vector<2x512xf32> -> vector<2x512xf32>
    %589 = arith.addf %586, %588 : vector<2x512xf32>
    %590 = math.tanh %589 : vector<2x512xf32>
    %591 = vector.extract_strided_slice %590 {offsets = [0, 0], sizes = [2, 128], strides = [1, 1]} : vector<2x512xf32> to vector<2x128xf32>
    %cst_235 = arith.constant 5.000000e-01 : f32
    %592 = vector.broadcast %cst_235 : f32 to vector<2x128xf32>
    %593 = arith.mulf %592, %591 : vector<2x128xf32>
    %cst_236 = arith.constant 5.000000e-01 : f32
    %594 = vector.broadcast %cst_236 : f32 to vector<2x128xf32>
    %595 = arith.addf %593, %594 : vector<2x128xf32>
    %596 = vector.extract_strided_slice %590 {offsets = [0, 128], sizes = [2, 128], strides = [1, 1]} : vector<2x512xf32> to vector<2x128xf32>
    %cst_237 = arith.constant 5.000000e-01 : f32
    %597 = vector.broadcast %cst_237 : f32 to vector<2x128xf32>
    %598 = arith.mulf %597, %596 : vector<2x128xf32>
    %cst_238 = arith.constant 5.000000e-01 : f32
    %599 = vector.broadcast %cst_238 : f32 to vector<2x128xf32>
    %600 = arith.addf %598, %599 : vector<2x128xf32>
    %601 = vector.extract_strided_slice %590 {offsets = [0, 256], sizes = [2, 128], strides = [1, 1]} : vector<2x512xf32> to vector<2x128xf32>
    %602 = vector.extract_strided_slice %590 {offsets = [0, 384], sizes = [2, 128], strides = [1, 1]} : vector<2x512xf32> to vector<2x128xf32>
    %cst_239 = arith.constant 5.000000e-01 : f32
    %603 = vector.broadcast %cst_239 : f32 to vector<2x128xf32>
    %604 = arith.mulf %603, %602 : vector<2x128xf32>
    %cst_240 = arith.constant 5.000000e-01 : f32
    %605 = vector.broadcast %cst_240 : f32 to vector<2x128xf32>
    %606 = arith.addf %604, %605 : vector<2x128xf32>
    %607 = arith.mulf %600, %576 : vector<2x128xf32>
    %608 = arith.mulf %595, %601 : vector<2x128xf32>
    %609 = arith.addf %607, %608 : vector<2x128xf32>
    %610 = math.tanh %609 : vector<2x128xf32>
    %611 = arith.mulf %606, %610 : vector<2x128xf32>
    %612 = vector.extract_strided_slice %585 {offsets = [2, 0], sizes = [2, 512], strides = [1, 1]} : vector<8x512xf32> to vector<2x512xf32>
    %c0_241 = arith.constant 0 : index
    %c0_242 = arith.constant 0 : index
    %613 = vector.load %arg8[%c0_241, %c0_242] : memref<128x512xf32, #tpu.memory_space<vmem>>, vector<128x512xf32>
    %cst_243 = arith.constant dense<0.000000e+00> : vector<2x512xf32>
    %614 = tpu.matmul %611, %613, %cst_243 {dimension_numbers = #tpu.dot_dimension_numbers<[1], [0], [0], [1], [0, 0, 1, 1], [], []>} : vector<2x128xf32>, vector<128x512xf32>, vector<2x512xf32> -> vector<2x512xf32>
    %615 = arith.addf %612, %614 : vector<2x512xf32>
    %616 = math.tanh %615 : vector<2x512xf32>
    %617 = vector.extract_strided_slice %616 {offsets = [0, 0], sizes = [2, 128], strides = [1, 1]} : vector<2x512xf32> to vector<2x128xf32>
    %cst_244 = arith.constant 5.000000e-01 : f32
    %618 = vector.broadcast %cst_244 : f32 to vector<2x128xf32>
    %619 = arith.mulf %618, %617 : vector<2x128xf32>
    %cst_245 = arith.constant 5.000000e-01 : f32
    %620 = vector.broadcast %cst_245 : f32 to vector<2x128xf32>
    %621 = arith.addf %619, %620 : vector<2x128xf32>
    %622 = vector.extract_strided_slice %616 {offsets = [0, 128], sizes = [2, 128], strides = [1, 1]} : vector<2x512xf32> to vector<2x128xf32>
    %cst_246 = arith.constant 5.000000e-01 : f32
    %623 = vector.broadcast %cst_246 : f32 to vector<2x128xf32>
    %624 = arith.mulf %623, %622 : vector<2x128xf32>
    %cst_247 = arith.constant 5.000000e-01 : f32
    %625 = vector.broadcast %cst_247 : f32 to vector<2x128xf32>
    %626 = arith.addf %624, %625 : vector<2x128xf32>
    %627 = vector.extract_strided_slice %616 {offsets = [0, 256], sizes = [2, 128], strides = [1, 1]} : vector<2x512xf32> to vector<2x128xf32>
    %628 = vector.extract_strided_slice %616 {offsets = [0, 384], sizes = [2, 128], strides = [1, 1]} : vector<2x512xf32> to vector<2x128xf32>
    %cst_248 = arith.constant 5.000000e-01 : f32
    %629 = vector.broadcast %cst_248 : f32 to vector<2x128xf32>
    %630 = arith.mulf %629, %628 : vector<2x128xf32>
    %cst_249 = arith.constant 5.000000e-01 : f32
    %631 = vector.broadcast %cst_249 : f32 to vector<2x128xf32>
    %632 = arith.addf %630, %631 : vector<2x128xf32>
    %633 = arith.mulf %626, %609 : vector<2x128xf32>
    %634 = arith.mulf %621, %627 : vector<2x128xf32>
    %635 = arith.addf %633, %634 : vector<2x128xf32>
    %636 = math.tanh %635 : vector<2x128xf32>
    %637 = arith.mulf %632, %636 : vector<2x128xf32>
    %638 = vector.extract_strided_slice %585 {offsets = [4, 0], sizes = [2, 512], strides = [1, 1]} : vector<8x512xf32> to vector<2x512xf32>
    %c0_250 = arith.constant 0 : index
    %c0_251 = arith.constant 0 : index
    %639 = vector.load %arg8[%c0_250, %c0_251] : memref<128x512xf32, #tpu.memory_space<vmem>>, vector<128x512xf32>
    %cst_252 = arith.constant dense<0.000000e+00> : vector<2x512xf32>
    %640 = tpu.matmul %637, %639, %cst_252 {dimension_numbers = #tpu.dot_dimension_numbers<[1], [0], [0], [1], [0, 0, 1, 1], [], []>} : vector<2x128xf32>, vector<128x512xf32>, vector<2x512xf32> -> vector<2x512xf32>
    %641 = arith.addf %638, %640 : vector<2x512xf32>
    %642 = math.tanh %641 : vector<2x512xf32>
    %643 = vector.extract_strided_slice %642 {offsets = [0, 0], sizes = [2, 128], strides = [1, 1]} : vector<2x512xf32> to vector<2x128xf32>
    %cst_253 = arith.constant 5.000000e-01 : f32
    %644 = vector.broadcast %cst_253 : f32 to vector<2x128xf32>
    %645 = arith.mulf %644, %643 : vector<2x128xf32>
    %cst_254 = arith.constant 5.000000e-01 : f32
    %646 = vector.broadcast %cst_254 : f32 to vector<2x128xf32>
    %647 = arith.addf %645, %646 : vector<2x128xf32>
    %648 = vector.extract_strided_slice %642 {offsets = [0, 128], sizes = [2, 128], strides = [1, 1]} : vector<2x512xf32> to vector<2x128xf32>
    %cst_255 = arith.constant 5.000000e-01 : f32
    %649 = vector.broadcast %cst_255 : f32 to vector<2x128xf32>
    %650 = arith.mulf %649, %648 : vector<2x128xf32>
    %cst_256 = arith.constant 5.000000e-01 : f32
    %651 = vector.broadcast %cst_256 : f32 to vector<2x128xf32>
    %652 = arith.addf %650, %651 : vector<2x128xf32>
    %653 = vector.extract_strided_slice %642 {offsets = [0, 256], sizes = [2, 128], strides = [1, 1]} : vector<2x512xf32> to vector<2x128xf32>
    %654 = vector.extract_strided_slice %642 {offsets = [0, 384], sizes = [2, 128], strides = [1, 1]} : vector<2x512xf32> to vector<2x128xf32>
    %cst_257 = arith.constant 5.000000e-01 : f32
    %655 = vector.broadcast %cst_257 : f32 to vector<2x128xf32>
    %656 = arith.mulf %655, %654 : vector<2x128xf32>
    %cst_258 = arith.constant 5.000000e-01 : f32
    %657 = vector.broadcast %cst_258 : f32 to vector<2x128xf32>
    %658 = arith.addf %656, %657 : vector<2x128xf32>
    %659 = arith.mulf %652, %635 : vector<2x128xf32>
    %660 = arith.mulf %647, %653 : vector<2x128xf32>
    %661 = arith.addf %659, %660 : vector<2x128xf32>
    %662 = math.tanh %661 : vector<2x128xf32>
    %663 = arith.mulf %658, %662 : vector<2x128xf32>
    %664 = vector.extract_strided_slice %585 {offsets = [6, 0], sizes = [2, 512], strides = [1, 1]} : vector<8x512xf32> to vector<2x512xf32>
    %c0_259 = arith.constant 0 : index
    %c0_260 = arith.constant 0 : index
    %665 = vector.load %arg8[%c0_259, %c0_260] : memref<128x512xf32, #tpu.memory_space<vmem>>, vector<128x512xf32>
    %cst_261 = arith.constant dense<0.000000e+00> : vector<2x512xf32>
    %666 = tpu.matmul %663, %665, %cst_261 {dimension_numbers = #tpu.dot_dimension_numbers<[1], [0], [0], [1], [0, 0, 1, 1], [], []>} : vector<2x128xf32>, vector<128x512xf32>, vector<2x512xf32> -> vector<2x512xf32>
    %667 = arith.addf %664, %666 : vector<2x512xf32>
    %668 = math.tanh %667 : vector<2x512xf32>
    %669 = vector.extract_strided_slice %668 {offsets = [0, 0], sizes = [2, 128], strides = [1, 1]} : vector<2x512xf32> to vector<2x128xf32>
    %cst_262 = arith.constant 5.000000e-01 : f32
    %670 = vector.broadcast %cst_262 : f32 to vector<2x128xf32>
    %671 = arith.mulf %670, %669 : vector<2x128xf32>
    %cst_263 = arith.constant 5.000000e-01 : f32
    %672 = vector.broadcast %cst_263 : f32 to vector<2x128xf32>
    %673 = arith.addf %671, %672 : vector<2x128xf32>
    %674 = vector.extract_strided_slice %668 {offsets = [0, 128], sizes = [2, 128], strides = [1, 1]} : vector<2x512xf32> to vector<2x128xf32>
    %cst_264 = arith.constant 5.000000e-01 : f32
    %675 = vector.broadcast %cst_264 : f32 to vector<2x128xf32>
    %676 = arith.mulf %675, %674 : vector<2x128xf32>
    %cst_265 = arith.constant 5.000000e-01 : f32
    %677 = vector.broadcast %cst_265 : f32 to vector<2x128xf32>
    %678 = arith.addf %676, %677 : vector<2x128xf32>
    %679 = vector.extract_strided_slice %668 {offsets = [0, 256], sizes = [2, 128], strides = [1, 1]} : vector<2x512xf32> to vector<2x128xf32>
    %680 = vector.extract_strided_slice %668 {offsets = [0, 384], sizes = [2, 128], strides = [1, 1]} : vector<2x512xf32> to vector<2x128xf32>
    %cst_266 = arith.constant 5.000000e-01 : f32
    %681 = vector.broadcast %cst_266 : f32 to vector<2x128xf32>
    %682 = arith.mulf %681, %680 : vector<2x128xf32>
    %cst_267 = arith.constant 5.000000e-01 : f32
    %683 = vector.broadcast %cst_267 : f32 to vector<2x128xf32>
    %684 = arith.addf %682, %683 : vector<2x128xf32>
    %685 = arith.mulf %678, %661 : vector<2x128xf32>
    %686 = arith.mulf %673, %679 : vector<2x128xf32>
    %687 = arith.addf %685, %686 : vector<2x128xf32>
    %688 = math.tanh %687 : vector<2x128xf32>
    %689 = arith.mulf %684, %688 : vector<2x128xf32>
    %690 = tpu.concatenate %611, %637, %663, %689 in 0 : vector<2x128xf32>, vector<2x128xf32>, vector<2x128xf32>, vector<2x128xf32> -> vector<8x128xf32>
    %691 = arith.index_cast %583 : i32 to index
    %c0_268 = arith.constant 0 : index
    %692 = vector.load %arg17[%691, %c0_268] : memref<16x128xf32, #tpu.memory_space<vmem>>, vector<8x128xf32>
    tpu.vector_store %arg17[%691, %c0_268], %690 {strides = array<i32>} : memref<16x128xf32, #tpu.memory_space<vmem>>, vector<8x128xf32>,
    %c2_i32_269 = arith.constant 2 : i32
    %c0_270 = arith.constant 0 : index
    %c0_271 = arith.constant 0 : index
    %693 = vector.load %arg17[%c0_270, %c0_271] : memref<16x128xf32, #tpu.memory_space<vmem>>, vector<16x128xf32>
    %c0_272 = arith.constant 0 : index
    %c0_273 = arith.constant 0 : index
    %694 = vector.load %arg10[%c0_272, %c0_273] : memref<128x512xf32, #tpu.memory_space<vmem>>, vector<128x512xf32>
    %cst_274 = arith.constant dense<0.000000e+00> : vector<16x512xf32>
    %695 = tpu.matmul %693, %694, %cst_274 {dimension_numbers = #tpu.dot_dimension_numbers<[1], [0], [0], [1], [0, 0, 1, 1], [], []>} : vector<16x128xf32>, vector<128x512xf32>, vector<16x512xf32> -> vector<16x512xf32>
    %c0_275 = arith.constant 0 : index
    %c0_276 = arith.constant 0 : index
    %696 = vector.load %arg12[%c0_275, %c0_276] : memref<1x512xf32, #tpu.memory_space<vmem>>, vector<1x512xf32>
    %697 = vector.broadcast %696 : vector<1x512xf32> to vector<16x512xf32>
    %698 = arith.addf %695, %697 : vector<16x512xf32>
    %c0_277 = arith.constant 0 : index
    %c0_278 = arith.constant 0 : index
    %699 = vector.load %arg16[%c0_277, %c0_278] : memref<16x512xf32, #tpu.memory_space<vmem>>, vector<16x512xf32>
    tpu.vector_store %arg16[%c0_277, %c0_278], %698 {strides = array<i32>} : memref<16x512xf32, #tpu.memory_space<vmem>>, vector<16x512xf32>,
    %cst_279 = arith.constant 0.000000e+00 : f32
    %700 = vector.broadcast %cst_279 : f32 to vector<2x128xf32>
    %cst_280 = arith.constant 0.000000e+00 : f32
    %701 = vector.broadcast %cst_280 : f32 to vector<2x128xf32>
    %c0_i32_281 = arith.constant 0 : i32
    %c8_i32_282 = arith.constant 8 : i32
    %702 = arith.muli %c0_i32_281, %c8_i32_282 : i32
    %703 = tpu.assume_multiple %702, 8 : i32
    %704 = arith.index_cast %703 : i32 to index
    %c0_283 = arith.constant 0 : index
    %705 = vector.load %arg16[%704, %c0_283] : memref<16x512xf32, #tpu.memory_space<vmem>>, vector<8x512xf32>
    %706 = vector.extract_strided_slice %705 {offsets = [0, 0], sizes = [2, 512], strides = [1, 1]} : vector<8x512xf32> to vector<2x512xf32>
    %c0_284 = arith.constant 0 : index
    %c0_285 = arith.constant 0 : index
    %707 = vector.load %arg11[%c0_284, %c0_285] : memref<128x512xf32, #tpu.memory_space<vmem>>, vector<128x512xf32>
    %cst_286 = arith.constant dense<0.000000e+00> : vector<2x512xf32>
    %708 = tpu.matmul %700, %707, %cst_286 {dimension_numbers = #tpu.dot_dimension_numbers<[1], [0], [0], [1], [0, 0, 1, 1], [], []>} : vector<2x128xf32>, vector<128x512xf32>, vector<2x512xf32> -> vector<2x512xf32>
    %709 = arith.addf %706, %708 : vector<2x512xf32>
    %710 = math.tanh %709 : vector<2x512xf32>
    %711 = vector.extract_strided_slice %710 {offsets = [0, 0], sizes = [2, 128], strides = [1, 1]} : vector<2x512xf32> to vector<2x128xf32>
    %cst_287 = arith.constant 5.000000e-01 : f32
    %712 = vector.broadcast %cst_287 : f32 to vector<2x128xf32>
    %713 = arith.mulf %712, %711 : vector<2x128xf32>
    %cst_288 = arith.constant 5.000000e-01 : f32
    %714 = vector.broadcast %cst_288 : f32 to vector<2x128xf32>
    %715 = arith.addf %713, %714 : vector<2x128xf32>
    %716 = vector.extract_strided_slice %710 {offsets = [0, 128], sizes = [2, 128], strides = [1, 1]} : vector<2x512xf32> to vector<2x128xf32>
    %cst_289 = arith.constant 5.000000e-01 : f32
    %717 = vector.broadcast %cst_289 : f32 to vector<2x128xf32>
    %718 = arith.mulf %717, %716 : vector<2x128xf32>
    %cst_290 = arith.constant 5.000000e-01 : f32
    %719 = vector.broadcast %cst_290 : f32 to vector<2x128xf32>
    %720 = arith.addf %718, %719 : vector<2x128xf32>
    %721 = vector.extract_strided_slice %710 {offsets = [0, 256], sizes = [2, 128], strides = [1, 1]} : vector<2x512xf32> to vector<2x128xf32>
    %722 = vector.extract_strided_slice %710 {offsets = [0, 384], sizes = [2, 128], strides = [1, 1]} : vector<2x512xf32> to vector<2x128xf32>
    %cst_291 = arith.constant 5.000000e-01 : f32
    %723 = vector.broadcast %cst_291 : f32 to vector<2x128xf32>
    %724 = arith.mulf %723, %722 : vector<2x128xf32>
    %cst_292 = arith.constant 5.000000e-01 : f32
    %725 = vector.broadcast %cst_292 : f32 to vector<2x128xf32>
    %726 = arith.addf %724, %725 : vector<2x128xf32>
    %727 = arith.mulf %720, %701 : vector<2x128xf32>
    %728 = arith.mulf %715, %721 : vector<2x128xf32>
    %729 = arith.addf %727, %728 : vector<2x128xf32>
    %730 = math.tanh %729 : vector<2x128xf32>
    %731 = arith.mulf %726, %730 : vector<2x128xf32>
    %732 = vector.extract_strided_slice %705 {offsets = [2, 0], sizes = [2, 512], strides = [1, 1]} : vector<8x512xf32> to vector<2x512xf32>
    %c0_293 = arith.constant 0 : index
    %c0_294 = arith.constant 0 : index
    %733 = vector.load %arg11[%c0_293, %c0_294] : memref<128x512xf32, #tpu.memory_space<vmem>>, vector<128x512xf32>
    %cst_295 = arith.constant dense<0.000000e+00> : vector<2x512xf32>
    %734 = tpu.matmul %731, %733, %cst_295 {dimension_numbers = #tpu.dot_dimension_numbers<[1], [0], [0], [1], [0, 0, 1, 1], [], []>} : vector<2x128xf32>, vector<128x512xf32>, vector<2x512xf32> -> vector<2x512xf32>
    %735 = arith.addf %732, %734 : vector<2x512xf32>
    %736 = math.tanh %735 : vector<2x512xf32>
    %737 = vector.extract_strided_slice %736 {offsets = [0, 0], sizes = [2, 128], strides = [1, 1]} : vector<2x512xf32> to vector<2x128xf32>
    %cst_296 = arith.constant 5.000000e-01 : f32
    %738 = vector.broadcast %cst_296 : f32 to vector<2x128xf32>
    %739 = arith.mulf %738, %737 : vector<2x128xf32>
    %cst_297 = arith.constant 5.000000e-01 : f32
    %740 = vector.broadcast %cst_297 : f32 to vector<2x128xf32>
    %741 = arith.addf %739, %740 : vector<2x128xf32>
    %742 = vector.extract_strided_slice %736 {offsets = [0, 128], sizes = [2, 128], strides = [1, 1]} : vector<2x512xf32> to vector<2x128xf32>
    %cst_298 = arith.constant 5.000000e-01 : f32
    %743 = vector.broadcast %cst_298 : f32 to vector<2x128xf32>
    %744 = arith.mulf %743, %742 : vector<2x128xf32>
    %cst_299 = arith.constant 5.000000e-01 : f32
    %745 = vector.broadcast %cst_299 : f32 to vector<2x128xf32>
    %746 = arith.addf %744, %745 : vector<2x128xf32>
    %747 = vector.extract_strided_slice %736 {offsets = [0, 256], sizes = [2, 128], strides = [1, 1]} : vector<2x512xf32> to vector<2x128xf32>
    %748 = vector.extract_strided_slice %736 {offsets = [0, 384], sizes = [2, 128], strides = [1, 1]} : vector<2x512xf32> to vector<2x128xf32>
    %cst_300 = arith.constant 5.000000e-01 : f32
    %749 = vector.broadcast %cst_300 : f32 to vector<2x128xf32>
    %750 = arith.mulf %749, %748 : vector<2x128xf32>
    %cst_301 = arith.constant 5.000000e-01 : f32
    %751 = vector.broadcast %cst_301 : f32 to vector<2x128xf32>
    %752 = arith.addf %750, %751 : vector<2x128xf32>
    %753 = arith.mulf %746, %729 : vector<2x128xf32>
    %754 = arith.mulf %741, %747 : vector<2x128xf32>
    %755 = arith.addf %753, %754 : vector<2x128xf32>
    %756 = math.tanh %755 : vector<2x128xf32>
    %757 = arith.mulf %752, %756 : vector<2x128xf32>
    %758 = vector.extract_strided_slice %705 {offsets = [4, 0], sizes = [2, 512], strides = [1, 1]} : vector<8x512xf32> to vector<2x512xf32>
    %c0_302 = arith.constant 0 : index
    %c0_303 = arith.constant 0 : index
    %759 = vector.load %arg11[%c0_302, %c0_303] : memref<128x512xf32, #tpu.memory_space<vmem>>, vector<128x512xf32>
    %cst_304 = arith.constant dense<0.000000e+00> : vector<2x512xf32>
    %760 = tpu.matmul %757, %759, %cst_304 {dimension_numbers = #tpu.dot_dimension_numbers<[1], [0], [0], [1], [0, 0, 1, 1], [], []>} : vector<2x128xf32>, vector<128x512xf32>, vector<2x512xf32> -> vector<2x512xf32>
    %761 = arith.addf %758, %760 : vector<2x512xf32>
    %762 = math.tanh %761 : vector<2x512xf32>
    %763 = vector.extract_strided_slice %762 {offsets = [0, 0], sizes = [2, 128], strides = [1, 1]} : vector<2x512xf32> to vector<2x128xf32>
    %cst_305 = arith.constant 5.000000e-01 : f32
    %764 = vector.broadcast %cst_305 : f32 to vector<2x128xf32>
    %765 = arith.mulf %764, %763 : vector<2x128xf32>
    %cst_306 = arith.constant 5.000000e-01 : f32
    %766 = vector.broadcast %cst_306 : f32 to vector<2x128xf32>
    %767 = arith.addf %765, %766 : vector<2x128xf32>
    %768 = vector.extract_strided_slice %762 {offsets = [0, 128], sizes = [2, 128], strides = [1, 1]} : vector<2x512xf32> to vector<2x128xf32>
    %cst_307 = arith.constant 5.000000e-01 : f32
    %769 = vector.broadcast %cst_307 : f32 to vector<2x128xf32>
    %770 = arith.mulf %769, %768 : vector<2x128xf32>
    %cst_308 = arith.constant 5.000000e-01 : f32
    %771 = vector.broadcast %cst_308 : f32 to vector<2x128xf32>
    %772 = arith.addf %770, %771 : vector<2x128xf32>
    %773 = vector.extract_strided_slice %762 {offsets = [0, 256], sizes = [2, 128], strides = [1, 1]} : vector<2x512xf32> to vector<2x128xf32>
    %774 = vector.extract_strided_slice %762 {offsets = [0, 384], sizes = [2, 128], strides = [1, 1]} : vector<2x512xf32> to vector<2x128xf32>
    %cst_309 = arith.constant 5.000000e-01 : f32
    %775 = vector.broadcast %cst_309 : f32 to vector<2x128xf32>
    %776 = arith.mulf %775, %774 : vector<2x128xf32>
    %cst_310 = arith.constant 5.000000e-01 : f32
    %777 = vector.broadcast %cst_310 : f32 to vector<2x128xf32>
    %778 = arith.addf %776, %777 : vector<2x128xf32>
    %779 = arith.mulf %772, %755 : vector<2x128xf32>
    %780 = arith.mulf %767, %773 : vector<2x128xf32>
    %781 = arith.addf %779, %780 : vector<2x128xf32>
    %782 = math.tanh %781 : vector<2x128xf32>
    %783 = arith.mulf %778, %782 : vector<2x128xf32>
    %784 = vector.extract_strided_slice %705 {offsets = [6, 0], sizes = [2, 512], strides = [1, 1]} : vector<8x512xf32> to vector<2x512xf32>
    %c0_311 = arith.constant 0 : index
    %c0_312 = arith.constant 0 : index
    %785 = vector.load %arg11[%c0_311, %c0_312] : memref<128x512xf32, #tpu.memory_space<vmem>>, vector<128x512xf32>
    %cst_313 = arith.constant dense<0.000000e+00> : vector<2x512xf32>
    %786 = tpu.matmul %783, %785, %cst_313 {dimension_numbers = #tpu.dot_dimension_numbers<[1], [0], [0], [1], [0, 0, 1, 1], [], []>} : vector<2x128xf32>, vector<128x512xf32>, vector<2x512xf32> -> vector<2x512xf32>
    %787 = arith.addf %784, %786 : vector<2x512xf32>
    %788 = math.tanh %787 : vector<2x512xf32>
    %789 = vector.extract_strided_slice %788 {offsets = [0, 0], sizes = [2, 128], strides = [1, 1]} : vector<2x512xf32> to vector<2x128xf32>
    %cst_314 = arith.constant 5.000000e-01 : f32
    %790 = vector.broadcast %cst_314 : f32 to vector<2x128xf32>
    %791 = arith.mulf %790, %789 : vector<2x128xf32>
    %cst_315 = arith.constant 5.000000e-01 : f32
    %792 = vector.broadcast %cst_315 : f32 to vector<2x128xf32>
    %793 = arith.addf %791, %792 : vector<2x128xf32>
    %794 = vector.extract_strided_slice %788 {offsets = [0, 128], sizes = [2, 128], strides = [1, 1]} : vector<2x512xf32> to vector<2x128xf32>
    %cst_316 = arith.constant 5.000000e-01 : f32
    %795 = vector.broadcast %cst_316 : f32 to vector<2x128xf32>
    %796 = arith.mulf %795, %794 : vector<2x128xf32>
    %cst_317 = arith.constant 5.000000e-01 : f32
    %797 = vector.broadcast %cst_317 : f32 to vector<2x128xf32>
    %798 = arith.addf %796, %797 : vector<2x128xf32>
    %799 = vector.extract_strided_slice %788 {offsets = [0, 256], sizes = [2, 128], strides = [1, 1]} : vector<2x512xf32> to vector<2x128xf32>
    %800 = vector.extract_strided_slice %788 {offsets = [0, 384], sizes = [2, 128], strides = [1, 1]} : vector<2x512xf32> to vector<2x128xf32>
    %cst_318 = arith.constant 5.000000e-01 : f32
    %801 = vector.broadcast %cst_318 : f32 to vector<2x128xf32>
    %802 = arith.mulf %801, %800 : vector<2x128xf32>
    %cst_319 = arith.constant 5.000000e-01 : f32
    %803 = vector.broadcast %cst_319 : f32 to vector<2x128xf32>
    %804 = arith.addf %802, %803 : vector<2x128xf32>
    %805 = arith.mulf %798, %781 : vector<2x128xf32>
    %806 = arith.mulf %793, %799 : vector<2x128xf32>
    %807 = arith.addf %805, %806 : vector<2x128xf32>
    %808 = math.tanh %807 : vector<2x128xf32>
    %809 = arith.mulf %804, %808 : vector<2x128xf32>
    %810 = tpu.concatenate %731, %757, %783, %809 in 0 : vector<2x128xf32>, vector<2x128xf32>, vector<2x128xf32>, vector<2x128xf32> -> vector<8x128xf32>
    %811 = arith.index_cast %703 : i32 to index
    %c0_320 = arith.constant 0 : index
    %812 = vector.load %arg17[%811, %c0_320] : memref<16x128xf32, #tpu.memory_space<vmem>>, vector<8x128xf32>
    tpu.vector_store %arg17[%811, %c0_320], %810 {strides = array<i32>} : memref<16x128xf32, #tpu.memory_space<vmem>>, vector<8x128xf32>,
    %c1_i32_321 = arith.constant 1 : i32
    %c8_i32_322 = arith.constant 8 : i32
    %813 = arith.muli %c1_i32_321, %c8_i32_322 : i32
    %814 = tpu.assume_multiple %813, 8 : i32
    %815 = arith.index_cast %814 : i32 to index
    %c0_323 = arith.constant 0 : index
    %816 = vector.load %arg16[%815, %c0_323] : memref<16x512xf32, #tpu.memory_space<vmem>>, vector<8x512xf32>
    %817 = vector.extract_strided_slice %816 {offsets = [0, 0], sizes = [2, 512], strides = [1, 1]} : vector<8x512xf32> to vector<2x512xf32>
    %c0_324 = arith.constant 0 : index
    %c0_325 = arith.constant 0 : index
    %818 = vector.load %arg11[%c0_324, %c0_325] : memref<128x512xf32, #tpu.memory_space<vmem>>, vector<128x512xf32>
    %cst_326 = arith.constant dense<0.000000e+00> : vector<2x512xf32>
    %819 = tpu.matmul %809, %818, %cst_326 {dimension_numbers = #tpu.dot_dimension_numbers<[1], [0], [0], [1], [0, 0, 1, 1], [], []>} : vector<2x128xf32>, vector<128x512xf32>, vector<2x512xf32> -> vector<2x512xf32>
    %820 = arith.addf %817, %819 : vector<2x512xf32>
    %821 = math.tanh %820 : vector<2x512xf32>
    %822 = vector.extract_strided_slice %821 {offsets = [0, 0], sizes = [2, 128], strides = [1, 1]} : vector<2x512xf32> to vector<2x128xf32>
    %cst_327 = arith.constant 5.000000e-01 : f32
    %823 = vector.broadcast %cst_327 : f32 to vector<2x128xf32>
    %824 = arith.mulf %823, %822 : vector<2x128xf32>
    %cst_328 = arith.constant 5.000000e-01 : f32
    %825 = vector.broadcast %cst_328 : f32 to vector<2x128xf32>
    %826 = arith.addf %824, %825 : vector<2x128xf32>
    %827 = vector.extract_strided_slice %821 {offsets = [0, 128], sizes = [2, 128], strides = [1, 1]} : vector<2x512xf32> to vector<2x128xf32>
    %cst_329 = arith.constant 5.000000e-01 : f32
    %828 = vector.broadcast %cst_329 : f32 to vector<2x128xf32>
    %829 = arith.mulf %828, %827 : vector<2x128xf32>
    %cst_330 = arith.constant 5.000000e-01 : f32
    %830 = vector.broadcast %cst_330 : f32 to vector<2x128xf32>
    %831 = arith.addf %829, %830 : vector<2x128xf32>
    %832 = vector.extract_strided_slice %821 {offsets = [0, 256], sizes = [2, 128], strides = [1, 1]} : vector<2x512xf32> to vector<2x128xf32>
    %833 = vector.extract_strided_slice %821 {offsets = [0, 384], sizes = [2, 128], strides = [1, 1]} : vector<2x512xf32> to vector<2x128xf32>
    %cst_331 = arith.constant 5.000000e-01 : f32
    %834 = vector.broadcast %cst_331 : f32 to vector<2x128xf32>
    %835 = arith.mulf %834, %833 : vector<2x128xf32>
    %cst_332 = arith.constant 5.000000e-01 : f32
    %836 = vector.broadcast %cst_332 : f32 to vector<2x128xf32>
    %837 = arith.addf %835, %836 : vector<2x128xf32>
    %838 = arith.mulf %831, %807 : vector<2x128xf32>
    %839 = arith.mulf %826, %832 : vector<2x128xf32>
    %840 = arith.addf %838, %839 : vector<2x128xf32>
    %841 = math.tanh %840 : vector<2x128xf32>
    %842 = arith.mulf %837, %841 : vector<2x128xf32>
    %843 = vector.extract_strided_slice %816 {offsets = [2, 0], sizes = [2, 512], strides = [1, 1]} : vector<8x512xf32> to vector<2x512xf32>
    %c0_333 = arith.constant 0 : index
    %c0_334 = arith.constant 0 : index
    %844 = vector.load %arg11[%c0_333, %c0_334] : memref<128x512xf32, #tpu.memory_space<vmem>>, vector<128x512xf32>
    %cst_335 = arith.constant dense<0.000000e+00> : vector<2x512xf32>
    %845 = tpu.matmul %842, %844, %cst_335 {dimension_numbers = #tpu.dot_dimension_numbers<[1], [0], [0], [1], [0, 0, 1, 1], [], []>} : vector<2x128xf32>, vector<128x512xf32>, vector<2x512xf32> -> vector<2x512xf32>
    %846 = arith.addf %843, %845 : vector<2x512xf32>
    %847 = math.tanh %846 : vector<2x512xf32>
    %848 = vector.extract_strided_slice %847 {offsets = [0, 0], sizes = [2, 128], strides = [1, 1]} : vector<2x512xf32> to vector<2x128xf32>
    %cst_336 = arith.constant 5.000000e-01 : f32
    %849 = vector.broadcast %cst_336 : f32 to vector<2x128xf32>
    %850 = arith.mulf %849, %848 : vector<2x128xf32>
    %cst_337 = arith.constant 5.000000e-01 : f32
    %851 = vector.broadcast %cst_337 : f32 to vector<2x128xf32>
    %852 = arith.addf %850, %851 : vector<2x128xf32>
    %853 = vector.extract_strided_slice %847 {offsets = [0, 128], sizes = [2, 128], strides = [1, 1]} : vector<2x512xf32> to vector<2x128xf32>
    %cst_338 = arith.constant 5.000000e-01 : f32
    %854 = vector.broadcast %cst_338 : f32 to vector<2x128xf32>
    %855 = arith.mulf %854, %853 : vector<2x128xf32>
    %cst_339 = arith.constant 5.000000e-01 : f32
    %856 = vector.broadcast %cst_339 : f32 to vector<2x128xf32>
    %857 = arith.addf %855, %856 : vector<2x128xf32>
    %858 = vector.extract_strided_slice %847 {offsets = [0, 256], sizes = [2, 128], strides = [1, 1]} : vector<2x512xf32> to vector<2x128xf32>
    %859 = vector.extract_strided_slice %847 {offsets = [0, 384], sizes = [2, 128], strides = [1, 1]} : vector<2x512xf32> to vector<2x128xf32>
    %cst_340 = arith.constant 5.000000e-01 : f32
    %860 = vector.broadcast %cst_340 : f32 to vector<2x128xf32>
    %861 = arith.mulf %860, %859 : vector<2x128xf32>
    %cst_341 = arith.constant 5.000000e-01 : f32
    %862 = vector.broadcast %cst_341 : f32 to vector<2x128xf32>
    %863 = arith.addf %861, %862 : vector<2x128xf32>
    %864 = arith.mulf %857, %840 : vector<2x128xf32>
    %865 = arith.mulf %852, %858 : vector<2x128xf32>
    %866 = arith.addf %864, %865 : vector<2x128xf32>
    %867 = math.tanh %866 : vector<2x128xf32>
    %868 = arith.mulf %863, %867 : vector<2x128xf32>
    %869 = vector.extract_strided_slice %816 {offsets = [4, 0], sizes = [2, 512], strides = [1, 1]} : vector<8x512xf32> to vector<2x512xf32>
    %c0_342 = arith.constant 0 : index
    %c0_343 = arith.constant 0 : index
    %870 = vector.load %arg11[%c0_342, %c0_343] : memref<128x512xf32, #tpu.memory_space<vmem>>, vector<128x512xf32>
    %cst_344 = arith.constant dense<0.000000e+00> : vector<2x512xf32>
    %871 = tpu.matmul %868, %870, %cst_344 {dimension_numbers = #tpu.dot_dimension_numbers<[1], [0], [0], [1], [0, 0, 1, 1], [], []>} : vector<2x128xf32>, vector<128x512xf32>, vector<2x512xf32> -> vector<2x512xf32>
    %872 = arith.addf %869, %871 : vector<2x512xf32>
    %873 = math.tanh %872 : vector<2x512xf32>
    %874 = vector.extract_strided_slice %873 {offsets = [0, 0], sizes = [2, 128], strides = [1, 1]} : vector<2x512xf32> to vector<2x128xf32>
    %cst_345 = arith.constant 5.000000e-01 : f32
    %875 = vector.broadcast %cst_345 : f32 to vector<2x128xf32>
    %876 = arith.mulf %875, %874 : vector<2x128xf32>
    %cst_346 = arith.constant 5.000000e-01 : f32
    %877 = vector.broadcast %cst_346 : f32 to vector<2x128xf32>
    %878 = arith.addf %876, %877 : vector<2x128xf32>
    %879 = vector.extract_strided_slice %873 {offsets = [0, 128], sizes = [2, 128], strides = [1, 1]} : vector<2x512xf32> to vector<2x128xf32>
    %cst_347 = arith.constant 5.000000e-01 : f32
    %880 = vector.broadcast %cst_347 : f32 to vector<2x128xf32>
    %881 = arith.mulf %880, %879 : vector<2x128xf32>
    %cst_348 = arith.constant 5.000000e-01 : f32
    %882 = vector.broadcast %cst_348 : f32 to vector<2x128xf32>
    %883 = arith.addf %881, %882 : vector<2x128xf32>
    %884 = vector.extract_strided_slice %873 {offsets = [0, 256], sizes = [2, 128], strides = [1, 1]} : vector<2x512xf32> to vector<2x128xf32>
    %885 = vector.extract_strided_slice %873 {offsets = [0, 384], sizes = [2, 128], strides = [1, 1]} : vector<2x512xf32> to vector<2x128xf32>
    %cst_349 = arith.constant 5.000000e-01 : f32
    %886 = vector.broadcast %cst_349 : f32 to vector<2x128xf32>
    %887 = arith.mulf %886, %885 : vector<2x128xf32>
    %cst_350 = arith.constant 5.000000e-01 : f32
    %888 = vector.broadcast %cst_350 : f32 to vector<2x128xf32>
    %889 = arith.addf %887, %888 : vector<2x128xf32>
    %890 = arith.mulf %883, %866 : vector<2x128xf32>
    %891 = arith.mulf %878, %884 : vector<2x128xf32>
    %892 = arith.addf %890, %891 : vector<2x128xf32>
    %893 = math.tanh %892 : vector<2x128xf32>
    %894 = arith.mulf %889, %893 : vector<2x128xf32>
    %895 = vector.extract_strided_slice %816 {offsets = [6, 0], sizes = [2, 512], strides = [1, 1]} : vector<8x512xf32> to vector<2x512xf32>
    %c0_351 = arith.constant 0 : index
    %c0_352 = arith.constant 0 : index
    %896 = vector.load %arg11[%c0_351, %c0_352] : memref<128x512xf32, #tpu.memory_space<vmem>>, vector<128x512xf32>
    %cst_353 = arith.constant dense<0.000000e+00> : vector<2x512xf32>
    %897 = tpu.matmul %894, %896, %cst_353 {dimension_numbers = #tpu.dot_dimension_numbers<[1], [0], [0], [1], [0, 0, 1, 1], [], []>} : vector<2x128xf32>, vector<128x512xf32>, vector<2x512xf32> -> vector<2x512xf32>
    %898 = arith.addf %895, %897 : vector<2x512xf32>
    %899 = math.tanh %898 : vector<2x512xf32>
    %900 = vector.extract_strided_slice %899 {offsets = [0, 0], sizes = [2, 128], strides = [1, 1]} : vector<2x512xf32> to vector<2x128xf32>
    %cst_354 = arith.constant 5.000000e-01 : f32
    %901 = vector.broadcast %cst_354 : f32 to vector<2x128xf32>
    %902 = arith.mulf %901, %900 : vector<2x128xf32>
    %cst_355 = arith.constant 5.000000e-01 : f32
    %903 = vector.broadcast %cst_355 : f32 to vector<2x128xf32>
    %904 = arith.addf %902, %903 : vector<2x128xf32>
    %905 = vector.extract_strided_slice %899 {offsets = [0, 128], sizes = [2, 128], strides = [1, 1]} : vector<2x512xf32> to vector<2x128xf32>
    %cst_356 = arith.constant 5.000000e-01 : f32
    %906 = vector.broadcast %cst_356 : f32 to vector<2x128xf32>
    %907 = arith.mulf %906, %905 : vector<2x128xf32>
    %cst_357 = arith.constant 5.000000e-01 : f32
    %908 = vector.broadcast %cst_357 : f32 to vector<2x128xf32>
    %909 = arith.addf %907, %908 : vector<2x128xf32>
    %910 = vector.extract_strided_slice %899 {offsets = [0, 256], sizes = [2, 128], strides = [1, 1]} : vector<2x512xf32> to vector<2x128xf32>
    %911 = vector.extract_strided_slice %899 {offsets = [0, 384], sizes = [2, 128], strides = [1, 1]} : vector<2x512xf32> to vector<2x128xf32>
    %cst_358 = arith.constant 5.000000e-01 : f32
    %912 = vector.broadcast %cst_358 : f32 to vector<2x128xf32>
    %913 = arith.mulf %912, %911 : vector<2x128xf32>
    %cst_359 = arith.constant 5.000000e-01 : f32
    %914 = vector.broadcast %cst_359 : f32 to vector<2x128xf32>
    %915 = arith.addf %913, %914 : vector<2x128xf32>
    %916 = arith.mulf %909, %892 : vector<2x128xf32>
    %917 = arith.mulf %904, %910 : vector<2x128xf32>
    %918 = arith.addf %916, %917 : vector<2x128xf32>
    %919 = math.tanh %918 : vector<2x128xf32>
    %920 = arith.mulf %915, %919 : vector<2x128xf32>
    %921 = tpu.concatenate %842, %868, %894, %920 in 0 : vector<2x128xf32>, vector<2x128xf32>, vector<2x128xf32>, vector<2x128xf32> -> vector<8x128xf32>
    %922 = arith.index_cast %814 : i32 to index
    %c0_360 = arith.constant 0 : index
    %923 = vector.load %arg17[%922, %c0_360] : memref<16x128xf32, #tpu.memory_space<vmem>>, vector<8x128xf32>
    tpu.vector_store %arg17[%922, %c0_360], %921 {strides = array<i32>} : memref<16x128xf32, #tpu.memory_space<vmem>>, vector<8x128xf32>,
    %c2_i32_361 = arith.constant 2 : i32
    %c0_362 = arith.constant 0 : index
    %c0_363 = arith.constant 0 : index
    %924 = vector.load %arg17[%c0_362, %c0_363] : memref<16x128xf32, #tpu.memory_space<vmem>>, vector<16x128xf32>
    %c0_364 = arith.constant 0 : index
    %c0_365 = arith.constant 0 : index
    %925 = vector.load %arg13[%c0_364, %c0_365] : memref<128x128xf32, #tpu.memory_space<vmem>>, vector<128x128xf32>
    %cst_366 = arith.constant dense<0.000000e+00> : vector<16x128xf32>
    %926 = tpu.matmul %924, %925, %cst_366 {dimension_numbers = #tpu.dot_dimension_numbers<[1], [0], [0], [1], [0, 0, 1, 1], [], []>} : vector<16x128xf32>, vector<128x128xf32>, vector<16x128xf32> -> vector<16x128xf32>
    %c0_367 = arith.constant 0 : index
    %c0_368 = arith.constant 0 : index
    %927 = vector.load %arg14[%c0_367, %c0_368] : memref<1x128xf32, #tpu.memory_space<vmem>>, vector<1x128xf32>
    %928 = vector.broadcast %927 : vector<1x128xf32> to vector<16x128xf32>
    %929 = arith.addf %926, %928 : vector<16x128xf32>
    %930 = arith.negf %929 : vector<16x128xf32>
    %931 = math.exp %930 : vector<16x128xf32>
    %cst_369 = arith.constant 1.000000e+00 : f32
    %932 = vector.broadcast %cst_369 : f32 to vector<16x128xf32>
    %933 = arith.addf %932, %931 : vector<16x128xf32>
    %934 = arith.divf %932, %933 : vector<16x128xf32>
    %c0_370 = arith.constant 0 : index
    %c0_371 = arith.constant 0 : index
    %935 = vector.load %arg15[%c0_370, %c0_371] : memref<16x128xf32, #tpu.memory_space<vmem>>, vector<16x128xf32>
    tpu.vector_store %arg15[%c0_370, %c0_371], %934 {strides = array<i32>} : memref<16x128xf32, #tpu.memory_space<vmem>>, vector<16x128xf32>,
    return
  }
}

</mosaic_0001>

<bundles_post_ra>
// kernel: vae_forward.1
= control target key start
LH: loop header
LB: loop body
LE: loop exit
PB: predicated region body
PF: predicated region fallthrough
CT: control target
= control target key end

     0   :  { %20 = vsyncpa [#allocation5], 0  ;;  %s9797_s0 = inlined_call_operand.vmem [shape: f32[16,4], index: 0, kind: input, shape index: {}]   ;;  %s9798_s1 = inlined_call_operand.vmem [shape: f32[4,512], index: 1, kind: input, shape index: {}]   ;;  %s9799_s2 = inlined_call_operand.hbm [shape: f32[128,512], index: 2, kind: input, shape index: {}]   ;;  %s9800_s3 = inlined_call_operand.vmem [shape: f32[1,512], index: 3, kind: input, shape index: {}]   ;;  %s9801_s4 = inlined_call_operand.hbm [shape: f32[128,512], index: 4, kind: input, shape index: {}]   ;;  %s9802_s5 = inlined_call_operand.hbm [shape: f32[128,512], index: 5, kind: input, shape index: {}]   ;;  %s9803_s6 = inlined_call_operand.vmem [shape: f32[1,512], index: 6, kind: input, shape index: {}]   ;;  %s9804_s7 = inlined_call_operand.hbm [shape: f32[128,512], index: 7, kind: input, shape index: {}]   ;;  %s9805_s8 = inlined_call_operand.hbm [shape: f32[128,512], index: 8, kind: input, shape index: {}]   ;;  %s9806_s9 = inlined_call_operand.vmem [shape: f32[1,512], index: 9, kind: input, shape index: {}]   ;;  %s9807_s10 = inlined_call_operand.hbm [shape: f32[128,512], index: 10, kind: input, shape index: {}]   ;;  %s9808_s11 = inlined_call_operand.hbm [shape: f32[128,512], index: 11, kind: input, shape index: {}]   ;;  %s9809_s12 = inlined_call_operand.vmem [shape: f32[1,512], index: 12, kind: input, shape index: {}]   ;;  %s9810_s13 = inlined_call_operand.hbm [shape: f32[128,128], index: 13, kind: input, shape index: {}]   ;;  %s9811_s14 = inlined_call_operand.vmem [shape: f32[1,128], index: 14, kind: input, shape index: {}]   ;;  %s9812_s15 = inlined_call_operand.vmem [shape: f32[16,128], index: 15, kind: output, shape index: {}]  }
   0x1   :  { %21 = vsyncpa [#allocation7], 0 }
   0x2   :  { %22 = vsyncpa [#allocation10], 0 }
   0x3   :  { %23 = vsyncpa [#allocation13], 0 }
   0x4   :  { %24 = vsyncpa [#allocation16], 0  ;;  %s48_s20 = sshll.u32 %s9801_s4, 4  ;;  %s5924_s21 = smov [#allocation6]   ;;  %s49_s20 = int_to_ptr.hbm [resolvable:$true] %s48_s20 }
   0x5   :  { %s50_s22 = sshll.u32 %s5924_s21, 4  ;;  %s76_s25 = sshll.u32 %s9804_s7, 4  ;;  %s51_s22 = int_to_ptr.vmem [resolvable:$true] %s50_s22  ;;  %s77_s25 = int_to_ptr.hbm [resolvable:$true] %s76_s25 }
   0x6   :  { %s5925_s26 = smov 512   ;;  %s5926_s27 = smov 32  }
   0x7   :  { %56 = dma.hbm_to_vmem [thread:$0]  %s49_s20, 8192, %s51_s22, [#allocation7], %s5925_s26, %s5925_s26, %s5926_s27  }
   0x8   :  { %s5927_s28 = smov [#allocation9]   ;;  %s104_s4 = sshll.u32 %s9807_s10, 4  ;;  %s105_s4 = int_to_ptr.hbm [resolvable:$true] %s104_s4 }
   0x9   :  { %s78_s29 = sshll.u32 %s5927_s28, 4  ;;  %s33_s18 = sshll.u32 %s9799_s2, 4  ;;  %s79_s29 = int_to_ptr.vmem [resolvable:$true] %s78_s29  ;;  %s34_s18 = int_to_ptr.hbm [resolvable:$true] %s33_s18 }
   0xa   :  { %84 = dma.hbm_to_vmem [thread:$0]  %s77_s25, 8192, %s79_s29, [#allocation10], %s5925_s26, %s5925_s26, %s5926_s27  }
   0xb   :  { %s5928_s19 = smov [#allocation12]   ;;  %s5929_s20 = smov [#allocation4]  }
   0xc   :  { %s106_s21 = sshll.u32 %s5928_s19, 4  ;;  %s35_s10 = sshll.u32 %s5929_s20, 4  ;;  %s107_s21 = int_to_ptr.vmem [resolvable:$true] %s106_s21  ;;  %s36_s10 = int_to_ptr.vmem [resolvable:$true] %s35_s10 }
   0xd   :  { %112 = dma.hbm_to_vmem [thread:$0]  %s105_s4, 8192, %s107_s21, [#allocation13], %s5925_s26, %s5925_s26, %s5926_s27  }
   0xe   :  { %s61_s24 = sshll.u32 %s9802_s5, 4  ;;  %s89_s28 = sshll.u32 %s9805_s8, 4  ;;  %s62_s24 = int_to_ptr.hbm [resolvable:$true] %s61_s24  ;;  %s90_s28 = int_to_ptr.hbm [resolvable:$true] %s89_s28 }
   0xf   :  { %41 = dma.hbm_to_vmem [thread:$0]  %s34_s18, 8192, %s36_s10, [#allocation5], %s5925_s26, %s5925_s26, %s5926_s27  }
  0x10   :  { %s5930_s29 = smov [#allocation8]   ;;  %s5931_s16 = smov [#allocation11]  }
  0x11   :  { %s63_s30 = sshll.u32 %s5930_s29, 4  ;;  %s91_s5 = sshll.u32 %s5931_s16, 4  ;;  %s64_s30 = int_to_ptr.vmem [resolvable:$true] %s63_s30  ;;  %s92_s5 = int_to_ptr.vmem [resolvable:$true] %s91_s5 }
  0x12   :  { %69 = dma.hbm_to_vmem [thread:$0]  %s62_s24, 8192, %s64_s30, [#allocation7], %s5925_s26, %s5925_s26, %s5926_s27  }
  0x13   :  { %s117_s17 = sshll.u32 %s9808_s11, 4  ;;  %s132_s19 = sshll.u32 %s9810_s13, 4  ;;  %s118_s17 = int_to_ptr.hbm [resolvable:$true] %s117_s17  ;;  %s133_s19 = int_to_ptr.hbm [resolvable:$true] %s132_s19 }
  0x14   :  { %97 = dma.hbm_to_vmem [thread:$0]  %s90_s28, 8192, %s92_s5, [#allocation10], %s5925_s26, %s5925_s26, %s5926_s27  }
  0x15   :  { %s5932_s21 = smov [#allocation14]   ;;  %s5933_s10 = smov [#allocation15]  }
  0x16   :  { %s119_s20 = sshll.u32 %s5932_s21, 4  ;;  %s134_s11 = sshll.u32 %s5933_s10, 4  ;;  %s120_s20 = int_to_ptr.vmem [resolvable:$true] %s119_s20  ;;  %s135_s11 = int_to_ptr.vmem [resolvable:$true] %s134_s11 }
  0x17   :  { %125 = dma.hbm_to_vmem [thread:$0]  %s118_s17, 8192, %s120_s20, [#allocation13], %s5925_s26, %s5925_s26, %s5926_s27  }
  0x18   :  { %s5934_s22 = smov 128   ;;  %s5935_s23 = smov 8  }
  0x19   :  { %140 = dma.hbm_to_vmem [thread:$0]  %s133_s19, 2048, %s135_s11, [#allocation16], %s5934_s22, %s5934_s22, %s5935_s23  }
  0x1a   :  { %5914 = dma.done.wait [#allocation5], 8192  }
  0x1b   :  { %5915 = vsyncadd [#allocation5], 4294959104 }
  0x1c   :  { %5916 = dma.done.wait [#allocation7], 16384  }
  0x1d   :  { %5917 = vsyncadd [#allocation7], 4294950912 }
  0x1e   :  { %5918 = dma.done.wait [#allocation10], 16384  }
  0x1f   :  { %5919 = vsyncadd [#allocation10], 4294950912 }
  0x20   :  { %5920 = dma.done.wait [#allocation13], 16384  }
  0x21   :  { %5921 = vsyncadd [#allocation13], 4294950912 }
  0x22   :  { %5922 = dma.done.wait [#allocation16], 2048  }
  0x23   :  { %5923 = vsyncadd [#allocation16], 4294965248  ;;  %v6062_v0 = vld [vmem:[#allocation4 + $0x1e0] sm:$0xff]  ;;  %v177_v3 = vld [vmem:[%s9798_s1] sm:$0xff]  ;;  %vm205_vm0 = vcmask 1043456   ;;  %vm198_vm1 = vcmask 31744  }
  0x24   :  { %v6064_v1 = vld [vmem:[#allocation4 + $0x1c0] sm:$0xff]  ;;  %385 = vmatpush.msra.mxu1 %v6062_v0  ;;  %191 = vst [vmem:[#allocation1] ss:$2 sm:$0xff] %v177_v3  ;;  %v6090_v9 = vld [vmem:[%s9797_s0] sm:$0xff]  ;;  %v6092_v11 = vld [vmem:[#allocation4 + $0x1f0] sm:$0xff]  ;;  %v9813_v50 = vmov 0.0  }
  0x25   :  { %v6067_v2 = vld [vmem:[#allocation4 + $0x1a0] sm:$0xff]  ;;  %v6094_v12 = vld [vmem:[#allocation4 + $0x1f8] sm:$0xff]  ;;  %v6105_v16 = vld [vmem:[#allocation4 + $0x1d0] sm:$0xff]  ;;  %vm832_vm2 = vcmask 1041408   ;;  %vm835_vm3 = vcmask 1045504  }
  0x26   :  { %386 = vmatpush.msra.mxu1 %v6064_v1  ;;  %v178_v4 = vld [vmem:[%s9798_s1 + $0x8] sm:$0xff]  ;;  %v6107_v17 = vld [vmem:[#allocation4 + $0x1d8] sm:$0xff]  ;;  %v6114_v19 = vld [vmem:[#allocation4 + $0x1b0] sm:$0xff] }
  0x27   :  { %v6076_v5 = vld [vmem:[#allocation4 + $0x180] sm:$0xff]  ;;  %193 = vst [vmem:[#allocation1 + $0x10] ss:$2 sm:$0xff] %v178_v4  ;;  %v6116_v20 = vld [vmem:[#allocation4 + $0x1b8] sm:$0xff]  ;;  %v6125_v22 = vld [vmem:[#allocation4 + $0x190] sm:$0xff] }
  0x28   :  { %387 = vmatpush.msra.mxu1 %v6067_v2  ;;  %v6079_v6 = vld [vmem:[#allocation4 + $0x160] sm:$0xff]  ;;  %v6127_v23 = vld [vmem:[#allocation4 + $0x198] sm:$0xff]  ;;  %v6139_v26 = vld [vmem:[#allocation4 + $0x170] sm:$0xff] }
  0x29   :  { %v6082_v7 = vld [vmem:[#allocation4 + $0x140] sm:$0xff]  ;;  %v6141_v27 = vld [vmem:[#allocation4 + $0x178] sm:$0xff]  ;;  %v6150_v30 = vld [vmem:[#allocation4 + $0x150] sm:$0xff] }
  0x2a   :  { %388 = vmatpush.msra.mxu1 %v6076_v5  ;;  %v6085_v8 = vld [vmem:[#allocation4 + $0x120] sm:$0xff]  ;;  %v6152_v31 = vld [vmem:[#allocation4 + $0x158] sm:$0xff]  ;;  %v6159_v33 = vld [vmem:[#allocation4 + $0x130] sm:$0xff] }
  0x2b   :  { %v195_v10 = vld.sshfl [vmem:[#allocation1 + $0x8] sm:$0xff pattern:$0x75316420]  ;;  %v194_v29 = vld.sshfl [vmem:[#allocation1] sm:$0xff pattern:$0x75316420] }
  0x2c   :  { %389 = vmatpush.msra.mxu1 %v6079_v6  ;;  %5125 = vmatpush.msk.msra.mxu2 %vm205_vm0, %v195_v10  ;;  %v6100_v15 = vld [vmem:[#allocation4 + $0x100] sm:$0xff]  ;;  %v6161_v34 = vld [vmem:[#allocation4 + $0x138] sm:$0xff]  ;;  %v6169_v36 = vld [vmem:[#allocation4 + $0x110] sm:$0xff] }
  0x2d   :  { %5126 = vmatmul.msk.f32.vlgmr.msra.gmra.mxu2 %vm198_vm1, %v6090_v9  ;;  %v6110_v18 = vld [vmem:[#allocation4 + $0xe0] sm:$0xff]  ;;  %5122 = vmatpush.msk.msra.mxu0 %vm205_vm0, %v194_v29  ;;  %v6171_v37 = vld [vmem:[#allocation4 + $0x118] sm:$0xff]  ;;  %v6180_v39 = vld [vmem:[#allocation4 + $0xf0] sm:$0xff] }
  0x2e   :  { %390 = vmatpush.msra.mxu1 %v6082_v7  ;;  %v196_v13 = vld.sshfl [vmem:[#allocation1 + $0x10] sm:$0xff pattern:$0x75316420]  ;;  %v197_v14 = vld.sshfl [vmem:[#allocation1 + $0x18] sm:$0xff pattern:$0x75316420]  ;;  %5123 = vmatmul.msk.f32.vlgmr.msra.gmra.mxu0 %vm198_vm1, %v6090_v9 }
  0x2f   :  { %5131 = vmatpush.msk.msra.mxu3 %vm205_vm0, %v197_v14  ;;  %5128 = vmatpush.msk.msrb.mxu2 %vm205_vm0, %v196_v13  ;;  %10217 = vst [vmem:[#allocation22_spill] sm:$0xff] %v6110_v18  ;;  %v6121_v21 = vld [vmem:[#allocation4 + $0xc0] sm:$0xff]  ;;  %v6182_v40 = vld [vmem:[#allocation4 + $0xf8] sm:$0xff]  ;;  %v6193_v42 = vld [vmem:[#allocation4 + $0x1e8] sm:$0xff] }
  0x30   :  { %391 = vmatpush.msra.mxu1 %v6085_v8  ;;  %5132 = vmatmul.msk.f32.vlgmr.msra.gmra.mxu3 %vm198_vm1, %v6090_v9  ;;  %v6130_v24 = vld [vmem:[#allocation4 + $0xa0] sm:$0xff]  ;;  %v6195_v43 = vld [vmem:[#allocation4 + $0xd0] sm:$0xff]  ;;  %v6199_v44 = vld [vmem:[#allocation4 + $0xd8] sm:$0xff] }
  0x31   :  { %425 = vmatpush.msra.mxu2 %v6092_v11  ;;  %445 = vmatpush.msrb.mxu3 %v6094_v12  ;;  %10218 = vst [vmem:[#allocation23_spill] sm:$0xff] %v6130_v24  ;;  %v6135_v25 = vld [vmem:[%s9797_s0 + $0x8] sm:$0xff]  ;;  %v6202_v45 = vld [vmem:[#allocation4 + $0x1c8] sm:$0xff]  ;;  %v6204_v46 = vld [vmem:[#allocation4 + $0xb0] sm:$0xff] }
  0x32   :  { %392 = vmatpush.msra.mxu1 %v6100_v15  ;;  %v6144_v28 = vld [vmem:[#allocation4 + $0x80] sm:$0xff]  ;;  %484 = vmatpush.msrb.mxu0 %v6062_v0  ;;  %v6209_v47 = vld [vmem:[#allocation4 + $0xb8] sm:$0xff]  ;;  %v6211_v48 = vld [vmem:[#allocation4 + $0x1a8] sm:$0xff] }
  0x33   :  { %426 = vmatpush.msra.mxu2 %v6105_v16  ;;  %446 = vmatpush.msrb.mxu3 %v6107_v17  ;;  %v6155_v32 = vld [vmem:[#allocation4 + $0x60] sm:$0xff]  ;;  %v6213_v49 = vld [vmem:[#allocation4 + $0x90] sm:$0xff]  ;;  %v6219_v51 = vld [vmem:[#allocation4 + $0x98] sm:$0xff] }
  0x34   :  { %393 = vmatpush.msra.mxu1 %v6110_v18  ;;  %10219 = vst [vmem:[#allocation24_spill] sm:$0xff] %v6155_v32  ;;  %v6165_v35 = vld [vmem:[#allocation4 + $0x40] sm:$0xff]  ;;  %v6221_v52 = vld [vmem:[#allocation4 + $0x188] sm:$0xff]  ;;  %v6223_v53 = vld [vmem:[#allocation4 + $0x70] sm:$0xff]  ;;  %485 = vmatpush.msrb.mxu0 %v6064_v1 }
  0x35   :  { %427 = vmatpush.msra.mxu2 %v6114_v19  ;;  %447 = vmatpush.msrb.mxu3 %v6116_v20  ;;  %10220 = vst [vmem:[#allocation25_spill] sm:$0xff] %v6165_v35  ;;  %v6176_v38 = vld [vmem:[#allocation4 + $0x20] sm:$0xff]  ;;  %v6229_v54 = vld [vmem:[#allocation4 + $0x78] sm:$0xff]  ;;  %v6233_v55 = vld [vmem:[#allocation4 + $0x168] sm:$0xff] }
  0x36   :  { %394 = vmatpush.msra.mxu1 %v6121_v21  ;;  %5127 = vmatmul.msk.f32.gmra.mxu2 %vm198_vm1, %v6135_v25  ;;  %10221 = vst [vmem:[#allocation26_spill] sm:$0xff] %v6176_v38  ;;  %v6187_v41 = vld [vmem:[#allocation4] sm:$0xff]  ;;  %v6235_v56 = vld [vmem:[#allocation4 + $0x50] sm:$0xff]  ;;  %v6240_v57 = vld [vmem:[#allocation4 + $0x58] sm:$0xff] }
  0x37   :  { %428 = vmatpush.msra.mxu2 %v6125_v22  ;;  %448 = vmatpush.msrb.mxu3 %v6127_v23  ;;  %10222 = vst [vmem:[#allocation27_spill] sm:$0xff] %v6187_v41  ;;  %v6242_v58 = vld [vmem:[#allocation4 + $0x148] sm:$0xff]  ;;  %v6244_v59 = vld [vmem:[#allocation4 + $0x30] sm:$0xff]  ;;  %v6250_v60 = vld [vmem:[#allocation4 + $0x38] sm:$0xff] }
  0x38   :  { %395 = vmatpush.msra.mxu1 %v6130_v24  ;;  %5133 = vmatmul.msk.f32.gmra.mxu3 %vm198_vm1, %v6135_v25  ;;  %10223 = vst [vmem:[#allocation28_spill] sm:$0xff] %v6213_v49  ;;  %v6252_v61 = vld [vmem:[#allocation4 + $0x128] sm:$0xff]  ;;  %v6254_v62 = vld [vmem:[#allocation4 + $0x10] sm:$0xff]  ;;  %v6260_v63 = vld [vmem:[#allocation4 + $0x18] sm:$0xff] }
  0x39   :  { %429 = vmatpush.msra.mxu2 %v6139_v26  ;;  %449 = vmatpush.msrb.mxu3 %v6141_v27  ;;  %10224 = vst [vmem:[#allocation29_spill] sm:$0xff] %v6219_v51  ;;  %v6262_v3 = vld [vmem:[#allocation4 + $0x108] sm:$0xff] }
  0x3a   :  { %396 = vmatpush.msra.mxu1 %v6144_v28  ;;  %10225 = vst [vmem:[#allocation30_spill] sm:$0xff] %v6223_v53  ;;  %486 = vmatpush.msrb.mxu0 %v6067_v2  ;;  %v6269_v4 = vld [vmem:[#allocation4 + $0xe8] sm:$0xff] }
  0x3b   :  { %430 = vmatpush.msra.mxu2 %v6150_v30  ;;  %450 = vmatpush.msrb.mxu3 %v6152_v31  ;;  %10226 = vst [vmem:[#allocation31_spill] sm:$0xff] %v6229_v54  ;;  %v6280_v10 = vld [vmem:[#allocation4 + $0xa8] sm:$0xff] }
  0x3c   :  { %397 = vmatpush.msra.mxu1 %v6155_v32  ;;  %10227 = vst [vmem:[#allocation32_spill] sm:$0xff] %v6235_v56  ;;  %487 = vmatpush.msrb.mxu0 %v6076_v5  ;;  %v6286_v13 = vld [vmem:[#allocation4 + $0x88] sm:$0xff] }
  0x3d   :  { %431 = vmatpush.msra.mxu2 %v6159_v33  ;;  %451 = vmatpush.msrb.mxu3 %v6161_v34  ;;  %10228 = vst [vmem:[#allocation33_spill] sm:$0xff] %v6240_v57  ;;  %v6292_v14 = vld [vmem:[#allocation4 + $0x68] sm:$0xff] }
  0x3e   :  { %398 = vmatpush.msra.mxu1 %v6165_v35  ;;  %5129 = vmatmul.msk.f32.vlgmr.msrb.gmra.mxu2 %vm198_vm1, %v6090_v9  ;;  %10229 = vst [vmem:[#allocation34_spill] sm:$0xff] %v6244_v59  ;;  %v6274_v9 = vld [vmem:[#allocation4 + $0xc8] sm:$0xff] }
  0x3f   :  { %432 = vmatpush.msra.mxu2 %v6169_v36  ;;  %452 = vmatpush.msrb.mxu3 %v6171_v37  ;;  %10230 = vst [vmem:[#allocation35_spill] sm:$0xff] %v6250_v60  ;;  %v6298_v29 = vld [vmem:[#allocation4 + $0x48] sm:$0xff] }
  0x40   :  { %399 = vmatpush.msra.mxu1 %v6176_v38  ;;  %10231 = vst [vmem:[#allocation36_spill] sm:$0xff] %v6254_v62  ;;  %488 = vmatpush.msrb.mxu0 %v6079_v6 }
  0x41   :  { %433 = vmatpush.msra.mxu2 %v6180_v39  ;;  %453 = vmatpush.msrb.mxu3 %v6182_v40  ;;  %10232 = vst [vmem:[#allocation37_spill] sm:$0xff] %v6260_v63 }
  0x42   :  { %400 = vmatpush.msra.mxu1 %v6187_v41  ;;  %489 = vmatpush.msrb.mxu0 %v6082_v7  ;;  %10233 = vst [vmem:[#allocation38_spill] sm:$0xff] %v6286_v13 }
  0x43   :  { %434 = vmatpush.msra.mxu2 %v6195_v43  ;;  %454 = vmatpush.msrb.mxu3 %v6199_v44  ;;  %10234 = vst [vmem:[#allocation39_spill] sm:$0xff] %v6292_v14 }
  0x44   :  { %405 = vmatpush.msrb.mxu1 %v6193_v42  ;;  %490 = vmatpush.msrb.mxu0 %v6085_v8  ;;  %10235 = vst [vmem:[#allocation40_spill] sm:$0xff] %v6298_v29 }
  0x45   :  { %401 = vmatmul.f32.vlgmr.msra.gmra.mxu1 %v9813_v50  ;;  %435 = vmatpush.msra.mxu2 %v6204_v46 }
  0x46   :  { %406 = vmatpush.msrb.mxu1 %v6202_v45  ;;  %455 = vmatpush.msrb.mxu3 %v6209_v47 }
  0x47   :  { %436 = vmatpush.msra.mxu2 %v6213_v49  ;;  %491 = vmatpush.msrb.mxu0 %v6100_v15 }
  0x48   :  { %407 = vmatpush.msrb.mxu1 %v6211_v48  ;;  %5130 = vmatmul.msk.f32.gmra.mxu2 %vm198_vm1, %v6135_v25 }
  0x49   :  { %456 = vmatpush.msrb.mxu3 %v6219_v51  ;;  %437 = vmatpush.msra.mxu2 %v6223_v53 }
  0x4a   :  { %408 = vmatpush.msrb.mxu1 %v6221_v52  ;;  %492 = vmatpush.msrb.mxu0 %v6110_v18  ;;  %v6310_v18 = vld [vmem:[#allocation4 + $0x8] sm:$0xff] }
  0x4b   :  { %457 = vmatpush.msrb.mxu3 %v6229_v54  ;;  %438 = vmatpush.msra.mxu2 %v6235_v56  ;;  %10237 = vst [vmem:[#allocation42_spill] sm:$0xff] %v6310_v18 }
  0x4c   :  { %409 = vmatpush.msrb.mxu1 %v6233_v55  ;;  %493 = vmatpush.msrb.mxu0 %v6121_v21 }
  0x4d   :  { %458 = vmatpush.msrb.mxu3 %v6240_v57  ;;  %439 = vmatpush.msra.mxu2 %v6244_v59 }
  0x4e   :  { %410 = vmatpush.msrb.mxu1 %v6242_v58  ;;  %494 = vmatpush.msrb.mxu0 %v6130_v24  ;;  %v10238_v24 = vmov 0.0  }
  0x4f   :  { %459 = vmatpush.msrb.mxu3 %v6250_v60  ;;  %440 = vmatpush.msra.mxu2 %v6254_v62 }
  0x50   :  { %411 = vmatpush.msrb.mxu1 %v6252_v61  ;;  %441 = vmatmul.f32.vlgmr.msra.gmra.mxu2 %v9813_v50 }
  0x51   :  { %460 = vmatpush.msrb.mxu3 %v6260_v63  ;;  %524 = vmatpush.msrb.mxu2 %v6092_v11 }
  0x52   :  { %412 = vmatpush.msrb.mxu1 %v6262_v3  ;;  %461 = vmatmul.f32.vlgmr.msrb.gmra.mxu3 %v9813_v50  ;;  %v6304_v50 = vld [vmem:[#allocation4 + $0x28] sm:$0xff] }
  0x53   :  { %544 = vmatpush.msra.mxu3 %v6094_v12  ;;  %525 = vmatpush.msrb.mxu2 %v6105_v16  ;;  %10236 = vst [vmem:[#allocation41_spill] sm:$0xff] %v6304_v50 }
  0x54   :  { %413 = vmatpush.msrb.mxu1 %v6269_v4  ;;  %495 = vmatpush.msrb.mxu0 %v6144_v28 }
  0x55   :  { %545 = vmatpush.msra.mxu3 %v6107_v17  ;;  %526 = vmatpush.msrb.mxu2 %v6114_v19 }
  0x56   :  { %414 = vmatpush.msrb.mxu1 %v6274_v9  ;;  %5124 = vmatmul.msk.f32.gmra.mxu0 %vm198_vm1, %v6135_v25  ;;  %v10239_v25 = vld [vmem:[#allocation22_spill] sm:$0xff] }
  0x57   :  { %546 = vmatpush.msra.mxu3 %v6116_v20  ;;  %527 = vmatpush.msrb.mxu2 %v6125_v22 }
  0x58   :  { %415 = vmatpush.msrb.mxu1 %v6280_v10  ;;  %496 = vmatpush.msrb.mxu0 %v6155_v32 }
  0x59   :  { %547 = vmatpush.msra.mxu3 %v6127_v23  ;;  %528 = vmatpush.msrb.mxu2 %v6139_v26 }
  0x5a   :  { %416 = vmatpush.msrb.mxu1 %v6286_v13  ;;  %497 = vmatpush.msrb.mxu0 %v6165_v35 }
  0x5b   :  { %548 = vmatpush.msra.mxu3 %v6141_v27  ;;  %529 = vmatpush.msrb.mxu2 %v6150_v30 }
  0x5c   :  { %417 = vmatpush.msrb.mxu1 %v6292_v14  ;;  %498 = vmatpush.msrb.mxu0 %v6176_v38 }
  0x5d   :  { %549 = vmatpush.msra.mxu3 %v6152_v31  ;;  %530 = vmatpush.msrb.mxu2 %v6159_v33 }
  0x5e   :  { %418 = vmatpush.msrb.mxu1 %v6298_v29  ;;  %499 = vmatpush.msrb.mxu0 %v6187_v41 }
  0x5f   :  { %550 = vmatpush.msra.mxu3 %v6161_v34  ;;  %531 = vmatpush.msrb.mxu2 %v6169_v36 }
  0x60   :  { %419 = vmatpush.msrb.mxu1 %v6304_v50  ;;  %601 = vmatpush.msra.mxu0 %v6062_v0 }
  0x61   :  { %551 = vmatpush.msra.mxu3 %v6171_v37  ;;  %532 = vmatpush.msrb.mxu2 %v6180_v39 }
  0x62   :  { %420 = vmatpush.msrb.mxu1 %v6310_v18  ;;  %602 = vmatpush.msra.mxu0 %v6064_v1 }
  0x63   :  { %421 = vmatmul.f32.vlgmr.msrb.gmra.mxu1 %v10238_v24  ;;  %552 = vmatpush.msra.mxu3 %v6182_v40  ;;  %v10240_v24 = vld [vmem:[#allocation23_spill] sm:$0xff] }
  0x64   :  { %504 = vmatpush.msra.mxu1 %v6193_v42  ;;  %533 = vmatpush.msrb.mxu2 %v6195_v43 }
  0x65   :  { %553 = vmatpush.msra.mxu3 %v6199_v44  ;;  %603 = vmatpush.msra.mxu0 %v6067_v2 }
  0x66   :  { %505 = vmatpush.msra.mxu1 %v6202_v45  ;;  %534 = vmatpush.msrb.mxu2 %v6204_v46 }
  0x67   :  { %554 = vmatpush.msra.mxu3 %v6209_v47  ;;  %604 = vmatpush.msra.mxu0 %v6076_v5 }
  0x68   :  { %506 = vmatpush.msra.mxu1 %v6211_v48  ;;  %535 = vmatpush.msrb.mxu2 %v6213_v49 }
  0x69   :  { %555 = vmatpush.msra.mxu3 %v6219_v51  ;;  %605 = vmatpush.msra.mxu0 %v6079_v6 }
  0x6a   :  { %507 = vmatpush.msra.mxu1 %v6221_v52  ;;  %536 = vmatpush.msrb.mxu2 %v6223_v53 }
  0x6b   :  { %556 = vmatpush.msra.mxu3 %v6229_v54  ;;  %606 = vmatpush.msra.mxu0 %v6082_v7 }
  0x6c   :  { %508 = vmatpush.msra.mxu1 %v6233_v55  ;;  %537 = vmatpush.msrb.mxu2 %v6235_v56 }
  0x6d   :  { %557 = vmatpush.msra.mxu3 %v6240_v57  ;;  %607 = vmatpush.msra.mxu0 %v6085_v8 }
  0x6e   :  { %509 = vmatpush.msra.mxu1 %v6242_v58  ;;  %538 = vmatpush.msrb.mxu2 %v6244_v59 }
  0x6f   :  { %558 = vmatpush.msra.mxu3 %v6250_v60  ;;  %608 = vmatpush.msra.mxu0 %v6100_v15 }
  0x70   :  { %510 = vmatpush.msra.mxu1 %v6252_v61  ;;  %539 = vmatpush.msrb.mxu2 %v6254_v62 }
  0x71   :  { %559 = vmatpush.msra.mxu3 %v6260_v63  ;;  %609 = vmatpush.msra.mxu0 %v10239_v25 }
  0x72   :  { %511 = vmatpush.msra.mxu1 %v6262_v3  ;;  %641 = vmatpush.msra.mxu2 %v6092_v11 }
  0x73   :  { %661 = vmatpush.msrb.mxu3 %v6094_v12  ;;  %610 = vmatpush.msra.mxu0 %v6121_v21 }
  0x74   :  { %512 = vmatpush.msra.mxu1 %v6269_v4  ;;  %642 = vmatpush.msra.mxu2 %v6105_v16 }
  0x75   :  { %662 = vmatpush.msrb.mxu3 %v6107_v17  ;;  %611 = vmatpush.msra.mxu0 %v10240_v24 }
  0x76   :  { %513 = vmatpush.msra.mxu1 %v6274_v9  ;;  %643 = vmatpush.msra.mxu2 %v6114_v19 }
  0x77   :  { %663 = vmatpush.msrb.mxu3 %v6116_v20  ;;  %612 = vmatpush.msra.mxu0 %v6144_v28 }
  0x78   :  { %514 = vmatpush.msra.mxu1 %v6280_v10  ;;  %644 = vmatpush.msra.mxu2 %v6125_v22 }
  0x79   :  { %664 = vmatpush.msrb.mxu3 %v6127_v23  ;;  %613 = vmatpush.msra.mxu0 %v6155_v32 }
  0x7a   :  { %515 = vmatpush.msra.mxu1 %v6286_v13  ;;  %645 = vmatpush.msra.mxu2 %v6139_v26 }
  0x7b   :  { %665 = vmatpush.msrb.mxu3 %v6141_v27  ;;  %614 = vmatpush.msra.mxu0 %v6165_v35 }
  0x7c   :  { %516 = vmatpush.msra.mxu1 %v6292_v14  ;;  %646 = vmatpush.msra.mxu2 %v6150_v30 }
  0x7d   :  { %666 = vmatpush.msrb.mxu3 %v6152_v31  ;;  %615 = vmatpush.msra.mxu0 %v6176_v38 }
  0x7e   :  { %517 = vmatpush.msra.mxu1 %v6298_v29  ;;  %647 = vmatpush.msra.mxu2 %v6159_v33 }
  0x7f   :  { %667 = vmatpush.msrb.mxu3 %v6161_v34  ;;  %616 = vmatpush.msra.mxu0 %v6187_v41 }
  0x80   :  { %518 = vmatpush.msra.mxu1 %v6304_v50  ;;  %648 = vmatpush.msra.mxu2 %v6169_v36 }
  0x81   :  { %668 = vmatpush.msrb.mxu3 %v6171_v37 }
  0x82   :  { %519 = vmatpush.msra.mxu1 %v6310_v18  ;;  %649 = vmatpush.msra.mxu2 %v6180_v39 }
  0x83   :  { %669 = vmatpush.msrb.mxu3 %v6182_v40 }
  0x84   :  { %621 = vmatpush.msrb.mxu1 %v6193_v42  ;;  %650 = vmatpush.msra.mxu2 %v6195_v43 }
  0x85   :  { %670 = vmatpush.msrb.mxu3 %v6199_v44 }
  0x86   :  { %622 = vmatpush.msrb.mxu1 %v6202_v45  ;;  %651 = vmatpush.msra.mxu2 %v6204_v46 }
  0x87   :  { %671 = vmatpush.msrb.mxu3 %v6209_v47 }
  0x88   :  { %623 = vmatpush.msrb.mxu1 %v6211_v48  ;;  %652 = vmatpush.msra.mxu2 %v6213_v49 }
  0x89   :  { %672 = vmatpush.msrb.mxu3 %v6219_v51 }
  0x8a   :  { %624 = vmatpush.msrb.mxu1 %v6221_v52  ;;  %653 = vmatpush.msra.mxu2 %v6223_v53 }
  0x8b   :  { %673 = vmatpush.msrb.mxu3 %v6229_v54 }
  0x8c   :  { %625 = vmatpush.msrb.mxu1 %v6233_v55  ;;  %654 = vmatpush.msra.mxu2 %v6235_v56 }
  0x8d   :  { %674 = vmatpush.msrb.mxu3 %v6240_v57 }
  0x8e   :  { %626 = vmatpush.msrb.mxu1 %v6242_v58  ;;  %655 = vmatpush.msra.mxu2 %v6244_v59  ;;  %v6427_v59 = vld [vmem:[%s9800_s3] sm:$0xf] }
  0x8f   :  { %675 = vmatpush.msrb.mxu3 %v6250_v60  ;;  %10242 = vst [vmem:[#allocation23_spill] sm:$0xff] %v6427_v59  ;;  %v9846_v38 = vperm.slane %v6427_v59, 0  ;;  %v9855_v54 = vperm.slane %v6427_v59, 1 }
  0x90   :  { %627 = vmatpush.msrb.mxu1 %v6252_v61  ;;  %656 = vmatpush.msra.mxu2 %v6254_v62 }
  0x91   :  { %676 = vmatpush.msrb.mxu3 %v6260_v63 }
  0x92   :  { %628 = vmatpush.msrb.mxu1 %v6262_v3 }
  0x94   :  { %629 = vmatpush.msrb.mxu1 %v6269_v4 }
  0x96   :  { %630 = vmatpush.msrb.mxu1 %v6274_v9 }
  0x98   :  { %631 = vmatpush.msrb.mxu1 %v6280_v10 }
  0x9a   :  { %632 = vmatpush.msrb.mxu1 %v6286_v13 }
  0x9c   :  { %633 = vmatpush.msrb.mxu1 %v6292_v14 }
  0x9e   :  { %634 = vmatpush.msrb.mxu1 %v6298_v29  ;;  %v9850_v29 = vperm.slane %v6427_v59, 2 }
  0xa0   :  { %635 = vmatpush.msrb.mxu1 %v6304_v50 }
  0xa2   :  { %636 = vmatpush.msrb.mxu1 %v6310_v18 }
  0xab   :  { %v231_v57 = vpop.f32.mrf.mxu0 }
  0xac   :  { %v6434_v50 = vadd.f32 %v231_v57, %v9846_v38 }
  0xae   :  { %10244 = vst [vmem:[#allocation44_spill] sm:$0xff] %v6434_v50 }
  0xb0   :  { %v254_v41 = vpop.f32.mrf.mxu2 }
  0xb1   :  { %v6448_v57 = vadd.f32 %v254_v41, %v9855_v54 }
  0xb3   :  { %v300_v60 = vpop.f32.mrf.mxu3  ;;  %10247 = vst [vmem:[#allocation47_spill] sm:$0xff] %v6448_v57 }
  0xb9   :  { %v6422_v62 = vpop.f32.mrf.mxu2 }
  0xba   :  { %10241 = vst [vmem:[#allocation22_spill] sm:$0xff] %v6422_v62 }
  0xbb   :  { %v6438_v35 = vpop.f32.mrf.mxu3 }
  0xbc   :  { %10245 = vst [vmem:[#allocation45_spill] sm:$0xff] %v6438_v35 }
  0xc1   :  { %v277_v63 = vpop.f32.mrf.mxu2 }
  0xc2   :  { %v402_v18 = vpop.f32.mrf.mxu1  ;;  %v6443_v53 = vadd.f32 %v277_v63, %v9850_v29 }
  0xc3   :  { %v465_v62 = vadd.f32 %v402_v18, %v6434_v50 }
  0xc4   :  { %10246 = vst [vmem:[#allocation46_spill] sm:$0xff] %v6443_v53 }
  0xc5   :  { %5150 = vtanh.f32 %v465_v62 }
  0xcb   :  { %v6430_v56 = vpop.f32.mrf.mxu2  ;;  %v5151_v50 = vpop.eup %5150 }
  0xcc   :  { %10243 = vst [vmem:[#allocation43_spill] sm:$0xff] %v6430_v56  ;;  %v9862_v56 = vperm.slane %v6427_v59, 3  ;;  %v473_v62 = vmul.f32 0.5, %v5151_v50  ;;  %v10257_v50 = vld [vmem:[#allocation25_spill] sm:$0xff]  ;;  %v10271_v59 = vld [vmem:[#allocation47_spill] sm:$0xff] }
  0xce   :  { %v6454_v35 = vadd.f32 %v300_v60, %v9862_v56  ;;  %v474_v49 = vadd.f32 0.5, %v473_v62  ;;  %v10267_v62 = vld [vmem:[#allocation36_spill] sm:$0xff] }
  0xd0   :  { %10248 = vst [vmem:[#allocation48_spill] sm:$0xff] %v6454_v35 }
  0xd3   :  { %v442_v14 = vpop.f32.mrf.mxu2 }
  0xd4   :  { %v467_v32 = vadd.f32 %v442_v14, %v6443_v53 }
  0xd5   :  { %v462_v63 = vpop.f32.mrf.mxu3 }
  0xd6   :  { %v468_v29 = vadd.f32 %v462_v63, %v6454_v35  ;;  %v10266_v63 = vld [vmem:[#allocation42_spill] sm:$0xff] }
  0xe0   :  { %v422_v38 = vpop.f32.mrf.mxu1 }
  0xe1   :  { %v466_v18 = vadd.f32 %v422_v38, %v6448_v57 }
  0xe3   :  { %5152 = vtanh.f32 %v466_v18 }
  0xe4   :  { %5154 = vtanh.f32 %v467_v32 }
  0xe5   :  { %5156 = vtanh.f32 %v468_v29  ;;  %v10264_v29 = vld [vmem:[#allocation35_spill] sm:$0xff] }
  0xe9   :  { %v5153_v51 = vpop.eup %5152 }
  0xea   :  { %v475_v41 = vmul.f32 0.5, %v5153_v51  ;;  %v5155_v54 = vpop.eup %5154  ;;  %v10258_v51 = vld [vmem:[#allocation40_spill] sm:$0xff] }
  0xeb   :  { %v480_v53 = vmul.f32 %v5155_v54, %v474_v49  ;;  %v5157_v38 = vpop.eup %5156  ;;  %v10255_v49 = vld [vmem:[#allocation30_spill] sm:$0xff] }
  0xec   :  { %v476_v13 = vadd.f32 0.5, %v475_v41  ;;  %v477_v60 = vmul.f32 0.5, %v5157_v38  ;;  %v10261_v54 = vld [vmem:[#allocation26_spill] sm:$0xff]  ;;  %v10268_v41 = vld [vmem:[#allocation37_spill] sm:$0xff] }
  0xee   :  { %v479_v14 = vmul.f32 0.0, %v476_v13  ;;  %v478_v56 = vadd.f32 0.5, %v477_v60  ;;  %v10263_v13 = vld [vmem:[#allocation34_spill] sm:$0xff] }
  0xf0   :  { %v6457_v57 = vadd.f32 %v480_v53, %v479_v14  ;;  %v10259_v53 = vld [vmem:[#allocation32_spill] sm:$0xff]  ;;  %v6530_v14 = vpop.f32.mrf.mxu0 }
  0xf2   :  { %5158 = vtanh.f32 %v6457_v57 }
  0xf8   :  { %v5159_v18 = vpop.eup %5158 }
  0xf9   :  { %v6460_v32 = vmul.f32 %v5159_v18, %v478_v56  ;;  %v10262_v56 = vld [vmem:[#allocation41_spill] sm:$0xff] }
  0xfb   :  { %10249 = vst [vmem:[#allocation49_spill] sm:$0xff] %v6460_v32  ;;  %500 = vmatmul.f32.vlgmr.msrb.gmra.mxu0 %v6460_v32  ;;  %520 = vmatmul.f32.vlgmr.msra.gmra.mxu1 %v6460_v32 }
  0xfc   :  { %540 = vmatmul.f32.vlgmr.msrb.gmra.mxu2 %v6460_v32  ;;  %560 = vmatmul.f32.vlgmr.msra.gmra.mxu3 %v6460_v32 }
  0xfd   :  { %718 = vmatpush.msrb.mxu0 %v6062_v0  ;;  %738 = vmatpush.msra.mxu1 %v6193_v42 }
  0xfe   :  { %758 = vmatpush.msrb.mxu2 %v6092_v11  ;;  %778 = vmatpush.msra.mxu3 %v6094_v12 }
  0xff   :  { %719 = vmatpush.msrb.mxu0 %v6064_v1  ;;  %739 = vmatpush.msra.mxu1 %v6202_v45 }
 0x100   :  { %759 = vmatpush.msrb.mxu2 %v6105_v16  ;;  %779 = vmatpush.msra.mxu3 %v6107_v17 }
 0x101   :  { %720 = vmatpush.msrb.mxu0 %v6067_v2  ;;  %740 = vmatpush.msra.mxu1 %v6211_v48 }
 0x102   :  { %760 = vmatpush.msrb.mxu2 %v6114_v19  ;;  %780 = vmatpush.msra.mxu3 %v6116_v20 }
 0x103   :  { %721 = vmatpush.msrb.mxu0 %v6076_v5  ;;  %741 = vmatpush.msra.mxu1 %v6221_v52 }
 0x104   :  { %761 = vmatpush.msrb.mxu2 %v6125_v22  ;;  %781 = vmatpush.msra.mxu3 %v6127_v23 }
 0x105   :  { %722 = vmatpush.msrb.mxu0 %v6079_v6  ;;  %742 = vmatpush.msra.mxu1 %v6233_v55  ;;  %v10250_v6 = vld [vmem:[#allocation38_spill] sm:$0xff] }
 0x106   :  { %762 = vmatpush.msrb.mxu2 %v6139_v26  ;;  %782 = vmatpush.msra.mxu3 %v6141_v27  ;;  %10269 = vst [vmem:[#allocation38_spill] sm:$0xff] %v6530_v14 }
 0x107   :  { %723 = vmatpush.msrb.mxu0 %v6082_v7  ;;  %743 = vmatpush.msra.mxu1 %v6242_v58  ;;  %v10251_v7 = vld [vmem:[#allocation28_spill] sm:$0xff] }
 0x108   :  { %763 = vmatpush.msrb.mxu2 %v6150_v30  ;;  %783 = vmatpush.msra.mxu3 %v6152_v31 }
 0x109   :  { %724 = vmatpush.msrb.mxu0 %v6085_v8  ;;  %744 = vmatpush.msra.mxu1 %v6252_v61  ;;  %v10252_v8 = vld [vmem:[#allocation29_spill] sm:$0xff] }
 0x10a   :  { %764 = vmatpush.msrb.mxu2 %v6159_v33  ;;  %784 = vmatpush.msra.mxu3 %v6161_v34 }
 0x10b   :  { %725 = vmatpush.msrb.mxu0 %v6100_v15  ;;  %745 = vmatpush.msra.mxu1 %v6262_v3  ;;  %v10253_v15 = vld [vmem:[#allocation24_spill] sm:$0xff] }
 0x10c   :  { %765 = vmatpush.msrb.mxu2 %v6169_v36  ;;  %785 = vmatpush.msra.mxu3 %v6171_v37 }
 0x10d   :  { %726 = vmatpush.msrb.mxu0 %v10239_v25  ;;  %746 = vmatpush.msra.mxu1 %v6269_v4  ;;  %v10265_v25 = vld [vmem:[#allocation27_spill] sm:$0xff] }
 0x10e   :  { %766 = vmatpush.msrb.mxu2 %v6180_v39  ;;  %786 = vmatpush.msra.mxu3 %v6182_v40 }
 0x10f   :  { %727 = vmatpush.msrb.mxu0 %v6121_v21  ;;  %747 = vmatpush.msra.mxu1 %v6274_v9  ;;  %v10254_v21 = vld [vmem:[#allocation39_spill] sm:$0xff] }
 0x110   :  { %767 = vmatpush.msrb.mxu2 %v6195_v43  ;;  %787 = vmatpush.msra.mxu3 %v6199_v44 }
 0x111   :  { %728 = vmatpush.msrb.mxu0 %v10240_v24  ;;  %748 = vmatpush.msra.mxu1 %v6280_v10  ;;  %v10256_v24 = vld [vmem:[#allocation31_spill] sm:$0xff] }
 0x112   :  { %768 = vmatpush.msrb.mxu2 %v6204_v46  ;;  %788 = vmatpush.msra.mxu3 %v6209_v47 }
 0x113   :  { %729 = vmatpush.msrb.mxu0 %v6144_v28  ;;  %749 = vmatpush.msra.mxu1 %v10250_v6  ;;  %v10260_v28 = vld [vmem:[#allocation33_spill] sm:$0xff] }
 0x114   :  { %769 = vmatpush.msrb.mxu2 %v10251_v7  ;;  %789 = vmatpush.msra.mxu3 %v10252_v8 }
 0x115   :  { %730 = vmatpush.msrb.mxu0 %v10253_v15  ;;  %750 = vmatpush.msra.mxu1 %v10254_v21 }
 0x116   :  { %770 = vmatpush.msrb.mxu2 %v10255_v49  ;;  %790 = vmatpush.msra.mxu3 %v10256_v24 }
 0x117   :  { %731 = vmatpush.msrb.mxu0 %v10257_v50  ;;  %751 = vmatpush.msra.mxu1 %v10258_v51  ;;  %v10270_v50 = vld [vmem:[#allocation44_spill] sm:$0xff] }
 0x118   :  { %771 = vmatpush.msrb.mxu2 %v10259_v53  ;;  %791 = vmatpush.msra.mxu3 %v10260_v28 }
 0x119   :  { %732 = vmatpush.msrb.mxu0 %v10261_v54  ;;  %752 = vmatpush.msra.mxu1 %v10262_v56  ;;  %v10272_v56 = vld [vmem:[#allocation46_spill] sm:$0xff] }
 0x11a   :  { %772 = vmatpush.msrb.mxu2 %v10263_v13  ;;  %792 = vmatpush.msra.mxu3 %v10264_v29 }
 0x11b   :  { %733 = vmatpush.msrb.mxu0 %v10265_v25  ;;  %753 = vmatpush.msra.mxu1 %v10266_v63 }
 0x11c   :  { %773 = vmatpush.msrb.mxu2 %v10267_v62  ;;  %793 = vmatpush.msra.mxu3 %v10268_v41 }
 0x178   :  { %v501_v38 = vpop.f32.mrf.mxu0  ;;  %v521_v60 = vpop.f32.mrf.mxu1 }
 0x179   :  { %v568_v18 = vrot.slane %v501_v38, 6  ;;  %v569_v15 = vrot.slane %v521_v60, 6 }
 0x17b   :  { %v576_v54 = vadd.f32 %v568_v18, %v10270_v50  ;;  %v577_v32 = vadd.f32 %v569_v15, %v10271_v59  ;;  %v591_v18 = vrot.slane %v6457_v57, 6  ;;  %v10278_v57 = vld [vmem:[#allocation42_spill] sm:$0xff] }
 0x17d   :  { %5160 = vtanh.f32 %v576_v54 }
 0x17e   :  { %5162 = vtanh.f32 %v577_v32 }
 0x17f   :  { %v541_v29 = vpop.f32.mrf.mxu2  ;;  %v561_v25 = vpop.f32.mrf.mxu3 }
 0x180   :  { %v570_v13 = vrot.slane %v541_v29, 6  ;;  %v571_v63 = vrot.slane %v561_v25, 6 }
 0x182   :  { %v578_v62 = vadd.f32 %v570_v13, %v10272_v56  ;;  %v579_v41 = vadd.f32 %v571_v63, %v6454_v35 }
 0x183   :  { %v5161_v28 = vpop.eup %5160 }
 0x184   :  { %v5163_v14 = vpop.eup %5162  ;;  %5164 = vtanh.f32 %v578_v62  ;;  %v584_v53 = vmul.f32 0.5, %v5161_v28  ;;  %v10280_v62 = vld [vmem:[#allocation37_spill] sm:$0xff] }
 0x185   :  { %v586_v38 = vmul.f32 0.5, %v5163_v14  ;;  %5166 = vtanh.f32 %v579_v41 }
 0x186   :  { %v585_v15 = vadd.f32 0.5, %v584_v53  ;;  %v10279_v53 = vld [vmem:[#allocation36_spill] sm:$0xff] }
 0x187   :  { %v587_v60 = vadd.f32 0.5, %v586_v38 }
 0x189   :  { %v593_v32 = vmul.f32 %v591_v18, %v587_v60  ;;  %v10281_v60 = vld [vmem:[#allocation44_spill] sm:$0xff] }
 0x18a   :  { %v5165_v54 = vpop.eup %5164 }
 0x18b   :  { %v594_v59 = vmul.f32 %v5165_v54, %v585_v15  ;;  %v5167_v50 = vpop.eup %5166  ;;  %v10282_v15 = vld [vmem:[#allocation47_spill] sm:$0xff] }
 0x18c   :  { %v588_v13 = vmul.f32 0.5, %v5167_v50 }
 0x18d   :  { %v6537_v29 = vadd.f32 %v594_v59, %v593_v32  ;;  %v10277_v59 = vld [vmem:[#allocation35_spill] sm:$0xff] }
 0x18e   :  { %v589_v25 = vadd.f32 0.5, %v588_v13 }
 0x18f   :  { %5168 = vtanh.f32 %v6537_v29 }
 0x195   :  { %v5169_v63 = vpop.eup %5168 }
 0x196   :  { %v6540_v35 = vmul.f32 %v5169_v63, %v589_v25 }
 0x198   :  { %v599_v28 = vrot.slane %v6540_v35, 2 }
 0x19a   :  { %617 = vmatmul.f32.vlgmr.msra.gmra.mxu0 %v599_v28  ;;  %637 = vmatmul.f32.vlgmr.msrb.gmra.mxu1 %v599_v28 }
 0x19b   :  { %657 = vmatmul.f32.vlgmr.msra.gmra.mxu2 %v599_v28  ;;  %677 = vmatmul.f32.vlgmr.msrb.gmra.mxu3 %v599_v28 }
 0x19c   :  { %912 = vmatpush.msra.mxu0 %v6062_v0  ;;  %932 = vmatpush.msrb.mxu1 %v6193_v42  ;;  %v10273_v0 = vld [vmem:[#allocation32_spill] sm:$0xff] }
 0x19d   :  { %952 = vmatpush.msra.mxu2 %v6092_v11  ;;  %972 = vmatpush.msrb.mxu3 %v6094_v12 }
 0x19e   :  { %913 = vmatpush.msra.mxu0 %v6064_v1  ;;  %933 = vmatpush.msrb.mxu1 %v6202_v45  ;;  %v10274_v1 = vld [vmem:[#allocation33_spill] sm:$0xff] }
 0x19f   :  { %953 = vmatpush.msra.mxu2 %v6105_v16  ;;  %973 = vmatpush.msrb.mxu3 %v6107_v17 }
 0x1a0   :  { %914 = vmatpush.msra.mxu0 %v6067_v2  ;;  %934 = vmatpush.msrb.mxu1 %v6211_v48  ;;  %v10275_v2 = vld [vmem:[#allocation41_spill] sm:$0xff] }
 0x1a1   :  { %954 = vmatpush.msra.mxu2 %v6114_v19  ;;  %974 = vmatpush.msrb.mxu3 %v6116_v20 }
 0x1a2   :  { %915 = vmatpush.msra.mxu0 %v6076_v5  ;;  %935 = vmatpush.msrb.mxu1 %v6221_v52  ;;  %v10276_v5 = vld [vmem:[#allocation34_spill] sm:$0xff] }
 0x1a3   :  { %955 = vmatpush.msra.mxu2 %v6125_v22  ;;  %975 = vmatpush.msrb.mxu3 %v6127_v23 }
 0x1a4   :  { %936 = vmatpush.msrb.mxu1 %v6233_v55 }
 0x1a5   :  { %956 = vmatpush.msra.mxu2 %v6139_v26  ;;  %976 = vmatpush.msrb.mxu3 %v6141_v27 }
 0x1a6   :  { %937 = vmatpush.msrb.mxu1 %v6242_v58 }
 0x1a7   :  { %957 = vmatpush.msra.mxu2 %v6150_v30  ;;  %977 = vmatpush.msrb.mxu3 %v6152_v31 }
 0x1a8   :  { %938 = vmatpush.msrb.mxu1 %v6252_v61 }
 0x1a9   :  { %958 = vmatpush.msra.mxu2 %v6159_v33  ;;  %978 = vmatpush.msrb.mxu3 %v6161_v34 }
 0x1aa   :  { %939 = vmatpush.msrb.mxu1 %v6262_v3 }
 0x1ab   :  { %959 = vmatpush.msra.mxu2 %v6169_v36  ;;  %979 = vmatpush.msrb.mxu3 %v6171_v37 }
 0x1ac   :  { %940 = vmatpush.msrb.mxu1 %v6269_v4 }
 0x1ad   :  { %960 = vmatpush.msra.mxu2 %v6180_v39  ;;  %980 = vmatpush.msrb.mxu3 %v6182_v40 }
 0x1ae   :  { %941 = vmatpush.msrb.mxu1 %v6274_v9 }
 0x1af   :  { %961 = vmatpush.msra.mxu2 %v6195_v43  ;;  %981 = vmatpush.msrb.mxu3 %v6199_v44 }
 0x1b0   :  { %942 = vmatpush.msrb.mxu1 %v6280_v10 }
 0x1b1   :  { %962 = vmatpush.msra.mxu2 %v6204_v46  ;;  %982 = vmatpush.msrb.mxu3 %v6209_v47 }
 0x1b2   :  { %943 = vmatpush.msrb.mxu1 %v10250_v6 }
 0x1b3   :  { %963 = vmatpush.msra.mxu2 %v10251_v7  ;;  %983 = vmatpush.msrb.mxu3 %v10252_v8 }
 0x1b4   :  { %944 = vmatpush.msrb.mxu1 %v10254_v21 }
 0x1b5   :  { %964 = vmatpush.msra.mxu2 %v10255_v49  ;;  %984 = vmatpush.msrb.mxu3 %v10256_v24 }
 0x1b6   :  { %945 = vmatpush.msrb.mxu1 %v10258_v51 }
 0x1b7   :  { %965 = vmatpush.msra.mxu2 %v10273_v0  ;;  %985 = vmatpush.msrb.mxu3 %v10274_v1 }
 0x1b8   :  { %946 = vmatpush.msrb.mxu1 %v10275_v2 }
 0x1b9   :  { %966 = vmatpush.msra.mxu2 %v10276_v5  ;;  %986 = vmatpush.msrb.mxu3 %v10277_v59 }
 0x1ba   :  { %947 = vmatpush.msrb.mxu1 %v10278_v57 }
 0x1bb   :  { %967 = vmatpush.msra.mxu2 %v10279_v53  ;;  %987 = vmatpush.msrb.mxu3 %v10280_v62  ;;  %v10283_v53 = vld [vmem:[#allocation48_spill] sm:$0xff] }
 0x217   :  { %v618_v41 = vpop.f32.mrf.mxu0  ;;  %v638_v14 = vpop.f32.mrf.mxu1 }
 0x218   :  { %v685_v50 = vrot.slane %v618_v41, 4  ;;  %v686_v38 = vrot.slane %v638_v14, 4 }
 0x21a   :  { %v693_v18 = vadd.f32 %v685_v50, %v10281_v60  ;;  %v694_v54 = vadd.f32 %v686_v38, %v10282_v15  ;;  %v708_v38 = vrot.slane %v6537_v29, 6 }
 0x21c   :  { %5170 = vtanh.f32 %v693_v18 }
 0x21d   :  { %5172 = vtanh.f32 %v694_v54 }
 0x21e   :  { %v658_v32 = vpop.f32.mrf.mxu2  ;;  %v678_v13 = vpop.f32.mrf.mxu3 }
 0x21f   :  { %v687_v25 = vrot.slane %v658_v32, 4  ;;  %v688_v63 = vrot.slane %v678_v13, 4 }
 0x221   :  { %v695_v28 = vadd.f32 %v687_v25, %v10272_v56  ;;  %v696_v59 = vadd.f32 %v688_v63, %v10283_v53 }
 0x222   :  { %v5171_v57 = vpop.eup %5170 }
 0x223   :  { %v5173_v62 = vpop.eup %5172  ;;  %5174 = vtanh.f32 %v695_v28  ;;  %v701_v5 = vmul.f32 0.5, %v5171_v57  ;;  %v10284_v57 = vld [vmem:[#allocation49_spill] sm:$0xff] }
 0x224   :  { %v703_v41 = vmul.f32 0.5, %v5173_v62  ;;  %5176 = vtanh.f32 %v696_v59  ;;  %v833_v59 = vsel %vm832_vm2, %v10284_v57, %v6540_v35  ;;  %v6684_v35 = vld [vmem:[#allocation4 + $0x40] sm:$0xff]  ;;  %v6753_v57 = vld [vmem:[#allocation4 + $0x1b0] sm:$0xff] }
 0x225   :  { %v702_v50 = vadd.f32 0.5, %v701_v5  ;;  %10291 = vst [vmem:[#allocation29_spill] sm:$0xff] %v6684_v35 }
 0x226   :  { %v704_v14 = vadd.f32 0.5, %v703_v41 }
 0x228   :  { %v710_v54 = vmul.f32 %v708_v38, %v704_v14 }
 0x229   :  { %v5175_v18 = vpop.eup %5174 }
 0x22a   :  { %v711_v15 = vmul.f32 %v5175_v18, %v702_v50  ;;  %v5177_v60 = vpop.eup %5176  ;;  %v6730_v18 = vld [vmem:[#allocation4 + $0x1e8] sm:$0xff] }
 0x22b   :  { %v705_v13 = vmul.f32 0.5, %v5177_v60 }
 0x22c   :  { %v6600_v32 = vadd.f32 %v711_v15, %v710_v54  ;;  %v6733_v54 = vld [vmem:[#allocation4 + $0x1f0] sm:$0xff] }
 0x22d   :  { %v706_v25 = vadd.f32 0.5, %v705_v13  ;;  %v6740_v13 = vld [vmem:[#allocation4 + $0x1c8] sm:$0xff] }
 0x22e   :  { %5178 = vtanh.f32 %v6600_v32 }
 0x234   :  { %v5179_v63 = vpop.eup %5178 }
 0x235   :  { %v714_v28 = vmul.f32 %v5179_v63, %v706_v25  ;;  %v6743_v25 = vld [vmem:[#allocation4 + $0x1d0] sm:$0xff]  ;;  %v6746_v63 = vld [vmem:[#allocation4 + $0x1d8] sm:$0xff] }
 0x237   :  { %v716_v5 = vrot.slane %v714_v28, 4  ;;  %v6607_v29 = vsel %vm205_vm0, %v833_v59, %v714_v28  ;;  %v6750_v28 = vld [vmem:[#allocation4 + $0x1a8] sm:$0xff]  ;;  %v6756_v59 = vld [vmem:[#allocation4 + $0x1b8] sm:$0xff] }
 0x239   :  { %734 = vmatmul.f32.vlgmr.msrb.gmra.mxu0 %v716_v5  ;;  %754 = vmatmul.f32.vlgmr.msra.gmra.mxu1 %v716_v5 }
 0x23a   :  { %774 = vmatmul.f32.vlgmr.msrb.gmra.mxu2 %v716_v5  ;;  %794 = vmatmul.f32.vlgmr.msra.gmra.mxu3 %v716_v5  ;;  %v6760_v5 = vld [vmem:[#allocation4 + $0x188] sm:$0xff] }
 0x23b   :  { %1034 = vmatpush.msra.mxu1 %v6193_v42  ;;  %1054 = vmatpush.msrb.mxu2 %v6092_v11  ;;  %v10285_v11 = vld [vmem:[#allocation34_spill] sm:$0xff] }
 0x23c   :  { %1074 = vmatpush.msra.mxu3 %v6094_v12  ;;  %v10286_v12 = vld [vmem:[#allocation35_spill] sm:$0xff] }
 0x23d   :  { %1035 = vmatpush.msra.mxu1 %v6202_v45  ;;  %1055 = vmatpush.msrb.mxu2 %v6105_v16  ;;  %v10287_v16 = vld [vmem:[#allocation42_spill] sm:$0xff] }
 0x23e   :  { %1075 = vmatpush.msra.mxu3 %v6107_v17  ;;  %v10288_v17 = vld [vmem:[#allocation36_spill] sm:$0xff] }
 0x23f   :  { %1036 = vmatpush.msra.mxu1 %v6211_v48  ;;  %1056 = vmatpush.msrb.mxu2 %v6114_v19  ;;  %v10289_v19 = vld [vmem:[#allocation37_spill] sm:$0xff]  ;;  %v6695_v48 = vld [vmem:[#allocation4 + $0x1e0] sm:$0xff] }
 0x240   :  { %1076 = vmatpush.msra.mxu3 %v6116_v20  ;;  %v6657_v20 = vld [vmem:[#allocation4 + $0x160] sm:$0xff] }
 0x241   :  { %1037 = vmatpush.msra.mxu1 %v6221_v52  ;;  %1057 = vmatpush.msrb.mxu2 %v6125_v22  ;;  %v6660_v22 = vld [vmem:[#allocation4 + $0x140] sm:$0xff] }
 0x242   :  { %1077 = vmatpush.msra.mxu3 %v6127_v23  ;;  %916 = vmatpush.msra.mxu0 %v6657_v20  ;;  %v6663_v23 = vld [vmem:[#allocation4 + $0x120] sm:$0xff] }
 0x243   :  { %1038 = vmatpush.msra.mxu1 %v6233_v55  ;;  %1058 = vmatpush.msrb.mxu2 %v6139_v26  ;;  %v6666_v26 = vld [vmem:[#allocation4 + $0x100] sm:$0xff] }
 0x244   :  { %1078 = vmatpush.msra.mxu3 %v6141_v27  ;;  %917 = vmatpush.msra.mxu0 %v6660_v22  ;;  %v6669_v27 = vld [vmem:[#allocation4 + $0xe0] sm:$0xff] }
 0x245   :  { %1039 = vmatpush.msra.mxu1 %v6242_v58  ;;  %1059 = vmatpush.msrb.mxu2 %v6150_v30  ;;  %v6672_v30 = vld [vmem:[#allocation4 + $0xc0] sm:$0xff] }
 0x246   :  { %1079 = vmatpush.msra.mxu3 %v6152_v31  ;;  %918 = vmatpush.msra.mxu0 %v6663_v23  ;;  %v6675_v31 = vld [vmem:[#allocation4 + $0xa0] sm:$0xff] }
 0x247   :  { %1040 = vmatpush.msra.mxu1 %v6252_v61  ;;  %1060 = vmatpush.msrb.mxu2 %v6159_v33  ;;  %v6678_v33 = vld [vmem:[#allocation4 + $0x80] sm:$0xff] }
 0x248   :  { %1080 = vmatpush.msra.mxu3 %v6161_v34  ;;  %919 = vmatpush.msra.mxu0 %v6666_v26  ;;  %v6681_v34 = vld [vmem:[#allocation4 + $0x60] sm:$0xff] }
 0x249   :  { %1041 = vmatpush.msra.mxu1 %v6262_v3  ;;  %1061 = vmatpush.msrb.mxu2 %v6169_v36  ;;  %10290 = vst [vmem:[#allocation28_spill] sm:$0xff] %v6681_v34  ;;  %v6687_v36 = vld [vmem:[#allocation4 + $0x20] sm:$0xff] }
 0x24a   :  { %1081 = vmatpush.msra.mxu3 %v6171_v37  ;;  %920 = vmatpush.msra.mxu0 %v6669_v27  ;;  %10292 = vst [vmem:[#allocation24_spill] sm:$0xff] %v6687_v36  ;;  %v6689_v37 = vld [vmem:[#allocation4] sm:$0xff] }
 0x24b   :  { %1042 = vmatpush.msra.mxu1 %v6269_v4  ;;  %1062 = vmatpush.msrb.mxu2 %v6180_v39  ;;  %10293 = vst [vmem:[#allocation39_spill] sm:$0xff] %v6689_v37  ;;  %v6698_v52 = vld [vmem:[#allocation4 + $0x1c0] sm:$0xff] }
 0x24c   :  { %1082 = vmatpush.msra.mxu3 %v6182_v40  ;;  %921 = vmatpush.msra.mxu0 %v6672_v30  ;;  %v6701_v61 = vld [vmem:[#allocation4 + $0x1a0] sm:$0xff] }
 0x24d   :  { %1043 = vmatpush.msra.mxu1 %v6274_v9  ;;  %1063 = vmatpush.msrb.mxu2 %v6195_v43  ;;  %v6704_v9 = vld [vmem:[#allocation4 + $0x180] sm:$0xff] }
 0x24e   :  { %1083 = vmatpush.msra.mxu3 %v6199_v44  ;;  %922 = vmatpush.msra.mxu0 %v6675_v31  ;;  %v10294_v44 = vld [vmem:[#allocation44_spill] sm:$0xff] }
 0x24f   :  { %1044 = vmatpush.msra.mxu1 %v6280_v10  ;;  %1064 = vmatpush.msrb.mxu2 %v6204_v46  ;;  %v10295_v46 = vld [vmem:[#allocation47_spill] sm:$0xff] }
 0x250   :  { %1084 = vmatpush.msra.mxu3 %v6209_v47  ;;  %923 = vmatpush.msra.mxu0 %v6678_v33 }
 0x251   :  { %1045 = vmatpush.msra.mxu1 %v10250_v6  ;;  %1065 = vmatpush.msrb.mxu2 %v10251_v7 }
 0x252   :  { %1085 = vmatpush.msra.mxu3 %v10252_v8  ;;  %924 = vmatpush.msra.mxu0 %v6681_v34 }
 0x253   :  { %1046 = vmatpush.msra.mxu1 %v10254_v21  ;;  %1066 = vmatpush.msrb.mxu2 %v10255_v49 }
 0x254   :  { %1086 = vmatpush.msra.mxu3 %v10256_v24  ;;  %925 = vmatpush.msra.mxu0 %v6684_v35 }
 0x255   :  { %1047 = vmatpush.msra.mxu1 %v10258_v51  ;;  %1067 = vmatpush.msrb.mxu2 %v10273_v0  ;;  %v825_v0 = vrot.slane %v6600_v32, 6  ;;  %v6736_v32 = vld [vmem:[#allocation4 + $0x1f8] sm:$0xff] }
 0x256   :  { %1087 = vmatpush.msra.mxu3 %v10274_v1  ;;  %926 = vmatpush.msra.mxu0 %v6687_v36 }
 0x257   :  { %1048 = vmatpush.msra.mxu1 %v10275_v2  ;;  %1068 = vmatpush.msrb.mxu2 %v10285_v11  ;;  %v6766_v11 = vld [vmem:[#allocation4 + $0x198] sm:$0xff] }
 0x258   :  { %1088 = vmatpush.msra.mxu3 %v10286_v12  ;;  %927 = vmatpush.msra.mxu0 %v6689_v37  ;;  %v6770_v12 = vld [vmem:[#allocation4 + $0x168] sm:$0xff] }
 0x259   :  { %1049 = vmatpush.msra.mxu1 %v10287_v16  ;;  %1069 = vmatpush.msrb.mxu2 %v10288_v17  ;;  %v6773_v16 = vld [vmem:[#allocation4 + $0x170] sm:$0xff]  ;;  %v6776_v17 = vld [vmem:[#allocation4 + $0x178] sm:$0xff] }
 0x25a   :  { %1089 = vmatpush.msra.mxu3 %v10289_v19  ;;  %1014 = vmatpush.msrb.mxu0 %v6695_v48  ;;  %v6780_v19 = vld [vmem:[#allocation4 + $0x148] sm:$0xff] }
 0x25c   :  { %1015 = vmatpush.msrb.mxu0 %v6698_v52 }
 0x25e   :  { %1016 = vmatpush.msrb.mxu0 %v6701_v61 }
 0x260   :  { %1017 = vmatpush.msrb.mxu0 %v6704_v9 }
 0x262   :  { %1018 = vmatpush.msrb.mxu0 %v6657_v20 }
 0x264   :  { %1019 = vmatpush.msrb.mxu0 %v6660_v22 }
 0x266   :  { %1020 = vmatpush.msrb.mxu0 %v6663_v23 }
 0x268   :  { %1021 = vmatpush.msrb.mxu0 %v6666_v26 }
 0x26a   :  { %1022 = vmatpush.msrb.mxu0 %v6669_v27 }
 0x26c   :  { %1023 = vmatpush.msrb.mxu0 %v6672_v30 }
 0x26e   :  { %1024 = vmatpush.msrb.mxu0 %v6675_v31 }
 0x270   :  { %1025 = vmatpush.msrb.mxu0 %v6678_v33 }
 0x272   :  { %1026 = vmatpush.msrb.mxu0 %v6681_v34 }
 0x274   :  { %1027 = vmatpush.msrb.mxu0 %v6684_v35 }
 0x276   :  { %1028 = vmatpush.msrb.mxu0 %v6687_v36 }
 0x278   :  { %1029 = vmatpush.msrb.mxu0 %v6689_v37 }
 0x2b6   :  { %v735_v39 = vpop.f32.mrf.mxu0  ;;  %v755_v40 = vpop.f32.mrf.mxu1 }
 0x2b7   :  { %v802_v42 = vrot.slane %v735_v39, 2  ;;  %v803_v43 = vrot.slane %v755_v40, 2  ;;  %v6783_v39 = vld [vmem:[#allocation4 + $0x150] sm:$0xff]  ;;  %v6786_v40 = vld [vmem:[#allocation4 + $0x158] sm:$0xff] }
 0x2b9   :  { %v810_v45 = vadd.f32 %v802_v42, %v10294_v44  ;;  %v811_v47 = vadd.f32 %v803_v43, %v10295_v46  ;;  %v6790_v42 = vld [vmem:[#allocation4 + $0x128] sm:$0xff]  ;;  %v6793_v43 = vld [vmem:[#allocation4 + $0x130] sm:$0xff]  ;;  %v6796_v44 = vld [vmem:[#allocation4 + $0x138] sm:$0xff] }
 0x2ba   :  { %v6803_v46 = vld [vmem:[#allocation4 + $0x110] sm:$0xff] }
 0x2bb   :  { %5180 = vtanh.f32 %v810_v45  ;;  %v6800_v45 = vld [vmem:[#allocation4 + $0x108] sm:$0xff] }
 0x2bc   :  { %5182 = vtanh.f32 %v811_v47  ;;  %v6806_v47 = vld [vmem:[#allocation4 + $0x118] sm:$0xff] }
 0x2bd   :  { %v775_v55 = vpop.f32.mrf.mxu2  ;;  %v795_v58 = vpop.f32.mrf.mxu3 }
 0x2be   :  { %v804_v3 = vrot.slane %v775_v55, 2  ;;  %v805_v4 = vrot.slane %v795_v58, 2  ;;  %v6810_v55 = vld [vmem:[#allocation4 + $0xe8] sm:$0xff]  ;;  %v6813_v58 = vld [vmem:[#allocation4 + $0xf0] sm:$0xff] }
 0x2c0   :  { %v812_v10 = vadd.f32 %v804_v3, %v10272_v56  ;;  %v813_v7 = vadd.f32 %v805_v4, %v10283_v53  ;;  %v6816_v3 = vld [vmem:[#allocation4 + $0xf8] sm:$0xff]  ;;  %v6820_v4 = vld [vmem:[#allocation4 + $0xc8] sm:$0xff] }
 0x2c1   :  { %v5181_v6 = vpop.eup %5180 }
 0x2c2   :  { %v5183_v8 = vpop.eup %5182  ;;  %5184 = vtanh.f32 %v812_v10  ;;  %v818_v21 = vmul.f32 0.5, %v5181_v6  ;;  %v6823_v10 = vld [vmem:[#allocation4 + $0xd0] sm:$0xff]  ;;  %v6826_v6 = vld [vmem:[#allocation4 + $0xd8] sm:$0xff] }
 0x2c3   :  { %v820_v49 = vmul.f32 0.5, %v5183_v8  ;;  %5186 = vtanh.f32 %v813_v7  ;;  %v6830_v7 = vld [vmem:[#allocation4 + $0xa8] sm:$0xff]  ;;  %v6833_v8 = vld [vmem:[#allocation4 + $0xb0] sm:$0xff] }
 0x2c4   :  { %v819_v51 = vadd.f32 0.5, %v818_v21  ;;  %v6836_v21 = vld [vmem:[#allocation4 + $0xb8] sm:$0xff] }
 0x2c5   :  { %v821_v24 = vadd.f32 0.5, %v820_v49  ;;  %v6840_v49 = vld [vmem:[#allocation4 + $0x88] sm:$0xff] }
 0x2c6   :  { %10297 = vst [vmem:[#allocation31_spill] sm:$0xff] %v6840_v49 }
 0x2c7   :  { %v827_v1 = vmul.f32 %v825_v0, %v821_v24  ;;  %v6843_v24 = vld [vmem:[#allocation4 + $0x90] sm:$0xff]  ;;  %v6850_v0 = vld [vmem:[#allocation4 + $0x68] sm:$0xff] }
 0x2c8   :  { %v5185_v56 = vpop.eup %5184  ;;  %10298 = vst [vmem:[#allocation25_spill] sm:$0xff] %v6843_v24 }
 0x2c9   :  { %v828_v2 = vmul.f32 %v5185_v56, %v819_v51  ;;  %v5187_v53 = vpop.eup %5186  ;;  %v6846_v51 = vld [vmem:[#allocation4 + $0x98] sm:$0xff]  ;;  %10300 = vst [vmem:[#allocation26_spill] sm:$0xff] %v6850_v0  ;;  %v6853_v56 = vld [vmem:[#allocation4 + $0x70] sm:$0xff] }
 0x2ca   :  { %v822_v60 = vmul.f32 0.5, %v5187_v53  ;;  %10299 = vst [vmem:[#allocation40_spill] sm:$0xff] %v6846_v51  ;;  %v6863_v53 = vld [vmem:[#allocation4 + $0x50] sm:$0xff] }
 0x2cb   :  { %v6715_v62 = vadd.f32 %v828_v2, %v827_v1  ;;  %10301 = vst [vmem:[#allocation27_spill] sm:$0xff] %v6853_v56  ;;  %v6856_v1 = vld [vmem:[#allocation4 + $0x78] sm:$0xff]  ;;  %v6860_v2 = vld [vmem:[#allocation4 + $0x48] sm:$0xff] }
 0x2cc   :  { %v823_v15 = vadd.f32 0.5, %v822_v60  ;;  %10302 = vst [vmem:[#allocation46_spill] sm:$0xff] %v6856_v1  ;;  %v6866_v60 = vld [vmem:[#allocation4 + $0x58] sm:$0xff] }
 0x2cd   :  { %5188 = vtanh.f32 %v6715_v62  ;;  %10303 = vst [vmem:[#allocation32_spill] sm:$0xff] %v6860_v2 }
 0x2ce   :  { %10304 = vst [vmem:[#allocation33_spill] sm:$0xff] %v6863_v53 }
 0x2cf   :  { %10305 = vst [vmem:[#allocation41_spill] sm:$0xff] %v6866_v60 }
 0x2d3   :  { %v5189_v41 = vpop.eup %5188 }
 0x2d4   :  { %v831_v14 = vmul.f32 %v5189_v41, %v823_v15  ;;  %v6870_v15 = vld [vmem:[#allocation4 + $0x28] sm:$0xff]  ;;  %v6873_v41 = vld [vmem:[#allocation4 + $0x30] sm:$0xff] }
 0x2d5   :  { %10306 = vst [vmem:[#allocation48_spill] sm:$0xff] %v6870_v15 }
 0x2d6   :  { %v910_v50 = vrot.slane %v831_v14, 6  ;;  %v6726_v38 = vsel %vm835_vm3, %v6607_v29, %v831_v14  ;;  %v6763_v29 = vld [vmem:[#allocation4 + $0x190] sm:$0xff]  ;;  %10307 = vst [vmem:[#allocation49_spill] sm:$0xff] %v6873_v41  ;;  %v6876_v14 = vld [vmem:[#allocation4 + $0x38] sm:$0xff] }
 0x2d7   :  { %10296 = vst [vmem:[#allocation30_spill] sm:$0xff] %v6726_v38  ;;  %v6883_v38 = vld [vmem:[#allocation4 + $0x10] sm:$0xff] }
 0x2d8   :  { %928 = vmatmul.f32.vlgmr.msra.gmra.mxu0 %v910_v50  ;;  %948 = vmatmul.f32.vlgmr.msrb.gmra.mxu1 %v910_v50  ;;  %10308 = vst [vmem:[#allocation34_spill] sm:$0xff] %v6876_v14 }
 0x2d9   :  { %968 = vmatmul.f32.vlgmr.msra.gmra.mxu2 %v910_v50  ;;  %988 = vmatmul.f32.vlgmr.msrb.gmra.mxu3 %v910_v50  ;;  %v6880_v50 = vld [vmem:[#allocation4 + $0x8] sm:$0xff]  ;;  %10310 = vst [vmem:[#allocation42_spill] sm:$0xff] %v6883_v38 }
 0x2da   :  { %1131 = vmatpush.msra.mxu0 %v6695_v48  ;;  %1151 = vmatpush.msrb.mxu1 %v6730_v18  ;;  %10309 = vst [vmem:[#allocation35_spill] sm:$0xff] %v6880_v50 }
 0x2db   :  { %1171 = vmatpush.msra.mxu2 %v6733_v54  ;;  %1191 = vmatpush.msrb.mxu3 %v6736_v32 }
 0x2dc   :  { %1132 = vmatpush.msra.mxu0 %v6698_v52  ;;  %1152 = vmatpush.msrb.mxu1 %v6740_v13 }
 0x2dd   :  { %1172 = vmatpush.msra.mxu2 %v6743_v25  ;;  %1192 = vmatpush.msrb.mxu3 %v6746_v63 }
 0x2de   :  { %1133 = vmatpush.msra.mxu0 %v6701_v61  ;;  %1153 = vmatpush.msrb.mxu1 %v6750_v28 }
 0x2df   :  { %1173 = vmatpush.msra.mxu2 %v6753_v57  ;;  %1193 = vmatpush.msrb.mxu3 %v6756_v59 }
 0x2e0   :  { %1134 = vmatpush.msra.mxu0 %v6704_v9  ;;  %1154 = vmatpush.msrb.mxu1 %v6760_v5 }
 0x2e1   :  { %1174 = vmatpush.msra.mxu2 %v6763_v29  ;;  %1194 = vmatpush.msrb.mxu3 %v6766_v11 }
 0x2e2   :  { %1135 = vmatpush.msra.mxu0 %v6657_v20  ;;  %1155 = vmatpush.msrb.mxu1 %v6770_v12 }
 0x2e3   :  { %1175 = vmatpush.msra.mxu2 %v6773_v16  ;;  %1195 = vmatpush.msrb.mxu3 %v6776_v17 }
 0x2e4   :  { %1136 = vmatpush.msra.mxu0 %v6660_v22  ;;  %1156 = vmatpush.msrb.mxu1 %v6780_v19 }
 0x2e5   :  { %1176 = vmatpush.msra.mxu2 %v6783_v39  ;;  %1196 = vmatpush.msrb.mxu3 %v6786_v40 }
 0x2e6   :  { %1137 = vmatpush.msra.mxu0 %v6663_v23  ;;  %1157 = vmatpush.msrb.mxu1 %v6790_v42 }
 0x2e7   :  { %1177 = vmatpush.msra.mxu2 %v6793_v43  ;;  %1197 = vmatpush.msrb.mxu3 %v6796_v44 }
 0x2e8   :  { %1138 = vmatpush.msra.mxu0 %v6666_v26  ;;  %1158 = vmatpush.msrb.mxu1 %v6800_v45 }
 0x2e9   :  { %1178 = vmatpush.msra.mxu2 %v6803_v46  ;;  %1198 = vmatpush.msrb.mxu3 %v6806_v47 }
 0x2ea   :  { %1139 = vmatpush.msra.mxu0 %v6669_v27  ;;  %1159 = vmatpush.msrb.mxu1 %v6810_v55 }
 0x2eb   :  { %1179 = vmatpush.msra.mxu2 %v6813_v58  ;;  %1199 = vmatpush.msrb.mxu3 %v6816_v3 }
 0x2ec   :  { %1140 = vmatpush.msra.mxu0 %v6672_v30  ;;  %1160 = vmatpush.msrb.mxu1 %v6820_v4 }
 0x2ed   :  { %1180 = vmatpush.msra.mxu2 %v6823_v10  ;;  %1200 = vmatpush.msrb.mxu3 %v6826_v6 }
 0x2ee   :  { %1141 = vmatpush.msra.mxu0 %v6675_v31  ;;  %1161 = vmatpush.msrb.mxu1 %v6830_v7 }
 0x2ef   :  { %1181 = vmatpush.msra.mxu2 %v6833_v8  ;;  %1201 = vmatpush.msrb.mxu3 %v6836_v21 }
 0x2f0   :  { %1142 = vmatpush.msra.mxu0 %v6678_v33  ;;  %1162 = vmatpush.msrb.mxu1 %v6840_v49 }
 0x2f1   :  { %1182 = vmatpush.msra.mxu2 %v6843_v24  ;;  %1202 = vmatpush.msrb.mxu3 %v6846_v51 }
 0x2f2   :  { %1143 = vmatpush.msra.mxu0 %v6681_v34  ;;  %1163 = vmatpush.msrb.mxu1 %v6850_v0 }
 0x2f3   :  { %1183 = vmatpush.msra.mxu2 %v6853_v56  ;;  %1203 = vmatpush.msrb.mxu3 %v6856_v1  ;;  %v10320_v56 = vld [vmem:[#allocation43_spill] sm:$0xff] }
 0x2f4   :  { %1144 = vmatpush.msra.mxu0 %v6684_v35  ;;  %1164 = vmatpush.msrb.mxu1 %v6860_v2 }
 0x2f5   :  { %1184 = vmatpush.msra.mxu2 %v6863_v53  ;;  %1204 = vmatpush.msrb.mxu3 %v6866_v60  ;;  %v10314_v60 = vld [vmem:[#allocation22_spill] sm:$0xff] }
 0x2f6   :  { %1145 = vmatpush.msra.mxu0 %v6687_v36  ;;  %1165 = vmatpush.msrb.mxu1 %v6870_v15  ;;  %v6886_v36 = vld [vmem:[#allocation4 + $0x18] sm:$0xff]  ;;  %v10312_v15 = vld [vmem:[#allocation23_spill] sm:$0xff] }
 0x2f7   :  { %1185 = vmatpush.msra.mxu2 %v6873_v41  ;;  %1205 = vmatpush.msrb.mxu3 %v6876_v14  ;;  %10311 = vst [vmem:[#allocation36_spill] sm:$0xff] %v6886_v36  ;;  %v10313_v41 = vperm.slane %v10312_v15, 1  ;;  %v10316_v14 = vperm.slane %v10312_v15, 0 }
 0x2f8   :  { %1146 = vmatpush.msra.mxu0 %v6689_v37  ;;  %1166 = vmatpush.msrb.mxu1 %v6880_v50  ;;  %v10317_v37 = vld [vmem:[#allocation38_spill] sm:$0xff] }
 0x2f9   :  { %1186 = vmatpush.msra.mxu2 %v6883_v38  ;;  %1206 = vmatpush.msrb.mxu3 %v6886_v36  ;;  %v6892_v53 = vadd.f32 %v10314_v60, %v10313_v41  ;;  %v6897_v2 = vadd.f32 %v10317_v37, %v10316_v14  ;;  %v10319_v36 = vperm.slane %v10312_v15, 2  ;;  %v10322_v60 = vperm.slane %v10312_v15, 3  ;;  %v10323_v41 = vld [vmem:[#allocation45_spill] sm:$0xff] }
 0x2fb   :  { %10315 = vst [vmem:[#allocation37_spill] sm:$0xff] %v6892_v53  ;;  %v6904_v0 = vadd.f32 %v10320_v56, %v10319_v36  ;;  %v6909_v34 = vadd.f32 %v10323_v41, %v10322_v60  ;;  %v1007_v56 = vrot.slane %v6715_v62, 6  ;;  %v10337_v62 = vld [vmem:[#allocation48_spill] sm:$0xff] }
 0x2fc   :  { %10318 = vst [vmem:[#allocation44_spill] sm:$0xff] %v6897_v2 }
 0x2fd   :  { %10321 = vst [vmem:[#allocation47_spill] sm:$0xff] %v6904_v0 }
 0x2fe   :  { %10324 = vst [vmem:[#allocation23_spill] sm:$0xff] %v6909_v34 }
 0x355   :  { %v929_v35 = vpop.f32.mrf.mxu0  ;;  %v949_v50 = vpop.f32.mrf.mxu1 }
 0x356   :  { %v992_v1 = vadd.f32 %v929_v35, %v6897_v2  ;;  %v993_v38 = vadd.f32 %v949_v50, %v6892_v53 }
 0x358   :  { %5190 = vtanh.f32 %v992_v1 }
 0x359   :  { %5192 = vtanh.f32 %v993_v38 }
 0x35c   :  { %v969_v37 = vpop.f32.mrf.mxu2  ;;  %v989_v14 = vpop.f32.mrf.mxu3 }
 0x35d   :  { %v994_v51 = vadd.f32 %v969_v37, %v6904_v0  ;;  %v995_v35 = vadd.f32 %v989_v14, %v6909_v34 }
 0x35e   :  { %v5191_v24 = vpop.eup %5190 }
 0x35f   :  { %v5193_v50 = vpop.eup %5192  ;;  %5194 = vtanh.f32 %v994_v51  ;;  %v1000_v38 = vmul.f32 0.5, %v5191_v24 }
 0x360   :  { %v1002_v1 = vmul.f32 0.5, %v5193_v50  ;;  %5196 = vtanh.f32 %v995_v35  ;;  %v1430_v50 = vld [vmem:[#allocation6 + $0x1e8] sm:$0xff] }
 0x361   :  { %v1001_v36 = vadd.f32 0.5, %v1000_v38  ;;  %v1431_v38 = vld [vmem:[#allocation6 + $0x1f0] sm:$0xff] }
 0x362   :  { %v1003_v53 = vadd.f32 0.5, %v1002_v1  ;;  %v1432_v1 = vld [vmem:[#allocation6 + $0x1f8] sm:$0xff] }
 0x364   :  { %v1009_v2 = vmul.f32 %v1007_v56, %v1003_v53  ;;  %v1426_v56 = vld [vmem:[#allocation6 + $0x1c8] sm:$0xff] }
 0x365   :  { %v5195_v15 = vpop.eup %5194 }
 0x366   :  { %v1010_v60 = vmul.f32 %v5195_v15, %v1001_v36  ;;  %v5197_v41 = vpop.eup %5196  ;;  %v1425_v36 = vld [vmem:[#allocation6 + $0x1c0] sm:$0xff]  ;;  %v1427_v15 = vld [vmem:[#allocation6 + $0x1d0] sm:$0xff] }
 0x367   :  { %v1004_v37 = vmul.f32 0.5, %v5197_v41  ;;  %v1421_v41 = vld [vmem:[#allocation6 + $0x1a0] sm:$0xff] }
 0x368   :  { %v6914_v49 = vadd.f32 %v1010_v60, %v1009_v2  ;;  %v1428_v60 = vld [vmem:[#allocation6 + $0x1d8] sm:$0xff] }
 0x369   :  { %v1005_v0 = vadd.f32 0.5, %v1004_v37  ;;  %v1422_v37 = vld [vmem:[#allocation6 + $0x1a8] sm:$0xff] }
 0x36a   :  { %5198 = vtanh.f32 %v6914_v49 }
 0x370   :  { %v5199_v14 = vpop.eup %5198 }
 0x371   :  { %v6917_v34 = vmul.f32 %v5199_v14, %v1005_v0  ;;  %v1423_v14 = vld [vmem:[#allocation6 + $0x1b0] sm:$0xff] }
 0x373   :  { %1030 = vmatmul.f32.vlgmr.msrb.gmra.mxu0 %v6917_v34  ;;  %1050 = vmatmul.f32.vlgmr.msra.gmra.mxu1 %v6917_v34 }
 0x374   :  { %1070 = vmatmul.f32.vlgmr.msrb.gmra.mxu2 %v6917_v34  ;;  %1090 = vmatmul.f32.vlgmr.msra.gmra.mxu3 %v6917_v34 }
 0x375   :  { %1248 = vmatpush.msrb.mxu0 %v6695_v48  ;;  %1268 = vmatpush.msra.mxu1 %v6730_v18  ;;  %v10332_v48 = vld [vmem:[#allocation29_spill] sm:$0xff] }
 0x376   :  { %1288 = vmatpush.msrb.mxu2 %v6733_v54  ;;  %1308 = vmatpush.msra.mxu3 %v6736_v32  ;;  %v10338_v18 = vld [vmem:[#allocation49_spill] sm:$0xff]  ;;  %v10339_v54 = vld [vmem:[#allocation34_spill] sm:$0xff]  ;;  %v10340_v32 = vld [vmem:[#allocation39_spill] sm:$0xff] }
 0x377   :  { %1249 = vmatpush.msrb.mxu0 %v6698_v52  ;;  %1269 = vmatpush.msra.mxu1 %v6740_v13  ;;  %v10333_v52 = vld [vmem:[#allocation32_spill] sm:$0xff]  ;;  %v10341_v13 = vld [vmem:[#allocation35_spill] sm:$0xff] }
 0x378   :  { %1289 = vmatpush.msrb.mxu2 %v6743_v25  ;;  %1309 = vmatpush.msra.mxu3 %v6746_v63  ;;  %v10342_v25 = vld [vmem:[#allocation42_spill] sm:$0xff]  ;;  %v10343_v63 = vld [vmem:[#allocation36_spill] sm:$0xff] }
 0x379   :  { %1250 = vmatpush.msrb.mxu0 %v6701_v61  ;;  %1270 = vmatpush.msra.mxu1 %v6750_v28  ;;  %v10334_v61 = vld [vmem:[#allocation33_spill] sm:$0xff] }
 0x37a   :  { %1290 = vmatpush.msrb.mxu2 %v6753_v57  ;;  %1310 = vmatpush.msra.mxu3 %v6756_v59 }
 0x37b   :  { %1251 = vmatpush.msrb.mxu0 %v6704_v9  ;;  %1271 = vmatpush.msra.mxu1 %v6760_v5  ;;  %v10336_v9 = vld [vmem:[#allocation24_spill] sm:$0xff] }
 0x37c   :  { %1291 = vmatpush.msrb.mxu2 %v6763_v29  ;;  %1311 = vmatpush.msra.mxu3 %v6766_v11  ;;  %v10344_v29 = vld [vmem:[#allocation44_spill] sm:$0xff] }
 0x37d   :  { %1252 = vmatpush.msrb.mxu0 %v6657_v20  ;;  %1272 = vmatpush.msra.mxu1 %v6770_v12  ;;  %v10325_v20 = vld [vmem:[#allocation31_spill] sm:$0xff]  ;;  %v10345_v12 = vld [vmem:[#allocation37_spill] sm:$0xff] }
 0x37e   :  { %1292 = vmatpush.msrb.mxu2 %v6773_v16  ;;  %1312 = vmatpush.msra.mxu3 %v6776_v17 }
 0x37f   :  { %1253 = vmatpush.msrb.mxu0 %v6660_v22  ;;  %1273 = vmatpush.msra.mxu1 %v6780_v19  ;;  %v10326_v22 = vld [vmem:[#allocation25_spill] sm:$0xff] }
 0x380   :  { %1293 = vmatpush.msrb.mxu2 %v6783_v39  ;;  %1313 = vmatpush.msra.mxu3 %v6786_v40 }
 0x381   :  { %1254 = vmatpush.msrb.mxu0 %v6663_v23  ;;  %1274 = vmatpush.msra.mxu1 %v6790_v42  ;;  %v10327_v23 = vld [vmem:[#allocation40_spill] sm:$0xff]  ;;  %v10346_v42 = vld [vmem:[#allocation47_spill] sm:$0xff] }
 0x382   :  { %1294 = vmatpush.msrb.mxu2 %v6793_v43  ;;  %1314 = vmatpush.msra.mxu3 %v6796_v44 }
 0x383   :  { %1255 = vmatpush.msrb.mxu0 %v6666_v26  ;;  %1275 = vmatpush.msra.mxu1 %v6800_v45  ;;  %v10328_v26 = vld [vmem:[#allocation28_spill] sm:$0xff]  ;;  %v10347_v45 = vld [vmem:[#allocation23_spill] sm:$0xff] }
 0x384   :  { %1295 = vmatpush.msrb.mxu2 %v6803_v46  ;;  %1315 = vmatpush.msra.mxu3 %v6806_v47 }
 0x385   :  { %1256 = vmatpush.msrb.mxu0 %v6669_v27  ;;  %1276 = vmatpush.msra.mxu1 %v6810_v55  ;;  %v10329_v27 = vld [vmem:[#allocation26_spill] sm:$0xff] }
 0x386   :  { %1296 = vmatpush.msrb.mxu2 %v6813_v58  ;;  %1316 = vmatpush.msra.mxu3 %v6816_v3 }
 0x387   :  { %1257 = vmatpush.msrb.mxu0 %v6672_v30  ;;  %1277 = vmatpush.msra.mxu1 %v6820_v4  ;;  %v10330_v30 = vld [vmem:[#allocation27_spill] sm:$0xff] }
 0x388   :  { %1297 = vmatpush.msrb.mxu2 %v6823_v10  ;;  %1317 = vmatpush.msra.mxu3 %v6826_v6  ;;  %v1121_v10 = vrot.slane %v6914_v49, 6  ;;  %v1429_v49 = vld [vmem:[#allocation6 + $0x1e0] sm:$0xff] }
 0x389   :  { %1258 = vmatpush.msrb.mxu0 %v6675_v31  ;;  %1278 = vmatpush.msra.mxu1 %v6830_v7  ;;  %v10331_v31 = vld [vmem:[#allocation46_spill] sm:$0xff] }
 0x38a   :  { %1298 = vmatpush.msrb.mxu2 %v6833_v8  ;;  %1318 = vmatpush.msra.mxu3 %v6836_v21 }
 0x38b   :  { %1259 = vmatpush.msrb.mxu0 %v6678_v33  ;;  %1279 = vmatpush.msra.mxu1 %v10325_v20  ;;  %v10335_v33 = vld [vmem:[#allocation41_spill] sm:$0xff] }
 0x38c   :  { %1299 = vmatpush.msrb.mxu2 %v10326_v22  ;;  %1319 = vmatpush.msra.mxu3 %v10327_v23  ;;  %v1424_v20 = vld [vmem:[#allocation6 + $0x1b8] sm:$0xff]  ;;  %v1417_v22 = vld [vmem:[#allocation6 + $0x180] sm:$0xff]  ;;  %v1418_v23 = vld [vmem:[#allocation6 + $0x188] sm:$0xff] }
 0x38d   :  { %1260 = vmatpush.msrb.mxu0 %v10328_v26  ;;  %1280 = vmatpush.msra.mxu1 %v10329_v27  ;;  %v1419_v26 = vld [vmem:[#allocation6 + $0x190] sm:$0xff]  ;;  %v1420_v27 = vld [vmem:[#allocation6 + $0x198] sm:$0xff] }
 0x38e   :  { %1300 = vmatpush.msrb.mxu2 %v10330_v30  ;;  %1320 = vmatpush.msra.mxu3 %v10331_v31  ;;  %v1413_v30 = vld [vmem:[#allocation6 + $0x160] sm:$0xff]  ;;  %v1414_v31 = vld [vmem:[#allocation6 + $0x168] sm:$0xff] }
 0x38f   :  { %1261 = vmatpush.msrb.mxu0 %v10332_v48  ;;  %1281 = vmatpush.msra.mxu1 %v10333_v52  ;;  %v1415_v48 = vld [vmem:[#allocation6 + $0x170] sm:$0xff]  ;;  %v1416_v52 = vld [vmem:[#allocation6 + $0x178] sm:$0xff] }
 0x390   :  { %1301 = vmatpush.msrb.mxu2 %v10334_v61  ;;  %1321 = vmatpush.msra.mxu3 %v10335_v33  ;;  %v1409_v61 = vld [vmem:[#allocation6 + $0x140] sm:$0xff]  ;;  %v1410_v33 = vld [vmem:[#allocation6 + $0x148] sm:$0xff] }
 0x391   :  { %1262 = vmatpush.msrb.mxu0 %v10336_v9  ;;  %1282 = vmatpush.msra.mxu1 %v10337_v62  ;;  %v1411_v9 = vld [vmem:[#allocation6 + $0x150] sm:$0xff]  ;;  %v1412_v62 = vld [vmem:[#allocation6 + $0x158] sm:$0xff] }
 0x392   :  { %1302 = vmatpush.msrb.mxu2 %v10338_v18  ;;  %1322 = vmatpush.msra.mxu3 %v10339_v54  ;;  %v1405_v18 = vld [vmem:[#allocation6 + $0x120] sm:$0xff]  ;;  %v1406_v54 = vld [vmem:[#allocation6 + $0x128] sm:$0xff] }
 0x393   :  { %1263 = vmatpush.msrb.mxu0 %v10340_v32  ;;  %1283 = vmatpush.msra.mxu1 %v10341_v13  ;;  %v1407_v32 = vld [vmem:[#allocation6 + $0x130] sm:$0xff]  ;;  %v1408_v13 = vld [vmem:[#allocation6 + $0x138] sm:$0xff] }
 0x394   :  { %1303 = vmatpush.msrb.mxu2 %v10342_v25  ;;  %1323 = vmatpush.msra.mxu3 %v10343_v63  ;;  %v1401_v25 = vld [vmem:[#allocation6 + $0x100] sm:$0xff]  ;;  %v1402_v63 = vld [vmem:[#allocation6 + $0x108] sm:$0xff] }
 0x3f0   :  { %v1031_v28 = vpop.f32.mrf.mxu0  ;;  %v1051_v57 = vpop.f32.mrf.mxu1 }
 0x3f1   :  { %v1098_v59 = vrot.slane %v1031_v28, 6  ;;  %v1099_v5 = vrot.slane %v1051_v57, 6  ;;  %v1403_v28 = vld [vmem:[#allocation6 + $0x110] sm:$0xff]  ;;  %v1404_v57 = vld [vmem:[#allocation6 + $0x118] sm:$0xff] }
 0x3f3   :  { %v1106_v11 = vadd.f32 %v1098_v59, %v10344_v29  ;;  %v1107_v16 = vadd.f32 %v1099_v5, %v10345_v12  ;;  %v1397_v59 = vld [vmem:[#allocation6 + $0xe0] sm:$0xff]  ;;  %v1398_v5 = vld [vmem:[#allocation6 + $0xe8] sm:$0xff] }
 0x3f5   :  { %5200 = vtanh.f32 %v1106_v11  ;;  %v1399_v11 = vld [vmem:[#allocation6 + $0xf0] sm:$0xff] }
 0x3f6   :  { %5202 = vtanh.f32 %v1107_v16  ;;  %v1400_v16 = vld [vmem:[#allocation6 + $0xf8] sm:$0xff] }
 0x3f7   :  { %v1071_v17 = vpop.f32.mrf.mxu2  ;;  %v1091_v19 = vpop.f32.mrf.mxu3 }
 0x3f8   :  { %v1100_v39 = vrot.slane %v1071_v17, 6  ;;  %v1101_v40 = vrot.slane %v1091_v19, 6  ;;  %v1393_v17 = vld [vmem:[#allocation6 + $0xc0] sm:$0xff]  ;;  %v1394_v19 = vld [vmem:[#allocation6 + $0xc8] sm:$0xff] }
 0x3fa   :  { %v1108_v43 = vadd.f32 %v1100_v39, %v10346_v42  ;;  %v1109_v46 = vadd.f32 %v1101_v40, %v10347_v45  ;;  %v1395_v39 = vld [vmem:[#allocation6 + $0xd0] sm:$0xff]  ;;  %v1396_v40 = vld [vmem:[#allocation6 + $0xd8] sm:$0xff] }
 0x3fb   :  { %v5201_v44 = vpop.eup %5200 }
 0x3fc   :  { %v5203_v47 = vpop.eup %5202  ;;  %5204 = vtanh.f32 %v1108_v43  ;;  %v1114_v55 = vmul.f32 0.5, %v5201_v44  ;;  %v1389_v43 = vld [vmem:[#allocation6 + $0xa0] sm:$0xff]  ;;  %v1390_v44 = vld [vmem:[#allocation6 + $0xa8] sm:$0xff] }
 0x3fd   :  { %v1116_v58 = vmul.f32 0.5, %v5203_v47  ;;  %5206 = vtanh.f32 %v1109_v46  ;;  %v1391_v46 = vld [vmem:[#allocation6 + $0xb0] sm:$0xff]  ;;  %v1392_v47 = vld [vmem:[#allocation6 + $0xb8] sm:$0xff] }
 0x3fe   :  { %v1115_v4 = vadd.f32 0.5, %v1114_v55  ;;  %v1385_v55 = vld [vmem:[#allocation6 + $0x80] sm:$0xff] }
 0x3ff   :  { %v1117_v3 = vadd.f32 0.5, %v1116_v58 }
 0x401   :  { %v1123_v7 = vmul.f32 %v1121_v10, %v1117_v3  ;;  %v1387_v10 = vld [vmem:[#allocation6 + $0x90] sm:$0xff] }
 0x402   :  { %v5205_v6 = vpop.eup %5204 }
 0x403   :  { %v1124_v8 = vmul.f32 %v5205_v6, %v1115_v4  ;;  %v5207_v21 = vpop.eup %5206  ;;  %v1386_v4 = vld [vmem:[#allocation6 + $0x88] sm:$0xff]  ;;  %v1388_v6 = vld [vmem:[#allocation6 + $0x98] sm:$0xff] }
 0x404   :  { %v1118_v51 = vmul.f32 0.5, %v5207_v21 }
 0x405   :  { %v6992_v24 = vadd.f32 %v1124_v8, %v1123_v7 }
 0x406   :  { %v1119_v0 = vadd.f32 0.5, %v1118_v51 }
 0x407   :  { %5208 = vtanh.f32 %v6992_v24 }
 0x40d   :  { %v5209_v2 = vpop.eup %5208 }
 0x40e   :  { %v6995_v53 = vmul.f32 %v5209_v2, %v1119_v0  ;;  %v1381_v0 = vld [vmem:[#allocation6 + $0x60] sm:$0xff]  ;;  %v1382_v2 = vld [vmem:[#allocation6 + $0x68] sm:$0xff] }
 0x410   :  { %v1129_v35 = vrot.slane %v6995_v53, 2 }
 0x412   :  { %1147 = vmatmul.f32.vlgmr.msra.gmra.mxu0 %v1129_v35  ;;  %1167 = vmatmul.f32.vlgmr.msrb.gmra.mxu1 %v1129_v35 }
 0x413   :  { %1187 = vmatmul.f32.vlgmr.msra.gmra.mxu2 %v1129_v35  ;;  %1207 = vmatmul.f32.vlgmr.msrb.gmra.mxu3 %v1129_v35  ;;  %v1383_v35 = vld [vmem:[#allocation6 + $0x70] sm:$0xff] }
 0x414   :  { %1443 = vmatpush.msra.mxu0 %v1429_v49  ;;  %1466 = vmatpush.msrb.mxu1 %v1430_v50  ;;  %v1384_v49 = vld [vmem:[#allocation6 + $0x78] sm:$0xff]  ;;  %v1377_v50 = vld [vmem:[#allocation6 + $0x40] sm:$0xff] }
 0x415   :  { %1489 = vmatpush.msra.mxu2 %v1431_v38  ;;  %1512 = vmatpush.msrb.mxu3 %v1432_v1  ;;  %v1378_v38 = vld [vmem:[#allocation6 + $0x48] sm:$0xff]  ;;  %v1379_v1 = vld [vmem:[#allocation6 + $0x50] sm:$0xff] }
 0x416   :  { %1444 = vmatpush.msra.mxu0 %v1425_v36  ;;  %1467 = vmatpush.msrb.mxu1 %v1426_v56  ;;  %v1380_v36 = vld [vmem:[#allocation6 + $0x58] sm:$0xff]  ;;  %v1373_v56 = vld [vmem:[#allocation6 + $0x20] sm:$0xff] }
 0x417   :  { %1490 = vmatpush.msra.mxu2 %v1427_v15  ;;  %1513 = vmatpush.msrb.mxu3 %v1428_v60  ;;  %v1374_v15 = vld [vmem:[#allocation6 + $0x28] sm:$0xff]  ;;  %v1375_v60 = vld [vmem:[#allocation6 + $0x30] sm:$0xff] }
 0x418   :  { %1445 = vmatpush.msra.mxu0 %v1421_v41  ;;  %1468 = vmatpush.msrb.mxu1 %v1422_v37  ;;  %v1376_v41 = vld [vmem:[#allocation6 + $0x38] sm:$0xff] }
 0x419   :  { %1491 = vmatpush.msra.mxu2 %v1423_v14  ;;  %1514 = vmatpush.msrb.mxu3 %v1424_v20  ;;  %v1369_v20 = vld [vmem:[#allocation6] sm:$0xff] }
 0x41a   :  { %1446 = vmatpush.msra.mxu0 %v1417_v22  ;;  %1469 = vmatpush.msrb.mxu1 %v1418_v23  ;;  %v1370_v22 = vld [vmem:[#allocation6 + $0x8] sm:$0xff] }
 0x41b   :  { %1492 = vmatpush.msra.mxu2 %v1419_v26  ;;  %1515 = vmatpush.msrb.mxu3 %v1420_v27  ;;  %v1371_v27 = vld [vmem:[#allocation6 + $0x10] sm:$0xff] }
 0x41c   :  { %1447 = vmatpush.msra.mxu0 %v1413_v30  ;;  %1470 = vmatpush.msrb.mxu1 %v1414_v31  ;;  %v1372_v30 = vld [vmem:[#allocation6 + $0x18] sm:$0xff] }
 0x41d   :  { %1493 = vmatpush.msra.mxu2 %v1415_v48  ;;  %1516 = vmatpush.msrb.mxu3 %v1416_v52 }
 0x41e   :  { %1448 = vmatpush.msra.mxu0 %v1409_v61  ;;  %1471 = vmatpush.msrb.mxu1 %v1410_v33 }
 0x41f   :  { %1494 = vmatpush.msra.mxu2 %v1411_v9  ;;  %1517 = vmatpush.msrb.mxu3 %v1412_v62 }
 0x420   :  { %1449 = vmatpush.msra.mxu0 %v1405_v18  ;;  %1472 = vmatpush.msrb.mxu1 %v1406_v54  ;;  %v1238_v54 = vrot.slane %v6992_v24, 6  ;;  %v10348_v24 = vld [vmem:[#allocation30_spill] sm:$0xff] }
 0x421   :  { %1495 = vmatpush.msra.mxu2 %v1407_v32  ;;  %1518 = vmatpush.msrb.mxu3 %v1408_v13 }
 0x422   :  { %1450 = vmatpush.msra.mxu0 %v1401_v25  ;;  %1473 = vmatpush.msrb.mxu1 %v1402_v63 }
 0x423   :  { %1496 = vmatpush.msra.mxu2 %v1403_v28  ;;  %1519 = vmatpush.msrb.mxu3 %v1404_v57 }
 0x424   :  { %1451 = vmatpush.msra.mxu0 %v1397_v59  ;;  %1474 = vmatpush.msrb.mxu1 %v1398_v5 }
 0x425   :  { %1497 = vmatpush.msra.mxu2 %v1399_v11  ;;  %1520 = vmatpush.msrb.mxu3 %v1400_v16  ;;  %v1362_v16 = vsel %vm832_vm2, %v6917_v34, %v6995_v53  ;;  %v7020_v34 = vld [vmem:[#allocation8 + $0x1f0] sm:$0xff]  ;;  %v7024_v53 = vld [vmem:[#allocation8 + $0x1f8] sm:$0xff] }
 0x426   :  { %1452 = vmatpush.msra.mxu0 %v1393_v17  ;;  %1475 = vmatpush.msrb.mxu1 %v1394_v19 }
 0x427   :  { %1498 = vmatpush.msra.mxu2 %v1395_v39  ;;  %1521 = vmatpush.msrb.mxu3 %v1396_v40  ;;  %v7016_v39 = vld [vmem:[#allocation8 + $0x1e0] sm:$0xff]  ;;  %v7018_v40 = vld [vmem:[#allocation8 + $0x1e8] sm:$0xff] }
 0x428   :  { %1453 = vmatpush.msra.mxu0 %v1389_v43  ;;  %1476 = vmatpush.msrb.mxu1 %v1390_v44  ;;  %v7028_v43 = vld [vmem:[#allocation8 + $0x1c0] sm:$0xff]  ;;  %v7030_v44 = vld [vmem:[#allocation8 + $0x1c8] sm:$0xff] }
 0x429   :  { %1499 = vmatpush.msra.mxu2 %v1391_v46  ;;  %1522 = vmatpush.msrb.mxu3 %v1392_v47  ;;  %v7032_v46 = vld [vmem:[#allocation8 + $0x1d0] sm:$0xff]  ;;  %v7036_v47 = vld [vmem:[#allocation8 + $0x1d8] sm:$0xff] }
 0x42a   :  { %1454 = vmatpush.msra.mxu0 %v1385_v55  ;;  %1477 = vmatpush.msrb.mxu1 %v1386_v4  ;;  %v7040_v55 = vld [vmem:[#allocation8 + $0x1a0] sm:$0xff]  ;;  %v7048_v4 = vld [vmem:[#allocation8 + $0x1b8] sm:$0xff] }
 0x42b   :  { %1500 = vmatpush.msra.mxu2 %v1387_v10  ;;  %1523 = vmatpush.msrb.mxu3 %v1388_v6  ;;  %v7052_v10 = vld [vmem:[#allocation8 + $0x180] sm:$0xff]  ;;  %v7054_v6 = vld [vmem:[#allocation8 + $0x188] sm:$0xff] }
 0x42c   :  { %1455 = vmatpush.msra.mxu0 %v1381_v0  ;;  %1478 = vmatpush.msrb.mxu1 %v1382_v2  ;;  %v7068_v0 = vld [vmem:[#allocation8 + $0x170] sm:$0xff]  ;;  %v7072_v2 = vld [vmem:[#allocation8 + $0x178] sm:$0xff] }
 0x42d   :  { %1501 = vmatpush.msra.mxu2 %v1383_v35  ;;  %1524 = vmatpush.msrb.mxu3 %v1384_v49  ;;  %v7076_v35 = vld [vmem:[#allocation8 + $0x140] sm:$0xff]  ;;  %v7078_v49 = vld [vmem:[#allocation8 + $0x148] sm:$0xff] }
 0x42e   :  { %1456 = vmatpush.msra.mxu0 %v1377_v50  ;;  %1479 = vmatpush.msrb.mxu1 %v1378_v38  ;;  %v7080_v50 = vld [vmem:[#allocation8 + $0x150] sm:$0xff]  ;;  %v7084_v38 = vld [vmem:[#allocation8 + $0x158] sm:$0xff] }
 0x42f   :  { %1502 = vmatpush.msra.mxu2 %v1379_v1  ;;  %1525 = vmatpush.msrb.mxu3 %v1380_v36  ;;  %v7088_v1 = vld [vmem:[#allocation8 + $0x120] sm:$0xff]  ;;  %v7090_v36 = vld [vmem:[#allocation8 + $0x128] sm:$0xff] }
 0x430   :  { %1457 = vmatpush.msra.mxu0 %v1373_v56  ;;  %1480 = vmatpush.msrb.mxu1 %v1374_v15  ;;  %v7092_v56 = vld [vmem:[#allocation8 + $0x130] sm:$0xff]  ;;  %v7096_v15 = vld [vmem:[#allocation8 + $0x138] sm:$0xff] }
 0x431   :  { %1503 = vmatpush.msra.mxu2 %v1375_v60  ;;  %1526 = vmatpush.msrb.mxu3 %v1376_v41  ;;  %v7098_v60 = vld [vmem:[#allocation8 + $0x100] sm:$0xff]  ;;  %v7100_v41 = vld [vmem:[#allocation8 + $0x108] sm:$0xff] }
 0x432   :  { %1458 = vmatpush.msra.mxu0 %v1369_v20  ;;  %1481 = vmatpush.msrb.mxu1 %v1370_v22  ;;  %v7108_v20 = vld [vmem:[#allocation8 + $0xe0] sm:$0xff]  ;;  %v7112_v22 = vld [vmem:[#allocation8 + $0xe8] sm:$0xff] }
 0x433   :  { %1504 = vmatpush.msra.mxu2 %v1371_v27  ;;  %1527 = vmatpush.msrb.mxu3 %v1372_v30  ;;  %v7120_v27 = vld [vmem:[#allocation8 + $0xc0] sm:$0xff]  ;;  %v7122_v30 = vld [vmem:[#allocation8 + $0xc8] sm:$0xff] }
 0x48f   :  { %v1148_v58 = vpop.f32.mrf.mxu0  ;;  %v1168_v3 = vpop.f32.mrf.mxu1 }
 0x490   :  { %v1215_v7 = vrot.slane %v1148_v58, 4  ;;  %v1216_v8 = vrot.slane %v1168_v3, 4  ;;  %v7042_v58 = vld [vmem:[#allocation8 + $0x1a8] sm:$0xff]  ;;  %v7044_v3 = vld [vmem:[#allocation8 + $0x1b0] sm:$0xff] }
 0x492   :  { %v1223_v21 = vadd.f32 %v1215_v7, %v10344_v29  ;;  %v1224_v51 = vadd.f32 %v1216_v8, %v10345_v12  ;;  %v7056_v7 = vld [vmem:[#allocation8 + $0x190] sm:$0xff]  ;;  %v7060_v8 = vld [vmem:[#allocation8 + $0x198] sm:$0xff] }
 0x494   :  { %5210 = vtanh.f32 %v1223_v21  ;;  %v7064_v21 = vld [vmem:[#allocation8 + $0x160] sm:$0xff] }
 0x495   :  { %5212 = vtanh.f32 %v1224_v51  ;;  %v7066_v51 = vld [vmem:[#allocation8 + $0x168] sm:$0xff] }
 0x496   :  { %v1188_v37 = vpop.f32.mrf.mxu2  ;;  %v1208_v14 = vpop.f32.mrf.mxu3 }
 0x497   :  { %v1217_v23 = vrot.slane %v1188_v37, 4  ;;  %v1218_v26 = vrot.slane %v1208_v14, 4  ;;  %v7104_v37 = vld [vmem:[#allocation8 + $0x110] sm:$0xff]  ;;  %v7106_v14 = vld [vmem:[#allocation8 + $0x118] sm:$0xff] }
 0x499   :  { %v1225_v31 = vadd.f32 %v1217_v23, %v10346_v42  ;;  %v1226_v52 = vadd.f32 %v1218_v26, %v10347_v45  ;;  %v7114_v23 = vld [vmem:[#allocation8 + $0xf0] sm:$0xff]  ;;  %v7116_v26 = vld [vmem:[#allocation8 + $0xf8] sm:$0xff] }
 0x49a   :  { %v5211_v48 = vpop.eup %5210 }
 0x49b   :  { %v5213_v61 = vpop.eup %5212  ;;  %5214 = vtanh.f32 %v1225_v31  ;;  %v1231_v33 = vmul.f32 0.5, %v5211_v48  ;;  %v7126_v31 = vld [vmem:[#allocation8 + $0xd0] sm:$0xff]  ;;  %v7128_v48 = vld [vmem:[#allocation8 + $0xd8] sm:$0xff] }
 0x49c   :  { %v1233_v9 = vmul.f32 0.5, %v5213_v61  ;;  %5216 = vtanh.f32 %v1226_v52  ;;  %v7132_v52 = vld [vmem:[#allocation8 + $0xa0] sm:$0xff]  ;;  %v7134_v61 = vld [vmem:[#allocation8 + $0xa8] sm:$0xff] }
 0x49d   :  { %v1232_v18 = vadd.f32 0.5, %v1231_v33  ;;  %v7138_v33 = vld [vmem:[#allocation8 + $0xb0] sm:$0xff] }
 0x49e   :  { %v1234_v62 = vadd.f32 0.5, %v1233_v9  ;;  %v7140_v9 = vld [vmem:[#allocation8 + $0xb8] sm:$0xff] }
 0x4a0   :  { %v1240_v13 = vmul.f32 %v1238_v54, %v1234_v62  ;;  %v7144_v62 = vld [vmem:[#allocation8 + $0x80] sm:$0xff]  ;;  %v7150_v54 = vld [vmem:[#allocation8 + $0x90] sm:$0xff] }
 0x4a1   :  { %v5215_v32 = vpop.eup %5214  ;;  %10349 = vst [vmem:[#allocation22_spill] sm:$0xff] %v7144_v62 }
 0x4a2   :  { %v1241_v25 = vmul.f32 %v5215_v32, %v1232_v18  ;;  %v5217_v63 = vpop.eup %5216  ;;  %v7146_v18 = vld [vmem:[#allocation8 + $0x88] sm:$0xff]  ;;  %10351 = vst [vmem:[#allocation43_spill] sm:$0xff] %v7150_v54  ;;  %v7152_v32 = vld [vmem:[#allocation8 + $0x98] sm:$0xff] }
 0x4a3   :  { %v1235_v57 = vmul.f32 0.5, %v5217_v63  ;;  %10350 = vst [vmem:[#allocation38_spill] sm:$0xff] %v7146_v18 }
 0x4a4   :  { %v7003_v28 = vadd.f32 %v1241_v25, %v1240_v13  ;;  %10352 = vst [vmem:[#allocation45_spill] sm:$0xff] %v7152_v32 }
 0x4a5   :  { %v1236_v59 = vadd.f32 0.5, %v1235_v57 }
 0x4a6   :  { %5218 = vtanh.f32 %v7003_v28 }
 0x4ac   :  { %v5219_v5 = vpop.eup %5218 }
 0x4ad   :  { %v1244_v11 = vmul.f32 %v5219_v5, %v1236_v59  ;;  %v7160_v59 = vld [vmem:[#allocation8 + $0x60] sm:$0xff]  ;;  %v7162_v5 = vld [vmem:[#allocation8 + $0x68] sm:$0xff] }
 0x4ae   :  { %10353 = vst [vmem:[#allocation31_spill] sm:$0xff] %v7160_v59 }
 0x4af   :  { %v1246_v17 = vrot.slane %v1244_v11, 4  ;;  %v7010_v19 = vsel %vm205_vm0, %v1362_v16, %v1244_v11  ;;  %10354 = vst [vmem:[#allocation25_spill] sm:$0xff] %v7162_v5  ;;  %v7164_v11 = vld [vmem:[#allocation8 + $0x70] sm:$0xff] }
 0x4b0   :  { %10355 = vst [vmem:[#allocation40_spill] sm:$0xff] %v7164_v11 }
 0x4b1   :  { %1264 = vmatmul.f32.vlgmr.msrb.gmra.mxu0 %v1246_v17  ;;  %1284 = vmatmul.f32.vlgmr.msra.gmra.mxu1 %v1246_v17 }
 0x4b2   :  { %1304 = vmatmul.f32.vlgmr.msrb.gmra.mxu2 %v1246_v17  ;;  %1324 = vmatmul.f32.vlgmr.msra.gmra.mxu3 %v1246_v17 }
 0x4b3   :  { %1611 = vmatpush.msrb.mxu0 %v7016_v39  ;;  %1631 = vmatpush.msra.mxu1 %v7018_v40 }
 0x4b4   :  { %1651 = vmatpush.msrb.mxu2 %v7020_v34  ;;  %1671 = vmatpush.msra.mxu3 %v7024_v53 }
 0x4b5   :  { %1612 = vmatpush.msrb.mxu0 %v7028_v43  ;;  %1632 = vmatpush.msra.mxu1 %v7030_v44 }
 0x4b6   :  { %1652 = vmatpush.msrb.mxu2 %v7032_v46  ;;  %1672 = vmatpush.msra.mxu3 %v7036_v47 }
 0x4b7   :  { %1613 = vmatpush.msrb.mxu0 %v7040_v55  ;;  %1633 = vmatpush.msra.mxu1 %v7042_v58 }
 0x4b8   :  { %1653 = vmatpush.msrb.mxu2 %v7044_v3  ;;  %1673 = vmatpush.msra.mxu3 %v7048_v4 }
 0x4b9   :  { %1459 = vmatmul.f32.vlgmr.msra.gmra.mxu0 %v10348_v24  ;;  %1482 = vmatmul.f32.vlgmr.msrb.gmra.mxu1 %v10348_v24 }
 0x4ba   :  { %1505 = vmatmul.f32.vlgmr.msra.gmra.mxu2 %v10348_v24  ;;  %1528 = vmatmul.f32.vlgmr.msrb.gmra.mxu3 %v10348_v24  ;;  %v7170_v24 = vld [vmem:[#allocation8 + $0x78] sm:$0xff] }
 0x4bb   :  { %1614 = vmatpush.msrb.mxu0 %v7052_v10  ;;  %1634 = vmatpush.msra.mxu1 %v7054_v6  ;;  %10356 = vst [vmem:[#allocation28_spill] sm:$0xff] %v7170_v24 }
 0x4bc   :  { %1654 = vmatpush.msrb.mxu2 %v7056_v7  ;;  %1674 = vmatpush.msra.mxu3 %v7060_v8 }
 0x4bd   :  { %1615 = vmatpush.msrb.mxu0 %v7064_v21  ;;  %1635 = vmatpush.msra.mxu1 %v7066_v51 }
 0x4be   :  { %1655 = vmatpush.msrb.mxu2 %v7068_v0  ;;  %1675 = vmatpush.msra.mxu3 %v7072_v2 }
 0x4bf   :  { %1616 = vmatpush.msrb.mxu0 %v7076_v35  ;;  %1636 = vmatpush.msra.mxu1 %v7078_v49 }
 0x4c0   :  { %1656 = vmatpush.msrb.mxu2 %v7080_v50  ;;  %1676 = vmatpush.msra.mxu3 %v7084_v38 }
 0x4c1   :  { %1617 = vmatpush.msrb.mxu0 %v7088_v1  ;;  %1637 = vmatpush.msra.mxu1 %v7090_v36 }
 0x4c2   :  { %1657 = vmatpush.msrb.mxu2 %v7092_v56  ;;  %1677 = vmatpush.msra.mxu3 %v7096_v15 }
 0x4c3   :  { %1618 = vmatpush.msrb.mxu0 %v7098_v60  ;;  %1638 = vmatpush.msra.mxu1 %v7100_v41 }
 0x4c4   :  { %1658 = vmatpush.msrb.mxu2 %v7104_v37  ;;  %1678 = vmatpush.msra.mxu3 %v7106_v14 }
 0x4c5   :  { %1619 = vmatpush.msrb.mxu0 %v7108_v20  ;;  %1639 = vmatpush.msra.mxu1 %v7112_v22 }
 0x4c6   :  { %1659 = vmatpush.msrb.mxu2 %v7114_v23  ;;  %1679 = vmatpush.msra.mxu3 %v7116_v26 }
 0x4c7   :  { %1620 = vmatpush.msrb.mxu0 %v7120_v27  ;;  %1640 = vmatpush.msra.mxu1 %v7122_v30 }
 0x4c8   :  { %1660 = vmatpush.msrb.mxu2 %v7126_v31  ;;  %1680 = vmatpush.msra.mxu3 %v7128_v48 }
 0x4c9   :  { %1621 = vmatpush.msrb.mxu0 %v7132_v52  ;;  %1641 = vmatpush.msra.mxu1 %v7134_v61 }
 0x4ca   :  { %1661 = vmatpush.msrb.mxu2 %v7138_v33  ;;  %1681 = vmatpush.msra.mxu3 %v7140_v9 }
 0x4cb   :  { %1622 = vmatpush.msrb.mxu0 %v7144_v62  ;;  %1642 = vmatpush.msra.mxu1 %v7146_v18 }
 0x4cc   :  { %1662 = vmatpush.msrb.mxu2 %v7150_v54  ;;  %1682 = vmatpush.msra.mxu3 %v7152_v32  ;;  %v7178_v32 = vld [vmem:[#allocation8 + $0x50] sm:$0xff]  ;;  %v7180_v54 = vld [vmem:[#allocation8 + $0x58] sm:$0xff] }
 0x4cd   :  { %1623 = vmatpush.msrb.mxu0 %v7160_v59  ;;  %1643 = vmatpush.msra.mxu1 %v7162_v5  ;;  %10359 = vst [vmem:[#allocation46_spill] sm:$0xff] %v7178_v32 }
 0x4ce   :  { %1663 = vmatpush.msrb.mxu2 %v7164_v11  ;;  %1683 = vmatpush.msra.mxu3 %v7170_v24  ;;  %10360 = vst [vmem:[#allocation29_spill] sm:$0xff] %v7180_v54  ;;  %v7194_v24 = vld [vmem:[#allocation8] sm:$0xff]  ;;  %v7196_v11 = vld [vmem:[#allocation8 + $0x8] sm:$0xff] }
 0x4cf   :  { %10365 = vst [vmem:[#allocation48_spill] sm:$0xff] %v7194_v24 }
 0x4d0   :  { %1664 = vmatpush.msrb.mxu2 %v7178_v32  ;;  %1684 = vmatpush.msra.mxu3 %v7180_v54  ;;  %10366 = vst [vmem:[#allocation49_spill] sm:$0xff] %v7196_v11 }
 0x52e   :  { %v1265_v13 = vpop.f32.mrf.mxu0  ;;  %v1285_v25 = vpop.f32.mrf.mxu1 }
 0x52f   :  { %v1332_v63 = vrot.slane %v1265_v13, 2  ;;  %v1333_v57 = vrot.slane %v1285_v25, 2  ;;  %v7172_v13 = vld [vmem:[#allocation8 + $0x40] sm:$0xff]  ;;  %v7174_v25 = vld [vmem:[#allocation8 + $0x48] sm:$0xff] }
 0x530   :  { %10357 = vst [vmem:[#allocation26_spill] sm:$0xff] %v7172_v13  ;;  %1624 = vmatpush.msrb.mxu0 %v7172_v13  ;;  %1644 = vmatpush.msra.mxu1 %v7174_v25  ;;  %v7202_v13 = vld [vmem:[#allocation8 + $0x18] sm:$0xff] }
 0x531   :  { %v1340_v16 = vadd.f32 %v1332_v63, %v10344_v29  ;;  %v1341_v17 = vadd.f32 %v1333_v57, %v10345_v12  ;;  %10358 = vst [vmem:[#allocation27_spill] sm:$0xff] %v7174_v25  ;;  %v7182_v29 = vld [vmem:[#allocation8 + $0x20] sm:$0xff]  ;;  %v7186_v12 = vld [vmem:[#allocation8 + $0x28] sm:$0xff]  ;;  %v7188_v63 = vld [vmem:[#allocation8 + $0x30] sm:$0xff] }
 0x532   :  { %10361 = vst [vmem:[#allocation32_spill] sm:$0xff] %v7182_v29  ;;  %v7190_v57 = vld [vmem:[#allocation8 + $0x38] sm:$0xff]  ;;  %1625 = vmatpush.msrb.mxu0 %v7182_v29  ;;  %1645 = vmatpush.msra.mxu1 %v7186_v12  ;;  %v7200_v25 = vld [vmem:[#allocation8 + $0x10] sm:$0xff] }
 0x533   :  { %5220 = vtanh.f32 %v1340_v16  ;;  %10362 = vst [vmem:[#allocation33_spill] sm:$0xff] %v7186_v12  ;;  %1665 = vmatpush.msrb.mxu2 %v7188_v63  ;;  %1685 = vmatpush.msra.mxu3 %v7190_v57 }
 0x534   :  { %10363 = vst [vmem:[#allocation41_spill] sm:$0xff] %v7188_v63  ;;  %5222 = vtanh.f32 %v1341_v17  ;;  %1626 = vmatpush.msrb.mxu0 %v7194_v24  ;;  %1646 = vmatpush.msra.mxu1 %v7196_v11 }
 0x535   :  { %10364 = vst [vmem:[#allocation24_spill] sm:$0xff] %v7190_v57  ;;  %v1305_v16 = vpop.f32.mrf.mxu2  ;;  %v1325_v5 = vpop.f32.mrf.mxu3  ;;  %1666 = vmatpush.msrb.mxu2 %v7200_v25  ;;  %1686 = vmatpush.msra.mxu3 %v7202_v13 }
 0x536   :  { %10367 = vst [vmem:[#allocation34_spill] sm:$0xff] %v7200_v25  ;;  %v1334_v59 = vrot.slane %v1305_v16, 2  ;;  %v1335_v17 = vrot.slane %v1325_v5, 2  ;;  %1710 = vmatpush.msra.mxu0 %v7016_v39  ;;  %1730 = vmatpush.msrb.mxu1 %v7018_v40 }
 0x537   :  { %10368 = vst [vmem:[#allocation39_spill] sm:$0xff] %v7202_v13  ;;  %1750 = vmatpush.msra.mxu2 %v7020_v34  ;;  %1770 = vmatpush.msrb.mxu3 %v7024_v53 }
 0x538   :  { %v1342_v54 = vadd.f32 %v1334_v59, %v10346_v42  ;;  %v1343_v29 = vadd.f32 %v1335_v17, %v10347_v45  ;;  %1711 = vmatpush.msra.mxu0 %v7028_v43  ;;  %1731 = vmatpush.msrb.mxu1 %v7030_v44 }
 0x539   :  { %v5221_v12 = vpop.eup %5220  ;;  %1751 = vmatpush.msra.mxu2 %v7032_v46  ;;  %1771 = vmatpush.msrb.mxu3 %v7036_v47 }
 0x53a   :  { %v5223_v5 = vpop.eup %5222  ;;  %5224 = vtanh.f32 %v1342_v54  ;;  %v1348_v16 = vmul.f32 0.5, %v5221_v12  ;;  %1712 = vmatpush.msra.mxu0 %v7040_v55  ;;  %1732 = vmatpush.msrb.mxu1 %v7042_v58  ;;  %v1355_v54 = vrot.slane %v7003_v28, 6 }
 0x53b   :  { %v1350_v11 = vmul.f32 0.5, %v5223_v5  ;;  %5226 = vtanh.f32 %v1343_v29  ;;  %1752 = vmatpush.msra.mxu2 %v7044_v3  ;;  %1772 = vmatpush.msrb.mxu3 %v7048_v4 }
 0x53c   :  { %v1349_v45 = vadd.f32 0.5, %v1348_v16  ;;  %1713 = vmatpush.msra.mxu0 %v7052_v10  ;;  %1733 = vmatpush.msrb.mxu1 %v7054_v6 }
 0x53d   :  { %v1351_v42 = vadd.f32 0.5, %v1350_v11  ;;  %1753 = vmatpush.msra.mxu2 %v7056_v7  ;;  %1773 = vmatpush.msrb.mxu3 %v7060_v8 }
 0x53e   :  { %1714 = vmatpush.msra.mxu0 %v7064_v21  ;;  %1734 = vmatpush.msrb.mxu1 %v7066_v51 }
 0x53f   :  { %v1357_v11 = vmul.f32 %v1355_v54, %v1351_v42  ;;  %1754 = vmatpush.msra.mxu2 %v7068_v0  ;;  %1774 = vmatpush.msrb.mxu3 %v7072_v2  ;;  %v10369_v54 = vld [vmem:[#allocation43_spill] sm:$0xff] }
 0x540   :  { %v5225_v59 = vpop.eup %5224  ;;  %1715 = vmatpush.msra.mxu0 %v7076_v35  ;;  %1735 = vmatpush.msrb.mxu1 %v7078_v49 }
 0x541   :  { %v1358_v29 = vmul.f32 %v5225_v59, %v1349_v45  ;;  %v5227_v28 = vpop.eup %5226  ;;  %1755 = vmatpush.msra.mxu2 %v7080_v50  ;;  %1775 = vmatpush.msrb.mxu3 %v7084_v38  ;;  %v10370_v59 = vld [vmem:[#allocation45_spill] sm:$0xff] }
 0x542   :  { %1716 = vmatpush.msra.mxu0 %v7088_v1  ;;  %1736 = vmatpush.msrb.mxu1 %v7090_v36  ;;  %v1352_v17 = vmul.f32 0.5, %v5227_v28  ;;  %v10374_v28 = vld [vmem:[#allocation28_spill] sm:$0xff] }
 0x543   :  { %v1359_v12 = vadd.f32 %v1358_v29, %v1357_v11  ;;  %1756 = vmatpush.msra.mxu2 %v7092_v56  ;;  %1776 = vmatpush.msrb.mxu3 %v7096_v15  ;;  %v10371_v11 = vld [vmem:[#allocation31_spill] sm:$0xff]  ;;  %v10372_v29 = vld [vmem:[#allocation25_spill] sm:$0xff] }
 0x544   :  { %1717 = vmatpush.msra.mxu0 %v7098_v60  ;;  %1737 = vmatpush.msrb.mxu1 %v7100_v41  ;;  %v1353_v5 = vadd.f32 0.5, %v1352_v17  ;;  %v10376_v17 = vld [vmem:[#allocation27_spill] sm:$0xff] }
 0x545   :  { %5228 = vtanh.f32 %v1359_v12  ;;  %1757 = vmatpush.msra.mxu2 %v7104_v37  ;;  %1777 = vmatpush.msrb.mxu3 %v7106_v14  ;;  %v10375_v12 = vld [vmem:[#allocation26_spill] sm:$0xff] }
 0x546   :  { %1718 = vmatpush.msra.mxu0 %v7108_v20  ;;  %1738 = vmatpush.msrb.mxu1 %v7112_v22 }
 0x547   :  { %1758 = vmatpush.msra.mxu2 %v7114_v23  ;;  %1778 = vmatpush.msrb.mxu3 %v7116_v26 }
 0x548   :  { %1719 = vmatpush.msra.mxu0 %v7120_v27  ;;  %1739 = vmatpush.msrb.mxu1 %v7122_v30 }
 0x549   :  { %1759 = vmatpush.msra.mxu2 %v7126_v31  ;;  %1779 = vmatpush.msrb.mxu3 %v7128_v48 }
 0x54a   :  { %1720 = vmatpush.msra.mxu0 %v7132_v52  ;;  %1740 = vmatpush.msrb.mxu1 %v7134_v61 }
 0x54b   :  { %v5229_v16 = vpop.eup %5228  ;;  %1760 = vmatpush.msra.mxu2 %v7138_v33  ;;  %1780 = vmatpush.msrb.mxu3 %v7140_v9 }
 0x54c   :  { %v1361_v42 = vmul.f32 %v5229_v16, %v1353_v5  ;;  %1721 = vmatpush.msra.mxu0 %v7144_v62  ;;  %1741 = vmatpush.msrb.mxu1 %v7146_v18  ;;  %v10377_v5 = vld [vmem:[#allocation29_spill] sm:$0xff]  ;;  %v10378_v16 = vmov 0.0  }
 0x54d   :  { %1761 = vmatpush.msra.mxu2 %v10369_v54  ;;  %1781 = vmatpush.msrb.mxu3 %v10370_v59 }
 0x54e   :  { %v1364_v45 = vsel %vm835_vm3, %v7010_v19, %v1361_v42  ;;  %1722 = vmatpush.msra.mxu0 %v10371_v11  ;;  %1742 = vmatpush.msrb.mxu1 %v10372_v29  ;;  %v10373_v19 = vld [vmem:[#allocation40_spill] sm:$0xff] }
 0x54f   :  { %1462 = vmatmul.f32.gmra.mxu0 %v1364_v45  ;;  %1485 = vmatmul.f32.gmra.mxu1 %v1364_v45  ;;  %v10379_v42 = vld [vmem:[#allocation32_spill] sm:$0xff] }
 0x550   :  { %1508 = vmatmul.f32.gmra.mxu2 %v1364_v45  ;;  %1531 = vmatmul.f32.gmra.mxu3 %v1364_v45  ;;  %v10380_v45 = vld [vmem:[#allocation33_spill] sm:$0xff] }
 0x551   :  { %1762 = vmatpush.msra.mxu2 %v10373_v19  ;;  %1782 = vmatpush.msrb.mxu3 %v10374_v28 }
 0x552   :  { %1723 = vmatpush.msra.mxu0 %v10375_v12  ;;  %1743 = vmatpush.msrb.mxu1 %v10376_v17 }
 0x553   :  { %1763 = vmatpush.msra.mxu2 %v7178_v32  ;;  %1783 = vmatpush.msrb.mxu3 %v10377_v5  ;;  %v10381_v32 = vld [vmem:[#allocation49_spill] sm:$0xff] }
 0x554   :  { %1724 = vmatpush.msra.mxu0 %v10379_v42  ;;  %1744 = vmatpush.msrb.mxu1 %v10380_v45 }
 0x555   :  { %1764 = vmatpush.msra.mxu2 %v7188_v63  ;;  %1784 = vmatpush.msrb.mxu3 %v7190_v57 }
 0x556   :  { %1725 = vmatpush.msra.mxu0 %v7194_v24  ;;  %1745 = vmatpush.msrb.mxu1 %v10381_v32 }
 0x557   :  { %1627 = vmatmul.f32.vlgmr.msrb.gmra.mxu0 %v10378_v16  ;;  %1647 = vmatmul.f32.vlgmr.msra.gmra.mxu1 %v10378_v16 }
 0x558   :  { %1667 = vmatmul.f32.vlgmr.msrb.gmra.mxu2 %v10378_v16  ;;  %1687 = vmatmul.f32.vlgmr.msra.gmra.mxu3 %v10378_v16  ;;  %v10382_v16 = vld [vmem:[#allocation46_spill] sm:$0xff] }
 0x559   :  { %1765 = vmatpush.msra.mxu2 %v7200_v25  ;;  %1785 = vmatpush.msrb.mxu3 %v7202_v13 }
 0x55a   :  { %1827 = vmatpush.msrb.mxu0 %v7016_v39  ;;  %1847 = vmatpush.msra.mxu1 %v7018_v40 }
 0x55b   :  { %1867 = vmatpush.msrb.mxu2 %v7020_v34  ;;  %1887 = vmatpush.msra.mxu3 %v7024_v53 }
 0x55c   :  { %1828 = vmatpush.msrb.mxu0 %v7028_v43  ;;  %1848 = vmatpush.msra.mxu1 %v7030_v44 }
 0x55d   :  { %1868 = vmatpush.msrb.mxu2 %v7032_v46  ;;  %1888 = vmatpush.msra.mxu3 %v7036_v47 }
 0x55e   :  { %1829 = vmatpush.msrb.mxu0 %v7040_v55  ;;  %1849 = vmatpush.msra.mxu1 %v7042_v58 }
 0x55f   :  { %1869 = vmatpush.msrb.mxu2 %v7044_v3  ;;  %1889 = vmatpush.msra.mxu3 %v7048_v4 }
 0x560   :  { %1830 = vmatpush.msrb.mxu0 %v7052_v10  ;;  %1850 = vmatpush.msra.mxu1 %v7054_v6 }
 0x561   :  { %1870 = vmatpush.msrb.mxu2 %v7056_v7  ;;  %1890 = vmatpush.msra.mxu3 %v7060_v8 }
 0x562   :  { %1831 = vmatpush.msrb.mxu0 %v7064_v21  ;;  %1851 = vmatpush.msra.mxu1 %v7066_v51 }
 0x563   :  { %1871 = vmatpush.msrb.mxu2 %v7068_v0  ;;  %1891 = vmatpush.msra.mxu3 %v7072_v2 }
 0x564   :  { %1832 = vmatpush.msrb.mxu0 %v7076_v35  ;;  %1852 = vmatpush.msra.mxu1 %v7078_v49 }
 0x565   :  { %1872 = vmatpush.msrb.mxu2 %v7080_v50  ;;  %1892 = vmatpush.msra.mxu3 %v7084_v38 }
 0x566   :  { %1833 = vmatpush.msrb.mxu0 %v7088_v1  ;;  %1853 = vmatpush.msra.mxu1 %v7090_v36 }
 0x567   :  { %1873 = vmatpush.msrb.mxu2 %v7092_v56  ;;  %1893 = vmatpush.msra.mxu3 %v7096_v15 }
 0x568   :  { %1834 = vmatpush.msrb.mxu0 %v7098_v60  ;;  %1854 = vmatpush.msra.mxu1 %v7100_v41 }
 0x569   :  { %1874 = vmatpush.msrb.mxu2 %v7104_v37  ;;  %1894 = vmatpush.msra.mxu3 %v7106_v14 }
 0x56a   :  { %1835 = vmatpush.msrb.mxu0 %v7108_v20  ;;  %1855 = vmatpush.msra.mxu1 %v7112_v22 }
 0x56b   :  { %1875 = vmatpush.msrb.mxu2 %v7114_v23  ;;  %1895 = vmatpush.msra.mxu3 %v7116_v26 }
 0x56c   :  { %1836 = vmatpush.msrb.mxu0 %v7120_v27  ;;  %1856 = vmatpush.msra.mxu1 %v7122_v30 }
 0x56d   :  { %1876 = vmatpush.msrb.mxu2 %v7126_v31  ;;  %1896 = vmatpush.msra.mxu3 %v7128_v48 }
 0x56e   :  { %1837 = vmatpush.msrb.mxu0 %v7132_v52  ;;  %1857 = vmatpush.msra.mxu1 %v7134_v61 }
 0x56f   :  { %1877 = vmatpush.msrb.mxu2 %v7138_v33  ;;  %1897 = vmatpush.msra.mxu3 %v7140_v9 }
 0x570   :  { %1838 = vmatpush.msrb.mxu0 %v7144_v62  ;;  %1858 = vmatpush.msra.mxu1 %v7146_v18 }
 0x571   :  { %1878 = vmatpush.msrb.mxu2 %v10369_v54  ;;  %1898 = vmatpush.msra.mxu3 %v10370_v59 }
 0x572   :  { %1839 = vmatpush.msrb.mxu0 %v10371_v11  ;;  %1859 = vmatpush.msra.mxu1 %v10372_v29 }
 0x573   :  { %1879 = vmatpush.msrb.mxu2 %v10373_v19  ;;  %1899 = vmatpush.msra.mxu3 %v10374_v28 }
 0x574   :  { %1840 = vmatpush.msrb.mxu0 %v10375_v12  ;;  %1860 = vmatpush.msra.mxu1 %v10376_v17  ;;  %v1460_v17 = vpop.f32.mrf.mxu0  ;;  %v1506_v12 = vpop.f32.mrf.mxu2 }
 0x575   :  { %1880 = vmatpush.msrb.mxu2 %v10382_v16  ;;  %1900 = vmatpush.msra.mxu3 %v10377_v5  ;;  %v1483_v16 = vpop.f32.mrf.mxu1  ;;  %v1529_v5 = vpop.f32.mrf.mxu3 }
 0x576   :  { %1841 = vmatpush.msrb.mxu0 %v10379_v42  ;;  %1861 = vmatpush.msra.mxu1 %v10380_v45  ;;  %v7350_v45 = vld [vmem:[%s9803_s6] sm:$0xf] }
 0x577   :  { %1881 = vmatpush.msrb.mxu2 %v7188_v63  ;;  %1901 = vmatpush.msra.mxu3 %v7190_v57  ;;  %10383 = vst [vmem:[#allocation35_spill] sm:$0xff] %v7350_v45  ;;  %v9950_v11 = vperm.slane %v7350_v45, 2  ;;  %v9954_v59 = vperm.slane %v7350_v45, 3 }
 0x578   :  { %1842 = vmatpush.msrb.mxu0 %v7194_v24  ;;  %1862 = vmatpush.msra.mxu1 %v10381_v32  ;;  %v9945_v24 = vperm.slane %v7350_v45, 0  ;;  %v9944_v32 = vperm.slane %v7350_v45, 1 }
 0x579   :  { %1882 = vmatpush.msrb.mxu2 %v7200_v25  ;;  %1902 = vmatpush.msra.mxu3 %v7202_v13 }
 0x57a   :  { %v7360_v13 = vadd.f32 %v1460_v17, %v9945_v24  ;;  %v7364_v25 = vadd.f32 %v1483_v16, %v9944_v32  ;;  %v7376_v17 = vadd.f32 %v1506_v12, %v9950_v11  ;;  %v7380_v16 = vadd.f32 %v1529_v5, %v9954_v59 }
 0x57c   :  { %10386 = vst [vmem:[#allocation44_spill] sm:$0xff] %v7360_v13 }
 0x57d   :  { %10387 = vst [vmem:[#allocation37_spill] sm:$0xff] %v7364_v25 }
 0x57e   :  { %10390 = vst [vmem:[#allocation30_spill] sm:$0xff] %v7376_v17 }
 0x57f   :  { %10391 = vst [vmem:[#allocation50_spill] sm:$0xff] %v7380_v16 }
 0x5cc   :  { %v7352_v63 = vpop.f32.mrf.mxu0  ;;  %v7354_v57 = vpop.f32.mrf.mxu1 }
 0x5cd   :  { %10384 = vst [vmem:[#allocation42_spill] sm:$0xff] %v7352_v63 }
 0x5ce   :  { %10385 = vst [vmem:[#allocation36_spill] sm:$0xff] %v7354_v57 }
 0x5d3   :  { %v7366_v42 = vpop.f32.mrf.mxu2  ;;  %v7368_v28 = vpop.f32.mrf.mxu3 }
 0x5d4   :  { %10388 = vst [vmem:[#allocation47_spill] sm:$0xff] %v7366_v42  ;;  %v1628_v19 = vpop.f32.mrf.mxu0  ;;  %v1648_v63 = vpop.f32.mrf.mxu1 }
 0x5d5   :  { %10389 = vst [vmem:[#allocation23_spill] sm:$0xff] %v7368_v28  ;;  %v1691_v57 = vadd.f32 %v1628_v19, %v7360_v13  ;;  %v1692_v29 = vadd.f32 %v1648_v63, %v7364_v25 }
 0x5d7   :  { %5230 = vtanh.f32 %v1691_v57 }
 0x5d8   :  { %5232 = vtanh.f32 %v1692_v29 }
 0x5db   :  { %v1668_v32 = vpop.f32.mrf.mxu2  ;;  %v1688_v24 = vpop.f32.mrf.mxu3 }
 0x5dc   :  { %v1693_v19 = vadd.f32 %v1668_v32, %v7376_v17  ;;  %v1694_v63 = vadd.f32 %v1688_v24, %v7380_v16  ;;  %v10393_v24 = vld [vmem:[#allocation38_spill] sm:$0xff] }
 0x5dd   :  { %v5231_v28 = vpop.eup %5230 }
 0x5de   :  { %v5233_v42 = vpop.eup %5232  ;;  %5234 = vtanh.f32 %v1693_v19  ;;  %v1699_v25 = vmul.f32 0.5, %v5231_v28  ;;  %v10399_v28 = vld [vmem:[#allocation28_spill] sm:$0xff]  ;;  %v10403_v19 = vld [vmem:[#allocation29_spill] sm:$0xff] }
 0x5df   :  { %v1701_v57 = vmul.f32 0.5, %v5233_v42  ;;  %5236 = vtanh.f32 %v1694_v63  ;;  %v10400_v42 = vld [vmem:[#allocation26_spill] sm:$0xff]  ;;  %v10404_v63 = vld [vmem:[#allocation32_spill] sm:$0xff] }
 0x5e0   :  { %v1700_v13 = vadd.f32 0.5, %v1699_v25  ;;  %v10395_v25 = vld [vmem:[#allocation45_spill] sm:$0xff] }
 0x5e1   :  { %v1702_v29 = vadd.f32 0.5, %v1701_v57  ;;  %v10405_v57 = vld [vmem:[#allocation33_spill] sm:$0xff] }
 0x5e3   :  { %v1705_v11 = vmul.f32 0.0, %v1702_v29  ;;  %v10406_v29 = vld [vmem:[#allocation41_spill] sm:$0xff] }
 0x5e4   :  { %v5235_v12 = vpop.eup %5234 }
 0x5e5   :  { %v1706_v54 = vmul.f32 %v5235_v12, %v1700_v13  ;;  %v5237_v45 = vpop.eup %5236  ;;  %v10394_v13 = vld [vmem:[#allocation43_spill] sm:$0xff]  ;;  %v10407_v12 = vld [vmem:[#allocation24_spill] sm:$0xff] }
 0x5e6   :  { %v1703_v59 = vmul.f32 0.5, %v5237_v45  ;;  %v10401_v45 = vld [vmem:[#allocation27_spill] sm:$0xff] }
 0x5e7   :  { %v7384_v5 = vadd.f32 %v1706_v54, %v1705_v11  ;;  %v10396_v54 = vld [vmem:[#allocation31_spill] sm:$0xff]  ;;  %v10398_v11 = vld [vmem:[#allocation40_spill] sm:$0xff] }
 0x5e8   :  { %v1704_v32 = vadd.f32 0.5, %v1703_v59  ;;  %v10397_v59 = vld [vmem:[#allocation25_spill] sm:$0xff] }
 0x5e9   :  { %5238 = vtanh.f32 %v7384_v5 }
 0x5ef   :  { %v5239_v17 = vpop.eup %5238 }
 0x5f0   :  { %v7387_v18 = vmul.f32 %v5239_v17, %v1704_v32  ;;  %v10402_v17 = vld [vmem:[#allocation46_spill] sm:$0xff]  ;;  %v10408_v32 = vld [vmem:[#allocation48_spill] sm:$0xff] }
 0x5f2   :  { %10392 = vst [vmem:[#allocation51_spill] sm:$0xff] %v7387_v18  ;;  %1726 = vmatmul.f32.vlgmr.msra.gmra.mxu0 %v7387_v18  ;;  %1746 = vmatmul.f32.vlgmr.msrb.gmra.mxu1 %v7387_v18 }
 0x5f3   :  { %1766 = vmatmul.f32.vlgmr.msra.gmra.mxu2 %v7387_v18  ;;  %1786 = vmatmul.f32.vlgmr.msrb.gmra.mxu3 %v7387_v18  ;;  %v10409_v18 = vld [vmem:[#allocation49_spill] sm:$0xff] }
 0x5f4   :  { %1944 = vmatpush.msra.mxu0 %v7016_v39  ;;  %1964 = vmatpush.msrb.mxu1 %v7018_v40 }
 0x5f5   :  { %1984 = vmatpush.msra.mxu2 %v7020_v34  ;;  %2004 = vmatpush.msrb.mxu3 %v7024_v53 }
 0x5f6   :  { %1945 = vmatpush.msra.mxu0 %v7028_v43  ;;  %1965 = vmatpush.msrb.mxu1 %v7030_v44 }
 0x5f7   :  { %1985 = vmatpush.msra.mxu2 %v7032_v46  ;;  %2005 = vmatpush.msrb.mxu3 %v7036_v47 }
 0x5f8   :  { %1946 = vmatpush.msra.mxu0 %v7040_v55  ;;  %1966 = vmatpush.msrb.mxu1 %v7042_v58 }
 0x5f9   :  { %1986 = vmatpush.msra.mxu2 %v7044_v3  ;;  %2006 = vmatpush.msrb.mxu3 %v7048_v4 }
 0x5fa   :  { %1947 = vmatpush.msra.mxu0 %v7052_v10  ;;  %1967 = vmatpush.msrb.mxu1 %v7054_v6 }
 0x5fb   :  { %1987 = vmatpush.msra.mxu2 %v7056_v7  ;;  %2007 = vmatpush.msrb.mxu3 %v7060_v8 }
 0x5fc   :  { %1948 = vmatpush.msra.mxu0 %v7064_v21  ;;  %1968 = vmatpush.msrb.mxu1 %v7066_v51 }
 0x5fd   :  { %1988 = vmatpush.msra.mxu2 %v7068_v0  ;;  %2008 = vmatpush.msrb.mxu3 %v7072_v2 }
 0x5fe   :  { %1949 = vmatpush.msra.mxu0 %v7076_v35  ;;  %1969 = vmatpush.msrb.mxu1 %v7078_v49 }
 0x5ff   :  { %1989 = vmatpush.msra.mxu2 %v7080_v50  ;;  %2009 = vmatpush.msrb.mxu3 %v7084_v38 }
 0x600   :  { %1950 = vmatpush.msra.mxu0 %v7088_v1  ;;  %1970 = vmatpush.msrb.mxu1 %v7090_v36 }
 0x601   :  { %1990 = vmatpush.msra.mxu2 %v7092_v56  ;;  %2010 = vmatpush.msrb.mxu3 %v7096_v15 }
 0x602   :  { %1951 = vmatpush.msra.mxu0 %v7098_v60  ;;  %1971 = vmatpush.msrb.mxu1 %v7100_v41 }
 0x603   :  { %1991 = vmatpush.msra.mxu2 %v7104_v37  ;;  %2011 = vmatpush.msrb.mxu3 %v7106_v14 }
 0x604   :  { %1952 = vmatpush.msra.mxu0 %v7108_v20  ;;  %1972 = vmatpush.msrb.mxu1 %v7112_v22 }
 0x605   :  { %1992 = vmatpush.msra.mxu2 %v7114_v23  ;;  %2012 = vmatpush.msrb.mxu3 %v7116_v26 }
 0x606   :  { %1953 = vmatpush.msra.mxu0 %v7120_v27  ;;  %1973 = vmatpush.msrb.mxu1 %v7122_v30 }
 0x607   :  { %1993 = vmatpush.msra.mxu2 %v7126_v31  ;;  %2013 = vmatpush.msrb.mxu3 %v7128_v48 }
 0x608   :  { %1954 = vmatpush.msra.mxu0 %v7132_v52  ;;  %1974 = vmatpush.msrb.mxu1 %v7134_v61 }
 0x609   :  { %1994 = vmatpush.msra.mxu2 %v7138_v33  ;;  %2014 = vmatpush.msrb.mxu3 %v7140_v9 }
 0x60a   :  { %1955 = vmatpush.msra.mxu0 %v7144_v62  ;;  %1975 = vmatpush.msrb.mxu1 %v10393_v24 }
 0x60b   :  { %1995 = vmatpush.msra.mxu2 %v10394_v13  ;;  %2015 = vmatpush.msrb.mxu3 %v10395_v25  ;;  %v10414_v13 = vld [vmem:[#allocation30_spill] sm:$0xff] }
 0x60c   :  { %1956 = vmatpush.msra.mxu0 %v10396_v54  ;;  %1976 = vmatpush.msrb.mxu1 %v10397_v59  ;;  %v10412_v59 = vld [vmem:[#allocation44_spill] sm:$0xff]  ;;  %v10413_v54 = vld [vmem:[#allocation37_spill] sm:$0xff] }
 0x60d   :  { %1996 = vmatpush.msra.mxu2 %v10398_v11  ;;  %2016 = vmatpush.msrb.mxu3 %v10399_v28  ;;  %v10410_v28 = vld [vmem:[#allocation34_spill] sm:$0xff] }
 0x60e   :  { %1957 = vmatpush.msra.mxu0 %v10400_v42  ;;  %1977 = vmatpush.msrb.mxu1 %v10401_v45  ;;  %v10411_v42 = vld [vmem:[#allocation39_spill] sm:$0xff] }
 0x60f   :  { %1997 = vmatpush.msra.mxu2 %v10402_v17  ;;  %2017 = vmatpush.msrb.mxu3 %v10403_v19 }
 0x610   :  { %1958 = vmatpush.msra.mxu0 %v10404_v63  ;;  %1978 = vmatpush.msrb.mxu1 %v10405_v57 }
 0x611   :  { %1998 = vmatpush.msra.mxu2 %v10406_v29  ;;  %2018 = vmatpush.msrb.mxu3 %v10407_v12 }
 0x612   :  { %1959 = vmatpush.msra.mxu0 %v10408_v32  ;;  %1979 = vmatpush.msrb.mxu1 %v10409_v18 }
 0x613   :  { %1999 = vmatpush.msra.mxu2 %v10410_v28  ;;  %2019 = vmatpush.msrb.mxu3 %v10411_v42 }
 0x66f   :  { %v1727_v45 = vpop.f32.mrf.mxu0  ;;  %v1747_v17 = vpop.f32.mrf.mxu1 }
 0x670   :  { %v1794_v11 = vrot.slane %v1727_v45, 6  ;;  %v1795_v19 = vrot.slane %v1747_v17, 6 }
 0x672   :  { %v1802_v63 = vadd.f32 %v1794_v11, %v10412_v59  ;;  %v1803_v57 = vadd.f32 %v1795_v19, %v10413_v54  ;;  %v1817_v19 = vrot.slane %v7384_v5, 6 }
 0x674   :  { %5240 = vtanh.f32 %v1802_v63 }
 0x675   :  { %5242 = vtanh.f32 %v1803_v57 }
 0x676   :  { %v1767_v29 = vpop.f32.mrf.mxu2  ;;  %v1787_v12 = vpop.f32.mrf.mxu3 }
 0x677   :  { %v1796_v25 = vrot.slane %v1767_v29, 6  ;;  %v1797_v32 = vrot.slane %v1787_v12, 6 }
 0x679   :  { %v1804_v18 = vadd.f32 %v1796_v25, %v10414_v13  ;;  %v1805_v28 = vadd.f32 %v1797_v32, %v7380_v16 }
 0x67a   :  { %v5241_v24 = vpop.eup %5240 }
 0x67b   :  { %v5243_v42 = vpop.eup %5242  ;;  %5244 = vtanh.f32 %v1804_v18  ;;  %v1810_v62 = vmul.f32 0.5, %v5241_v24 }
 0x67c   :  { %v1812_v45 = vmul.f32 0.5, %v5243_v42  ;;  %5246 = vtanh.f32 %v1805_v28 }
 0x67d   :  { %v1811_v11 = vadd.f32 0.5, %v1810_v62 }
 0x67e   :  { %v1813_v17 = vadd.f32 0.5, %v1812_v45  ;;  %v10438_v45 = vld [vmem:[#allocation51_spill] sm:$0xff] }
 0x680   :  { %v1819_v57 = vmul.f32 %v1817_v19, %v1813_v17 }
 0x681   :  { %v5245_v63 = vpop.eup %5244 }
 0x682   :  { %v1820_v54 = vmul.f32 %v5245_v63, %v1811_v11  ;;  %v5247_v59 = vpop.eup %5246  ;;  %v7546_v63 = vld [vmem:[#allocation8 + $0x1e0] sm:$0xff] }
 0x683   :  { %v1814_v25 = vmul.f32 0.5, %v5247_v59 }
 0x684   :  { %v7462_v29 = vadd.f32 %v1820_v54, %v1819_v57  ;;  %v7549_v57 = vld [vmem:[#allocation8 + $0x1e8] sm:$0xff] }
 0x685   :  { %v1815_v12 = vadd.f32 0.5, %v1814_v25  ;;  %v7558_v25 = vld [vmem:[#allocation8 + $0x1c0] sm:$0xff] }
 0x686   :  { %5248 = vtanh.f32 %v7462_v29 }
 0x68c   :  { %v5249_v32 = vpop.eup %5248 }
 0x68d   :  { %v7465_v16 = vmul.f32 %v5249_v32, %v1815_v12  ;;  %v7561_v12 = vld [vmem:[#allocation8 + $0x1c8] sm:$0xff]  ;;  %v7564_v32 = vld [vmem:[#allocation8 + $0x1d0] sm:$0xff] }
 0x68f   :  { %v1825_v18 = vrot.slane %v7465_v16, 2  ;;  %v2058_v17 = vsel %vm832_vm2, %v10438_v45, %v7465_v16  ;;  %v7555_v16 = vld [vmem:[#allocation8 + $0x1f8] sm:$0xff]  ;;  %v7657_v45 = vld [vmem:[#allocation8 + $0xc8] sm:$0xff] }
 0x691   :  { %1843 = vmatmul.f32.vlgmr.msrb.gmra.mxu0 %v1825_v18  ;;  %1863 = vmatmul.f32.vlgmr.msra.gmra.mxu1 %v1825_v18 }
 0x692   :  { %1883 = vmatmul.f32.vlgmr.msrb.gmra.mxu2 %v1825_v18  ;;  %1903 = vmatmul.f32.vlgmr.msra.gmra.mxu3 %v1825_v18  ;;  %v7567_v18 = vld [vmem:[#allocation8 + $0x1d8] sm:$0xff] }
 0x693   :  { %2133 = vmatpush.msrb.mxu0 %v7016_v39  ;;  %2153 = vmatpush.msra.mxu1 %v7018_v40  ;;  %v10415_v39 = vld [vmem:[#allocation22_spill] sm:$0xff] }
 0x694   :  { %2173 = vmatpush.msrb.mxu2 %v7020_v34  ;;  %2193 = vmatpush.msra.mxu3 %v7024_v53  ;;  %v10416_v40 = vld [vmem:[#allocation38_spill] sm:$0xff]  ;;  %v10417_v34 = vld [vmem:[#allocation43_spill] sm:$0xff]  ;;  %v10418_v53 = vld [vmem:[#allocation45_spill] sm:$0xff] }
 0x695   :  { %2134 = vmatpush.msrb.mxu0 %v7028_v43  ;;  %2154 = vmatpush.msra.mxu1 %v7030_v44  ;;  %v10419_v43 = vld [vmem:[#allocation31_spill] sm:$0xff]  ;;  %v10420_v44 = vld [vmem:[#allocation25_spill] sm:$0xff]  ;;  %10442 = vst [vmem:[#allocation43_spill] sm:$0xff] %v7657_v45 }
 0x696   :  { %2174 = vmatpush.msrb.mxu2 %v7032_v46  ;;  %2194 = vmatpush.msra.mxu3 %v7036_v47  ;;  %v10421_v46 = vld [vmem:[#allocation40_spill] sm:$0xff] }
 0x697   :  { %2135 = vmatpush.msrb.mxu0 %v7040_v55  ;;  %2155 = vmatpush.msra.mxu1 %v7042_v58  ;;  %v10422_v47 = vld [vmem:[#allocation28_spill] sm:$0xff]  ;;  %v10423_v55 = vld [vmem:[#allocation26_spill] sm:$0xff]  ;;  %v10424_v58 = vld [vmem:[#allocation27_spill] sm:$0xff] }
 0x698   :  { %2175 = vmatpush.msrb.mxu2 %v7044_v3  ;;  %2195 = vmatpush.msra.mxu3 %v7048_v4  ;;  %v10425_v3 = vld [vmem:[#allocation46_spill] sm:$0xff]  ;;  %v10426_v4 = vld [vmem:[#allocation29_spill] sm:$0xff] }
 0x699   :  { %2136 = vmatpush.msrb.mxu0 %v7052_v10  ;;  %2156 = vmatpush.msra.mxu1 %v7054_v6  ;;  %v10427_v10 = vld [vmem:[#allocation32_spill] sm:$0xff]  ;;  %v10428_v6 = vld [vmem:[#allocation33_spill] sm:$0xff] }
 0x69a   :  { %2176 = vmatpush.msrb.mxu2 %v7056_v7  ;;  %2196 = vmatpush.msra.mxu3 %v7060_v8  ;;  %v10429_v7 = vld [vmem:[#allocation41_spill] sm:$0xff]  ;;  %v10430_v8 = vld [vmem:[#allocation24_spill] sm:$0xff] }
 0x69b   :  { %2137 = vmatpush.msrb.mxu0 %v7064_v21  ;;  %2157 = vmatpush.msra.mxu1 %v7066_v51  ;;  %v10431_v21 = vld [vmem:[#allocation48_spill] sm:$0xff]  ;;  %v10432_v51 = vld [vmem:[#allocation49_spill] sm:$0xff] }
 0x69c   :  { %2177 = vmatpush.msrb.mxu2 %v7068_v0  ;;  %2197 = vmatpush.msra.mxu3 %v7072_v2  ;;  %v10433_v0 = vld [vmem:[#allocation34_spill] sm:$0xff]  ;;  %v10434_v2 = vld [vmem:[#allocation39_spill] sm:$0xff] }
 0x69d   :  { %2138 = vmatpush.msrb.mxu0 %v7076_v35  ;;  %2158 = vmatpush.msra.mxu1 %v7078_v49 }
 0x69e   :  { %2178 = vmatpush.msrb.mxu2 %v7080_v50  ;;  %2198 = vmatpush.msra.mxu3 %v7084_v38 }
 0x69f   :  { %2139 = vmatpush.msrb.mxu0 %v7088_v1  ;;  %2159 = vmatpush.msra.mxu1 %v7090_v36  ;;  %v10435_v1 = vld [vmem:[#allocation44_spill] sm:$0xff] }
 0x6a0   :  { %2179 = vmatpush.msrb.mxu2 %v7092_v56  ;;  %2199 = vmatpush.msra.mxu3 %v7096_v15  ;;  %v10436_v56 = vld [vmem:[#allocation37_spill] sm:$0xff] }
 0x6a1   :  { %2140 = vmatpush.msrb.mxu0 %v7098_v60  ;;  %2160 = vmatpush.msra.mxu1 %v7100_v41 }
 0x6a2   :  { %2180 = vmatpush.msrb.mxu2 %v7104_v37  ;;  %2200 = vmatpush.msra.mxu3 %v7106_v14 }
 0x6a3   :  { %2141 = vmatpush.msrb.mxu0 %v7108_v20  ;;  %2161 = vmatpush.msra.mxu1 %v7112_v22 }
 0x6a4   :  { %2181 = vmatpush.msrb.mxu2 %v7114_v23  ;;  %2201 = vmatpush.msra.mxu3 %v7116_v26  ;;  %v10437_v23 = vld [vmem:[#allocation50_spill] sm:$0xff] }
 0x6a5   :  { %2142 = vmatpush.msrb.mxu0 %v7120_v27  ;;  %2162 = vmatpush.msra.mxu1 %v7122_v30 }
 0x6a6   :  { %2182 = vmatpush.msrb.mxu2 %v7126_v31  ;;  %2202 = vmatpush.msra.mxu3 %v7128_v48 }
 0x6a7   :  { %2143 = vmatpush.msrb.mxu0 %v7132_v52  ;;  %2163 = vmatpush.msra.mxu1 %v7134_v61  ;;  %v1934_v61 = vrot.slane %v7462_v29, 6  ;;  %v7552_v29 = vld [vmem:[#allocation8 + $0x1f0] sm:$0xff] }
 0x6a8   :  { %2183 = vmatpush.msrb.mxu2 %v7138_v33  ;;  %2203 = vmatpush.msra.mxu3 %v7140_v9 }
 0x6a9   :  { %2144 = vmatpush.msrb.mxu0 %v10415_v39  ;;  %2164 = vmatpush.msra.mxu1 %v10416_v40  ;;  %v7570_v39 = vld [vmem:[#allocation8 + $0x1a0] sm:$0xff]  ;;  %v7573_v40 = vld [vmem:[#allocation8 + $0x1a8] sm:$0xff] }
 0x6aa   :  { %2184 = vmatpush.msrb.mxu2 %v10417_v34  ;;  %2204 = vmatpush.msra.mxu3 %v10418_v53 }
 0x6ab   :  { %2145 = vmatpush.msrb.mxu0 %v10419_v43  ;;  %2165 = vmatpush.msra.mxu1 %v10420_v44 }
 0x6ac   :  { %2185 = vmatpush.msrb.mxu2 %v10421_v46  ;;  %2205 = vmatpush.msra.mxu3 %v10422_v47 }
 0x6ad   :  { %2146 = vmatpush.msrb.mxu0 %v10423_v55  ;;  %2166 = vmatpush.msra.mxu1 %v10424_v58 }
 0x6ae   :  { %2186 = vmatpush.msrb.mxu2 %v10425_v3  ;;  %2206 = vmatpush.msra.mxu3 %v10426_v4 }
 0x6af   :  { %2147 = vmatpush.msrb.mxu0 %v10427_v10  ;;  %2167 = vmatpush.msra.mxu1 %v10428_v6 }
 0x6b0   :  { %2187 = vmatpush.msrb.mxu2 %v10429_v7  ;;  %2207 = vmatpush.msra.mxu3 %v10430_v8 }
 0x6b1   :  { %2148 = vmatpush.msrb.mxu0 %v10431_v21  ;;  %2168 = vmatpush.msra.mxu1 %v10432_v51 }
 0x6b2   :  { %2188 = vmatpush.msrb.mxu2 %v10433_v0  ;;  %2208 = vmatpush.msra.mxu3 %v10434_v2 }
 0x70e   :  { %v1844_v35 = vpop.f32.mrf.mxu0  ;;  %v1864_v49 = vpop.f32.mrf.mxu1 }
 0x70f   :  { %v1911_v50 = vrot.slane %v1844_v35, 4  ;;  %v1912_v38 = vrot.slane %v1864_v49, 4  ;;  %v7576_v35 = vld [vmem:[#allocation8 + $0x1b0] sm:$0xff]  ;;  %v7579_v49 = vld [vmem:[#allocation8 + $0x1b8] sm:$0xff] }
 0x711   :  { %v1919_v36 = vadd.f32 %v1911_v50, %v10435_v1  ;;  %v1920_v15 = vadd.f32 %v1912_v38, %v10436_v56  ;;  %v7582_v50 = vld [vmem:[#allocation8 + $0x180] sm:$0xff]  ;;  %v7585_v38 = vld [vmem:[#allocation8 + $0x188] sm:$0xff] }
 0x713   :  { %5250 = vtanh.f32 %v1919_v36  ;;  %v7588_v36 = vld [vmem:[#allocation8 + $0x190] sm:$0xff] }
 0x714   :  { %5252 = vtanh.f32 %v1920_v15  ;;  %v7591_v15 = vld [vmem:[#allocation8 + $0x198] sm:$0xff] }
 0x715   :  { %v1884_v60 = vpop.f32.mrf.mxu2  ;;  %v1904_v41 = vpop.f32.mrf.mxu3 }
 0x716   :  { %v1913_v37 = vrot.slane %v1884_v60, 4  ;;  %v1914_v14 = vrot.slane %v1904_v41, 4  ;;  %v7594_v60 = vld [vmem:[#allocation8 + $0x160] sm:$0xff]  ;;  %v7597_v41 = vld [vmem:[#allocation8 + $0x168] sm:$0xff] }
 0x718   :  { %v1921_v20 = vadd.f32 %v1913_v37, %v10414_v13  ;;  %v1922_v26 = vadd.f32 %v1914_v14, %v10437_v23  ;;  %v7600_v37 = vld [vmem:[#allocation8 + $0x170] sm:$0xff]  ;;  %v7603_v14 = vld [vmem:[#allocation8 + $0x178] sm:$0xff] }
 0x719   :  { %v5251_v22 = vpop.eup %5250 }
 0x71a   :  { %v5253_v27 = vpop.eup %5252  ;;  %5254 = vtanh.f32 %v1921_v20  ;;  %v1927_v30 = vmul.f32 0.5, %v5251_v22  ;;  %v7606_v20 = vld [vmem:[#allocation8 + $0x140] sm:$0xff]  ;;  %v7609_v22 = vld [vmem:[#allocation8 + $0x148] sm:$0xff] }
 0x71b   :  { %v1929_v31 = vmul.f32 0.5, %v5253_v27  ;;  %5256 = vtanh.f32 %v1922_v26  ;;  %v7612_v26 = vld [vmem:[#allocation8 + $0x150] sm:$0xff]  ;;  %v7615_v27 = vld [vmem:[#allocation8 + $0x158] sm:$0xff] }
 0x71c   :  { %v1928_v52 = vadd.f32 0.5, %v1927_v30  ;;  %v7618_v30 = vld [vmem:[#allocation8 + $0x120] sm:$0xff] }
 0x71d   :  { %v1930_v48 = vadd.f32 0.5, %v1929_v31  ;;  %v7621_v31 = vld [vmem:[#allocation8 + $0x128] sm:$0xff] }
 0x71f   :  { %v1936_v9 = vmul.f32 %v1934_v61, %v1930_v48  ;;  %v7624_v48 = vld [vmem:[#allocation8 + $0x130] sm:$0xff]  ;;  %v7630_v61 = vld [vmem:[#allocation8 + $0x100] sm:$0xff] }
 0x720   :  { %v5255_v33 = vpop.eup %5254 }
 0x721   :  { %v1937_v62 = vmul.f32 %v5255_v33, %v1928_v52  ;;  %v5257_v5 = vpop.eup %5256  ;;  %v7627_v52 = vld [vmem:[#allocation8 + $0x138] sm:$0xff]  ;;  %v7633_v33 = vld [vmem:[#allocation8 + $0x108] sm:$0xff] }
 0x722   :  { %v1931_v54 = vmul.f32 0.5, %v5257_v5  ;;  %v7642_v5 = vld [vmem:[#allocation8 + $0xe0] sm:$0xff] }
 0x723   :  { %v7537_v24 = vadd.f32 %v1937_v62, %v1936_v9  ;;  %v7636_v9 = vld [vmem:[#allocation8 + $0x110] sm:$0xff]  ;;  %v7639_v62 = vld [vmem:[#allocation8 + $0x118] sm:$0xff] }
 0x724   :  { %v1932_v59 = vadd.f32 0.5, %v1931_v54  ;;  %v7645_v54 = vld [vmem:[#allocation8 + $0xe8] sm:$0xff] }
 0x725   :  { %5258 = vtanh.f32 %v7537_v24 }
 0x72b   :  { %v5259_v28 = vpop.eup %5258 }
 0x72c   :  { %v1940_v42 = vmul.f32 %v5259_v28, %v1932_v59  ;;  %v7648_v59 = vld [vmem:[#allocation8 + $0xf0] sm:$0xff]  ;;  %v7651_v28 = vld [vmem:[#allocation8 + $0xf8] sm:$0xff] }
 0x72d   :  { %10439 = vst [vmem:[#allocation30_spill] sm:$0xff] %v7648_v59 }
 0x72e   :  { %v1942_v11 = vrot.slane %v1940_v42, 4  ;;  %v7544_v19 = vsel %vm205_vm0, %v2058_v17, %v1940_v42  ;;  %10440 = vst [vmem:[#allocation22_spill] sm:$0xff] %v7651_v28  ;;  %v7654_v42 = vld [vmem:[#allocation8 + $0xc0] sm:$0xff]  ;;  %v7660_v17 = vld [vmem:[#allocation8 + $0xd0] sm:$0xff] }
 0x72f   :  { %10441 = vst [vmem:[#allocation38_spill] sm:$0xff] %v7654_v42 }
 0x730   :  { %1960 = vmatmul.f32.vlgmr.msra.gmra.mxu0 %v1942_v11  ;;  %1980 = vmatmul.f32.vlgmr.msrb.gmra.mxu1 %v1942_v11  ;;  %10443 = vst [vmem:[#allocation45_spill] sm:$0xff] %v7660_v17 }
 0x731   :  { %2000 = vmatmul.f32.vlgmr.msra.gmra.mxu2 %v1942_v11  ;;  %2020 = vmatmul.f32.vlgmr.msrb.gmra.mxu3 %v1942_v11  ;;  %v7663_v11 = vld [vmem:[#allocation8 + $0xd8] sm:$0xff] }
 0x732   :  { %2235 = vmatpush.msra.mxu0 %v7546_v63  ;;  %2255 = vmatpush.msrb.mxu1 %v7549_v57  ;;  %10444 = vst [vmem:[#allocation31_spill] sm:$0xff] %v7663_v11 }
 0x733   :  { %2275 = vmatpush.msra.mxu2 %v7552_v29  ;;  %2295 = vmatpush.msrb.mxu3 %v7555_v16 }
 0x734   :  { %2236 = vmatpush.msra.mxu0 %v7558_v25  ;;  %2256 = vmatpush.msrb.mxu1 %v7561_v12 }
 0x735   :  { %2276 = vmatpush.msra.mxu2 %v7564_v32  ;;  %2296 = vmatpush.msrb.mxu3 %v7567_v18 }
 0x736   :  { %2237 = vmatpush.msra.mxu0 %v7570_v39  ;;  %2257 = vmatpush.msrb.mxu1 %v7573_v40 }
 0x737   :  { %2277 = vmatpush.msra.mxu2 %v7576_v35  ;;  %2297 = vmatpush.msrb.mxu3 %v7579_v49 }
 0x738   :  { %2238 = vmatpush.msra.mxu0 %v7582_v50  ;;  %2258 = vmatpush.msrb.mxu1 %v7585_v38 }
 0x739   :  { %2278 = vmatpush.msra.mxu2 %v7588_v36  ;;  %2298 = vmatpush.msrb.mxu3 %v7591_v15 }
 0x73a   :  { %2239 = vmatpush.msra.mxu0 %v7594_v60  ;;  %2259 = vmatpush.msrb.mxu1 %v7597_v41 }
 0x73b   :  { %2279 = vmatpush.msra.mxu2 %v7600_v37  ;;  %2299 = vmatpush.msrb.mxu3 %v7603_v14 }
 0x73c   :  { %2240 = vmatpush.msra.mxu0 %v7606_v20  ;;  %2260 = vmatpush.msrb.mxu1 %v7609_v22 }
 0x73d   :  { %2280 = vmatpush.msra.mxu2 %v7612_v26  ;;  %2300 = vmatpush.msrb.mxu3 %v7615_v27 }
 0x73e   :  { %2241 = vmatpush.msra.mxu0 %v7618_v30  ;;  %2261 = vmatpush.msrb.mxu1 %v7621_v31 }
 0x73f   :  { %2281 = vmatpush.msra.mxu2 %v7624_v48  ;;  %2301 = vmatpush.msrb.mxu3 %v7627_v52 }
 0x740   :  { %2242 = vmatpush.msra.mxu0 %v7630_v61  ;;  %2262 = vmatpush.msrb.mxu1 %v7633_v33 }
 0x741   :  { %2282 = vmatpush.msra.mxu2 %v7636_v9  ;;  %2302 = vmatpush.msrb.mxu3 %v7639_v62 }
 0x742   :  { %2243 = vmatpush.msra.mxu0 %v7642_v5  ;;  %2263 = vmatpush.msrb.mxu1 %v7645_v54 }
 0x743   :  { %2283 = vmatpush.msra.mxu2 %v7648_v59  ;;  %2303 = vmatpush.msrb.mxu3 %v7651_v28  ;;  %v7666_v59 = vld [vmem:[#allocation8 + $0xa0] sm:$0xff]  ;;  %v7669_v28 = vld [vmem:[#allocation8 + $0xa8] sm:$0xff] }
 0x744   :  { %2244 = vmatpush.msra.mxu0 %v7654_v42  ;;  %2264 = vmatpush.msrb.mxu1 %v7657_v45  ;;  %v7672_v42 = vld [vmem:[#allocation8 + $0xb0] sm:$0xff]  ;;  %v7675_v45 = vld [vmem:[#allocation8 + $0xb8] sm:$0xff] }
 0x745   :  { %2284 = vmatpush.msra.mxu2 %v7660_v17  ;;  %2304 = vmatpush.msrb.mxu3 %v7663_v11  ;;  %v7678_v17 = vld [vmem:[#allocation8 + $0x80] sm:$0xff]  ;;  %v7681_v11 = vld [vmem:[#allocation8 + $0x88] sm:$0xff] }
 0x746   :  { %2245 = vmatpush.msra.mxu0 %v7666_v59  ;;  %2265 = vmatpush.msrb.mxu1 %v7669_v28  ;;  %10445 = vst [vmem:[#allocation25_spill] sm:$0xff] %v7681_v11 }
 0x747   :  { %2285 = vmatpush.msra.mxu2 %v7672_v42  ;;  %2305 = vmatpush.msrb.mxu3 %v7675_v45 }
 0x748   :  { %2246 = vmatpush.msra.mxu0 %v7678_v17  ;;  %2266 = vmatpush.msrb.mxu1 %v7681_v11 }
 0x749   :  { %2286 = vmatpush.msra.mxu2 %v10417_v34  ;;  %2306 = vmatpush.msrb.mxu3 %v10418_v53 }
 0x74a   :  { %2247 = vmatpush.msra.mxu0 %v10419_v43  ;;  %2267 = vmatpush.msrb.mxu1 %v10420_v44 }
 0x74b   :  { %2287 = vmatpush.msra.mxu2 %v10421_v46  ;;  %2307 = vmatpush.msrb.mxu3 %v10422_v47 }
 0x74c   :  { %2248 = vmatpush.msra.mxu0 %v10423_v55  ;;  %2268 = vmatpush.msrb.mxu1 %v10424_v58 }
 0x74d   :  { %2288 = vmatpush.msra.mxu2 %v10425_v3  ;;  %2308 = vmatpush.msrb.mxu3 %v10426_v4 }
 0x74e   :  { %2249 = vmatpush.msra.mxu0 %v10427_v10  ;;  %2269 = vmatpush.msrb.mxu1 %v10428_v6 }
 0x74f   :  { %2289 = vmatpush.msra.mxu2 %v10429_v7  ;;  %2309 = vmatpush.msrb.mxu3 %v10430_v8 }
 0x750   :  { %2250 = vmatpush.msra.mxu0 %v10431_v21  ;;  %2270 = vmatpush.msrb.mxu1 %v10432_v51 }
 0x751   :  { %2290 = vmatpush.msra.mxu2 %v10433_v0  ;;  %2310 = vmatpush.msrb.mxu3 %v10434_v2 }
 0x7ad   :  { %v1961_v34 = vpop.f32.mrf.mxu0  ;;  %v1981_v53 = vpop.f32.mrf.mxu1 }
 0x7ae   :  { %v2028_v43 = vrot.slane %v1961_v34, 2  ;;  %v2029_v44 = vrot.slane %v1981_v53, 2 }
 0x7b0   :  { %v2036_v46 = vadd.f32 %v2028_v43, %v10435_v1  ;;  %v2037_v47 = vadd.f32 %v2029_v44, %v10436_v56  ;;  %v2051_v1 = vrot.slane %v7537_v24, 6  ;;  %v10447_v24 = vld [vmem:[#allocation30_spill] sm:$0xff] }
 0x7b2   :  { %5260 = vtanh.f32 %v2036_v46 }
 0x7b3   :  { %5262 = vtanh.f32 %v2037_v47 }
 0x7b4   :  { %v2001_v55 = vpop.f32.mrf.mxu2  ;;  %v2021_v58 = vpop.f32.mrf.mxu3 }
 0x7b5   :  { %v2030_v3 = vrot.slane %v2001_v55, 2  ;;  %v2031_v4 = vrot.slane %v2021_v58, 2 }
 0x7b7   :  { %v2038_v10 = vadd.f32 %v2030_v3, %v10414_v13  ;;  %v2039_v7 = vadd.f32 %v2031_v4, %v10437_v23  ;;  %v10449_v3 = vld [vmem:[#allocation38_spill] sm:$0xff]  ;;  %v10450_v4 = vld [vmem:[#allocation43_spill] sm:$0xff] }
 0x7b8   :  { %v5261_v6 = vpop.eup %5260 }
 0x7b9   :  { %v5263_v8 = vpop.eup %5262  ;;  %5264 = vtanh.f32 %v2038_v10  ;;  %v2044_v21 = vmul.f32 0.5, %v5261_v6  ;;  %v10451_v10 = vld [vmem:[#allocation45_spill] sm:$0xff]  ;;  %v10452_v6 = vld [vmem:[#allocation31_spill] sm:$0xff] }
 0x7ba   :  { %v2046_v51 = vmul.f32 0.5, %v5263_v8  ;;  %5266 = vtanh.f32 %v2039_v7  ;;  %v7760_v7 = vld [vmem:[#allocation8 + $0x90] sm:$0xff]  ;;  %v7763_v8 = vld [vmem:[#allocation8 + $0x98] sm:$0xff] }
 0x7bb   :  { %v2045_v2 = vadd.f32 0.5, %v2044_v21  ;;  %10453 = vst [vmem:[#allocation28_spill] sm:$0xff] %v7760_v7  ;;  %v7766_v21 = vld [vmem:[#allocation8 + $0x60] sm:$0xff] }
 0x7bc   :  { %v2047_v0 = vadd.f32 0.5, %v2046_v51  ;;  %10454 = vst [vmem:[#allocation26_spill] sm:$0xff] %v7763_v8  ;;  %v7769_v51 = vld [vmem:[#allocation8 + $0x68] sm:$0xff] }
 0x7bd   :  { %10455 = vst [vmem:[#allocation27_spill] sm:$0xff] %v7766_v21 }
 0x7be   :  { %v2053_v34 = vmul.f32 %v2051_v1, %v2047_v0  ;;  %10456 = vst [vmem:[#allocation46_spill] sm:$0xff] %v7769_v51  ;;  %v7772_v0 = vld [vmem:[#allocation8 + $0x70] sm:$0xff]  ;;  %v7778_v1 = vld [vmem:[#allocation8 + $0x40] sm:$0xff] }
 0x7bf   :  { %v5265_v56 = vpop.eup %5264  ;;  %10457 = vst [vmem:[#allocation29_spill] sm:$0xff] %v7772_v0 }
 0x7c0   :  { %v2054_v53 = vmul.f32 %v5265_v56, %v2045_v2  ;;  %v5267_v43 = vpop.eup %5266  ;;  %v7775_v2 = vld [vmem:[#allocation8 + $0x78] sm:$0xff]  ;;  %10459 = vst [vmem:[#allocation33_spill] sm:$0xff] %v7778_v1  ;;  %v7781_v56 = vld [vmem:[#allocation8 + $0x48] sm:$0xff] }
 0x7c1   :  { %v2048_v13 = vmul.f32 0.5, %v5267_v43  ;;  %10458 = vst [vmem:[#allocation32_spill] sm:$0xff] %v7775_v2  ;;  %v7790_v43 = vld [vmem:[#allocation8 + $0x20] sm:$0xff] }
 0x7c2   :  { %v7707_v44 = vadd.f32 %v2054_v53, %v2053_v34  ;;  %10460 = vst [vmem:[#allocation41_spill] sm:$0xff] %v7781_v56  ;;  %v7784_v34 = vld [vmem:[#allocation8 + $0x50] sm:$0xff]  ;;  %v7787_v53 = vld [vmem:[#allocation8 + $0x58] sm:$0xff] }
 0x7c3   :  { %v2049_v46 = vadd.f32 0.5, %v2048_v13  ;;  %10461 = vst [vmem:[#allocation24_spill] sm:$0xff] %v7784_v34  ;;  %v7793_v13 = vld [vmem:[#allocation8 + $0x28] sm:$0xff] }
 0x7c4   :  { %5268 = vtanh.f32 %v7707_v44  ;;  %10462 = vst [vmem:[#allocation48_spill] sm:$0xff] %v7787_v53 }
 0x7c5   :  { %10463 = vst [vmem:[#allocation49_spill] sm:$0xff] %v7790_v43 }
 0x7c6   :  { %10464 = vst [vmem:[#allocation34_spill] sm:$0xff] %v7793_v13 }
 0x7ca   :  { %v5269_v23 = vpop.eup %5268 }
 0x7cb   :  { %v2057_v47 = vmul.f32 %v5269_v23, %v2049_v46  ;;  %v7796_v46 = vld [vmem:[#allocation8 + $0x30] sm:$0xff]  ;;  %v7799_v23 = vld [vmem:[#allocation8 + $0x38] sm:$0xff] }
 0x7cc   :  { %10465 = vst [vmem:[#allocation39_spill] sm:$0xff] %v7796_v46 }
 0x7cd   :  { %v2131_v55 = vrot.slane %v2057_v47, 6  ;;  %v7712_v58 = vsel %vm835_vm3, %v7544_v19, %v2057_v47  ;;  %v10448_v19 = vld [vmem:[#allocation22_spill] sm:$0xff]  ;;  %10466 = vst [vmem:[#allocation44_spill] sm:$0xff] %v7799_v23 }
 0x7ce   :  { %10446 = vst [vmem:[#allocation40_spill] sm:$0xff] %v7712_v58  ;;  %v7802_v47 = vld [vmem:[#allocation8] sm:$0xff]  ;;  %v7808_v58 = vld [vmem:[#allocation8 + $0x10] sm:$0xff] }
 0x7cf   :  { %2149 = vmatmul.f32.vlgmr.msrb.gmra.mxu0 %v2131_v55  ;;  %2169 = vmatmul.f32.vlgmr.msra.gmra.mxu1 %v2131_v55  ;;  %10467 = vst [vmem:[#allocation37_spill] sm:$0xff] %v7802_v47 }
 0x7d0   :  { %2189 = vmatmul.f32.vlgmr.msrb.gmra.mxu2 %v2131_v55  ;;  %2209 = vmatmul.f32.vlgmr.msra.gmra.mxu3 %v2131_v55  ;;  %v7805_v55 = vld [vmem:[#allocation8 + $0x8] sm:$0xff]  ;;  %10469 = vst [vmem:[#allocation51_spill] sm:$0xff] %v7808_v58 }
 0x7d1   :  { %2352 = vmatpush.msrb.mxu0 %v7546_v63  ;;  %2372 = vmatpush.msra.mxu1 %v7549_v57  ;;  %10468 = vst [vmem:[#allocation50_spill] sm:$0xff] %v7805_v55 }
 0x7d2   :  { %2392 = vmatpush.msrb.mxu2 %v7552_v29  ;;  %2412 = vmatpush.msra.mxu3 %v7555_v16 }
 0x7d3   :  { %2353 = vmatpush.msrb.mxu0 %v7558_v25  ;;  %2373 = vmatpush.msra.mxu1 %v7561_v12 }
 0x7d4   :  { %2393 = vmatpush.msrb.mxu2 %v7564_v32  ;;  %2413 = vmatpush.msra.mxu3 %v7567_v18 }
 0x7d5   :  { %2354 = vmatpush.msrb.mxu0 %v7570_v39  ;;  %2374 = vmatpush.msra.mxu1 %v7573_v40 }
 0x7d6   :  { %2394 = vmatpush.msrb.mxu2 %v7576_v35  ;;  %2414 = vmatpush.msra.mxu3 %v7579_v49 }
 0x7d7   :  { %2355 = vmatpush.msrb.mxu0 %v7582_v50  ;;  %2375 = vmatpush.msra.mxu1 %v7585_v38 }
 0x7d8   :  { %2395 = vmatpush.msrb.mxu2 %v7588_v36  ;;  %2415 = vmatpush.msra.mxu3 %v7591_v15 }
 0x7d9   :  { %2356 = vmatpush.msrb.mxu0 %v7594_v60  ;;  %2376 = vmatpush.msra.mxu1 %v7597_v41 }
 0x7da   :  { %2396 = vmatpush.msrb.mxu2 %v7600_v37  ;;  %2416 = vmatpush.msra.mxu3 %v7603_v14 }
 0x7db   :  { %2357 = vmatpush.msrb.mxu0 %v7606_v20  ;;  %2377 = vmatpush.msra.mxu1 %v7609_v22 }
 0x7dc   :  { %2397 = vmatpush.msrb.mxu2 %v7612_v26  ;;  %2417 = vmatpush.msra.mxu3 %v7615_v27 }
 0x7dd   :  { %2358 = vmatpush.msrb.mxu0 %v7618_v30  ;;  %2378 = vmatpush.msra.mxu1 %v7621_v31 }
 0x7de   :  { %2398 = vmatpush.msrb.mxu2 %v7624_v48  ;;  %2418 = vmatpush.msra.mxu3 %v7627_v52 }
 0x7df   :  { %2359 = vmatpush.msrb.mxu0 %v7630_v61  ;;  %2379 = vmatpush.msra.mxu1 %v7633_v33 }
 0x7e0   :  { %2399 = vmatpush.msrb.mxu2 %v7636_v9  ;;  %2419 = vmatpush.msra.mxu3 %v7639_v62 }
 0x7e1   :  { %2360 = vmatpush.msrb.mxu0 %v7642_v5  ;;  %2380 = vmatpush.msra.mxu1 %v7645_v54 }
 0x7e2   :  { %2400 = vmatpush.msrb.mxu2 %v10447_v24  ;;  %2420 = vmatpush.msra.mxu3 %v10448_v19 }
 0x7e3   :  { %2361 = vmatpush.msrb.mxu0 %v10449_v3  ;;  %2381 = vmatpush.msra.mxu1 %v10450_v4 }
 0x7e4   :  { %2401 = vmatpush.msrb.mxu2 %v10451_v10  ;;  %2421 = vmatpush.msra.mxu3 %v10452_v6 }
 0x7e5   :  { %2362 = vmatpush.msrb.mxu0 %v7666_v59  ;;  %2382 = vmatpush.msra.mxu1 %v7669_v28 }
 0x7e6   :  { %2402 = vmatpush.msrb.mxu2 %v7672_v42  ;;  %2422 = vmatpush.msra.mxu3 %v7675_v45 }
 0x7e7   :  { %2363 = vmatpush.msrb.mxu0 %v7678_v17  ;;  %2383 = vmatpush.msra.mxu1 %v7681_v11 }
 0x7e8   :  { %2403 = vmatpush.msrb.mxu2 %v7760_v7  ;;  %2423 = vmatpush.msra.mxu3 %v7763_v8 }
 0x7e9   :  { %2364 = vmatpush.msrb.mxu0 %v7766_v21  ;;  %2384 = vmatpush.msra.mxu1 %v7769_v51 }
 0x7ea   :  { %2404 = vmatpush.msrb.mxu2 %v7772_v0  ;;  %2424 = vmatpush.msra.mxu3 %v7775_v2  ;;  %v10479_v0 = vld [vmem:[#allocation47_spill] sm:$0xff] }
 0x7eb   :  { %2365 = vmatpush.msrb.mxu0 %v7778_v1  ;;  %2385 = vmatpush.msra.mxu1 %v7781_v56 }
 0x7ec   :  { %2405 = vmatpush.msrb.mxu2 %v7784_v34  ;;  %2425 = vmatpush.msra.mxu3 %v7787_v53  ;;  %v10473_v53 = vld [vmem:[#allocation42_spill] sm:$0xff] }
 0x7ed   :  { %2366 = vmatpush.msrb.mxu0 %v7790_v43  ;;  %2386 = vmatpush.msra.mxu1 %v7793_v13  ;;  %v7811_v13 = vld [vmem:[#allocation8 + $0x18] sm:$0xff] }
 0x7ee   :  { %2406 = vmatpush.msrb.mxu2 %v7796_v46  ;;  %2426 = vmatpush.msra.mxu3 %v7799_v23  ;;  %10470 = vst [vmem:[#allocation30_spill] sm:$0xff] %v7811_v13  ;;  %v10471_v46 = vld [vmem:[#allocation35_spill] sm:$0xff] }
 0x7ef   :  { %2367 = vmatpush.msrb.mxu0 %v7802_v47  ;;  %2387 = vmatpush.msra.mxu1 %v7805_v55  ;;  %v10472_v43 = vperm.slane %v10471_v46, 0  ;;  %v10475_v34 = vperm.slane %v10471_v46, 1  ;;  %v10476_v47 = vld [vmem:[#allocation36_spill] sm:$0xff] }
 0x7f0   :  { %2407 = vmatpush.msrb.mxu2 %v7808_v58  ;;  %2427 = vmatpush.msra.mxu3 %v7811_v13  ;;  %v10478_v13 = vperm.slane %v10471_v46, 2 }
 0x7f1   :  { %v7817_v23 = vadd.f32 %v10473_v53, %v10472_v43  ;;  %v7822_v56 = vadd.f32 %v10476_v47, %v10475_v34  ;;  %v10481_v53 = vperm.slane %v10471_v46, 3  ;;  %v10482_v43 = vld [vmem:[#allocation23_spill] sm:$0xff] }
 0x7f2   :  { %v7829_v51 = vadd.f32 %v10479_v0, %v10478_v13  ;;  %v2228_v13 = vrot.slane %v7707_v44, 6 }
 0x7f3   :  { %10474 = vst [vmem:[#allocation22_spill] sm:$0xff] %v7817_v23  ;;  %v7834_v21 = vadd.f32 %v10482_v43, %v10481_v53 }
 0x7f4   :  { %10477 = vst [vmem:[#allocation38_spill] sm:$0xff] %v7822_v56 }
 0x7f5   :  { %10480 = vst [vmem:[#allocation43_spill] sm:$0xff] %v7829_v51 }
 0x7f6   :  { %10483 = vst [vmem:[#allocation45_spill] sm:$0xff] %v7834_v21 }
 0x84c   :  { %v2150_v1 = vpop.f32.mrf.mxu0  ;;  %v2170_v55 = vpop.f32.mrf.mxu1 }
 0x84d   :  { %v2213_v2 = vadd.f32 %v2150_v1, %v7817_v23  ;;  %v2214_v58 = vadd.f32 %v2170_v55, %v7822_v56 }
 0x84f   :  { %5270 = vtanh.f32 %v2213_v2 }
 0x850   :  { %5272 = vtanh.f32 %v2214_v58 }
 0x853   :  { %v2190_v34 = vpop.f32.mrf.mxu2  ;;  %v2210_v47 = vpop.f32.mrf.mxu3 }
 0x854   :  { %v2215_v8 = vadd.f32 %v2190_v34, %v7829_v51  ;;  %v2216_v1 = vadd.f32 %v2210_v47, %v7834_v21 }
 0x855   :  { %v5271_v7 = vpop.eup %5270 }
 0x856   :  { %v5273_v55 = vpop.eup %5272  ;;  %5274 = vtanh.f32 %v2215_v8  ;;  %v2221_v58 = vmul.f32 0.5, %v5271_v7 }
 0x857   :  { %v2223_v2 = vmul.f32 0.5, %v5273_v55  ;;  %5276 = vtanh.f32 %v2216_v1  ;;  %v2650_v55 = vld [vmem:[#allocation9 + $0x1e8] sm:$0xff] }
 0x858   :  { %v2222_v0 = vadd.f32 0.5, %v2221_v58  ;;  %v2651_v58 = vld [vmem:[#allocation9 + $0x1f0] sm:$0xff] }
 0x859   :  { %v2224_v56 = vadd.f32 0.5, %v2223_v2  ;;  %v2652_v2 = vld [vmem:[#allocation9 + $0x1f8] sm:$0xff] }
 0x85b   :  { %v2230_v23 = vmul.f32 %v2228_v13, %v2224_v56  ;;  %v2646_v13 = vld [vmem:[#allocation9 + $0x1c8] sm:$0xff] }
 0x85c   :  { %v5275_v46 = vpop.eup %5274 }
 0x85d   :  { %v2231_v53 = vmul.f32 %v5275_v46, %v2222_v0  ;;  %v5277_v43 = vpop.eup %5276  ;;  %v2645_v0 = vld [vmem:[#allocation9 + $0x1c0] sm:$0xff]  ;;  %v2647_v46 = vld [vmem:[#allocation9 + $0x1d0] sm:$0xff] }
 0x85e   :  { %v2225_v34 = vmul.f32 0.5, %v5277_v43  ;;  %v2641_v43 = vld [vmem:[#allocation9 + $0x1a0] sm:$0xff] }
 0x85f   :  { %v7839_v11 = vadd.f32 %v2231_v53, %v2230_v23  ;;  %v2648_v53 = vld [vmem:[#allocation9 + $0x1d8] sm:$0xff] }
 0x860   :  { %v2226_v51 = vadd.f32 0.5, %v2225_v34  ;;  %v2642_v34 = vld [vmem:[#allocation9 + $0x1a8] sm:$0xff] }
 0x861   :  { %5278 = vtanh.f32 %v7839_v11 }
 0x867   :  { %v5279_v47 = vpop.eup %5278 }
 0x868   :  { %v7842_v21 = vmul.f32 %v5279_v47, %v2226_v51  ;;  %v2643_v47 = vld [vmem:[#allocation9 + $0x1b0] sm:$0xff] }
 0x86a   :  { %2251 = vmatmul.f32.vlgmr.msra.gmra.mxu0 %v7842_v21  ;;  %2271 = vmatmul.f32.vlgmr.msrb.gmra.mxu1 %v7842_v21 }
 0x86b   :  { %2291 = vmatmul.f32.vlgmr.msra.gmra.mxu2 %v7842_v21  ;;  %2311 = vmatmul.f32.vlgmr.msrb.gmra.mxu3 %v7842_v21 }
 0x86c   :  { %2469 = vmatpush.msra.mxu0 %v7546_v63  ;;  %2489 = vmatpush.msrb.mxu1 %v7549_v57  ;;  %v10484_v63 = vld [vmem:[#allocation25_spill] sm:$0xff]  ;;  %v10485_v57 = vld [vmem:[#allocation28_spill] sm:$0xff] }
 0x86d   :  { %2509 = vmatpush.msra.mxu2 %v7552_v29  ;;  %2529 = vmatpush.msrb.mxu3 %v7555_v16  ;;  %v10486_v29 = vld [vmem:[#allocation26_spill] sm:$0xff]  ;;  %v10487_v16 = vld [vmem:[#allocation27_spill] sm:$0xff] }
 0x86e   :  { %2470 = vmatpush.msra.mxu0 %v7558_v25  ;;  %2490 = vmatpush.msrb.mxu1 %v7561_v12  ;;  %v10488_v25 = vld [vmem:[#allocation46_spill] sm:$0xff]  ;;  %v10489_v12 = vld [vmem:[#allocation29_spill] sm:$0xff] }
 0x86f   :  { %2510 = vmatpush.msra.mxu2 %v7564_v32  ;;  %2530 = vmatpush.msrb.mxu3 %v7567_v18  ;;  %v10490_v32 = vld [vmem:[#allocation32_spill] sm:$0xff]  ;;  %v10491_v18 = vld [vmem:[#allocation33_spill] sm:$0xff] }
 0x870   :  { %2471 = vmatpush.msra.mxu0 %v7570_v39  ;;  %2491 = vmatpush.msrb.mxu1 %v7573_v40  ;;  %v10492_v39 = vld [vmem:[#allocation41_spill] sm:$0xff]  ;;  %v10493_v40 = vld [vmem:[#allocation24_spill] sm:$0xff] }
 0x871   :  { %2511 = vmatpush.msra.mxu2 %v7576_v35  ;;  %2531 = vmatpush.msrb.mxu3 %v7579_v49  ;;  %v10494_v35 = vld [vmem:[#allocation48_spill] sm:$0xff]  ;;  %v10495_v49 = vld [vmem:[#allocation49_spill] sm:$0xff] }
 0x872   :  { %2472 = vmatpush.msra.mxu0 %v7582_v50  ;;  %2492 = vmatpush.msrb.mxu1 %v7585_v38  ;;  %v10496_v50 = vld [vmem:[#allocation34_spill] sm:$0xff]  ;;  %v10497_v38 = vld [vmem:[#allocation39_spill] sm:$0xff] }
 0x873   :  { %2512 = vmatpush.msra.mxu2 %v7588_v36  ;;  %2532 = vmatpush.msrb.mxu3 %v7591_v15  ;;  %v10498_v36 = vld [vmem:[#allocation44_spill] sm:$0xff]  ;;  %v10499_v15 = vld [vmem:[#allocation37_spill] sm:$0xff] }
 0x874   :  { %2473 = vmatpush.msra.mxu0 %v7594_v60  ;;  %2493 = vmatpush.msrb.mxu1 %v7597_v41  ;;  %v10500_v60 = vld [vmem:[#allocation50_spill] sm:$0xff]  ;;  %v10501_v41 = vld [vmem:[#allocation51_spill] sm:$0xff] }
 0x875   :  { %2513 = vmatpush.msra.mxu2 %v7600_v37  ;;  %2533 = vmatpush.msrb.mxu3 %v7603_v14  ;;  %v10502_v37 = vld [vmem:[#allocation30_spill] sm:$0xff] }
 0x876   :  { %2474 = vmatpush.msra.mxu0 %v7606_v20  ;;  %2494 = vmatpush.msrb.mxu1 %v7609_v22 }
 0x877   :  { %2514 = vmatpush.msra.mxu2 %v7612_v26  ;;  %2534 = vmatpush.msrb.mxu3 %v7615_v27  ;;  %v10503_v27 = vld [vmem:[#allocation22_spill] sm:$0xff] }
 0x878   :  { %2475 = vmatpush.msra.mxu0 %v7618_v30  ;;  %2495 = vmatpush.msrb.mxu1 %v7621_v31  ;;  %v10504_v31 = vld [vmem:[#allocation38_spill] sm:$0xff] }
 0x879   :  { %2515 = vmatpush.msra.mxu2 %v7624_v48  ;;  %2535 = vmatpush.msrb.mxu3 %v7627_v52 }
 0x87a   :  { %2476 = vmatpush.msra.mxu0 %v7630_v61  ;;  %2496 = vmatpush.msrb.mxu1 %v7633_v33 }
 0x87b   :  { %2516 = vmatpush.msra.mxu2 %v7636_v9  ;;  %2536 = vmatpush.msrb.mxu3 %v7639_v62  ;;  %v10505_v62 = vld [vmem:[#allocation43_spill] sm:$0xff] }
 0x87c   :  { %2477 = vmatpush.msra.mxu0 %v7642_v5  ;;  %2497 = vmatpush.msrb.mxu1 %v7645_v54 }
 0x87d   :  { %2517 = vmatpush.msra.mxu2 %v10447_v24  ;;  %2537 = vmatpush.msrb.mxu3 %v10448_v19  ;;  %v2342_v19 = vrot.slane %v7839_v11, 6  ;;  %v2649_v11 = vld [vmem:[#allocation9 + $0x1e0] sm:$0xff] }
 0x87e   :  { %2478 = vmatpush.msra.mxu0 %v10449_v3  ;;  %2498 = vmatpush.msrb.mxu1 %v10450_v4 }
 0x87f   :  { %2518 = vmatpush.msra.mxu2 %v10451_v10  ;;  %2538 = vmatpush.msrb.mxu3 %v10452_v6 }
 0x880   :  { %2479 = vmatpush.msra.mxu0 %v7666_v59  ;;  %2499 = vmatpush.msrb.mxu1 %v7669_v28  ;;  %v10506_v59 = vld [vmem:[#allocation45_spill] sm:$0xff] }
 0x881   :  { %2519 = vmatpush.msra.mxu2 %v7672_v42  ;;  %2539 = vmatpush.msrb.mxu3 %v7675_v45 }
 0x882   :  { %2480 = vmatpush.msra.mxu0 %v7678_v17  ;;  %2500 = vmatpush.msrb.mxu1 %v10484_v63  ;;  %v2644_v63 = vld [vmem:[#allocation9 + $0x1b8] sm:$0xff] }
 0x883   :  { %2520 = vmatpush.msra.mxu2 %v10485_v57  ;;  %2540 = vmatpush.msrb.mxu3 %v10486_v29  ;;  %v2637_v57 = vld [vmem:[#allocation9 + $0x180] sm:$0xff]  ;;  %v2638_v29 = vld [vmem:[#allocation9 + $0x188] sm:$0xff] }
 0x884   :  { %2481 = vmatpush.msra.mxu0 %v10487_v16  ;;  %2501 = vmatpush.msrb.mxu1 %v10488_v25  ;;  %v2639_v16 = vld [vmem:[#allocation9 + $0x190] sm:$0xff]  ;;  %v2640_v25 = vld [vmem:[#allocation9 + $0x198] sm:$0xff] }
 0x885   :  { %2521 = vmatpush.msra.mxu2 %v10489_v12  ;;  %2541 = vmatpush.msrb.mxu3 %v10490_v32  ;;  %v2633_v12 = vld [vmem:[#allocation9 + $0x160] sm:$0xff]  ;;  %v2634_v32 = vld [vmem:[#allocation9 + $0x168] sm:$0xff] }
 0x886   :  { %2482 = vmatpush.msra.mxu0 %v10491_v18  ;;  %2502 = vmatpush.msrb.mxu1 %v10492_v39  ;;  %v2635_v18 = vld [vmem:[#allocation9 + $0x170] sm:$0xff]  ;;  %v2636_v39 = vld [vmem:[#allocation9 + $0x178] sm:$0xff] }
 0x887   :  { %2522 = vmatpush.msra.mxu2 %v10493_v40  ;;  %2542 = vmatpush.msrb.mxu3 %v10494_v35  ;;  %v2629_v40 = vld [vmem:[#allocation9 + $0x140] sm:$0xff]  ;;  %v2630_v35 = vld [vmem:[#allocation9 + $0x148] sm:$0xff] }
 0x888   :  { %2483 = vmatpush.msra.mxu0 %v10495_v49  ;;  %2503 = vmatpush.msrb.mxu1 %v10496_v50  ;;  %v2631_v49 = vld [vmem:[#allocation9 + $0x150] sm:$0xff]  ;;  %v2632_v50 = vld [vmem:[#allocation9 + $0x158] sm:$0xff] }
 0x889   :  { %2523 = vmatpush.msra.mxu2 %v10497_v38  ;;  %2543 = vmatpush.msrb.mxu3 %v10498_v36  ;;  %v2625_v38 = vld [vmem:[#allocation9 + $0x120] sm:$0xff]  ;;  %v2626_v36 = vld [vmem:[#allocation9 + $0x128] sm:$0xff] }
 0x88a   :  { %2484 = vmatpush.msra.mxu0 %v10499_v15  ;;  %2504 = vmatpush.msrb.mxu1 %v10500_v60  ;;  %v2627_v15 = vld [vmem:[#allocation9 + $0x130] sm:$0xff]  ;;  %v2628_v60 = vld [vmem:[#allocation9 + $0x138] sm:$0xff] }
 0x88b   :  { %2524 = vmatpush.msra.mxu2 %v10501_v41  ;;  %2544 = vmatpush.msrb.mxu3 %v10502_v37  ;;  %v2621_v41 = vld [vmem:[#allocation9 + $0x100] sm:$0xff]  ;;  %v2622_v37 = vld [vmem:[#allocation9 + $0x108] sm:$0xff] }
 0x8e7   :  { %v2252_v14 = vpop.f32.mrf.mxu0  ;;  %v2272_v20 = vpop.f32.mrf.mxu1 }
 0x8e8   :  { %v2319_v22 = vrot.slane %v2252_v14, 6  ;;  %v2320_v26 = vrot.slane %v2272_v20, 6  ;;  %v2623_v14 = vld [vmem:[#allocation9 + $0x110] sm:$0xff]  ;;  %v2624_v20 = vld [vmem:[#allocation9 + $0x118] sm:$0xff] }
 0x8ea   :  { %v2327_v30 = vadd.f32 %v2319_v22, %v10503_v27  ;;  %v2328_v48 = vadd.f32 %v2320_v26, %v10504_v31  ;;  %v2617_v22 = vld [vmem:[#allocation9 + $0xe0] sm:$0xff]  ;;  %v2618_v26 = vld [vmem:[#allocation9 + $0xe8] sm:$0xff] }
 0x8ec   :  { %5280 = vtanh.f32 %v2327_v30  ;;  %v2619_v30 = vld [vmem:[#allocation9 + $0xf0] sm:$0xff] }
 0x8ed   :  { %5282 = vtanh.f32 %v2328_v48  ;;  %v2620_v48 = vld [vmem:[#allocation9 + $0xf8] sm:$0xff] }
 0x8ee   :  { %v2292_v52 = vpop.f32.mrf.mxu2  ;;  %v2312_v61 = vpop.f32.mrf.mxu3 }
 0x8ef   :  { %v2321_v33 = vrot.slane %v2292_v52, 6  ;;  %v2322_v9 = vrot.slane %v2312_v61, 6  ;;  %v2613_v52 = vld [vmem:[#allocation9 + $0xc0] sm:$0xff]  ;;  %v2614_v61 = vld [vmem:[#allocation9 + $0xc8] sm:$0xff] }
 0x8f1   :  { %v2329_v5 = vadd.f32 %v2321_v33, %v10505_v62  ;;  %v2330_v28 = vadd.f32 %v2322_v9, %v10506_v59  ;;  %v2615_v33 = vld [vmem:[#allocation9 + $0xd0] sm:$0xff]  ;;  %v2616_v9 = vld [vmem:[#allocation9 + $0xd8] sm:$0xff] }
 0x8f2   :  { %v5281_v54 = vpop.eup %5280 }
 0x8f3   :  { %v5283_v42 = vpop.eup %5282  ;;  %5284 = vtanh.f32 %v2329_v5  ;;  %v2335_v45 = vmul.f32 0.5, %v5281_v54  ;;  %v2609_v5 = vld [vmem:[#allocation9 + $0xa0] sm:$0xff]  ;;  %v2610_v54 = vld [vmem:[#allocation9 + $0xa8] sm:$0xff] }
 0x8f4   :  { %v2337_v17 = vmul.f32 0.5, %v5283_v42  ;;  %5286 = vtanh.f32 %v2330_v28  ;;  %v2611_v28 = vld [vmem:[#allocation9 + $0xb0] sm:$0xff]  ;;  %v2612_v42 = vld [vmem:[#allocation9 + $0xb8] sm:$0xff] }
 0x8f5   :  { %v2336_v24 = vadd.f32 0.5, %v2335_v45  ;;  %v2605_v45 = vld [vmem:[#allocation9 + $0x80] sm:$0xff] }
 0x8f6   :  { %v2338_v44 = vadd.f32 0.5, %v2337_v17 }
 0x8f8   :  { %v2344_v4 = vmul.f32 %v2342_v19, %v2338_v44  ;;  %v2607_v19 = vld [vmem:[#allocation9 + $0x90] sm:$0xff] }
 0x8f9   :  { %v5285_v3 = vpop.eup %5284 }
 0x8fa   :  { %v2345_v10 = vmul.f32 %v5285_v3, %v2336_v24  ;;  %v5287_v6 = vpop.eup %5286  ;;  %v2606_v24 = vld [vmem:[#allocation9 + $0x88] sm:$0xff]  ;;  %v2608_v3 = vld [vmem:[#allocation9 + $0x98] sm:$0xff] }
 0x8fb   :  { %v2339_v8 = vmul.f32 0.5, %v5287_v6 }
 0x8fc   :  { %v7917_v7 = vadd.f32 %v2345_v10, %v2344_v4 }
 0x8fd   :  { %v2340_v51 = vadd.f32 0.5, %v2339_v8 }
 0x8fe   :  { %5288 = vtanh.f32 %v7917_v7 }
 0x904   :  { %v5289_v56 = vpop.eup %5288 }
 0x905   :  { %v7920_v23 = vmul.f32 %v5289_v56, %v2340_v51  ;;  %v2601_v51 = vld [vmem:[#allocation9 + $0x60] sm:$0xff]  ;;  %v2602_v56 = vld [vmem:[#allocation9 + $0x68] sm:$0xff] }
 0x907   :  { %v2350_v1 = vrot.slane %v7920_v23, 2 }
 0x909   :  { %2368 = vmatmul.f32.vlgmr.msrb.gmra.mxu0 %v2350_v1  ;;  %2388 = vmatmul.f32.vlgmr.msra.gmra.mxu1 %v2350_v1 }
 0x90a   :  { %2408 = vmatmul.f32.vlgmr.msrb.gmra.mxu2 %v2350_v1  ;;  %2428 = vmatmul.f32.vlgmr.msra.gmra.mxu3 %v2350_v1  ;;  %v2603_v1 = vld [vmem:[#allocation9 + $0x70] sm:$0xff] }
 0x90b   :  { %2663 = vmatpush.msrb.mxu0 %v2649_v11  ;;  %2686 = vmatpush.msra.mxu1 %v2650_v55  ;;  %v2604_v11 = vld [vmem:[#allocation9 + $0x78] sm:$0xff]  ;;  %v2597_v55 = vld [vmem:[#allocation9 + $0x40] sm:$0xff] }
 0x90c   :  { %2709 = vmatpush.msrb.mxu2 %v2651_v58  ;;  %2732 = vmatpush.msra.mxu3 %v2652_v2  ;;  %v2598_v58 = vld [vmem:[#allocation9 + $0x48] sm:$0xff]  ;;  %v2599_v2 = vld [vmem:[#allocation9 + $0x50] sm:$0xff] }
 0x90d   :  { %2664 = vmatpush.msrb.mxu0 %v2645_v0  ;;  %2687 = vmatpush.msra.mxu1 %v2646_v13  ;;  %v2600_v0 = vld [vmem:[#allocation9 + $0x58] sm:$0xff]  ;;  %v2593_v13 = vld [vmem:[#allocation9 + $0x20] sm:$0xff] }
 0x90e   :  { %2710 = vmatpush.msrb.mxu2 %v2647_v46  ;;  %2733 = vmatpush.msra.mxu3 %v2648_v53  ;;  %v2594_v46 = vld [vmem:[#allocation9 + $0x28] sm:$0xff]  ;;  %v2595_v53 = vld [vmem:[#allocation9 + $0x30] sm:$0xff] }
 0x90f   :  { %2665 = vmatpush.msrb.mxu0 %v2641_v43  ;;  %2688 = vmatpush.msra.mxu1 %v2642_v34  ;;  %v2596_v43 = vld [vmem:[#allocation9 + $0x38] sm:$0xff] }
 0x910   :  { %2711 = vmatpush.msrb.mxu2 %v2643_v47  ;;  %2734 = vmatpush.msra.mxu3 %v2644_v63  ;;  %v2589_v63 = vld [vmem:[#allocation9] sm:$0xff] }
 0x911   :  { %2666 = vmatpush.msrb.mxu0 %v2637_v57  ;;  %2689 = vmatpush.msra.mxu1 %v2638_v29  ;;  %v2590_v57 = vld [vmem:[#allocation9 + $0x8] sm:$0xff] }
 0x912   :  { %2712 = vmatpush.msrb.mxu2 %v2639_v16  ;;  %2735 = vmatpush.msra.mxu3 %v2640_v25  ;;  %v2591_v25 = vld [vmem:[#allocation9 + $0x10] sm:$0xff] }
 0x913   :  { %2667 = vmatpush.msrb.mxu0 %v2633_v12  ;;  %2690 = vmatpush.msra.mxu1 %v2634_v32  ;;  %v2592_v12 = vld [vmem:[#allocation9 + $0x18] sm:$0xff] }
 0x914   :  { %2713 = vmatpush.msrb.mxu2 %v2635_v18  ;;  %2736 = vmatpush.msra.mxu3 %v2636_v39 }
 0x915   :  { %2668 = vmatpush.msrb.mxu0 %v2629_v40  ;;  %2691 = vmatpush.msra.mxu1 %v2630_v35 }
 0x916   :  { %2714 = vmatpush.msrb.mxu2 %v2631_v49  ;;  %2737 = vmatpush.msra.mxu3 %v2632_v50 }
 0x917   :  { %2669 = vmatpush.msrb.mxu0 %v2625_v38  ;;  %2692 = vmatpush.msra.mxu1 %v2626_v36  ;;  %v2459_v36 = vrot.slane %v7917_v7, 6  ;;  %v10507_v7 = vld [vmem:[#allocation40_spill] sm:$0xff] }
 0x918   :  { %2715 = vmatpush.msrb.mxu2 %v2627_v15  ;;  %2738 = vmatpush.msra.mxu3 %v2628_v60 }
 0x919   :  { %2670 = vmatpush.msrb.mxu0 %v2621_v41  ;;  %2693 = vmatpush.msra.mxu1 %v2622_v37 }
 0x91a   :  { %2716 = vmatpush.msrb.mxu2 %v2623_v14  ;;  %2739 = vmatpush.msra.mxu3 %v2624_v20 }
 0x91b   :  { %2671 = vmatpush.msrb.mxu0 %v2617_v22  ;;  %2694 = vmatpush.msra.mxu1 %v2618_v26 }
 0x91c   :  { %2717 = vmatpush.msrb.mxu2 %v2619_v30  ;;  %2740 = vmatpush.msra.mxu3 %v2620_v48  ;;  %v2583_v48 = vsel %vm832_vm2, %v7842_v21, %v7920_v23  ;;  %v7945_v21 = vld [vmem:[#allocation11 + $0x1f0] sm:$0xff]  ;;  %v7949_v23 = vld [vmem:[#allocation11 + $0x1f8] sm:$0xff] }
 0x91d   :  { %2672 = vmatpush.msrb.mxu0 %v2613_v52  ;;  %2695 = vmatpush.msra.mxu1 %v2614_v61 }
 0x91e   :  { %2718 = vmatpush.msrb.mxu2 %v2615_v33  ;;  %2741 = vmatpush.msra.mxu3 %v2616_v9  ;;  %v7941_v33 = vld [vmem:[#allocation11 + $0x1e0] sm:$0xff]  ;;  %v7943_v9 = vld [vmem:[#allocation11 + $0x1e8] sm:$0xff] }
 0x91f   :  { %2673 = vmatpush.msrb.mxu0 %v2609_v5  ;;  %2696 = vmatpush.msra.mxu1 %v2610_v54  ;;  %v7953_v5 = vld [vmem:[#allocation11 + $0x1c0] sm:$0xff]  ;;  %v7955_v54 = vld [vmem:[#allocation11 + $0x1c8] sm:$0xff] }
 0x920   :  { %2719 = vmatpush.msrb.mxu2 %v2611_v28  ;;  %2742 = vmatpush.msra.mxu3 %v2612_v42  ;;  %v7957_v28 = vld [vmem:[#allocation11 + $0x1d0] sm:$0xff]  ;;  %v7961_v42 = vld [vmem:[#allocation11 + $0x1d8] sm:$0xff] }
 0x921   :  { %2674 = vmatpush.msrb.mxu0 %v2605_v45  ;;  %2697 = vmatpush.msra.mxu1 %v2606_v24  ;;  %v7965_v45 = vld [vmem:[#allocation11 + $0x1a0] sm:$0xff]  ;;  %v7973_v24 = vld [vmem:[#allocation11 + $0x1b8] sm:$0xff] }
 0x922   :  { %2720 = vmatpush.msrb.mxu2 %v2607_v19  ;;  %2743 = vmatpush.msra.mxu3 %v2608_v3  ;;  %v7977_v19 = vld [vmem:[#allocation11 + $0x180] sm:$0xff]  ;;  %v7979_v3 = vld [vmem:[#allocation11 + $0x188] sm:$0xff] }
 0x923   :  { %2675 = vmatpush.msrb.mxu0 %v2601_v51  ;;  %2698 = vmatpush.msra.mxu1 %v2602_v56  ;;  %v7993_v51 = vld [vmem:[#allocation11 + $0x170] sm:$0xff]  ;;  %v7997_v56 = vld [vmem:[#allocation11 + $0x178] sm:$0xff] }
 0x924   :  { %2721 = vmatpush.msrb.mxu2 %v2603_v1  ;;  %2744 = vmatpush.msra.mxu3 %v2604_v11  ;;  %v8001_v1 = vld [vmem:[#allocation11 + $0x140] sm:$0xff]  ;;  %v8003_v11 = vld [vmem:[#allocation11 + $0x148] sm:$0xff] }
 0x925   :  { %2676 = vmatpush.msrb.mxu0 %v2597_v55  ;;  %2699 = vmatpush.msra.mxu1 %v2598_v58  ;;  %v8005_v55 = vld [vmem:[#allocation11 + $0x150] sm:$0xff]  ;;  %v8009_v58 = vld [vmem:[#allocation11 + $0x158] sm:$0xff] }
 0x926   :  { %2722 = vmatpush.msrb.mxu2 %v2599_v2  ;;  %2745 = vmatpush.msra.mxu3 %v2600_v0  ;;  %v8013_v2 = vld [vmem:[#allocation11 + $0x120] sm:$0xff]  ;;  %v8015_v0 = vld [vmem:[#allocation11 + $0x128] sm:$0xff] }
 0x927   :  { %2677 = vmatpush.msrb.mxu0 %v2593_v13  ;;  %2700 = vmatpush.msra.mxu1 %v2594_v46  ;;  %v8017_v13 = vld [vmem:[#allocation11 + $0x130] sm:$0xff]  ;;  %v8021_v46 = vld [vmem:[#allocation11 + $0x138] sm:$0xff] }
 0x928   :  { %2723 = vmatpush.msrb.mxu2 %v2595_v53  ;;  %2746 = vmatpush.msra.mxu3 %v2596_v43  ;;  %v8025_v53 = vld [vmem:[#allocation11 + $0x100] sm:$0xff]  ;;  %v8027_v43 = vld [vmem:[#allocation11 + $0x108] sm:$0xff] }
 0x929   :  { %2678 = vmatpush.msrb.mxu0 %v2589_v63  ;;  %2701 = vmatpush.msra.mxu1 %v2590_v57  ;;  %v8037_v63 = vld [vmem:[#allocation11 + $0xe0] sm:$0xff]  ;;  %v8039_v57 = vld [vmem:[#allocation11 + $0xe8] sm:$0xff] }
 0x92a   :  { %2724 = vmatpush.msrb.mxu2 %v2591_v25  ;;  %2747 = vmatpush.msra.mxu3 %v2592_v12  ;;  %v8049_v25 = vld [vmem:[#allocation11 + $0xc0] sm:$0xff]  ;;  %v8051_v12 = vld [vmem:[#allocation11 + $0xc8] sm:$0xff] }
 0x986   :  { %v2369_v17 = vpop.f32.mrf.mxu0  ;;  %v2389_v44 = vpop.f32.mrf.mxu1 }
 0x987   :  { %v2436_v4 = vrot.slane %v2369_v17, 4  ;;  %v2437_v10 = vrot.slane %v2389_v44, 4  ;;  %v7967_v17 = vld [vmem:[#allocation11 + $0x1a8] sm:$0xff]  ;;  %v7969_v44 = vld [vmem:[#allocation11 + $0x1b0] sm:$0xff] }
 0x989   :  { %v2444_v6 = vadd.f32 %v2436_v4, %v10503_v27  ;;  %v2445_v8 = vadd.f32 %v2437_v10, %v10504_v31  ;;  %v7981_v4 = vld [vmem:[#allocation11 + $0x190] sm:$0xff]  ;;  %v7985_v10 = vld [vmem:[#allocation11 + $0x198] sm:$0xff] }
 0x98b   :  { %5290 = vtanh.f32 %v2444_v6  ;;  %v7989_v6 = vld [vmem:[#allocation11 + $0x160] sm:$0xff] }
 0x98c   :  { %5292 = vtanh.f32 %v2445_v8  ;;  %v7991_v8 = vld [vmem:[#allocation11 + $0x168] sm:$0xff] }
 0x98d   :  { %v2409_v34 = vpop.f32.mrf.mxu2  ;;  %v2429_v47 = vpop.f32.mrf.mxu3 }
 0x98e   :  { %v2438_v29 = vrot.slane %v2409_v34, 4  ;;  %v2439_v16 = vrot.slane %v2429_v47, 4  ;;  %v8029_v34 = vld [vmem:[#allocation11 + $0x110] sm:$0xff]  ;;  %v8033_v47 = vld [vmem:[#allocation11 + $0x118] sm:$0xff] }
 0x990   :  { %v2446_v32 = vadd.f32 %v2438_v29, %v10505_v62  ;;  %v2447_v39 = vadd.f32 %v2439_v16, %v10506_v59  ;;  %v8041_v29 = vld [vmem:[#allocation11 + $0xf0] sm:$0xff]  ;;  %v8045_v16 = vld [vmem:[#allocation11 + $0xf8] sm:$0xff] }
 0x991   :  { %v5291_v18 = vpop.eup %5290 }
 0x992   :  { %v5293_v40 = vpop.eup %5292  ;;  %5294 = vtanh.f32 %v2446_v32  ;;  %v2452_v35 = vmul.f32 0.5, %v5291_v18  ;;  %v8053_v32 = vld [vmem:[#allocation11 + $0xd0] sm:$0xff]  ;;  %v8057_v18 = vld [vmem:[#allocation11 + $0xd8] sm:$0xff] }
 0x993   :  { %v2454_v49 = vmul.f32 0.5, %v5293_v40  ;;  %5296 = vtanh.f32 %v2447_v39  ;;  %v8061_v39 = vld [vmem:[#allocation11 + $0xa0] sm:$0xff]  ;;  %v8063_v40 = vld [vmem:[#allocation11 + $0xa8] sm:$0xff] }
 0x994   :  { %v2453_v38 = vadd.f32 0.5, %v2452_v35  ;;  %v8065_v35 = vld [vmem:[#allocation11 + $0xb0] sm:$0xff] }
 0x995   :  { %v2455_v50 = vadd.f32 0.5, %v2454_v49  ;;  %v8069_v49 = vld [vmem:[#allocation11 + $0xb8] sm:$0xff] }
 0x997   :  { %v2461_v60 = vmul.f32 %v2459_v36, %v2455_v50  ;;  %v8071_v50 = vld [vmem:[#allocation11 + $0x80] sm:$0xff] }
 0x998   :  { %v5295_v15 = vpop.eup %5294  ;;  %10508 = vst [vmem:[#allocation31_spill] sm:$0xff] %v8071_v50 }
 0x999   :  { %v2462_v41 = vmul.f32 %v5295_v15, %v2453_v38  ;;  %v5297_v37 = vpop.eup %5296  ;;  %v8073_v38 = vld [vmem:[#allocation11 + $0x88] sm:$0xff] }
 0x99a   :  { %v2456_v20 = vmul.f32 0.5, %v5297_v37  ;;  %10509 = vst [vmem:[#allocation35_spill] sm:$0xff] %v8073_v38 }
 0x99b   :  { %v7928_v14 = vadd.f32 %v2462_v41, %v2461_v60  ;;  %v8077_v60 = vld [vmem:[#allocation11 + $0x90] sm:$0xff]  ;;  %v8079_v41 = vld [vmem:[#allocation11 + $0x98] sm:$0xff] }
 0x99c   :  { %v2457_v22 = vadd.f32 0.5, %v2456_v20  ;;  %10510 = vst [vmem:[#allocation42_spill] sm:$0xff] %v8077_v60 }
 0x99d   :  { %5298 = vtanh.f32 %v7928_v14  ;;  %10511 = vst [vmem:[#allocation36_spill] sm:$0xff] %v8079_v41 }
 0x9a3   :  { %v5299_v26 = vpop.eup %5298 }
 0x9a4   :  { %v2465_v30 = vmul.f32 %v5299_v26, %v2457_v22  ;;  %v8085_v22 = vld [vmem:[#allocation11 + $0x60] sm:$0xff]  ;;  %v8087_v26 = vld [vmem:[#allocation11 + $0x68] sm:$0xff] }
 0x9a5   :  { %10512 = vst [vmem:[#allocation47_spill] sm:$0xff] %v8085_v22 }
 0x9a6   :  { %v2467_v52 = vrot.slane %v2465_v30, 4  ;;  %v7935_v61 = vsel %vm205_vm0, %v2583_v48, %v2465_v30  ;;  %10513 = vst [vmem:[#allocation23_spill] sm:$0xff] %v8087_v26  ;;  %v8089_v30 = vld [vmem:[#allocation11 + $0x70] sm:$0xff] }
 0x9a7   :  { %10514 = vst [vmem:[#allocation25_spill] sm:$0xff] %v8089_v30 }
 0x9a8   :  { %2485 = vmatmul.f32.vlgmr.msra.gmra.mxu0 %v2467_v52  ;;  %2505 = vmatmul.f32.vlgmr.msrb.gmra.mxu1 %v2467_v52 }
 0x9a9   :  { %2525 = vmatmul.f32.vlgmr.msra.gmra.mxu2 %v2467_v52  ;;  %2545 = vmatmul.f32.vlgmr.msrb.gmra.mxu3 %v2467_v52 }
 0x9aa   :  { %2831 = vmatpush.msra.mxu0 %v7941_v33  ;;  %2851 = vmatpush.msrb.mxu1 %v7943_v9 }
 0x9ab   :  { %2871 = vmatpush.msra.mxu2 %v7945_v21  ;;  %2891 = vmatpush.msrb.mxu3 %v7949_v23 }
 0x9ac   :  { %2832 = vmatpush.msra.mxu0 %v7953_v5  ;;  %2852 = vmatpush.msrb.mxu1 %v7955_v54 }
 0x9ad   :  { %2872 = vmatpush.msra.mxu2 %v7957_v28  ;;  %2892 = vmatpush.msrb.mxu3 %v7961_v42 }
 0x9ae   :  { %2833 = vmatpush.msra.mxu0 %v7965_v45  ;;  %2853 = vmatpush.msrb.mxu1 %v7967_v17 }
 0x9af   :  { %2873 = vmatpush.msra.mxu2 %v7969_v44  ;;  %2893 = vmatpush.msrb.mxu3 %v7973_v24 }
 0x9b0   :  { %2679 = vmatmul.f32.vlgmr.msrb.gmra.mxu0 %v10507_v7  ;;  %2702 = vmatmul.f32.vlgmr.msra.gmra.mxu1 %v10507_v7 }
 0x9b1   :  { %2725 = vmatmul.f32.vlgmr.msrb.gmra.mxu2 %v10507_v7  ;;  %2748 = vmatmul.f32.vlgmr.msra.gmra.mxu3 %v10507_v7  ;;  %v8095_v7 = vld [vmem:[#allocation11 + $0x78] sm:$0xff] }
 0x9b2   :  { %2834 = vmatpush.msra.mxu0 %v7977_v19  ;;  %2854 = vmatpush.msrb.mxu1 %v7979_v3  ;;  %10515 = vst [vmem:[#allocation28_spill] sm:$0xff] %v8095_v7 }
 0x9b3   :  { %2874 = vmatpush.msra.mxu2 %v7981_v4  ;;  %2894 = vmatpush.msrb.mxu3 %v7985_v10 }
 0x9b4   :  { %2835 = vmatpush.msra.mxu0 %v7989_v6  ;;  %2855 = vmatpush.msrb.mxu1 %v7991_v8 }
 0x9b5   :  { %2875 = vmatpush.msra.mxu2 %v7993_v51  ;;  %2895 = vmatpush.msrb.mxu3 %v7997_v56 }
 0x9b6   :  { %2836 = vmatpush.msra.mxu0 %v8001_v1  ;;  %2856 = vmatpush.msrb.mxu1 %v8003_v11 }
 0x9b7   :  { %2876 = vmatpush.msra.mxu2 %v8005_v55  ;;  %2896 = vmatpush.msrb.mxu3 %v8009_v58 }
 0x9b8   :  { %2837 = vmatpush.msra.mxu0 %v8013_v2  ;;  %2857 = vmatpush.msrb.mxu1 %v8015_v0 }
 0x9b9   :  { %2877 = vmatpush.msra.mxu2 %v8017_v13  ;;  %2897 = vmatpush.msrb.mxu3 %v8021_v46 }
 0x9ba   :  { %2838 = vmatpush.msra.mxu0 %v8025_v53  ;;  %2858 = vmatpush.msrb.mxu1 %v8027_v43 }
 0x9bb   :  { %2878 = vmatpush.msra.mxu2 %v8029_v34  ;;  %2898 = vmatpush.msrb.mxu3 %v8033_v47 }
 0x9bc   :  { %2839 = vmatpush.msra.mxu0 %v8037_v63  ;;  %2859 = vmatpush.msrb.mxu1 %v8039_v57 }
 0x9bd   :  { %2879 = vmatpush.msra.mxu2 %v8041_v29  ;;  %2899 = vmatpush.msrb.mxu3 %v8045_v16 }
 0x9be   :  { %2840 = vmatpush.msra.mxu0 %v8049_v25  ;;  %2860 = vmatpush.msrb.mxu1 %v8051_v12 }
 0x9bf   :  { %2880 = vmatpush.msra.mxu2 %v8053_v32  ;;  %2900 = vmatpush.msrb.mxu3 %v8057_v18 }
 0x9c0   :  { %2841 = vmatpush.msra.mxu0 %v8061_v39  ;;  %2861 = vmatpush.msrb.mxu1 %v8063_v40 }
 0x9c1   :  { %2881 = vmatpush.msra.mxu2 %v8065_v35  ;;  %2901 = vmatpush.msrb.mxu3 %v8069_v49 }
 0x9c2   :  { %2842 = vmatpush.msra.mxu0 %v8071_v50  ;;  %2862 = vmatpush.msrb.mxu1 %v8073_v38 }
 0x9c3   :  { %2882 = vmatpush.msra.mxu2 %v8077_v60  ;;  %2902 = vmatpush.msrb.mxu3 %v8079_v41  ;;  %v8103_v41 = vld [vmem:[#allocation11 + $0x50] sm:$0xff]  ;;  %v8105_v60 = vld [vmem:[#allocation11 + $0x58] sm:$0xff] }
 0x9c4   :  { %2843 = vmatpush.msra.mxu0 %v8085_v22  ;;  %2863 = vmatpush.msrb.mxu1 %v8087_v26  ;;  %10518 = vst [vmem:[#allocation46_spill] sm:$0xff] %v8103_v41 }
 0x9c5   :  { %2883 = vmatpush.msra.mxu2 %v8089_v30  ;;  %2903 = vmatpush.msrb.mxu3 %v8095_v7  ;;  %10519 = vst [vmem:[#allocation29_spill] sm:$0xff] %v8105_v60  ;;  %v8119_v7 = vld [vmem:[#allocation11] sm:$0xff]  ;;  %v8121_v30 = vld [vmem:[#allocation11 + $0x8] sm:$0xff] }
 0x9c6   :  { %10524 = vst [vmem:[#allocation48_spill] sm:$0xff] %v8119_v7 }
 0x9c7   :  { %2884 = vmatpush.msra.mxu2 %v8103_v41  ;;  %2904 = vmatpush.msrb.mxu3 %v8105_v60  ;;  %10525 = vst [vmem:[#allocation49_spill] sm:$0xff] %v8121_v30 }
 0xa25   :  { %v2486_v36 = vpop.f32.mrf.mxu0  ;;  %v2506_v15 = vpop.f32.mrf.mxu1 }
 0xa26   :  { %v2553_v37 = vrot.slane %v2486_v36, 2  ;;  %v2554_v20 = vrot.slane %v2506_v15, 2  ;;  %v8097_v36 = vld [vmem:[#allocation11 + $0x40] sm:$0xff]  ;;  %v8099_v15 = vld [vmem:[#allocation11 + $0x48] sm:$0xff] }
 0xa27   :  { %10516 = vst [vmem:[#allocation26_spill] sm:$0xff] %v8097_v36  ;;  %2844 = vmatpush.msra.mxu0 %v8097_v36  ;;  %2864 = vmatpush.msrb.mxu1 %v8099_v15  ;;  %v8127_v36 = vld [vmem:[#allocation11 + $0x18] sm:$0xff] }
 0xa28   :  { %v2561_v48 = vadd.f32 %v2553_v37, %v10503_v27  ;;  %v2562_v52 = vadd.f32 %v2554_v20, %v10504_v31  ;;  %10517 = vst [vmem:[#allocation27_spill] sm:$0xff] %v8099_v15  ;;  %v8107_v27 = vld [vmem:[#allocation11 + $0x20] sm:$0xff]  ;;  %v8111_v31 = vld [vmem:[#allocation11 + $0x28] sm:$0xff]  ;;  %v8113_v37 = vld [vmem:[#allocation11 + $0x30] sm:$0xff] }
 0xa29   :  { %10520 = vst [vmem:[#allocation32_spill] sm:$0xff] %v8107_v27  ;;  %v8115_v20 = vld [vmem:[#allocation11 + $0x38] sm:$0xff]  ;;  %2845 = vmatpush.msra.mxu0 %v8107_v27  ;;  %2865 = vmatpush.msrb.mxu1 %v8111_v31  ;;  %v8125_v15 = vld [vmem:[#allocation11 + $0x10] sm:$0xff] }
 0xa2a   :  { %5300 = vtanh.f32 %v2561_v48  ;;  %10521 = vst [vmem:[#allocation33_spill] sm:$0xff] %v8111_v31  ;;  %2885 = vmatpush.msra.mxu2 %v8113_v37  ;;  %2905 = vmatpush.msrb.mxu3 %v8115_v20 }
 0xa2b   :  { %10522 = vst [vmem:[#allocation41_spill] sm:$0xff] %v8113_v37  ;;  %5302 = vtanh.f32 %v2562_v52  ;;  %2846 = vmatpush.msra.mxu0 %v8119_v7  ;;  %2866 = vmatpush.msrb.mxu1 %v8121_v30 }
 0xa2c   :  { %10523 = vst [vmem:[#allocation24_spill] sm:$0xff] %v8115_v20  ;;  %v2526_v48 = vpop.f32.mrf.mxu2  ;;  %v2546_v26 = vpop.f32.mrf.mxu3  ;;  %2886 = vmatpush.msra.mxu2 %v8125_v15  ;;  %2906 = vmatpush.msrb.mxu3 %v8127_v36 }
 0xa2d   :  { %10526 = vst [vmem:[#allocation34_spill] sm:$0xff] %v8125_v15  ;;  %v2555_v22 = vrot.slane %v2526_v48, 2  ;;  %v2556_v52 = vrot.slane %v2546_v26, 2  ;;  %2930 = vmatpush.msrb.mxu0 %v7941_v33  ;;  %2950 = vmatpush.msra.mxu1 %v7943_v9 }
 0xa2e   :  { %10527 = vst [vmem:[#allocation39_spill] sm:$0xff] %v8127_v36  ;;  %2970 = vmatpush.msrb.mxu2 %v7945_v21  ;;  %2990 = vmatpush.msra.mxu3 %v7949_v23 }
 0xa2f   :  { %v2563_v60 = vadd.f32 %v2555_v22, %v10505_v62  ;;  %v2564_v27 = vadd.f32 %v2556_v52, %v10506_v59  ;;  %2931 = vmatpush.msrb.mxu0 %v7953_v5  ;;  %2951 = vmatpush.msra.mxu1 %v7955_v54 }
 0xa30   :  { %v5301_v31 = vpop.eup %5300  ;;  %2971 = vmatpush.msrb.mxu2 %v7957_v28  ;;  %2991 = vmatpush.msra.mxu3 %v7961_v42 }
 0xa31   :  { %v5303_v26 = vpop.eup %5302  ;;  %5304 = vtanh.f32 %v2563_v60  ;;  %v2569_v48 = vmul.f32 0.5, %v5301_v31  ;;  %2932 = vmatpush.msrb.mxu0 %v7965_v45  ;;  %2952 = vmatpush.msra.mxu1 %v7967_v17  ;;  %v2576_v60 = vrot.slane %v7928_v14, 6 }
 0xa32   :  { %v2571_v30 = vmul.f32 0.5, %v5303_v26  ;;  %5306 = vtanh.f32 %v2564_v27  ;;  %2972 = vmatpush.msrb.mxu2 %v7969_v44  ;;  %2992 = vmatpush.msra.mxu3 %v7973_v24 }
 0xa33   :  { %v2570_v59 = vadd.f32 0.5, %v2569_v48  ;;  %2933 = vmatpush.msrb.mxu0 %v7977_v19  ;;  %2953 = vmatpush.msra.mxu1 %v7979_v3 }
 0xa34   :  { %v2572_v62 = vadd.f32 0.5, %v2571_v30  ;;  %2973 = vmatpush.msrb.mxu2 %v7981_v4  ;;  %2993 = vmatpush.msra.mxu3 %v7985_v10 }
 0xa35   :  { %2934 = vmatpush.msrb.mxu0 %v7989_v6  ;;  %2954 = vmatpush.msra.mxu1 %v7991_v8 }
 0xa36   :  { %v2578_v30 = vmul.f32 %v2576_v60, %v2572_v62  ;;  %2974 = vmatpush.msrb.mxu2 %v7993_v51  ;;  %2994 = vmatpush.msra.mxu3 %v7997_v56  ;;  %v10528_v60 = vld [vmem:[#allocation42_spill] sm:$0xff] }
 0xa37   :  { %v5305_v22 = vpop.eup %5304  ;;  %2935 = vmatpush.msrb.mxu0 %v8001_v1  ;;  %2955 = vmatpush.msra.mxu1 %v8003_v11 }
 0xa38   :  { %v2579_v27 = vmul.f32 %v5305_v22, %v2570_v59  ;;  %v5307_v14 = vpop.eup %5306  ;;  %2975 = vmatpush.msrb.mxu2 %v8005_v55  ;;  %2995 = vmatpush.msra.mxu3 %v8009_v58  ;;  %v10529_v22 = vld [vmem:[#allocation36_spill] sm:$0xff] }
 0xa39   :  { %2936 = vmatpush.msrb.mxu0 %v8013_v2  ;;  %2956 = vmatpush.msra.mxu1 %v8015_v0  ;;  %v2573_v52 = vmul.f32 0.5, %v5307_v14  ;;  %v10533_v14 = vld [vmem:[#allocation28_spill] sm:$0xff] }
 0xa3a   :  { %v2580_v31 = vadd.f32 %v2579_v27, %v2578_v30  ;;  %2976 = vmatpush.msrb.mxu2 %v8017_v13  ;;  %2996 = vmatpush.msra.mxu3 %v8021_v46  ;;  %v10530_v30 = vld [vmem:[#allocation47_spill] sm:$0xff] }
 0xa3b   :  { %2937 = vmatpush.msrb.mxu0 %v8025_v53  ;;  %2957 = vmatpush.msra.mxu1 %v8027_v43  ;;  %v2574_v26 = vadd.f32 0.5, %v2573_v52  ;;  %v10531_v27 = vld [vmem:[#allocation23_spill] sm:$0xff] }
 0xa3c   :  { %5308 = vtanh.f32 %v2580_v31  ;;  %2977 = vmatpush.msrb.mxu2 %v8029_v34  ;;  %2997 = vmatpush.msra.mxu3 %v8033_v47  ;;  %v10534_v31 = vld [vmem:[#allocation26_spill] sm:$0xff]  ;;  %v10535_v52 = vld [vmem:[#allocation27_spill] sm:$0xff] }
 0xa3d   :  { %2938 = vmatpush.msrb.mxu0 %v8037_v63  ;;  %2958 = vmatpush.msra.mxu1 %v8039_v57 }
 0xa3e   :  { %2978 = vmatpush.msrb.mxu2 %v8041_v29  ;;  %2998 = vmatpush.msra.mxu3 %v8045_v16 }
 0xa3f   :  { %2939 = vmatpush.msrb.mxu0 %v8049_v25  ;;  %2959 = vmatpush.msra.mxu1 %v8051_v12 }
 0xa40   :  { %2979 = vmatpush.msrb.mxu2 %v8053_v32  ;;  %2999 = vmatpush.msra.mxu3 %v8057_v18 }
 0xa41   :  { %2940 = vmatpush.msrb.mxu0 %v8061_v39  ;;  %2960 = vmatpush.msra.mxu1 %v8063_v40 }
 0xa42   :  { %v5309_v48 = vpop.eup %5308  ;;  %2980 = vmatpush.msrb.mxu2 %v8065_v35  ;;  %3000 = vmatpush.msra.mxu3 %v8069_v49 }
 0xa43   :  { %v2582_v62 = vmul.f32 %v5309_v48, %v2574_v26  ;;  %2941 = vmatpush.msrb.mxu0 %v8071_v50  ;;  %2961 = vmatpush.msra.mxu1 %v8073_v38  ;;  %v10536_v26 = vld [vmem:[#allocation29_spill] sm:$0xff]  ;;  %v10537_v48 = vmov 0.0  }
 0xa44   :  { %2981 = vmatpush.msrb.mxu2 %v10528_v60  ;;  %3001 = vmatpush.msra.mxu3 %v10529_v22 }
 0xa45   :  { %v2585_v59 = vsel %vm835_vm3, %v7935_v61, %v2582_v62  ;;  %2942 = vmatpush.msrb.mxu0 %v10530_v30  ;;  %2962 = vmatpush.msra.mxu1 %v10531_v27  ;;  %v10532_v61 = vld [vmem:[#allocation25_spill] sm:$0xff]  ;;  %v10538_v62 = vld [vmem:[#allocation32_spill] sm:$0xff] }
 0xa46   :  { %2682 = vmatmul.f32.gmra.mxu0 %v2585_v59  ;;  %2705 = vmatmul.f32.gmra.mxu1 %v2585_v59 }
 0xa47   :  { %2728 = vmatmul.f32.gmra.mxu2 %v2585_v59  ;;  %2751 = vmatmul.f32.gmra.mxu3 %v2585_v59  ;;  %v10539_v59 = vld [vmem:[#allocation33_spill] sm:$0xff] }
 0xa48   :  { %2982 = vmatpush.msrb.mxu2 %v10532_v61  ;;  %3002 = vmatpush.msra.mxu3 %v10533_v14 }
 0xa49   :  { %2943 = vmatpush.msrb.mxu0 %v10534_v31  ;;  %2963 = vmatpush.msra.mxu1 %v10535_v52 }
 0xa4a   :  { %2983 = vmatpush.msrb.mxu2 %v8103_v41  ;;  %3003 = vmatpush.msra.mxu3 %v10536_v26  ;;  %v10540_v41 = vld [vmem:[#allocation49_spill] sm:$0xff] }
 0xa4b   :  { %2944 = vmatpush.msrb.mxu0 %v10538_v62  ;;  %2964 = vmatpush.msra.mxu1 %v10539_v59 }
 0xa4c   :  { %2984 = vmatpush.msrb.mxu2 %v8113_v37  ;;  %3004 = vmatpush.msra.mxu3 %v8115_v20 }
 0xa4d   :  { %2945 = vmatpush.msrb.mxu0 %v8119_v7  ;;  %2965 = vmatpush.msra.mxu1 %v10540_v41 }
 0xa4e   :  { %2847 = vmatmul.f32.vlgmr.msra.gmra.mxu0 %v10537_v48  ;;  %2867 = vmatmul.f32.vlgmr.msrb.gmra.mxu1 %v10537_v48 }
 0xa4f   :  { %2887 = vmatmul.f32.vlgmr.msra.gmra.mxu2 %v10537_v48  ;;  %2907 = vmatmul.f32.vlgmr.msrb.gmra.mxu3 %v10537_v48  ;;  %v10541_v48 = vld [vmem:[#allocation46_spill] sm:$0xff] }
 0xa50   :  { %2985 = vmatpush.msrb.mxu2 %v8125_v15  ;;  %3005 = vmatpush.msra.mxu3 %v8127_v36 }
 0xa51   :  { %3047 = vmatpush.msra.mxu0 %v7941_v33  ;;  %3067 = vmatpush.msrb.mxu1 %v7943_v9 }
 0xa52   :  { %3087 = vmatpush.msra.mxu2 %v7945_v21  ;;  %3107 = vmatpush.msrb.mxu3 %v7949_v23 }
 0xa53   :  { %3048 = vmatpush.msra.mxu0 %v7953_v5  ;;  %3068 = vmatpush.msrb.mxu1 %v7955_v54 }
 0xa54   :  { %3088 = vmatpush.msra.mxu2 %v7957_v28  ;;  %3108 = vmatpush.msrb.mxu3 %v7961_v42 }
 0xa55   :  { %3049 = vmatpush.msra.mxu0 %v7965_v45  ;;  %3069 = vmatpush.msrb.mxu1 %v7967_v17 }
 0xa56   :  { %3089 = vmatpush.msra.mxu2 %v7969_v44  ;;  %3109 = vmatpush.msrb.mxu3 %v7973_v24 }
 0xa57   :  { %3050 = vmatpush.msra.mxu0 %v7977_v19  ;;  %3070 = vmatpush.msrb.mxu1 %v7979_v3 }
 0xa58   :  { %3090 = vmatpush.msra.mxu2 %v7981_v4  ;;  %3110 = vmatpush.msrb.mxu3 %v7985_v10 }
 0xa59   :  { %3051 = vmatpush.msra.mxu0 %v7989_v6  ;;  %3071 = vmatpush.msrb.mxu1 %v7991_v8 }
 0xa5a   :  { %3091 = vmatpush.msra.mxu2 %v7993_v51  ;;  %3111 = vmatpush.msrb.mxu3 %v7997_v56 }
 0xa5b   :  { %3052 = vmatpush.msra.mxu0 %v8001_v1  ;;  %3072 = vmatpush.msrb.mxu1 %v8003_v11 }
 0xa5c   :  { %3092 = vmatpush.msra.mxu2 %v8005_v55  ;;  %3112 = vmatpush.msrb.mxu3 %v8009_v58 }
 0xa5d   :  { %3053 = vmatpush.msra.mxu0 %v8013_v2  ;;  %3073 = vmatpush.msrb.mxu1 %v8015_v0 }
 0xa5e   :  { %3093 = vmatpush.msra.mxu2 %v8017_v13  ;;  %3113 = vmatpush.msrb.mxu3 %v8021_v46 }
 0xa5f   :  { %3054 = vmatpush.msra.mxu0 %v8025_v53  ;;  %3074 = vmatpush.msrb.mxu1 %v8027_v43 }
 0xa60   :  { %3094 = vmatpush.msra.mxu2 %v8029_v34  ;;  %3114 = vmatpush.msrb.mxu3 %v8033_v47 }
 0xa61   :  { %3055 = vmatpush.msra.mxu0 %v8037_v63  ;;  %3075 = vmatpush.msrb.mxu1 %v8039_v57 }
 0xa62   :  { %3095 = vmatpush.msra.mxu2 %v8041_v29  ;;  %3115 = vmatpush.msrb.mxu3 %v8045_v16 }
 0xa63   :  { %3056 = vmatpush.msra.mxu0 %v8049_v25  ;;  %3076 = vmatpush.msrb.mxu1 %v8051_v12 }
 0xa64   :  { %3096 = vmatpush.msra.mxu2 %v8053_v32  ;;  %3116 = vmatpush.msrb.mxu3 %v8057_v18 }
 0xa65   :  { %3057 = vmatpush.msra.mxu0 %v8061_v39  ;;  %3077 = vmatpush.msrb.mxu1 %v8063_v40 }
 0xa66   :  { %3097 = vmatpush.msra.mxu2 %v8065_v35  ;;  %3117 = vmatpush.msrb.mxu3 %v8069_v49 }
 0xa67   :  { %3058 = vmatpush.msra.mxu0 %v8071_v50  ;;  %3078 = vmatpush.msrb.mxu1 %v8073_v38 }
 0xa68   :  { %3098 = vmatpush.msra.mxu2 %v10528_v60  ;;  %3118 = vmatpush.msrb.mxu3 %v10529_v22 }
 0xa69   :  { %3059 = vmatpush.msra.mxu0 %v10530_v30  ;;  %3079 = vmatpush.msrb.mxu1 %v10531_v27 }
 0xa6a   :  { %3099 = vmatpush.msra.mxu2 %v10532_v61  ;;  %3119 = vmatpush.msrb.mxu3 %v10533_v14 }
 0xa6b   :  { %3060 = vmatpush.msra.mxu0 %v10534_v31  ;;  %3080 = vmatpush.msrb.mxu1 %v10535_v52  ;;  %v2680_v52 = vpop.f32.mrf.mxu0  ;;  %v2726_v31 = vpop.f32.mrf.mxu2 }
 0xa6c   :  { %3100 = vmatpush.msra.mxu2 %v10541_v48  ;;  %3120 = vmatpush.msrb.mxu3 %v10536_v26  ;;  %v2703_v48 = vpop.f32.mrf.mxu1  ;;  %v2749_v26 = vpop.f32.mrf.mxu3 }
 0xa6d   :  { %3061 = vmatpush.msra.mxu0 %v10538_v62  ;;  %3081 = vmatpush.msrb.mxu1 %v10539_v59  ;;  %v8275_v59 = vld [vmem:[%s9806_s9] sm:$0xf] }
 0xa6e   :  { %3101 = vmatpush.msra.mxu2 %v8113_v37  ;;  %3121 = vmatpush.msrb.mxu3 %v8115_v20  ;;  %10542 = vst [vmem:[#allocation44_spill] sm:$0xff] %v8275_v59  ;;  %v10057_v30 = vperm.slane %v8275_v59, 2  ;;  %v10061_v22 = vperm.slane %v8275_v59, 3 }
 0xa6f   :  { %3062 = vmatpush.msra.mxu0 %v8119_v7  ;;  %3082 = vmatpush.msrb.mxu1 %v10540_v41  ;;  %v10052_v7 = vperm.slane %v8275_v59, 0  ;;  %v10051_v41 = vperm.slane %v8275_v59, 1 }
 0xa70   :  { %3102 = vmatpush.msra.mxu2 %v8125_v15  ;;  %3122 = vmatpush.msrb.mxu3 %v8127_v36 }
 0xa71   :  { %v8285_v36 = vadd.f32 %v2680_v52, %v10052_v7  ;;  %v8289_v15 = vadd.f32 %v2703_v48, %v10051_v41  ;;  %v8301_v52 = vadd.f32 %v2726_v31, %v10057_v30  ;;  %v8305_v48 = vadd.f32 %v2749_v26, %v10061_v22 }
 0xa73   :  { %10545 = vst [vmem:[#allocation51_spill] sm:$0xff] %v8285_v36 }
 0xa74   :  { %10546 = vst [vmem:[#allocation30_spill] sm:$0xff] %v8289_v15 }
 0xa75   :  { %10549 = vst [vmem:[#allocation43_spill] sm:$0xff] %v8301_v52 }
 0xa76   :  { %10550 = vst [vmem:[#allocation45_spill] sm:$0xff] %v8305_v48 }
 0xac3   :  { %v8277_v37 = vpop.f32.mrf.mxu0  ;;  %v8279_v20 = vpop.f32.mrf.mxu1 }
 0xac4   :  { %10543 = vst [vmem:[#allocation37_spill] sm:$0xff] %v8277_v37 }
 0xac5   :  { %10544 = vst [vmem:[#allocation50_spill] sm:$0xff] %v8279_v20 }
 0xaca   :  { %v8291_v62 = vpop.f32.mrf.mxu2  ;;  %v8293_v14 = vpop.f32.mrf.mxu3 }
 0xacb   :  { %10547 = vst [vmem:[#allocation22_spill] sm:$0xff] %v8291_v62  ;;  %v2848_v61 = vpop.f32.mrf.mxu0  ;;  %v2868_v37 = vpop.f32.mrf.mxu1 }
 0xacc   :  { %10548 = vst [vmem:[#allocation38_spill] sm:$0xff] %v8293_v14  ;;  %v2911_v20 = vadd.f32 %v2848_v61, %v8285_v36  ;;  %v2912_v27 = vadd.f32 %v2868_v37, %v8289_v15 }
 0xace   :  { %5310 = vtanh.f32 %v2911_v20 }
 0xacf   :  { %5312 = vtanh.f32 %v2912_v27 }
 0xad2   :  { %v2888_v41 = vpop.f32.mrf.mxu2  ;;  %v2908_v7 = vpop.f32.mrf.mxu3 }
 0xad3   :  { %v2913_v61 = vadd.f32 %v2888_v41, %v8301_v52  ;;  %v2914_v37 = vadd.f32 %v2908_v7, %v8305_v48  ;;  %v10552_v7 = vld [vmem:[#allocation35_spill] sm:$0xff] }
 0xad4   :  { %v5311_v14 = vpop.eup %5310 }
 0xad5   :  { %v5313_v62 = vpop.eup %5312  ;;  %5314 = vtanh.f32 %v2913_v61  ;;  %v2919_v15 = vmul.f32 0.5, %v5311_v14  ;;  %v10558_v14 = vld [vmem:[#allocation28_spill] sm:$0xff]  ;;  %v10562_v61 = vld [vmem:[#allocation29_spill] sm:$0xff] }
 0xad6   :  { %v2921_v20 = vmul.f32 0.5, %v5313_v62  ;;  %5316 = vtanh.f32 %v2914_v37  ;;  %v10559_v62 = vld [vmem:[#allocation26_spill] sm:$0xff]  ;;  %v10563_v37 = vld [vmem:[#allocation32_spill] sm:$0xff] }
 0xad7   :  { %v2920_v36 = vadd.f32 0.5, %v2919_v15  ;;  %v10554_v15 = vld [vmem:[#allocation36_spill] sm:$0xff] }
 0xad8   :  { %v2922_v27 = vadd.f32 0.5, %v2921_v20  ;;  %v10564_v20 = vld [vmem:[#allocation33_spill] sm:$0xff] }
 0xada   :  { %v2925_v30 = vmul.f32 0.0, %v2922_v27  ;;  %v10565_v27 = vld [vmem:[#allocation41_spill] sm:$0xff] }
 0xadb   :  { %v5315_v31 = vpop.eup %5314 }
 0xadc   :  { %v2926_v60 = vmul.f32 %v5315_v31, %v2920_v36  ;;  %v5317_v59 = vpop.eup %5316  ;;  %v10553_v36 = vld [vmem:[#allocation42_spill] sm:$0xff]  ;;  %v10566_v31 = vld [vmem:[#allocation24_spill] sm:$0xff] }
 0xadd   :  { %v2923_v22 = vmul.f32 0.5, %v5317_v59  ;;  %v10560_v59 = vld [vmem:[#allocation27_spill] sm:$0xff] }
 0xade   :  { %v8309_v26 = vadd.f32 %v2926_v60, %v2925_v30  ;;  %v10555_v60 = vld [vmem:[#allocation47_spill] sm:$0xff]  ;;  %v10557_v30 = vld [vmem:[#allocation25_spill] sm:$0xff] }
 0xadf   :  { %v2924_v41 = vadd.f32 0.5, %v2923_v22  ;;  %v10556_v22 = vld [vmem:[#allocation23_spill] sm:$0xff] }
 0xae0   :  { %5318 = vtanh.f32 %v8309_v26 }
 0xae6   :  { %v5319_v52 = vpop.eup %5318 }
 0xae7   :  { %v8312_v38 = vmul.f32 %v5319_v52, %v2924_v41  ;;  %v10561_v52 = vld [vmem:[#allocation46_spill] sm:$0xff]  ;;  %v10567_v41 = vld [vmem:[#allocation48_spill] sm:$0xff] }
 0xae9   :  { %10551 = vst [vmem:[#allocation40_spill] sm:$0xff] %v8312_v38  ;;  %2946 = vmatmul.f32.vlgmr.msrb.gmra.mxu0 %v8312_v38  ;;  %2966 = vmatmul.f32.vlgmr.msra.gmra.mxu1 %v8312_v38 }
 0xaea   :  { %2986 = vmatmul.f32.vlgmr.msrb.gmra.mxu2 %v8312_v38  ;;  %3006 = vmatmul.f32.vlgmr.msra.gmra.mxu3 %v8312_v38  ;;  %v10568_v38 = vld [vmem:[#allocation49_spill] sm:$0xff] }
 0xaeb   :  { %3164 = vmatpush.msrb.mxu0 %v7941_v33  ;;  %3184 = vmatpush.msra.mxu1 %v7943_v9 }
 0xaec   :  { %3204 = vmatpush.msrb.mxu2 %v7945_v21  ;;  %3224 = vmatpush.msra.mxu3 %v7949_v23 }
 0xaed   :  { %3165 = vmatpush.msrb.mxu0 %v7953_v5  ;;  %3185 = vmatpush.msra.mxu1 %v7955_v54 }
 0xaee   :  { %3205 = vmatpush.msrb.mxu2 %v7957_v28  ;;  %3225 = vmatpush.msra.mxu3 %v7961_v42 }
 0xaef   :  { %3166 = vmatpush.msrb.mxu0 %v7965_v45  ;;  %3186 = vmatpush.msra.mxu1 %v7967_v17 }
 0xaf0   :  { %3206 = vmatpush.msrb.mxu2 %v7969_v44  ;;  %3226 = vmatpush.msra.mxu3 %v7973_v24 }
 0xaf1   :  { %3167 = vmatpush.msrb.mxu0 %v7977_v19  ;;  %3187 = vmatpush.msra.mxu1 %v7979_v3 }
 0xaf2   :  { %3207 = vmatpush.msrb.mxu2 %v7981_v4  ;;  %3227 = vmatpush.msra.mxu3 %v7985_v10 }
 0xaf3   :  { %3168 = vmatpush.msrb.mxu0 %v7989_v6  ;;  %3188 = vmatpush.msra.mxu1 %v7991_v8 }
 0xaf4   :  { %3208 = vmatpush.msrb.mxu2 %v7993_v51  ;;  %3228 = vmatpush.msra.mxu3 %v7997_v56 }
 0xaf5   :  { %3169 = vmatpush.msrb.mxu0 %v8001_v1  ;;  %3189 = vmatpush.msra.mxu1 %v8003_v11 }
 0xaf6   :  { %3209 = vmatpush.msrb.mxu2 %v8005_v55  ;;  %3229 = vmatpush.msra.mxu3 %v8009_v58 }
 0xaf7   :  { %3170 = vmatpush.msrb.mxu0 %v8013_v2  ;;  %3190 = vmatpush.msra.mxu1 %v8015_v0 }
 0xaf8   :  { %3210 = vmatpush.msrb.mxu2 %v8017_v13  ;;  %3230 = vmatpush.msra.mxu3 %v8021_v46 }
 0xaf9   :  { %3171 = vmatpush.msrb.mxu0 %v8025_v53  ;;  %3191 = vmatpush.msra.mxu1 %v8027_v43 }
 0xafa   :  { %3211 = vmatpush.msrb.mxu2 %v8029_v34  ;;  %3231 = vmatpush.msra.mxu3 %v8033_v47 }
 0xafb   :  { %3172 = vmatpush.msrb.mxu0 %v8037_v63  ;;  %3192 = vmatpush.msra.mxu1 %v8039_v57 }
 0xafc   :  { %3212 = vmatpush.msrb.mxu2 %v8041_v29  ;;  %3232 = vmatpush.msra.mxu3 %v8045_v16 }
 0xafd   :  { %3173 = vmatpush.msrb.mxu0 %v8049_v25  ;;  %3193 = vmatpush.msra.mxu1 %v8051_v12 }
 0xafe   :  { %3213 = vmatpush.msrb.mxu2 %v8053_v32  ;;  %3233 = vmatpush.msra.mxu3 %v8057_v18 }
 0xaff   :  { %3174 = vmatpush.msrb.mxu0 %v8061_v39  ;;  %3194 = vmatpush.msra.mxu1 %v8063_v40 }
 0xb00   :  { %3214 = vmatpush.msrb.mxu2 %v8065_v35  ;;  %3234 = vmatpush.msra.mxu3 %v8069_v49 }
 0xb01   :  { %3175 = vmatpush.msrb.mxu0 %v8071_v50  ;;  %3195 = vmatpush.msra.mxu1 %v10552_v7 }
 0xb02   :  { %3215 = vmatpush.msrb.mxu2 %v10553_v36  ;;  %3235 = vmatpush.msra.mxu3 %v10554_v15  ;;  %v10573_v36 = vld [vmem:[#allocation43_spill] sm:$0xff] }
 0xb03   :  { %3176 = vmatpush.msrb.mxu0 %v10555_v60  ;;  %3196 = vmatpush.msra.mxu1 %v10556_v22  ;;  %v10571_v22 = vld [vmem:[#allocation51_spill] sm:$0xff]  ;;  %v10572_v60 = vld [vmem:[#allocation30_spill] sm:$0xff] }
 0xb04   :  { %3216 = vmatpush.msrb.mxu2 %v10557_v30  ;;  %3236 = vmatpush.msra.mxu3 %v10558_v14  ;;  %v10569_v14 = vld [vmem:[#allocation34_spill] sm:$0xff] }
 0xb05   :  { %3177 = vmatpush.msrb.mxu0 %v10559_v62  ;;  %3197 = vmatpush.msra.mxu1 %v10560_v59  ;;  %v10570_v62 = vld [vmem:[#allocation39_spill] sm:$0xff] }
 0xb06   :  { %3217 = vmatpush.msrb.mxu2 %v10561_v52  ;;  %3237 = vmatpush.msra.mxu3 %v10562_v61 }
 0xb07   :  { %3178 = vmatpush.msrb.mxu0 %v10563_v37  ;;  %3198 = vmatpush.msra.mxu1 %v10564_v20 }
 0xb08   :  { %3218 = vmatpush.msrb.mxu2 %v10565_v27  ;;  %3238 = vmatpush.msra.mxu3 %v10566_v31 }
 0xb09   :  { %3179 = vmatpush.msrb.mxu0 %v10567_v41  ;;  %3199 = vmatpush.msra.mxu1 %v10568_v38 }
 0xb0a   :  { %3219 = vmatpush.msrb.mxu2 %v10569_v14  ;;  %3239 = vmatpush.msra.mxu3 %v10570_v62 }
 0xb66   :  { %v2947_v59 = vpop.f32.mrf.mxu0  ;;  %v2967_v52 = vpop.f32.mrf.mxu1 }
 0xb67   :  { %v3014_v30 = vrot.slane %v2947_v59, 6  ;;  %v3015_v61 = vrot.slane %v2967_v52, 6 }
 0xb69   :  { %v3022_v37 = vadd.f32 %v3014_v30, %v10571_v22  ;;  %v3023_v20 = vadd.f32 %v3015_v61, %v10572_v60  ;;  %v3037_v61 = vrot.slane %v8309_v26, 6 }
 0xb6b   :  { %5320 = vtanh.f32 %v3022_v37 }
 0xb6c   :  { %5322 = vtanh.f32 %v3023_v20 }
 0xb6d   :  { %v2987_v27 = vpop.f32.mrf.mxu2  ;;  %v3007_v31 = vpop.f32.mrf.mxu3 }
 0xb6e   :  { %v3016_v15 = vrot.slane %v2987_v27, 6  ;;  %v3017_v41 = vrot.slane %v3007_v31, 6 }
 0xb70   :  { %v3024_v38 = vadd.f32 %v3016_v15, %v10573_v36  ;;  %v3025_v14 = vadd.f32 %v3017_v41, %v8305_v48 }
 0xb71   :  { %v5321_v7 = vpop.eup %5320 }
 0xb72   :  { %v5323_v62 = vpop.eup %5322  ;;  %5324 = vtanh.f32 %v3024_v38  ;;  %v3030_v50 = vmul.f32 0.5, %v5321_v7 }
 0xb73   :  { %v3032_v59 = vmul.f32 0.5, %v5323_v62  ;;  %5326 = vtanh.f32 %v3025_v14 }
 0xb74   :  { %v3031_v30 = vadd.f32 0.5, %v3030_v50 }
 0xb75   :  { %v3033_v52 = vadd.f32 0.5, %v3032_v59 }
 0xb77   :  { %v3039_v20 = vmul.f32 %v3037_v61, %v3033_v52  ;;  %v10597_v52 = vld [vmem:[#allocation40_spill] sm:$0xff] }
 0xb78   :  { %v5325_v37 = vpop.eup %5324 }
 0xb79   :  { %v3040_v60 = vmul.f32 %v5325_v37, %v3031_v30  ;;  %v5327_v22 = vpop.eup %5326 }
 0xb7a   :  { %v3034_v15 = vmul.f32 0.5, %v5327_v22 }
 0xb7b   :  { %v8387_v27 = vadd.f32 %v3040_v60, %v3039_v20  ;;  %v8471_v20 = vld [vmem:[#allocation11 + $0x1e0] sm:$0xff] }
 0xb7c   :  { %v3035_v31 = vadd.f32 0.5, %v3034_v15  ;;  %v8477_v15 = vld [vmem:[#allocation11 + $0x1f0] sm:$0xff] }
 0xb7d   :  { %5328 = vtanh.f32 %v8387_v27 }
 0xb83   :  { %v5329_v41 = vpop.eup %5328 }
 0xb84   :  { %v8390_v48 = vmul.f32 %v5329_v41, %v3035_v31  ;;  %v8483_v31 = vld [vmem:[#allocation11 + $0x1c0] sm:$0xff]  ;;  %v8486_v41 = vld [vmem:[#allocation11 + $0x1c8] sm:$0xff] }
 0xb86   :  { %v3045_v38 = vrot.slane %v8390_v48, 2  ;;  %v3278_v30 = vsel %vm832_vm2, %v10597_v52, %v8390_v48  ;;  %v8480_v48 = vld [vmem:[#allocation11 + $0x1f8] sm:$0xff]  ;;  %v8573_v52 = vld [vmem:[#allocation11 + $0xf0] sm:$0xff] }
 0xb88   :  { %3063 = vmatmul.f32.vlgmr.msra.gmra.mxu0 %v3045_v38  ;;  %3083 = vmatmul.f32.vlgmr.msrb.gmra.mxu1 %v3045_v38 }
 0xb89   :  { %3103 = vmatmul.f32.vlgmr.msra.gmra.mxu2 %v3045_v38  ;;  %3123 = vmatmul.f32.vlgmr.msrb.gmra.mxu3 %v3045_v38  ;;  %v8489_v38 = vld [vmem:[#allocation11 + $0x1d0] sm:$0xff] }
 0xb8a   :  { %3353 = vmatpush.msra.mxu0 %v7941_v33  ;;  %3373 = vmatpush.msrb.mxu1 %v7943_v9  ;;  %v10574_v33 = vld [vmem:[#allocation31_spill] sm:$0xff] }
 0xb8b   :  { %3393 = vmatpush.msra.mxu2 %v7945_v21  ;;  %3413 = vmatpush.msrb.mxu3 %v7949_v23  ;;  %v10575_v9 = vld [vmem:[#allocation35_spill] sm:$0xff]  ;;  %v10576_v21 = vld [vmem:[#allocation42_spill] sm:$0xff]  ;;  %v10577_v23 = vld [vmem:[#allocation36_spill] sm:$0xff] }
 0xb8c   :  { %3354 = vmatpush.msra.mxu0 %v7953_v5  ;;  %3374 = vmatpush.msrb.mxu1 %v7955_v54  ;;  %v10578_v5 = vld [vmem:[#allocation47_spill] sm:$0xff]  ;;  %10601 = vst [vmem:[#allocation42_spill] sm:$0xff] %v8573_v52 }
 0xb8d   :  { %3394 = vmatpush.msra.mxu2 %v7957_v28  ;;  %3414 = vmatpush.msrb.mxu3 %v7961_v42  ;;  %v10579_v54 = vld [vmem:[#allocation23_spill] sm:$0xff]  ;;  %v10580_v28 = vld [vmem:[#allocation25_spill] sm:$0xff]  ;;  %v10581_v42 = vld [vmem:[#allocation28_spill] sm:$0xff] }
 0xb8e   :  { %3355 = vmatpush.msra.mxu0 %v7965_v45  ;;  %3375 = vmatpush.msrb.mxu1 %v7967_v17  ;;  %v10582_v45 = vld [vmem:[#allocation26_spill] sm:$0xff]  ;;  %v10583_v17 = vld [vmem:[#allocation27_spill] sm:$0xff] }
 0xb8f   :  { %3395 = vmatpush.msra.mxu2 %v7969_v44  ;;  %3415 = vmatpush.msrb.mxu3 %v7973_v24  ;;  %v10584_v44 = vld [vmem:[#allocation46_spill] sm:$0xff]  ;;  %v10585_v24 = vld [vmem:[#allocation29_spill] sm:$0xff] }
 0xb90   :  { %3356 = vmatpush.msra.mxu0 %v7977_v19  ;;  %3376 = vmatpush.msrb.mxu1 %v7979_v3  ;;  %v10586_v19 = vld [vmem:[#allocation32_spill] sm:$0xff]  ;;  %v10587_v3 = vld [vmem:[#allocation33_spill] sm:$0xff] }
 0xb91   :  { %3396 = vmatpush.msra.mxu2 %v7981_v4  ;;  %3416 = vmatpush.msrb.mxu3 %v7985_v10  ;;  %v10588_v4 = vld [vmem:[#allocation41_spill] sm:$0xff]  ;;  %v10589_v10 = vld [vmem:[#allocation24_spill] sm:$0xff] }
 0xb92   :  { %3357 = vmatpush.msra.mxu0 %v7989_v6  ;;  %3377 = vmatpush.msrb.mxu1 %v7991_v8  ;;  %v10590_v6 = vld [vmem:[#allocation48_spill] sm:$0xff]  ;;  %v10591_v8 = vld [vmem:[#allocation49_spill] sm:$0xff] }
 0xb93   :  { %3397 = vmatpush.msra.mxu2 %v7993_v51  ;;  %3417 = vmatpush.msrb.mxu3 %v7997_v56  ;;  %v10592_v51 = vld [vmem:[#allocation34_spill] sm:$0xff]  ;;  %v10593_v56 = vld [vmem:[#allocation39_spill] sm:$0xff] }
 0xb94   :  { %3358 = vmatpush.msra.mxu0 %v8001_v1  ;;  %3378 = vmatpush.msrb.mxu1 %v8003_v11 }
 0xb95   :  { %3398 = vmatpush.msra.mxu2 %v8005_v55  ;;  %3418 = vmatpush.msrb.mxu3 %v8009_v58 }
 0xb96   :  { %3359 = vmatpush.msra.mxu0 %v8013_v2  ;;  %3379 = vmatpush.msrb.mxu1 %v8015_v0  ;;  %v10594_v2 = vld [vmem:[#allocation51_spill] sm:$0xff] }
 0xb97   :  { %3399 = vmatpush.msra.mxu2 %v8017_v13  ;;  %3419 = vmatpush.msrb.mxu3 %v8021_v46  ;;  %v10595_v13 = vld [vmem:[#allocation30_spill] sm:$0xff] }
 0xb98   :  { %3360 = vmatpush.msra.mxu0 %v8025_v53  ;;  %3380 = vmatpush.msrb.mxu1 %v8027_v43 }
 0xb99   :  { %3400 = vmatpush.msra.mxu2 %v8029_v34  ;;  %3420 = vmatpush.msrb.mxu3 %v8033_v47 }
 0xb9a   :  { %3361 = vmatpush.msra.mxu0 %v8037_v63  ;;  %3381 = vmatpush.msrb.mxu1 %v8039_v57 }
 0xb9b   :  { %3401 = vmatpush.msra.mxu2 %v8041_v29  ;;  %3421 = vmatpush.msrb.mxu3 %v8045_v16  ;;  %v10596_v29 = vld [vmem:[#allocation45_spill] sm:$0xff] }
 0xb9c   :  { %3362 = vmatpush.msra.mxu0 %v8049_v25  ;;  %3382 = vmatpush.msrb.mxu1 %v8051_v12 }
 0xb9d   :  { %3402 = vmatpush.msra.mxu2 %v8053_v32  ;;  %3422 = vmatpush.msrb.mxu3 %v8057_v18 }
 0xb9e   :  { %3363 = vmatpush.msra.mxu0 %v8061_v39  ;;  %3383 = vmatpush.msrb.mxu1 %v8063_v40  ;;  %v3154_v40 = vrot.slane %v8387_v27, 6  ;;  %v8474_v27 = vld [vmem:[#allocation11 + $0x1e8] sm:$0xff] }
 0xb9f   :  { %3403 = vmatpush.msra.mxu2 %v8065_v35  ;;  %3423 = vmatpush.msrb.mxu3 %v8069_v49 }
 0xba0   :  { %3364 = vmatpush.msra.mxu0 %v10574_v33  ;;  %3384 = vmatpush.msrb.mxu1 %v10575_v9 }
 0xba1   :  { %3404 = vmatpush.msra.mxu2 %v10576_v21  ;;  %3424 = vmatpush.msrb.mxu3 %v10577_v23 }
 0xba2   :  { %3365 = vmatpush.msra.mxu0 %v10578_v5  ;;  %3385 = vmatpush.msrb.mxu1 %v10579_v54 }
 0xba3   :  { %3405 = vmatpush.msra.mxu2 %v10580_v28  ;;  %3425 = vmatpush.msrb.mxu3 %v10581_v42 }
 0xba4   :  { %3366 = vmatpush.msra.mxu0 %v10582_v45  ;;  %3386 = vmatpush.msrb.mxu1 %v10583_v17 }
 0xba5   :  { %3406 = vmatpush.msra.mxu2 %v10584_v44  ;;  %3426 = vmatpush.msrb.mxu3 %v10585_v24 }
 0xba6   :  { %3367 = vmatpush.msra.mxu0 %v10586_v19  ;;  %3387 = vmatpush.msrb.mxu1 %v10587_v3 }
 0xba7   :  { %3407 = vmatpush.msra.mxu2 %v10588_v4  ;;  %3427 = vmatpush.msrb.mxu3 %v10589_v10 }
 0xba8   :  { %3368 = vmatpush.msra.mxu0 %v10590_v6  ;;  %3388 = vmatpush.msrb.mxu1 %v10591_v8 }
 0xba9   :  { %3408 = vmatpush.msra.mxu2 %v10592_v51  ;;  %3428 = vmatpush.msrb.mxu3 %v10593_v56 }
 0xc05   :  { %v3064_v1 = vpop.f32.mrf.mxu0  ;;  %v3084_v11 = vpop.f32.mrf.mxu1 }
 0xc06   :  { %v3131_v55 = vrot.slane %v3064_v1, 4  ;;  %v3132_v58 = vrot.slane %v3084_v11, 4  ;;  %v8492_v1 = vld [vmem:[#allocation11 + $0x1d8] sm:$0xff]  ;;  %v8495_v11 = vld [vmem:[#allocation11 + $0x1a0] sm:$0xff] }
 0xc08   :  { %v3139_v0 = vadd.f32 %v3131_v55, %v10594_v2  ;;  %v3140_v46 = vadd.f32 %v3132_v58, %v10595_v13  ;;  %v8498_v55 = vld [vmem:[#allocation11 + $0x1a8] sm:$0xff]  ;;  %v8501_v58 = vld [vmem:[#allocation11 + $0x1b0] sm:$0xff] }
 0xc0a   :  { %5330 = vtanh.f32 %v3139_v0  ;;  %v8504_v0 = vld [vmem:[#allocation11 + $0x1b8] sm:$0xff] }
 0xc0b   :  { %5332 = vtanh.f32 %v3140_v46  ;;  %v8507_v46 = vld [vmem:[#allocation11 + $0x180] sm:$0xff] }
 0xc0c   :  { %v3104_v53 = vpop.f32.mrf.mxu2  ;;  %v3124_v43 = vpop.f32.mrf.mxu3 }
 0xc0d   :  { %v3133_v34 = vrot.slane %v3104_v53, 4  ;;  %v3134_v47 = vrot.slane %v3124_v43, 4  ;;  %v8510_v53 = vld [vmem:[#allocation11 + $0x188] sm:$0xff]  ;;  %v8513_v43 = vld [vmem:[#allocation11 + $0x190] sm:$0xff] }
 0xc0f   :  { %v3141_v63 = vadd.f32 %v3133_v34, %v10573_v36  ;;  %v3142_v16 = vadd.f32 %v3134_v47, %v10596_v29  ;;  %v8516_v34 = vld [vmem:[#allocation11 + $0x198] sm:$0xff]  ;;  %v8519_v47 = vld [vmem:[#allocation11 + $0x160] sm:$0xff] }
 0xc10   :  { %v5331_v57 = vpop.eup %5330 }
 0xc11   :  { %v5333_v25 = vpop.eup %5332  ;;  %5334 = vtanh.f32 %v3141_v63  ;;  %v3147_v12 = vmul.f32 0.5, %v5331_v57  ;;  %v8522_v63 = vld [vmem:[#allocation11 + $0x168] sm:$0xff]  ;;  %v8525_v57 = vld [vmem:[#allocation11 + $0x170] sm:$0xff] }
 0xc12   :  { %v3149_v32 = vmul.f32 0.5, %v5333_v25  ;;  %5336 = vtanh.f32 %v3142_v16  ;;  %v8528_v16 = vld [vmem:[#allocation11 + $0x178] sm:$0xff]  ;;  %v8531_v25 = vld [vmem:[#allocation11 + $0x140] sm:$0xff] }
 0xc13   :  { %v3148_v39 = vadd.f32 0.5, %v3147_v12  ;;  %v8534_v12 = vld [vmem:[#allocation11 + $0x148] sm:$0xff] }
 0xc14   :  { %v3150_v18 = vadd.f32 0.5, %v3149_v32  ;;  %v8537_v32 = vld [vmem:[#allocation11 + $0x150] sm:$0xff] }
 0xc16   :  { %v3156_v50 = vmul.f32 %v3154_v40, %v3150_v18  ;;  %v8540_v18 = vld [vmem:[#allocation11 + $0x158] sm:$0xff]  ;;  %v8546_v40 = vld [vmem:[#allocation11 + $0x128] sm:$0xff] }
 0xc17   :  { %v5335_v35 = vpop.eup %5334 }
 0xc18   :  { %v3157_v26 = vmul.f32 %v5335_v35, %v3148_v39  ;;  %v5337_v7 = vpop.eup %5336  ;;  %v8543_v39 = vld [vmem:[#allocation11 + $0x120] sm:$0xff]  ;;  %v8549_v35 = vld [vmem:[#allocation11 + $0x130] sm:$0xff] }
 0xc19   :  { %v3151_v22 = vmul.f32 0.5, %v5337_v7  ;;  %v8558_v7 = vld [vmem:[#allocation11 + $0x108] sm:$0xff] }
 0xc1a   :  { %v8462_v60 = vadd.f32 %v3157_v26, %v3156_v50  ;;  %v8552_v50 = vld [vmem:[#allocation11 + $0x138] sm:$0xff]  ;;  %v8555_v26 = vld [vmem:[#allocation11 + $0x100] sm:$0xff] }
 0xc1b   :  { %v3152_v14 = vadd.f32 0.5, %v3151_v22  ;;  %v8561_v22 = vld [vmem:[#allocation11 + $0x110] sm:$0xff] }
 0xc1c   :  { %5338 = vtanh.f32 %v8462_v60 }
 0xc22   :  { %v5339_v62 = vpop.eup %5338 }
 0xc23   :  { %v3160_v59 = vmul.f32 %v5339_v62, %v3152_v14  ;;  %v8564_v14 = vld [vmem:[#allocation11 + $0x118] sm:$0xff]  ;;  %v8567_v62 = vld [vmem:[#allocation11 + $0xe0] sm:$0xff] }
 0xc24   :  { %10598 = vst [vmem:[#allocation43_spill] sm:$0xff] %v8564_v14 }
 0xc25   :  { %v3162_v61 = vrot.slane %v3160_v59, 4  ;;  %v8469_v37 = vsel %vm205_vm0, %v3278_v30, %v3160_v59  ;;  %10599 = vst [vmem:[#allocation31_spill] sm:$0xff] %v8567_v62  ;;  %v8570_v59 = vld [vmem:[#allocation11 + $0xe8] sm:$0xff]  ;;  %v8576_v30 = vld [vmem:[#allocation11 + $0xf8] sm:$0xff] }
 0xc26   :  { %10600 = vst [vmem:[#allocation35_spill] sm:$0xff] %v8570_v59 }
 0xc27   :  { %3180 = vmatmul.f32.vlgmr.msrb.gmra.mxu0 %v3162_v61  ;;  %3200 = vmatmul.f32.vlgmr.msra.gmra.mxu1 %v3162_v61  ;;  %10602 = vst [vmem:[#allocation36_spill] sm:$0xff] %v8576_v30 }
 0xc28   :  { %3220 = vmatmul.f32.vlgmr.msrb.gmra.mxu2 %v3162_v61  ;;  %3240 = vmatmul.f32.vlgmr.msra.gmra.mxu3 %v3162_v61  ;;  %v8579_v61 = vld [vmem:[#allocation11 + $0xc0] sm:$0xff] }
 0xc29   :  { %3455 = vmatpush.msrb.mxu0 %v8471_v20  ;;  %3475 = vmatpush.msra.mxu1 %v8474_v27  ;;  %10603 = vst [vmem:[#allocation47_spill] sm:$0xff] %v8579_v61 }
 0xc2a   :  { %3495 = vmatpush.msrb.mxu2 %v8477_v15  ;;  %3515 = vmatpush.msra.mxu3 %v8480_v48 }
 0xc2b   :  { %3456 = vmatpush.msrb.mxu0 %v8483_v31  ;;  %3476 = vmatpush.msra.mxu1 %v8486_v41 }
 0xc2c   :  { %3496 = vmatpush.msrb.mxu2 %v8489_v38  ;;  %3516 = vmatpush.msra.mxu3 %v8492_v1 }
 0xc2d   :  { %3457 = vmatpush.msrb.mxu0 %v8495_v11  ;;  %3477 = vmatpush.msra.mxu1 %v8498_v55 }
 0xc2e   :  { %3497 = vmatpush.msrb.mxu2 %v8501_v58  ;;  %3517 = vmatpush.msra.mxu3 %v8504_v0 }
 0xc2f   :  { %3458 = vmatpush.msrb.mxu0 %v8507_v46  ;;  %3478 = vmatpush.msra.mxu1 %v8510_v53 }
 0xc30   :  { %3498 = vmatpush.msrb.mxu2 %v8513_v43  ;;  %3518 = vmatpush.msra.mxu3 %v8516_v34 }
 0xc31   :  { %3459 = vmatpush.msrb.mxu0 %v8519_v47  ;;  %3479 = vmatpush.msra.mxu1 %v8522_v63 }
 0xc32   :  { %3499 = vmatpush.msrb.mxu2 %v8525_v57  ;;  %3519 = vmatpush.msra.mxu3 %v8528_v16 }
 0xc33   :  { %3460 = vmatpush.msrb.mxu0 %v8531_v25  ;;  %3480 = vmatpush.msra.mxu1 %v8534_v12 }
 0xc34   :  { %3500 = vmatpush.msrb.mxu2 %v8537_v32  ;;  %3520 = vmatpush.msra.mxu3 %v8540_v18 }
 0xc35   :  { %3461 = vmatpush.msrb.mxu0 %v8543_v39  ;;  %3481 = vmatpush.msra.mxu1 %v8546_v40 }
 0xc36   :  { %3501 = vmatpush.msrb.mxu2 %v8549_v35  ;;  %3521 = vmatpush.msra.mxu3 %v8552_v50 }
 0xc37   :  { %3462 = vmatpush.msrb.mxu0 %v8555_v26  ;;  %3482 = vmatpush.msra.mxu1 %v8558_v7 }
 0xc38   :  { %3502 = vmatpush.msrb.mxu2 %v8561_v22  ;;  %3522 = vmatpush.msra.mxu3 %v8564_v14  ;;  %v8582_v14 = vld [vmem:[#allocation11 + $0xc8] sm:$0xff] }
 0xc39   :  { %3463 = vmatpush.msrb.mxu0 %v8567_v62  ;;  %3483 = vmatpush.msra.mxu1 %v8570_v59  ;;  %v8585_v62 = vld [vmem:[#allocation11 + $0xd0] sm:$0xff]  ;;  %v8588_v59 = vld [vmem:[#allocation11 + $0xd8] sm:$0xff] }
 0xc3a   :  { %3503 = vmatpush.msrb.mxu2 %v8573_v52  ;;  %3523 = vmatpush.msra.mxu3 %v8576_v30  ;;  %v8591_v52 = vld [vmem:[#allocation11 + $0xa0] sm:$0xff]  ;;  %v8594_v30 = vld [vmem:[#allocation11 + $0xa8] sm:$0xff] }
 0xc3b   :  { %3464 = vmatpush.msrb.mxu0 %v8579_v61  ;;  %3484 = vmatpush.msra.mxu1 %v8582_v14  ;;  %v8597_v61 = vld [vmem:[#allocation11 + $0xb0] sm:$0xff] }
 0xc3c   :  { %3504 = vmatpush.msrb.mxu2 %v8585_v62  ;;  %3524 = vmatpush.msra.mxu3 %v8588_v59 }
 0xc3d   :  { %3465 = vmatpush.msrb.mxu0 %v8591_v52  ;;  %3485 = vmatpush.msra.mxu1 %v8594_v30 }
 0xc3e   :  { %3505 = vmatpush.msrb.mxu2 %v8597_v61  ;;  %3525 = vmatpush.msra.mxu3 %v8069_v49 }
 0xc3f   :  { %3466 = vmatpush.msrb.mxu0 %v10574_v33  ;;  %3486 = vmatpush.msra.mxu1 %v10575_v9 }
 0xc40   :  { %3506 = vmatpush.msrb.mxu2 %v10576_v21  ;;  %3526 = vmatpush.msra.mxu3 %v10577_v23 }
 0xc41   :  { %3467 = vmatpush.msrb.mxu0 %v10578_v5  ;;  %3487 = vmatpush.msra.mxu1 %v10579_v54 }
 0xc42   :  { %3507 = vmatpush.msrb.mxu2 %v10580_v28  ;;  %3527 = vmatpush.msra.mxu3 %v10581_v42 }
 0xc43   :  { %3468 = vmatpush.msrb.mxu0 %v10582_v45  ;;  %3488 = vmatpush.msra.mxu1 %v10583_v17 }
 0xc44   :  { %3508 = vmatpush.msrb.mxu2 %v10584_v44  ;;  %3528 = vmatpush.msra.mxu3 %v10585_v24 }
 0xc45   :  { %3469 = vmatpush.msrb.mxu0 %v10586_v19  ;;  %3489 = vmatpush.msra.mxu1 %v10587_v3 }
 0xc46   :  { %3509 = vmatpush.msrb.mxu2 %v10588_v4  ;;  %3529 = vmatpush.msra.mxu3 %v10589_v10 }
 0xc47   :  { %3470 = vmatpush.msrb.mxu0 %v10590_v6  ;;  %3490 = vmatpush.msra.mxu1 %v10591_v8  ;;  %v3271_v8 = vrot.slane %v8462_v60, 6  ;;  %v10605_v60 = vld [vmem:[#allocation43_spill] sm:$0xff] }
 0xc48   :  { %3510 = vmatpush.msrb.mxu2 %v10592_v51  ;;  %3530 = vmatpush.msra.mxu3 %v10593_v56 }
 0xca4   :  { %v3181_v49 = vpop.f32.mrf.mxu0  ;;  %v3201_v33 = vpop.f32.mrf.mxu1 }
 0xca5   :  { %v3248_v9 = vrot.slane %v3181_v49, 2  ;;  %v3249_v21 = vrot.slane %v3201_v33, 2 }
 0xca7   :  { %v3256_v23 = vadd.f32 %v3248_v9, %v10594_v2  ;;  %v3257_v5 = vadd.f32 %v3249_v21, %v10595_v13 }
 0xca9   :  { %5340 = vtanh.f32 %v3256_v23 }
 0xcaa   :  { %5342 = vtanh.f32 %v3257_v5  ;;  %v10607_v5 = vld [vmem:[#allocation35_spill] sm:$0xff] }
 0xcab   :  { %v3221_v54 = vpop.f32.mrf.mxu2  ;;  %v3241_v28 = vpop.f32.mrf.mxu3 }
 0xcac   :  { %v3250_v42 = vrot.slane %v3221_v54, 2  ;;  %v3251_v45 = vrot.slane %v3241_v28, 2  ;;  %v10608_v54 = vld [vmem:[#allocation42_spill] sm:$0xff]  ;;  %v10609_v28 = vld [vmem:[#allocation36_spill] sm:$0xff] }
 0xcae   :  { %v3258_v17 = vadd.f32 %v3250_v42, %v10573_v36  ;;  %v3259_v24 = vadd.f32 %v3251_v45, %v10596_v29  ;;  %v10610_v42 = vld [vmem:[#allocation47_spill] sm:$0xff]  ;;  %v8676_v45 = vld [vmem:[#allocation11 + $0xb8] sm:$0xff] }
 0xcaf   :  { %v5341_v44 = vpop.eup %5340 }
 0xcb0   :  { %v5343_v19 = vpop.eup %5342  ;;  %5344 = vtanh.f32 %v3258_v17  ;;  %v3264_v3 = vmul.f32 0.5, %v5341_v44  ;;  %v8679_v17 = vld [vmem:[#allocation11 + $0x80] sm:$0xff]  ;;  %v8682_v44 = vld [vmem:[#allocation11 + $0x88] sm:$0xff] }
 0xcb1   :  { %v3266_v4 = vmul.f32 0.5, %v5343_v19  ;;  %5346 = vtanh.f32 %v3259_v24  ;;  %10611 = vst [vmem:[#allocation25_spill] sm:$0xff] %v8682_v44  ;;  %v8685_v24 = vld [vmem:[#allocation11 + $0x90] sm:$0xff]  ;;  %v8688_v19 = vld [vmem:[#allocation11 + $0x98] sm:$0xff] }
 0xcb2   :  { %v3265_v6 = vadd.f32 0.5, %v3264_v3  ;;  %10612 = vst [vmem:[#allocation28_spill] sm:$0xff] %v8685_v24  ;;  %v8691_v3 = vld [vmem:[#allocation11 + $0x60] sm:$0xff] }
 0xcb3   :  { %v3267_v10 = vadd.f32 0.5, %v3266_v4  ;;  %10613 = vst [vmem:[#allocation26_spill] sm:$0xff] %v8688_v19  ;;  %v8694_v4 = vld [vmem:[#allocation11 + $0x68] sm:$0xff] }
 0xcb4   :  { %10614 = vst [vmem:[#allocation27_spill] sm:$0xff] %v8691_v3 }
 0xcb5   :  { %v3273_v56 = vmul.f32 %v3271_v8, %v3267_v10  ;;  %10615 = vst [vmem:[#allocation46_spill] sm:$0xff] %v8694_v4  ;;  %v8697_v10 = vld [vmem:[#allocation11 + $0x70] sm:$0xff]  ;;  %v8703_v8 = vld [vmem:[#allocation11 + $0x40] sm:$0xff] }
 0xcb6   :  { %v5345_v51 = vpop.eup %5344  ;;  %10616 = vst [vmem:[#allocation29_spill] sm:$0xff] %v8697_v10 }
 0xcb7   :  { %v3274_v2 = vmul.f32 %v5345_v51, %v3265_v6  ;;  %v5347_v13 = vpop.eup %5346  ;;  %v8700_v6 = vld [vmem:[#allocation11 + $0x78] sm:$0xff]  ;;  %10618 = vst [vmem:[#allocation33_spill] sm:$0xff] %v8703_v8  ;;  %v8706_v51 = vld [vmem:[#allocation11 + $0x48] sm:$0xff] }
 0xcb8   :  { %v3268_v36 = vmul.f32 0.5, %v5347_v13  ;;  %10617 = vst [vmem:[#allocation32_spill] sm:$0xff] %v8700_v6  ;;  %v8715_v13 = vld [vmem:[#allocation11 + $0x20] sm:$0xff] }
 0xcb9   :  { %v8626_v49 = vadd.f32 %v3274_v2, %v3273_v56  ;;  %10619 = vst [vmem:[#allocation41_spill] sm:$0xff] %v8706_v51  ;;  %v8709_v56 = vld [vmem:[#allocation11 + $0x50] sm:$0xff]  ;;  %v8712_v2 = vld [vmem:[#allocation11 + $0x58] sm:$0xff] }
 0xcba   :  { %v3269_v33 = vadd.f32 0.5, %v3268_v36  ;;  %10620 = vst [vmem:[#allocation24_spill] sm:$0xff] %v8709_v56  ;;  %v8718_v36 = vld [vmem:[#allocation11 + $0x28] sm:$0xff] }
 0xcbb   :  { %5348 = vtanh.f32 %v8626_v49  ;;  %10621 = vst [vmem:[#allocation48_spill] sm:$0xff] %v8712_v2 }
 0xcbc   :  { %10622 = vst [vmem:[#allocation49_spill] sm:$0xff] %v8715_v13 }
 0xcbd   :  { %10623 = vst [vmem:[#allocation34_spill] sm:$0xff] %v8718_v36 }
 0xcc1   :  { %v5349_v29 = vpop.eup %5348 }
 0xcc2   :  { %v3277_v9 = vmul.f32 %v5349_v29, %v3269_v33  ;;  %v8721_v33 = vld [vmem:[#allocation11 + $0x30] sm:$0xff]  ;;  %v8724_v29 = vld [vmem:[#allocation11 + $0x38] sm:$0xff] }
 0xcc3   :  { %10624 = vst [vmem:[#allocation39_spill] sm:$0xff] %v8721_v33 }
 0xcc4   :  { %v3351_v21 = vrot.slane %v3277_v9, 6  ;;  %v8631_v23 = vsel %vm835_vm3, %v8469_v37, %v3277_v9  ;;  %v10606_v37 = vld [vmem:[#allocation31_spill] sm:$0xff]  ;;  %10625 = vst [vmem:[#allocation51_spill] sm:$0xff] %v8724_v29  ;;  %v8727_v9 = vld [vmem:[#allocation11] sm:$0xff] }
 0xcc5   :  { %10604 = vst [vmem:[#allocation23_spill] sm:$0xff] %v8631_v23  ;;  %v8733_v23 = vld [vmem:[#allocation11 + $0x10] sm:$0xff] }
 0xcc6   :  { %3369 = vmatmul.f32.vlgmr.msra.gmra.mxu0 %v3351_v21  ;;  %3389 = vmatmul.f32.vlgmr.msrb.gmra.mxu1 %v3351_v21  ;;  %10626 = vst [vmem:[#allocation30_spill] sm:$0xff] %v8727_v9 }
 0xcc7   :  { %3409 = vmatmul.f32.vlgmr.msra.gmra.mxu2 %v3351_v21  ;;  %3429 = vmatmul.f32.vlgmr.msrb.gmra.mxu3 %v3351_v21  ;;  %v8730_v21 = vld [vmem:[#allocation11 + $0x8] sm:$0xff]  ;;  %10628 = vst [vmem:[#allocation40_spill] sm:$0xff] %v8733_v23 }
 0xcc8   :  { %3572 = vmatpush.msra.mxu0 %v8471_v20  ;;  %3592 = vmatpush.msrb.mxu1 %v8474_v27  ;;  %10627 = vst [vmem:[#allocation45_spill] sm:$0xff] %v8730_v21 }
 0xcc9   :  { %3612 = vmatpush.msra.mxu2 %v8477_v15  ;;  %3632 = vmatpush.msrb.mxu3 %v8480_v48 }
 0xcca   :  { %3573 = vmatpush.msra.mxu0 %v8483_v31  ;;  %3593 = vmatpush.msrb.mxu1 %v8486_v41 }
 0xccb   :  { %3613 = vmatpush.msra.mxu2 %v8489_v38  ;;  %3633 = vmatpush.msrb.mxu3 %v8492_v1 }
 0xccc   :  { %3574 = vmatpush.msra.mxu0 %v8495_v11  ;;  %3594 = vmatpush.msrb.mxu1 %v8498_v55 }
 0xccd   :  { %3614 = vmatpush.msra.mxu2 %v8501_v58  ;;  %3634 = vmatpush.msrb.mxu3 %v8504_v0 }
 0xcce   :  { %3575 = vmatpush.msra.mxu0 %v8507_v46  ;;  %3595 = vmatpush.msrb.mxu1 %v8510_v53 }
 0xccf   :  { %3615 = vmatpush.msra.mxu2 %v8513_v43  ;;  %3635 = vmatpush.msrb.mxu3 %v8516_v34 }
 0xcd0   :  { %3576 = vmatpush.msra.mxu0 %v8519_v47  ;;  %3596 = vmatpush.msrb.mxu1 %v8522_v63 }
 0xcd1   :  { %3616 = vmatpush.msra.mxu2 %v8525_v57  ;;  %3636 = vmatpush.msrb.mxu3 %v8528_v16 }
 0xcd2   :  { %3577 = vmatpush.msra.mxu0 %v8531_v25  ;;  %3597 = vmatpush.msrb.mxu1 %v8534_v12 }
 0xcd3   :  { %3617 = vmatpush.msra.mxu2 %v8537_v32  ;;  %3637 = vmatpush.msrb.mxu3 %v8540_v18 }
 0xcd4   :  { %3578 = vmatpush.msra.mxu0 %v8543_v39  ;;  %3598 = vmatpush.msrb.mxu1 %v8546_v40 }
 0xcd5   :  { %3618 = vmatpush.msra.mxu2 %v8549_v35  ;;  %3638 = vmatpush.msrb.mxu3 %v8552_v50 }
 0xcd6   :  { %3579 = vmatpush.msra.mxu0 %v8555_v26  ;;  %3599 = vmatpush.msrb.mxu1 %v8558_v7 }
 0xcd7   :  { %3619 = vmatpush.msra.mxu2 %v8561_v22  ;;  %3639 = vmatpush.msrb.mxu3 %v10605_v60 }
 0xcd8   :  { %3580 = vmatpush.msra.mxu0 %v10606_v37  ;;  %3600 = vmatpush.msrb.mxu1 %v10607_v5 }
 0xcd9   :  { %3620 = vmatpush.msra.mxu2 %v10608_v54  ;;  %3640 = vmatpush.msrb.mxu3 %v10609_v28 }
 0xcda   :  { %3581 = vmatpush.msra.mxu0 %v10610_v42  ;;  %3601 = vmatpush.msrb.mxu1 %v8582_v14 }
 0xcdb   :  { %3621 = vmatpush.msra.mxu2 %v8585_v62  ;;  %3641 = vmatpush.msrb.mxu3 %v8588_v59 }
 0xcdc   :  { %3582 = vmatpush.msra.mxu0 %v8591_v52  ;;  %3602 = vmatpush.msrb.mxu1 %v8594_v30 }
 0xcdd   :  { %3622 = vmatpush.msra.mxu2 %v8597_v61  ;;  %3642 = vmatpush.msrb.mxu3 %v8676_v45 }
 0xcde   :  { %3583 = vmatpush.msra.mxu0 %v8679_v17  ;;  %3603 = vmatpush.msrb.mxu1 %v8682_v44 }
 0xcdf   :  { %3623 = vmatpush.msra.mxu2 %v8685_v24  ;;  %3643 = vmatpush.msrb.mxu3 %v8688_v19 }
 0xce0   :  { %3584 = vmatpush.msra.mxu0 %v8691_v3  ;;  %3604 = vmatpush.msrb.mxu1 %v8694_v4 }
 0xce1   :  { %3624 = vmatpush.msra.mxu2 %v8697_v10  ;;  %3644 = vmatpush.msrb.mxu3 %v8700_v6  ;;  %v10638_v10 = vld [vmem:[#allocation22_spill] sm:$0xff] }
 0xce2   :  { %3585 = vmatpush.msra.mxu0 %v8703_v8  ;;  %3605 = vmatpush.msrb.mxu1 %v8706_v51 }
 0xce3   :  { %3625 = vmatpush.msra.mxu2 %v8709_v56  ;;  %3645 = vmatpush.msrb.mxu3 %v8712_v2  ;;  %v10632_v2 = vld [vmem:[#allocation37_spill] sm:$0xff] }
 0xce4   :  { %3586 = vmatpush.msra.mxu0 %v8715_v13  ;;  %3606 = vmatpush.msrb.mxu1 %v8718_v36  ;;  %v8736_v36 = vld [vmem:[#allocation11 + $0x18] sm:$0xff] }
 0xce5   :  { %3626 = vmatpush.msra.mxu2 %v8721_v33  ;;  %3646 = vmatpush.msrb.mxu3 %v8724_v29  ;;  %10629 = vst [vmem:[#allocation43_spill] sm:$0xff] %v8736_v36  ;;  %v10630_v33 = vld [vmem:[#allocation44_spill] sm:$0xff] }
 0xce6   :  { %3587 = vmatpush.msra.mxu0 %v8727_v9  ;;  %3607 = vmatpush.msrb.mxu1 %v8730_v21  ;;  %v10631_v13 = vperm.slane %v10630_v33, 0  ;;  %v10634_v56 = vperm.slane %v10630_v33, 1  ;;  %v10635_v9 = vld [vmem:[#allocation50_spill] sm:$0xff] }
 0xce7   :  { %3627 = vmatpush.msra.mxu2 %v8733_v23  ;;  %3647 = vmatpush.msrb.mxu3 %v8736_v36  ;;  %v10637_v36 = vperm.slane %v10630_v33, 2 }
 0xce8   :  { %v8742_v29 = vadd.f32 %v10632_v2, %v10631_v13  ;;  %v8747_v51 = vadd.f32 %v10635_v9, %v10634_v56  ;;  %v10640_v2 = vperm.slane %v10630_v33, 3  ;;  %v10641_v13 = vld [vmem:[#allocation38_spill] sm:$0xff] }
 0xce9   :  { %v8754_v4 = vadd.f32 %v10638_v10, %v10637_v36  ;;  %v3448_v36 = vrot.slane %v8626_v49, 6 }
 0xcea   :  { %10633 = vst [vmem:[#allocation31_spill] sm:$0xff] %v8742_v29  ;;  %v8759_v3 = vadd.f32 %v10641_v13, %v10640_v2 }
 0xceb   :  { %10636 = vst [vmem:[#allocation35_spill] sm:$0xff] %v8747_v51 }
 0xcec   :  { %10639 = vst [vmem:[#allocation42_spill] sm:$0xff] %v8754_v4 }
 0xced   :  { %10642 = vst [vmem:[#allocation36_spill] sm:$0xff] %v8759_v3 }
 0xd43   :  { %v3370_v8 = vpop.f32.mrf.mxu0  ;;  %v3390_v21 = vpop.f32.mrf.mxu1 }
 0xd44   :  { %v3433_v6 = vadd.f32 %v3370_v8, %v8742_v29  ;;  %v3434_v23 = vadd.f32 %v3390_v21, %v8747_v51 }
 0xd46   :  { %5350 = vtanh.f32 %v3433_v6 }
 0xd47   :  { %5352 = vtanh.f32 %v3434_v23 }
 0xd4a   :  { %v3410_v56 = vpop.f32.mrf.mxu2  ;;  %v3430_v9 = vpop.f32.mrf.mxu3 }
 0xd4b   :  { %v3435_v19 = vadd.f32 %v3410_v56, %v8754_v4  ;;  %v3436_v8 = vadd.f32 %v3430_v9, %v8759_v3 }
 0xd4c   :  { %v5351_v24 = vpop.eup %5350 }
 0xd4d   :  { %v5353_v21 = vpop.eup %5352  ;;  %5354 = vtanh.f32 %v3435_v19  ;;  %v3441_v23 = vmul.f32 0.5, %v5351_v24 }
 0xd4e   :  { %v3443_v6 = vmul.f32 0.5, %v5353_v21  ;;  %5356 = vtanh.f32 %v3436_v8  ;;  %v3870_v21 = vld [vmem:[#allocation12 + $0x1e8] sm:$0xff] }
 0xd4f   :  { %v3442_v10 = vadd.f32 0.5, %v3441_v23  ;;  %v3871_v23 = vld [vmem:[#allocation12 + $0x1f0] sm:$0xff] }
 0xd50   :  { %v3444_v51 = vadd.f32 0.5, %v3443_v6  ;;  %v3872_v6 = vld [vmem:[#allocation12 + $0x1f8] sm:$0xff] }
 0xd52   :  { %v3450_v29 = vmul.f32 %v3448_v36, %v3444_v51  ;;  %v3866_v36 = vld [vmem:[#allocation12 + $0x1c8] sm:$0xff] }
 0xd53   :  { %v5355_v33 = vpop.eup %5354 }
 0xd54   :  { %v3451_v2 = vmul.f32 %v5355_v33, %v3442_v10  ;;  %v5357_v13 = vpop.eup %5356  ;;  %v3865_v10 = vld [vmem:[#allocation12 + $0x1c0] sm:$0xff]  ;;  %v3867_v33 = vld [vmem:[#allocation12 + $0x1d0] sm:$0xff] }
 0xd55   :  { %v3445_v56 = vmul.f32 0.5, %v5357_v13  ;;  %v3861_v13 = vld [vmem:[#allocation12 + $0x1a0] sm:$0xff] }
 0xd56   :  { %v8764_v44 = vadd.f32 %v3451_v2, %v3450_v29  ;;  %v3868_v2 = vld [vmem:[#allocation12 + $0x1d8] sm:$0xff] }
 0xd57   :  { %v3446_v4 = vadd.f32 0.5, %v3445_v56  ;;  %v3862_v56 = vld [vmem:[#allocation12 + $0x1a8] sm:$0xff] }
 0xd58   :  { %5358 = vtanh.f32 %v8764_v44 }
 0xd5e   :  { %v5359_v9 = vpop.eup %5358 }
 0xd5f   :  { %v8767_v3 = vmul.f32 %v5359_v9, %v3446_v4  ;;  %v3863_v9 = vld [vmem:[#allocation12 + $0x1b0] sm:$0xff] }
 0xd61   :  { %3471 = vmatmul.f32.vlgmr.msrb.gmra.mxu0 %v8767_v3  ;;  %3491 = vmatmul.f32.vlgmr.msra.gmra.mxu1 %v8767_v3 }
 0xd62   :  { %3511 = vmatmul.f32.vlgmr.msrb.gmra.mxu2 %v8767_v3  ;;  %3531 = vmatmul.f32.vlgmr.msra.gmra.mxu3 %v8767_v3 }
 0xd63   :  { %3689 = vmatpush.msrb.mxu0 %v8471_v20  ;;  %3709 = vmatpush.msra.mxu1 %v8474_v27  ;;  %v10643_v20 = vld [vmem:[#allocation25_spill] sm:$0xff]  ;;  %v10644_v27 = vld [vmem:[#allocation28_spill] sm:$0xff] }
 0xd64   :  { %3729 = vmatpush.msrb.mxu2 %v8477_v15  ;;  %3749 = vmatpush.msra.mxu3 %v8480_v48  ;;  %v10645_v15 = vld [vmem:[#allocation26_spill] sm:$0xff]  ;;  %v10646_v48 = vld [vmem:[#allocation27_spill] sm:$0xff] }
 0xd65   :  { %3690 = vmatpush.msrb.mxu0 %v8483_v31  ;;  %3710 = vmatpush.msra.mxu1 %v8486_v41  ;;  %v10647_v31 = vld [vmem:[#allocation46_spill] sm:$0xff]  ;;  %v10648_v41 = vld [vmem:[#allocation29_spill] sm:$0xff] }
 0xd66   :  { %3730 = vmatpush.msrb.mxu2 %v8489_v38  ;;  %3750 = vmatpush.msra.mxu3 %v8492_v1  ;;  %v10649_v38 = vld [vmem:[#allocation32_spill] sm:$0xff]  ;;  %v10650_v1 = vld [vmem:[#allocation33_spill] sm:$0xff] }
 0xd67   :  { %3691 = vmatpush.msrb.mxu0 %v8495_v11  ;;  %3711 = vmatpush.msra.mxu1 %v8498_v55  ;;  %v10651_v11 = vld [vmem:[#allocation41_spill] sm:$0xff]  ;;  %v10652_v55 = vld [vmem:[#allocation24_spill] sm:$0xff] }
 0xd68   :  { %3731 = vmatpush.msrb.mxu2 %v8501_v58  ;;  %3751 = vmatpush.msra.mxu3 %v8504_v0  ;;  %v10653_v58 = vld [vmem:[#allocation48_spill] sm:$0xff]  ;;  %v10654_v0 = vld [vmem:[#allocation49_spill] sm:$0xff] }
 0xd69   :  { %3692 = vmatpush.msrb.mxu0 %v8507_v46  ;;  %3712 = vmatpush.msra.mxu1 %v8510_v53  ;;  %v10655_v46 = vld [vmem:[#allocation34_spill] sm:$0xff]  ;;  %v10656_v53 = vld [vmem:[#allocation39_spill] sm:$0xff] }
 0xd6a   :  { %3732 = vmatpush.msrb.mxu2 %v8513_v43  ;;  %3752 = vmatpush.msra.mxu3 %v8516_v34  ;;  %v10657_v43 = vld [vmem:[#allocation51_spill] sm:$0xff]  ;;  %v10658_v34 = vld [vmem:[#allocation30_spill] sm:$0xff] }
 0xd6b   :  { %3693 = vmatpush.msrb.mxu0 %v8519_v47  ;;  %3713 = vmatpush.msra.mxu1 %v8522_v63  ;;  %v10659_v47 = vld [vmem:[#allocation45_spill] sm:$0xff]  ;;  %v10660_v63 = vld [vmem:[#allocation40_spill] sm:$0xff] }
 0xd6c   :  { %3733 = vmatpush.msrb.mxu2 %v8525_v57  ;;  %3753 = vmatpush.msra.mxu3 %v8528_v16  ;;  %v10661_v57 = vld [vmem:[#allocation43_spill] sm:$0xff] }
 0xd6d   :  { %3694 = vmatpush.msrb.mxu0 %v8531_v25  ;;  %3714 = vmatpush.msra.mxu1 %v8534_v12 }
 0xd6e   :  { %3734 = vmatpush.msrb.mxu2 %v8537_v32  ;;  %3754 = vmatpush.msra.mxu3 %v8540_v18  ;;  %v10662_v18 = vld [vmem:[#allocation31_spill] sm:$0xff] }
 0xd6f   :  { %3695 = vmatpush.msrb.mxu0 %v8543_v39  ;;  %3715 = vmatpush.msra.mxu1 %v8546_v40  ;;  %v10663_v40 = vld [vmem:[#allocation35_spill] sm:$0xff] }
 0xd70   :  { %3735 = vmatpush.msrb.mxu2 %v8549_v35  ;;  %3755 = vmatpush.msra.mxu3 %v8552_v50 }
 0xd71   :  { %3696 = vmatpush.msrb.mxu0 %v8555_v26  ;;  %3716 = vmatpush.msra.mxu1 %v8558_v7 }
 0xd72   :  { %3736 = vmatpush.msrb.mxu2 %v8561_v22  ;;  %3756 = vmatpush.msra.mxu3 %v10605_v60 }
 0xd73   :  { %3697 = vmatpush.msrb.mxu0 %v10606_v37  ;;  %3717 = vmatpush.msra.mxu1 %v10607_v5 }
 0xd74   :  { %3737 = vmatpush.msrb.mxu2 %v10608_v54  ;;  %3757 = vmatpush.msra.mxu3 %v10609_v28  ;;  %v3562_v54 = vrot.slane %v8764_v44, 6  ;;  %v3869_v44 = vld [vmem:[#allocation12 + $0x1e0] sm:$0xff] }
 0xd75   :  { %3698 = vmatpush.msrb.mxu0 %v10610_v42  ;;  %3718 = vmatpush.msra.mxu1 %v8582_v14  ;;  %v10664_v14 = vld [vmem:[#allocation42_spill] sm:$0xff] }
 0xd76   :  { %3738 = vmatpush.msrb.mxu2 %v8585_v62  ;;  %3758 = vmatpush.msra.mxu3 %v8588_v59 }
 0xd77   :  { %3699 = vmatpush.msrb.mxu0 %v8591_v52  ;;  %3719 = vmatpush.msra.mxu1 %v8594_v30  ;;  %v10665_v52 = vld [vmem:[#allocation36_spill] sm:$0xff] }
 0xd78   :  { %3739 = vmatpush.msrb.mxu2 %v8597_v61  ;;  %3759 = vmatpush.msra.mxu3 %v8676_v45 }
 0xd79   :  { %3700 = vmatpush.msrb.mxu0 %v8679_v17  ;;  %3720 = vmatpush.msra.mxu1 %v10643_v20  ;;  %v3864_v20 = vld [vmem:[#allocation12 + $0x1b8] sm:$0xff] }
 0xd7a   :  { %3740 = vmatpush.msrb.mxu2 %v10644_v27  ;;  %3760 = vmatpush.msra.mxu3 %v10645_v15  ;;  %v3857_v27 = vld [vmem:[#allocation12 + $0x180] sm:$0xff]  ;;  %v3858_v15 = vld [vmem:[#allocation12 + $0x188] sm:$0xff] }
 0xd7b   :  { %3701 = vmatpush.msrb.mxu0 %v10646_v48  ;;  %3721 = vmatpush.msra.mxu1 %v10647_v31  ;;  %v3859_v48 = vld [vmem:[#allocation12 + $0x190] sm:$0xff]  ;;  %v3860_v31 = vld [vmem:[#allocation12 + $0x198] sm:$0xff] }
 0xd7c   :  { %3741 = vmatpush.msrb.mxu2 %v10648_v41  ;;  %3761 = vmatpush.msra.mxu3 %v10649_v38  ;;  %v3853_v41 = vld [vmem:[#allocation12 + $0x160] sm:$0xff]  ;;  %v3854_v38 = vld [vmem:[#allocation12 + $0x168] sm:$0xff] }
 0xd7d   :  { %3702 = vmatpush.msrb.mxu0 %v10650_v1  ;;  %3722 = vmatpush.msra.mxu1 %v10651_v11  ;;  %v3855_v1 = vld [vmem:[#allocation12 + $0x170] sm:$0xff]  ;;  %v3856_v11 = vld [vmem:[#allocation12 + $0x178] sm:$0xff] }
 0xd7e   :  { %3742 = vmatpush.msrb.mxu2 %v10652_v55  ;;  %3762 = vmatpush.msra.mxu3 %v10653_v58  ;;  %v3849_v55 = vld [vmem:[#allocation12 + $0x140] sm:$0xff]  ;;  %v3850_v58 = vld [vmem:[#allocation12 + $0x148] sm:$0xff] }
 0xd7f   :  { %3703 = vmatpush.msrb.mxu0 %v10654_v0  ;;  %3723 = vmatpush.msra.mxu1 %v10655_v46  ;;  %v3851_v0 = vld [vmem:[#allocation12 + $0x150] sm:$0xff]  ;;  %v3852_v46 = vld [vmem:[#allocation12 + $0x158] sm:$0xff] }
 0xd80   :  { %3743 = vmatpush.msrb.mxu2 %v10656_v53  ;;  %3763 = vmatpush.msra.mxu3 %v10657_v43  ;;  %v3845_v53 = vld [vmem:[#allocation12 + $0x120] sm:$0xff]  ;;  %v3846_v43 = vld [vmem:[#allocation12 + $0x128] sm:$0xff] }
 0xd81   :  { %3704 = vmatpush.msrb.mxu0 %v10658_v34  ;;  %3724 = vmatpush.msra.mxu1 %v10659_v47  ;;  %v3847_v34 = vld [vmem:[#allocation12 + $0x130] sm:$0xff]  ;;  %v3848_v47 = vld [vmem:[#allocation12 + $0x138] sm:$0xff] }
 0xd82   :  { %3744 = vmatpush.msrb.mxu2 %v10660_v63  ;;  %3764 = vmatpush.msra.mxu3 %v10661_v57  ;;  %v3841_v63 = vld [vmem:[#allocation12 + $0x100] sm:$0xff]  ;;  %v3842_v57 = vld [vmem:[#allocation12 + $0x108] sm:$0xff] }
 0xdde   :  { %v3472_v16 = vpop.f32.mrf.mxu0  ;;  %v3492_v25 = vpop.f32.mrf.mxu1 }
 0xddf   :  { %v3539_v12 = vrot.slane %v3472_v16, 6  ;;  %v3540_v32 = vrot.slane %v3492_v25, 6  ;;  %v3843_v16 = vld [vmem:[#allocation12 + $0x110] sm:$0xff]  ;;  %v3844_v25 = vld [vmem:[#allocation12 + $0x118] sm:$0xff] }
 0xde1   :  { %v3547_v39 = vadd.f32 %v3539_v12, %v10662_v18  ;;  %v3548_v35 = vadd.f32 %v3540_v32, %v10663_v40  ;;  %v3837_v12 = vld [vmem:[#allocation12 + $0xe0] sm:$0xff]  ;;  %v3838_v32 = vld [vmem:[#allocation12 + $0xe8] sm:$0xff] }
 0xde3   :  { %5360 = vtanh.f32 %v3547_v39  ;;  %v3839_v39 = vld [vmem:[#allocation12 + $0xf0] sm:$0xff] }
 0xde4   :  { %5362 = vtanh.f32 %v3548_v35  ;;  %v3840_v35 = vld [vmem:[#allocation12 + $0xf8] sm:$0xff] }
 0xde5   :  { %v3512_v50 = vpop.f32.mrf.mxu2  ;;  %v3532_v26 = vpop.f32.mrf.mxu3 }
 0xde6   :  { %v3541_v7 = vrot.slane %v3512_v50, 6  ;;  %v3542_v22 = vrot.slane %v3532_v26, 6  ;;  %v3833_v50 = vld [vmem:[#allocation12 + $0xc0] sm:$0xff]  ;;  %v3834_v26 = vld [vmem:[#allocation12 + $0xc8] sm:$0xff] }
 0xde8   :  { %v3549_v62 = vadd.f32 %v3541_v7, %v10664_v14  ;;  %v3550_v30 = vadd.f32 %v3542_v22, %v10665_v52  ;;  %v3835_v7 = vld [vmem:[#allocation12 + $0xd0] sm:$0xff]  ;;  %v3836_v22 = vld [vmem:[#allocation12 + $0xd8] sm:$0xff] }
 0xde9   :  { %v5361_v59 = vpop.eup %5360 }
 0xdea   :  { %v5363_v61 = vpop.eup %5362  ;;  %5364 = vtanh.f32 %v3549_v62  ;;  %v3555_v49 = vmul.f32 0.5, %v5361_v59  ;;  %v3829_v62 = vld [vmem:[#allocation12 + $0xa0] sm:$0xff]  ;;  %v3830_v59 = vld [vmem:[#allocation12 + $0xa8] sm:$0xff] }
 0xdeb   :  { %v3557_v60 = vmul.f32 0.5, %v5363_v61  ;;  %5366 = vtanh.f32 %v3550_v30  ;;  %v3831_v30 = vld [vmem:[#allocation12 + $0xb0] sm:$0xff] }
 0xdec   :  { %v3556_v5 = vadd.f32 0.5, %v3555_v49 }
 0xded   :  { %v3558_v37 = vadd.f32 0.5, %v3557_v60  ;;  %v3832_v60 = vld [vmem:[#allocation12 + $0xb8] sm:$0xff] }
 0xdef   :  { %v3564_v42 = vmul.f32 %v3562_v54, %v3558_v37  ;;  %v3825_v37 = vld [vmem:[#allocation12 + $0x80] sm:$0xff] }
 0xdf0   :  { %v5365_v28 = vpop.eup %5364 }
 0xdf1   :  { %v3565_v45 = vmul.f32 %v5365_v28, %v3556_v5  ;;  %v5367_v17 = vpop.eup %5366  ;;  %v3826_v5 = vld [vmem:[#allocation12 + $0x88] sm:$0xff] }
 0xdf2   :  { %v3559_v19 = vmul.f32 0.5, %v5367_v17 }
 0xdf3   :  { %v8842_v24 = vadd.f32 %v3565_v45, %v3564_v42  ;;  %v3827_v42 = vld [vmem:[#allocation12 + $0x90] sm:$0xff]  ;;  %v3828_v45 = vld [vmem:[#allocation12 + $0x98] sm:$0xff] }
 0xdf4   :  { %v3560_v4 = vadd.f32 0.5, %v3559_v19 }
 0xdf5   :  { %5368 = vtanh.f32 %v8842_v24 }
 0xdfb   :  { %v5369_v51 = vpop.eup %5368 }
 0xdfc   :  { %v8845_v29 = vmul.f32 %v5369_v51, %v3560_v4  ;;  %v3821_v4 = vld [vmem:[#allocation12 + $0x60] sm:$0xff]  ;;  %v3822_v51 = vld [vmem:[#allocation12 + $0x68] sm:$0xff] }
 0xdfe   :  { %v3570_v8 = vrot.slane %v8845_v29, 2 }
 0xe00   :  { %3588 = vmatmul.f32.vlgmr.msra.gmra.mxu0 %v3570_v8  ;;  %3608 = vmatmul.f32.vlgmr.msrb.gmra.mxu1 %v3570_v8 }
 0xe01   :  { %3628 = vmatmul.f32.vlgmr.msra.gmra.mxu2 %v3570_v8  ;;  %3648 = vmatmul.f32.vlgmr.msrb.gmra.mxu3 %v3570_v8  ;;  %v3823_v8 = vld [vmem:[#allocation12 + $0x70] sm:$0xff] }
 0xe02   :  { %3883 = vmatpush.msra.mxu0 %v3869_v44  ;;  %3906 = vmatpush.msrb.mxu1 %v3870_v21  ;;  %v3824_v44 = vld [vmem:[#allocation12 + $0x78] sm:$0xff]  ;;  %v3817_v21 = vld [vmem:[#allocation12 + $0x40] sm:$0xff] }
 0xe03   :  { %3929 = vmatpush.msra.mxu2 %v3871_v23  ;;  %3952 = vmatpush.msrb.mxu3 %v3872_v6  ;;  %v3818_v23 = vld [vmem:[#allocation12 + $0x48] sm:$0xff]  ;;  %v3819_v6 = vld [vmem:[#allocation12 + $0x50] sm:$0xff] }
 0xe04   :  { %3884 = vmatpush.msra.mxu0 %v3865_v10  ;;  %3907 = vmatpush.msrb.mxu1 %v3866_v36  ;;  %v3820_v10 = vld [vmem:[#allocation12 + $0x58] sm:$0xff]  ;;  %v3813_v36 = vld [vmem:[#allocation12 + $0x20] sm:$0xff] }
 0xe05   :  { %3930 = vmatpush.msra.mxu2 %v3867_v33  ;;  %3953 = vmatpush.msrb.mxu3 %v3868_v2  ;;  %v3814_v33 = vld [vmem:[#allocation12 + $0x28] sm:$0xff]  ;;  %v3815_v2 = vld [vmem:[#allocation12 + $0x30] sm:$0xff] }
 0xe06   :  { %3885 = vmatpush.msra.mxu0 %v3861_v13  ;;  %3908 = vmatpush.msrb.mxu1 %v3862_v56  ;;  %v3816_v13 = vld [vmem:[#allocation12 + $0x38] sm:$0xff] }
 0xe07   :  { %3931 = vmatpush.msra.mxu2 %v3863_v9  ;;  %3954 = vmatpush.msrb.mxu3 %v3864_v20  ;;  %v3809_v20 = vld [vmem:[#allocation12] sm:$0xff] }
 0xe08   :  { %3886 = vmatpush.msra.mxu0 %v3857_v27  ;;  %3909 = vmatpush.msrb.mxu1 %v3858_v15  ;;  %v3810_v27 = vld [vmem:[#allocation12 + $0x8] sm:$0xff] }
 0xe09   :  { %3932 = vmatpush.msra.mxu2 %v3859_v48  ;;  %3955 = vmatpush.msrb.mxu3 %v3860_v31  ;;  %v3811_v31 = vld [vmem:[#allocation12 + $0x10] sm:$0xff] }
 0xe0a   :  { %3887 = vmatpush.msra.mxu0 %v3853_v41  ;;  %3910 = vmatpush.msrb.mxu1 %v3854_v38  ;;  %v3812_v41 = vld [vmem:[#allocation12 + $0x18] sm:$0xff] }
 0xe0b   :  { %3933 = vmatpush.msra.mxu2 %v3855_v1  ;;  %3956 = vmatpush.msrb.mxu3 %v3856_v11 }
 0xe0c   :  { %3888 = vmatpush.msra.mxu0 %v3849_v55  ;;  %3911 = vmatpush.msrb.mxu1 %v3850_v58 }
 0xe0d   :  { %3934 = vmatpush.msra.mxu2 %v3851_v0  ;;  %3957 = vmatpush.msrb.mxu3 %v3852_v46 }
 0xe0e   :  { %3889 = vmatpush.msra.mxu0 %v3845_v53  ;;  %3912 = vmatpush.msrb.mxu1 %v3846_v43  ;;  %v3679_v43 = vrot.slane %v8842_v24, 6  ;;  %v10666_v24 = vld [vmem:[#allocation23_spill] sm:$0xff] }
 0xe0f   :  { %3935 = vmatpush.msra.mxu2 %v3847_v34  ;;  %3958 = vmatpush.msrb.mxu3 %v3848_v47 }
 0xe10   :  { %3890 = vmatpush.msra.mxu0 %v3841_v63  ;;  %3913 = vmatpush.msrb.mxu1 %v3842_v57 }
 0xe11   :  { %3936 = vmatpush.msra.mxu2 %v3843_v16  ;;  %3959 = vmatpush.msrb.mxu3 %v3844_v25 }
 0xe12   :  { %3891 = vmatpush.msra.mxu0 %v3837_v12  ;;  %3914 = vmatpush.msrb.mxu1 %v3838_v32 }
 0xe13   :  { %3937 = vmatpush.msra.mxu2 %v3839_v39  ;;  %3960 = vmatpush.msrb.mxu3 %v3840_v35  ;;  %v3803_v35 = vsel %vm832_vm2, %v8767_v3, %v8845_v29  ;;  %v8870_v3 = vld [vmem:[#allocation14 + $0x1f0] sm:$0xff]  ;;  %v8874_v29 = vld [vmem:[#allocation14 + $0x1f8] sm:$0xff] }
 0xe14   :  { %3892 = vmatpush.msra.mxu0 %v3833_v50  ;;  %3915 = vmatpush.msrb.mxu1 %v3834_v26 }
 0xe15   :  { %3938 = vmatpush.msra.mxu2 %v3835_v7  ;;  %3961 = vmatpush.msrb.mxu3 %v3836_v22  ;;  %v8866_v7 = vld [vmem:[#allocation14 + $0x1e0] sm:$0xff]  ;;  %v8868_v22 = vld [vmem:[#allocation14 + $0x1e8] sm:$0xff] }
 0xe16   :  { %3893 = vmatpush.msra.mxu0 %v3829_v62  ;;  %3916 = vmatpush.msrb.mxu1 %v3830_v59  ;;  %v8878_v62 = vld [vmem:[#allocation14 + $0x1c0] sm:$0xff]  ;;  %v8880_v59 = vld [vmem:[#allocation14 + $0x1c8] sm:$0xff] }
 0xe17   :  { %3939 = vmatpush.msra.mxu2 %v3831_v30  ;;  %3962 = vmatpush.msrb.mxu3 %v3832_v60  ;;  %v8882_v30 = vld [vmem:[#allocation14 + $0x1d0] sm:$0xff]  ;;  %v8892_v60 = vld [vmem:[#allocation14 + $0x1a8] sm:$0xff] }
 0xe18   :  { %3894 = vmatpush.msra.mxu0 %v3825_v37  ;;  %3917 = vmatpush.msrb.mxu1 %v3826_v5  ;;  %v8894_v37 = vld [vmem:[#allocation14 + $0x1b0] sm:$0xff]  ;;  %v8898_v5 = vld [vmem:[#allocation14 + $0x1b8] sm:$0xff] }
 0xe19   :  { %3940 = vmatpush.msra.mxu2 %v3827_v42  ;;  %3963 = vmatpush.msrb.mxu3 %v3828_v45  ;;  %v8906_v42 = vld [vmem:[#allocation14 + $0x190] sm:$0xff]  ;;  %v8910_v45 = vld [vmem:[#allocation14 + $0x198] sm:$0xff] }
 0xe1a   :  { %3895 = vmatpush.msra.mxu0 %v3821_v4  ;;  %3918 = vmatpush.msrb.mxu1 %v3822_v51  ;;  %v8918_v4 = vld [vmem:[#allocation14 + $0x170] sm:$0xff]  ;;  %v8922_v51 = vld [vmem:[#allocation14 + $0x178] sm:$0xff] }
 0xe1b   :  { %3941 = vmatpush.msra.mxu2 %v3823_v8  ;;  %3964 = vmatpush.msrb.mxu3 %v3824_v44  ;;  %v8926_v8 = vld [vmem:[#allocation14 + $0x140] sm:$0xff]  ;;  %v8928_v44 = vld [vmem:[#allocation14 + $0x148] sm:$0xff] }
 0xe1c   :  { %3896 = vmatpush.msra.mxu0 %v3817_v21  ;;  %3919 = vmatpush.msrb.mxu1 %v3818_v23  ;;  %v8930_v21 = vld [vmem:[#allocation14 + $0x150] sm:$0xff]  ;;  %v8934_v23 = vld [vmem:[#allocation14 + $0x158] sm:$0xff] }
 0xe1d   :  { %3942 = vmatpush.msra.mxu2 %v3819_v6  ;;  %3965 = vmatpush.msrb.mxu3 %v3820_v10  ;;  %v8938_v6 = vld [vmem:[#allocation14 + $0x120] sm:$0xff]  ;;  %v8940_v10 = vld [vmem:[#allocation14 + $0x128] sm:$0xff] }
 0xe1e   :  { %3897 = vmatpush.msra.mxu0 %v3813_v36  ;;  %3920 = vmatpush.msrb.mxu1 %v3814_v33  ;;  %v8942_v36 = vld [vmem:[#allocation14 + $0x130] sm:$0xff]  ;;  %v8946_v33 = vld [vmem:[#allocation14 + $0x138] sm:$0xff] }
 0xe1f   :  { %3943 = vmatpush.msra.mxu2 %v3815_v2  ;;  %3966 = vmatpush.msrb.mxu3 %v3816_v13  ;;  %v8950_v2 = vld [vmem:[#allocation14 + $0x100] sm:$0xff]  ;;  %v8952_v13 = vld [vmem:[#allocation14 + $0x108] sm:$0xff] }
 0xe20   :  { %3898 = vmatpush.msra.mxu0 %v3809_v20  ;;  %3921 = vmatpush.msrb.mxu1 %v3810_v27  ;;  %v8962_v20 = vld [vmem:[#allocation14 + $0xe0] sm:$0xff]  ;;  %v8964_v27 = vld [vmem:[#allocation14 + $0xe8] sm:$0xff] }
 0xe21   :  { %3944 = vmatpush.msra.mxu2 %v3811_v31  ;;  %3967 = vmatpush.msrb.mxu3 %v3812_v41  ;;  %v8974_v31 = vld [vmem:[#allocation14 + $0xc0] sm:$0xff]  ;;  %v8976_v41 = vld [vmem:[#allocation14 + $0xc8] sm:$0xff] }
 0xe7d   :  { %v3589_v61 = vpop.f32.mrf.mxu0  ;;  %v3609_v49 = vpop.f32.mrf.mxu1 }
 0xe7e   :  { %v3656_v54 = vrot.slane %v3589_v61, 4  ;;  %v3657_v28 = vrot.slane %v3609_v49, 4  ;;  %v8886_v61 = vld [vmem:[#allocation14 + $0x1d8] sm:$0xff]  ;;  %v8890_v49 = vld [vmem:[#allocation14 + $0x1a0] sm:$0xff] }
 0xe80   :  { %v3664_v17 = vadd.f32 %v3656_v54, %v10662_v18  ;;  %v3665_v19 = vadd.f32 %v3657_v28, %v10663_v40  ;;  %v8902_v54 = vld [vmem:[#allocation14 + $0x180] sm:$0xff]  ;;  %v8904_v28 = vld [vmem:[#allocation14 + $0x188] sm:$0xff] }
 0xe82   :  { %5370 = vtanh.f32 %v3664_v17  ;;  %v8914_v17 = vld [vmem:[#allocation14 + $0x160] sm:$0xff] }
 0xe83   :  { %5372 = vtanh.f32 %v3665_v19  ;;  %v8916_v19 = vld [vmem:[#allocation14 + $0x168] sm:$0xff] }
 0xe84   :  { %v3629_v56 = vpop.f32.mrf.mxu2  ;;  %v3649_v9 = vpop.f32.mrf.mxu3 }
 0xe85   :  { %v3658_v15 = vrot.slane %v3629_v56, 4  ;;  %v3659_v48 = vrot.slane %v3649_v9, 4  ;;  %v8954_v56 = vld [vmem:[#allocation14 + $0x110] sm:$0xff]  ;;  %v8958_v9 = vld [vmem:[#allocation14 + $0x118] sm:$0xff] }
 0xe87   :  { %v3666_v38 = vadd.f32 %v3658_v15, %v10664_v14  ;;  %v3667_v11 = vadd.f32 %v3659_v48, %v10665_v52  ;;  %v8966_v15 = vld [vmem:[#allocation14 + $0xf0] sm:$0xff]  ;;  %v8970_v48 = vld [vmem:[#allocation14 + $0xf8] sm:$0xff] }
 0xe88   :  { %v5371_v1 = vpop.eup %5370 }
 0xe89   :  { %v5373_v55 = vpop.eup %5372  ;;  %5374 = vtanh.f32 %v3666_v38  ;;  %v3672_v58 = vmul.f32 0.5, %v5371_v1  ;;  %v8978_v38 = vld [vmem:[#allocation14 + $0xd0] sm:$0xff]  ;;  %v8982_v1 = vld [vmem:[#allocation14 + $0xd8] sm:$0xff] }
 0xe8a   :  { %v3674_v0 = vmul.f32 0.5, %v5373_v55  ;;  %5376 = vtanh.f32 %v3667_v11  ;;  %v8986_v11 = vld [vmem:[#allocation14 + $0xa0] sm:$0xff]  ;;  %v8988_v55 = vld [vmem:[#allocation14 + $0xa8] sm:$0xff] }
 0xe8b   :  { %v3673_v53 = vadd.f32 0.5, %v3672_v58  ;;  %v8990_v58 = vld [vmem:[#allocation14 + $0xb0] sm:$0xff] }
 0xe8c   :  { %v3675_v46 = vadd.f32 0.5, %v3674_v0  ;;  %v8994_v0 = vld [vmem:[#allocation14 + $0xb8] sm:$0xff] }
 0xe8e   :  { %v3681_v47 = vmul.f32 %v3679_v43, %v3675_v46  ;;  %v8996_v46 = vld [vmem:[#allocation14 + $0x80] sm:$0xff] }
 0xe8f   :  { %v5375_v34 = vpop.eup %5374  ;;  %10667 = vst [vmem:[#allocation47_spill] sm:$0xff] %v8996_v46 }
 0xe90   :  { %v3682_v63 = vmul.f32 %v5375_v34, %v3673_v53  ;;  %v5377_v57 = vpop.eup %5376  ;;  %v8998_v53 = vld [vmem:[#allocation14 + $0x88] sm:$0xff] }
 0xe91   :  { %v3676_v25 = vmul.f32 0.5, %v5377_v57  ;;  %10668 = vst [vmem:[#allocation44_spill] sm:$0xff] %v8998_v53 }
 0xe92   :  { %v8853_v16 = vadd.f32 %v3682_v63, %v3681_v47  ;;  %v9002_v47 = vld [vmem:[#allocation14 + $0x90] sm:$0xff]  ;;  %v9004_v63 = vld [vmem:[#allocation14 + $0x98] sm:$0xff] }
 0xe93   :  { %v3677_v12 = vadd.f32 0.5, %v3676_v25  ;;  %10669 = vst [vmem:[#allocation37_spill] sm:$0xff] %v9002_v47 }
 0xe94   :  { %5378 = vtanh.f32 %v8853_v16  ;;  %10670 = vst [vmem:[#allocation50_spill] sm:$0xff] %v9004_v63 }
 0xe9a   :  { %v5379_v32 = vpop.eup %5378 }
 0xe9b   :  { %v3685_v39 = vmul.f32 %v5379_v32, %v3677_v12  ;;  %v9010_v12 = vld [vmem:[#allocation14 + $0x60] sm:$0xff]  ;;  %v9012_v32 = vld [vmem:[#allocation14 + $0x68] sm:$0xff] }
 0xe9c   :  { %10671 = vst [vmem:[#allocation22_spill] sm:$0xff] %v9010_v12 }
 0xe9d   :  { %v3687_v50 = vrot.slane %v3685_v39, 4  ;;  %v8860_v26 = vsel %vm205_vm0, %v3803_v35, %v3685_v39  ;;  %10672 = vst [vmem:[#allocation38_spill] sm:$0xff] %v9012_v32  ;;  %v9014_v39 = vld [vmem:[#allocation14 + $0x70] sm:$0xff] }
 0xe9e   :  { %10673 = vst [vmem:[#allocation25_spill] sm:$0xff] %v9014_v39 }
 0xe9f   :  { %3705 = vmatmul.f32.vlgmr.msrb.gmra.mxu0 %v3687_v50  ;;  %3725 = vmatmul.f32.vlgmr.msra.gmra.mxu1 %v3687_v50 }
 0xea0   :  { %3745 = vmatmul.f32.vlgmr.msrb.gmra.mxu2 %v3687_v50  ;;  %3765 = vmatmul.f32.vlgmr.msra.gmra.mxu3 %v3687_v50 }
 0xea1   :  { %4051 = vmatpush.msrb.mxu0 %v8866_v7  ;;  %4071 = vmatpush.msra.mxu1 %v8868_v22 }
 0xea2   :  { %4091 = vmatpush.msrb.mxu2 %v8870_v3  ;;  %4111 = vmatpush.msra.mxu3 %v8874_v29 }
 0xea3   :  { %4052 = vmatpush.msrb.mxu0 %v8878_v62  ;;  %4072 = vmatpush.msra.mxu1 %v8880_v59 }
 0xea4   :  { %4092 = vmatpush.msrb.mxu2 %v8882_v30  ;;  %4112 = vmatpush.msra.mxu3 %v8886_v61 }
 0xea5   :  { %4053 = vmatpush.msrb.mxu0 %v8890_v49  ;;  %4073 = vmatpush.msra.mxu1 %v8892_v60 }
 0xea6   :  { %4093 = vmatpush.msrb.mxu2 %v8894_v37  ;;  %4113 = vmatpush.msra.mxu3 %v8898_v5 }
 0xea7   :  { %3899 = vmatmul.f32.vlgmr.msra.gmra.mxu0 %v10666_v24  ;;  %3922 = vmatmul.f32.vlgmr.msrb.gmra.mxu1 %v10666_v24 }
 0xea8   :  { %3945 = vmatmul.f32.vlgmr.msra.gmra.mxu2 %v10666_v24  ;;  %3968 = vmatmul.f32.vlgmr.msrb.gmra.mxu3 %v10666_v24  ;;  %v9020_v24 = vld [vmem:[#allocation14 + $0x78] sm:$0xff] }
 0xea9   :  { %4054 = vmatpush.msrb.mxu0 %v8902_v54  ;;  %4074 = vmatpush.msra.mxu1 %v8904_v28  ;;  %10674 = vst [vmem:[#allocation28_spill] sm:$0xff] %v9020_v24 }
 0xeaa   :  { %4094 = vmatpush.msrb.mxu2 %v8906_v42  ;;  %4114 = vmatpush.msra.mxu3 %v8910_v45 }
 0xeab   :  { %4055 = vmatpush.msrb.mxu0 %v8914_v17  ;;  %4075 = vmatpush.msra.mxu1 %v8916_v19 }
 0xeac   :  { %4095 = vmatpush.msrb.mxu2 %v8918_v4  ;;  %4115 = vmatpush.msra.mxu3 %v8922_v51 }
 0xead   :  { %4056 = vmatpush.msrb.mxu0 %v8926_v8  ;;  %4076 = vmatpush.msra.mxu1 %v8928_v44 }
 0xeae   :  { %4096 = vmatpush.msrb.mxu2 %v8930_v21  ;;  %4116 = vmatpush.msra.mxu3 %v8934_v23 }
 0xeaf   :  { %4057 = vmatpush.msrb.mxu0 %v8938_v6  ;;  %4077 = vmatpush.msra.mxu1 %v8940_v10 }
 0xeb0   :  { %4097 = vmatpush.msrb.mxu2 %v8942_v36  ;;  %4117 = vmatpush.msra.mxu3 %v8946_v33 }
 0xeb1   :  { %4058 = vmatpush.msrb.mxu0 %v8950_v2  ;;  %4078 = vmatpush.msra.mxu1 %v8952_v13 }
 0xeb2   :  { %4098 = vmatpush.msrb.mxu2 %v8954_v56  ;;  %4118 = vmatpush.msra.mxu3 %v8958_v9 }
 0xeb3   :  { %4059 = vmatpush.msrb.mxu0 %v8962_v20  ;;  %4079 = vmatpush.msra.mxu1 %v8964_v27 }
 0xeb4   :  { %4099 = vmatpush.msrb.mxu2 %v8966_v15  ;;  %4119 = vmatpush.msra.mxu3 %v8970_v48 }
 0xeb5   :  { %4060 = vmatpush.msrb.mxu0 %v8974_v31  ;;  %4080 = vmatpush.msra.mxu1 %v8976_v41 }
 0xeb6   :  { %4100 = vmatpush.msrb.mxu2 %v8978_v38  ;;  %4120 = vmatpush.msra.mxu3 %v8982_v1 }
 0xeb7   :  { %4061 = vmatpush.msrb.mxu0 %v8986_v11  ;;  %4081 = vmatpush.msra.mxu1 %v8988_v55 }
 0xeb8   :  { %4101 = vmatpush.msrb.mxu2 %v8990_v58  ;;  %4121 = vmatpush.msra.mxu3 %v8994_v0 }
 0xeb9   :  { %4062 = vmatpush.msrb.mxu0 %v8996_v46  ;;  %4082 = vmatpush.msra.mxu1 %v8998_v53 }
 0xeba   :  { %4102 = vmatpush.msrb.mxu2 %v9002_v47  ;;  %4122 = vmatpush.msra.mxu3 %v9004_v63  ;;  %v9028_v63 = vld [vmem:[#allocation14 + $0x50] sm:$0xff]  ;;  %v9030_v47 = vld [vmem:[#allocation14 + $0x58] sm:$0xff] }
 0xebb   :  { %4063 = vmatpush.msrb.mxu0 %v9010_v12  ;;  %4083 = vmatpush.msra.mxu1 %v9012_v32  ;;  %10677 = vst [vmem:[#allocation46_spill] sm:$0xff] %v9028_v63 }
 0xebc   :  { %4103 = vmatpush.msrb.mxu2 %v9014_v39  ;;  %4123 = vmatpush.msra.mxu3 %v9020_v24  ;;  %10678 = vst [vmem:[#allocation29_spill] sm:$0xff] %v9030_v47  ;;  %v9044_v24 = vld [vmem:[#allocation14] sm:$0xff]  ;;  %v9046_v39 = vld [vmem:[#allocation14 + $0x8] sm:$0xff] }
 0xebd   :  { %10683 = vst [vmem:[#allocation48_spill] sm:$0xff] %v9044_v24 }
 0xebe   :  { %4104 = vmatpush.msrb.mxu2 %v9028_v63  ;;  %4124 = vmatpush.msra.mxu3 %v9030_v47  ;;  %10684 = vst [vmem:[#allocation49_spill] sm:$0xff] %v9046_v39 }
 0xf1c   :  { %v3706_v43 = vpop.f32.mrf.mxu0  ;;  %v3726_v34 = vpop.f32.mrf.mxu1 }
 0xf1d   :  { %v3773_v57 = vrot.slane %v3706_v43, 2  ;;  %v3774_v25 = vrot.slane %v3726_v34, 2  ;;  %v9022_v43 = vld [vmem:[#allocation14 + $0x40] sm:$0xff]  ;;  %v9024_v34 = vld [vmem:[#allocation14 + $0x48] sm:$0xff] }
 0xf1e   :  { %10675 = vst [vmem:[#allocation26_spill] sm:$0xff] %v9022_v43  ;;  %4064 = vmatpush.msrb.mxu0 %v9022_v43  ;;  %4084 = vmatpush.msra.mxu1 %v9024_v34  ;;  %v9052_v43 = vld [vmem:[#allocation14 + $0x18] sm:$0xff] }
 0xf1f   :  { %v3781_v35 = vadd.f32 %v3773_v57, %v10662_v18  ;;  %v3782_v50 = vadd.f32 %v3774_v25, %v10663_v40  ;;  %10676 = vst [vmem:[#allocation27_spill] sm:$0xff] %v9024_v34  ;;  %v9032_v18 = vld [vmem:[#allocation14 + $0x20] sm:$0xff]  ;;  %v9036_v40 = vld [vmem:[#allocation14 + $0x28] sm:$0xff]  ;;  %v9038_v57 = vld [vmem:[#allocation14 + $0x30] sm:$0xff] }
 0xf20   :  { %10679 = vst [vmem:[#allocation32_spill] sm:$0xff] %v9032_v18  ;;  %v9040_v25 = vld [vmem:[#allocation14 + $0x38] sm:$0xff]  ;;  %4065 = vmatpush.msrb.mxu0 %v9032_v18  ;;  %4085 = vmatpush.msra.mxu1 %v9036_v40  ;;  %v9050_v34 = vld [vmem:[#allocation14 + $0x10] sm:$0xff] }
 0xf21   :  { %5380 = vtanh.f32 %v3781_v35  ;;  %10680 = vst [vmem:[#allocation33_spill] sm:$0xff] %v9036_v40  ;;  %4105 = vmatpush.msrb.mxu2 %v9038_v57  ;;  %4125 = vmatpush.msra.mxu3 %v9040_v25 }
 0xf22   :  { %10681 = vst [vmem:[#allocation41_spill] sm:$0xff] %v9038_v57  ;;  %5382 = vtanh.f32 %v3782_v50  ;;  %4066 = vmatpush.msrb.mxu0 %v9044_v24  ;;  %4086 = vmatpush.msra.mxu1 %v9046_v39 }
 0xf23   :  { %10682 = vst [vmem:[#allocation24_spill] sm:$0xff] %v9040_v25  ;;  %v3746_v35 = vpop.f32.mrf.mxu2  ;;  %v3766_v32 = vpop.f32.mrf.mxu3  ;;  %4106 = vmatpush.msrb.mxu2 %v9050_v34  ;;  %4126 = vmatpush.msra.mxu3 %v9052_v43 }
 0xf24   :  { %10685 = vst [vmem:[#allocation34_spill] sm:$0xff] %v9050_v34  ;;  %v3775_v12 = vrot.slane %v3746_v35, 2  ;;  %v3776_v50 = vrot.slane %v3766_v32, 2  ;;  %4150 = vmatpush.msra.mxu0 %v8866_v7  ;;  %4170 = vmatpush.msrb.mxu1 %v8868_v22 }
 0xf25   :  { %10686 = vst [vmem:[#allocation39_spill] sm:$0xff] %v9052_v43  ;;  %4190 = vmatpush.msra.mxu2 %v8870_v3  ;;  %4210 = vmatpush.msrb.mxu3 %v8874_v29 }
 0xf26   :  { %v3783_v47 = vadd.f32 %v3775_v12, %v10664_v14  ;;  %v3784_v18 = vadd.f32 %v3776_v50, %v10665_v52  ;;  %4151 = vmatpush.msra.mxu0 %v8878_v62  ;;  %4171 = vmatpush.msrb.mxu1 %v8880_v59 }
 0xf27   :  { %v5381_v40 = vpop.eup %5380  ;;  %4191 = vmatpush.msra.mxu2 %v8882_v30  ;;  %4211 = vmatpush.msrb.mxu3 %v8886_v61 }
 0xf28   :  { %v5383_v32 = vpop.eup %5382  ;;  %5384 = vtanh.f32 %v3783_v47  ;;  %v3789_v35 = vmul.f32 0.5, %v5381_v40  ;;  %4152 = vmatpush.msra.mxu0 %v8890_v49  ;;  %4172 = vmatpush.msrb.mxu1 %v8892_v60  ;;  %v3796_v47 = vrot.slane %v8853_v16, 6 }
 0xf29   :  { %v3791_v39 = vmul.f32 0.5, %v5383_v32  ;;  %5386 = vtanh.f32 %v3784_v18  ;;  %4192 = vmatpush.msra.mxu2 %v8894_v37  ;;  %4212 = vmatpush.msrb.mxu3 %v8898_v5 }
 0xf2a   :  { %v3790_v52 = vadd.f32 0.5, %v3789_v35  ;;  %4153 = vmatpush.msra.mxu0 %v8902_v54  ;;  %4173 = vmatpush.msrb.mxu1 %v8904_v28 }
 0xf2b   :  { %v3792_v14 = vadd.f32 0.5, %v3791_v39  ;;  %4193 = vmatpush.msra.mxu2 %v8906_v42  ;;  %4213 = vmatpush.msrb.mxu3 %v8910_v45 }
 0xf2c   :  { %4154 = vmatpush.msra.mxu0 %v8914_v17  ;;  %4174 = vmatpush.msrb.mxu1 %v8916_v19 }
 0xf2d   :  { %v3798_v39 = vmul.f32 %v3796_v47, %v3792_v14  ;;  %4194 = vmatpush.msra.mxu2 %v8918_v4  ;;  %4214 = vmatpush.msrb.mxu3 %v8922_v51  ;;  %v10687_v47 = vld [vmem:[#allocation37_spill] sm:$0xff] }
 0xf2e   :  { %v5385_v12 = vpop.eup %5384  ;;  %4155 = vmatpush.msra.mxu0 %v8926_v8  ;;  %4175 = vmatpush.msrb.mxu1 %v8928_v44 }
 0xf2f   :  { %v3799_v18 = vmul.f32 %v5385_v12, %v3790_v52  ;;  %v5387_v16 = vpop.eup %5386  ;;  %4195 = vmatpush.msra.mxu2 %v8930_v21  ;;  %4215 = vmatpush.msrb.mxu3 %v8934_v23  ;;  %v10688_v12 = vld [vmem:[#allocation50_spill] sm:$0xff] }
 0xf30   :  { %4156 = vmatpush.msra.mxu0 %v8938_v6  ;;  %4176 = vmatpush.msrb.mxu1 %v8940_v10  ;;  %v3793_v50 = vmul.f32 0.5, %v5387_v16  ;;  %v10692_v16 = vld [vmem:[#allocation28_spill] sm:$0xff] }
 0xf31   :  { %v3800_v40 = vadd.f32 %v3799_v18, %v3798_v39  ;;  %4196 = vmatpush.msra.mxu2 %v8942_v36  ;;  %4216 = vmatpush.msrb.mxu3 %v8946_v33  ;;  %v10689_v39 = vld [vmem:[#allocation22_spill] sm:$0xff] }
 0xf32   :  { %4157 = vmatpush.msra.mxu0 %v8950_v2  ;;  %4177 = vmatpush.msrb.mxu1 %v8952_v13  ;;  %v3794_v32 = vadd.f32 0.5, %v3793_v50  ;;  %v10690_v18 = vld [vmem:[#allocation38_spill] sm:$0xff]  ;;  %v10694_v50 = vld [vmem:[#allocation27_spill] sm:$0xff] }
 0xf33   :  { %5388 = vtanh.f32 %v3800_v40  ;;  %4197 = vmatpush.msra.mxu2 %v8954_v56  ;;  %4217 = vmatpush.msrb.mxu3 %v8958_v9  ;;  %v10693_v40 = vld [vmem:[#allocation26_spill] sm:$0xff] }
 0xf34   :  { %4158 = vmatpush.msra.mxu0 %v8962_v20  ;;  %4178 = vmatpush.msrb.mxu1 %v8964_v27 }
 0xf35   :  { %4198 = vmatpush.msra.mxu2 %v8966_v15  ;;  %4218 = vmatpush.msrb.mxu3 %v8970_v48 }
 0xf36   :  { %4159 = vmatpush.msra.mxu0 %v8974_v31  ;;  %4179 = vmatpush.msrb.mxu1 %v8976_v41 }
 0xf37   :  { %4199 = vmatpush.msra.mxu2 %v8978_v38  ;;  %4219 = vmatpush.msrb.mxu3 %v8982_v1 }
 0xf38   :  { %4160 = vmatpush.msra.mxu0 %v8986_v11  ;;  %4180 = vmatpush.msrb.mxu1 %v8988_v55 }
 0xf39   :  { %v5389_v35 = vpop.eup %5388  ;;  %4200 = vmatpush.msra.mxu2 %v8990_v58  ;;  %4220 = vmatpush.msrb.mxu3 %v8994_v0 }
 0xf3a   :  { %v3802_v14 = vmul.f32 %v5389_v35, %v3794_v32  ;;  %4161 = vmatpush.msra.mxu0 %v8996_v46  ;;  %4181 = vmatpush.msrb.mxu1 %v8998_v53  ;;  %v10695_v32 = vld [vmem:[#allocation29_spill] sm:$0xff]  ;;  %v10696_v35 = vmov 0.0  }
 0xf3b   :  { %4201 = vmatpush.msra.mxu2 %v10687_v47  ;;  %4221 = vmatpush.msrb.mxu3 %v10688_v12 }
 0xf3c   :  { %v3805_v52 = vsel %vm835_vm3, %v8860_v26, %v3802_v14  ;;  %4162 = vmatpush.msra.mxu0 %v10689_v39  ;;  %4182 = vmatpush.msrb.mxu1 %v10690_v18  ;;  %v10691_v26 = vld [vmem:[#allocation25_spill] sm:$0xff]  ;;  %v10697_v14 = vld [vmem:[#allocation32_spill] sm:$0xff] }
 0xf3d   :  { %3902 = vmatmul.f32.gmra.mxu0 %v3805_v52  ;;  %3925 = vmatmul.f32.gmra.mxu1 %v3805_v52 }
 0xf3e   :  { %3948 = vmatmul.f32.gmra.mxu2 %v3805_v52  ;;  %3971 = vmatmul.f32.gmra.mxu3 %v3805_v52  ;;  %v10698_v52 = vld [vmem:[#allocation33_spill] sm:$0xff] }
 0xf3f   :  { %4202 = vmatpush.msra.mxu2 %v10691_v26  ;;  %4222 = vmatpush.msrb.mxu3 %v10692_v16 }
 0xf40   :  { %4163 = vmatpush.msra.mxu0 %v10693_v40  ;;  %4183 = vmatpush.msrb.mxu1 %v10694_v50 }
 0xf41   :  { %4203 = vmatpush.msra.mxu2 %v9028_v63  ;;  %4223 = vmatpush.msrb.mxu3 %v10695_v32  ;;  %v10699_v63 = vld [vmem:[#allocation49_spill] sm:$0xff] }
 0xf42   :  { %4164 = vmatpush.msra.mxu0 %v10697_v14  ;;  %4184 = vmatpush.msrb.mxu1 %v10698_v52 }
 0xf43   :  { %4204 = vmatpush.msra.mxu2 %v9038_v57  ;;  %4224 = vmatpush.msrb.mxu3 %v9040_v25 }
 0xf44   :  { %4165 = vmatpush.msra.mxu0 %v9044_v24  ;;  %4185 = vmatpush.msrb.mxu1 %v10699_v63 }
 0xf45   :  { %4067 = vmatmul.f32.vlgmr.msrb.gmra.mxu0 %v10696_v35  ;;  %4087 = vmatmul.f32.vlgmr.msra.gmra.mxu1 %v10696_v35 }
 0xf46   :  { %4107 = vmatmul.f32.vlgmr.msrb.gmra.mxu2 %v10696_v35  ;;  %4127 = vmatmul.f32.vlgmr.msra.gmra.mxu3 %v10696_v35  ;;  %v10700_v35 = vld [vmem:[#allocation46_spill] sm:$0xff] }
 0xf47   :  { %4205 = vmatpush.msra.mxu2 %v9050_v34  ;;  %4225 = vmatpush.msrb.mxu3 %v9052_v43 }
 0xf48   :  { %4267 = vmatpush.msrb.mxu0 %v8866_v7  ;;  %4287 = vmatpush.msra.mxu1 %v8868_v22 }
 0xf49   :  { %4307 = vmatpush.msrb.mxu2 %v8870_v3  ;;  %4327 = vmatpush.msra.mxu3 %v8874_v29 }
 0xf4a   :  { %4268 = vmatpush.msrb.mxu0 %v8878_v62  ;;  %4288 = vmatpush.msra.mxu1 %v8880_v59 }
 0xf4b   :  { %4308 = vmatpush.msrb.mxu2 %v8882_v30  ;;  %4328 = vmatpush.msra.mxu3 %v8886_v61 }
 0xf4c   :  { %4269 = vmatpush.msrb.mxu0 %v8890_v49  ;;  %4289 = vmatpush.msra.mxu1 %v8892_v60 }
 0xf4d   :  { %4309 = vmatpush.msrb.mxu2 %v8894_v37  ;;  %4329 = vmatpush.msra.mxu3 %v8898_v5 }
 0xf4e   :  { %4270 = vmatpush.msrb.mxu0 %v8902_v54  ;;  %4290 = vmatpush.msra.mxu1 %v8904_v28 }
 0xf4f   :  { %4310 = vmatpush.msrb.mxu2 %v8906_v42  ;;  %4330 = vmatpush.msra.mxu3 %v8910_v45 }
 0xf50   :  { %4271 = vmatpush.msrb.mxu0 %v8914_v17  ;;  %4291 = vmatpush.msra.mxu1 %v8916_v19 }
 0xf51   :  { %4311 = vmatpush.msrb.mxu2 %v8918_v4  ;;  %4331 = vmatpush.msra.mxu3 %v8922_v51 }
 0xf52   :  { %4272 = vmatpush.msrb.mxu0 %v8926_v8  ;;  %4292 = vmatpush.msra.mxu1 %v8928_v44 }
 0xf53   :  { %4312 = vmatpush.msrb.mxu2 %v8930_v21  ;;  %4332 = vmatpush.msra.mxu3 %v8934_v23 }
 0xf54   :  { %4273 = vmatpush.msrb.mxu0 %v8938_v6  ;;  %4293 = vmatpush.msra.mxu1 %v8940_v10 }
 0xf55   :  { %4313 = vmatpush.msrb.mxu2 %v8942_v36  ;;  %4333 = vmatpush.msra.mxu3 %v8946_v33 }
 0xf56   :  { %4274 = vmatpush.msrb.mxu0 %v8950_v2  ;;  %4294 = vmatpush.msra.mxu1 %v8952_v13 }
 0xf57   :  { %4314 = vmatpush.msrb.mxu2 %v8954_v56  ;;  %4334 = vmatpush.msra.mxu3 %v8958_v9 }
 0xf58   :  { %4275 = vmatpush.msrb.mxu0 %v8962_v20  ;;  %4295 = vmatpush.msra.mxu1 %v8964_v27 }
 0xf59   :  { %4315 = vmatpush.msrb.mxu2 %v8966_v15  ;;  %4335 = vmatpush.msra.mxu3 %v8970_v48 }
 0xf5a   :  { %4276 = vmatpush.msrb.mxu0 %v8974_v31  ;;  %4296 = vmatpush.msra.mxu1 %v8976_v41 }
 0xf5b   :  { %4316 = vmatpush.msrb.mxu2 %v8978_v38  ;;  %4336 = vmatpush.msra.mxu3 %v8982_v1 }
 0xf5c   :  { %4277 = vmatpush.msrb.mxu0 %v8986_v11  ;;  %4297 = vmatpush.msra.mxu1 %v8988_v55 }
 0xf5d   :  { %4317 = vmatpush.msrb.mxu2 %v8990_v58  ;;  %4337 = vmatpush.msra.mxu3 %v8994_v0 }
 0xf5e   :  { %4278 = vmatpush.msrb.mxu0 %v8996_v46  ;;  %4298 = vmatpush.msra.mxu1 %v8998_v53 }
 0xf5f   :  { %4318 = vmatpush.msrb.mxu2 %v10687_v47  ;;  %4338 = vmatpush.msra.mxu3 %v10688_v12 }
 0xf60   :  { %4279 = vmatpush.msrb.mxu0 %v10689_v39  ;;  %4299 = vmatpush.msra.mxu1 %v10690_v18 }
 0xf61   :  { %4319 = vmatpush.msrb.mxu2 %v10691_v26  ;;  %4339 = vmatpush.msra.mxu3 %v10692_v16 }
 0xf62   :  { %4280 = vmatpush.msrb.mxu0 %v10693_v40  ;;  %4300 = vmatpush.msra.mxu1 %v10694_v50  ;;  %v3900_v50 = vpop.f32.mrf.mxu0  ;;  %v3946_v40 = vpop.f32.mrf.mxu2 }
 0xf63   :  { %4320 = vmatpush.msrb.mxu2 %v10700_v35  ;;  %4340 = vmatpush.msra.mxu3 %v10695_v32  ;;  %v3923_v35 = vpop.f32.mrf.mxu1  ;;  %v3969_v32 = vpop.f32.mrf.mxu3 }
 0xf64   :  { %4281 = vmatpush.msrb.mxu0 %v10697_v14  ;;  %4301 = vmatpush.msra.mxu1 %v10698_v52  ;;  %v9200_v52 = vld [vmem:[%s9809_s12] sm:$0xf] }
 0xf65   :  { %4321 = vmatpush.msrb.mxu2 %v9038_v57  ;;  %4341 = vmatpush.msra.mxu3 %v9040_v25  ;;  %10701 = vst [vmem:[#allocation51_spill] sm:$0xff] %v9200_v52  ;;  %v10164_v39 = vperm.slane %v9200_v52, 2  ;;  %v10168_v12 = vperm.slane %v9200_v52, 3 }
 0xf66   :  { %4282 = vmatpush.msrb.mxu0 %v9044_v24  ;;  %4302 = vmatpush.msra.mxu1 %v10699_v63  ;;  %v10159_v24 = vperm.slane %v9200_v52, 0  ;;  %v10158_v63 = vperm.slane %v9200_v52, 1 }
 0xf67   :  { %4322 = vmatpush.msrb.mxu2 %v9050_v34  ;;  %4342 = vmatpush.msra.mxu3 %v9052_v43 }
 0xf68   :  { %v9210_v43 = vadd.f32 %v3900_v50, %v10159_v24  ;;  %v9214_v34 = vadd.f32 %v3923_v35, %v10158_v63  ;;  %v9226_v50 = vadd.f32 %v3946_v40, %v10164_v39  ;;  %v9230_v35 = vadd.f32 %v3969_v32, %v10168_v12 }
 0xf6a   :  { %10704 = vst [vmem:[#allocation40_spill] sm:$0xff] %v9210_v43 }
 0xf6b   :  { %10705 = vst [vmem:[#allocation43_spill] sm:$0xff] %v9214_v34 }
 0xf6c   :  { %10708 = vst [vmem:[#allocation42_spill] sm:$0xff] %v9226_v50 }
 0xf6d   :  { %10709 = vst [vmem:[#allocation36_spill] sm:$0xff] %v9230_v35 }
 0xfba   :  { %v9202_v57 = vpop.f32.mrf.mxu0  ;;  %v9204_v25 = vpop.f32.mrf.mxu1 }
 0xfbb   :  { %10702 = vst [vmem:[#allocation30_spill] sm:$0xff] %v9202_v57 }
 0xfbc   :  { %10703 = vst [vmem:[#allocation45_spill] sm:$0xff] %v9204_v25 }
 0xfc1   :  { %v9216_v14 = vpop.f32.mrf.mxu2  ;;  %v9218_v16 = vpop.f32.mrf.mxu3 }
 0xfc2   :  { %10706 = vst [vmem:[#allocation31_spill] sm:$0xff] %v9216_v14  ;;  %v4068_v26 = vpop.f32.mrf.mxu0  ;;  %v4088_v57 = vpop.f32.mrf.mxu1 }
 0xfc3   :  { %10707 = vst [vmem:[#allocation35_spill] sm:$0xff] %v9218_v16  ;;  %v4131_v25 = vadd.f32 %v4068_v26, %v9210_v43  ;;  %v4132_v18 = vadd.f32 %v4088_v57, %v9214_v34 }
 0xfc5   :  { %5390 = vtanh.f32 %v4131_v25 }
 0xfc6   :  { %5392 = vtanh.f32 %v4132_v18 }
 0xfc9   :  { %v4108_v63 = vpop.f32.mrf.mxu2  ;;  %v4128_v24 = vpop.f32.mrf.mxu3 }
 0xfca   :  { %v4133_v26 = vadd.f32 %v4108_v63, %v9226_v50  ;;  %v4134_v57 = vadd.f32 %v4128_v24, %v9230_v35  ;;  %v10711_v24 = vld [vmem:[#allocation44_spill] sm:$0xff] }
 0xfcb   :  { %v5391_v16 = vpop.eup %5390 }
 0xfcc   :  { %v5393_v14 = vpop.eup %5392  ;;  %5394 = vtanh.f32 %v4133_v26  ;;  %v4139_v34 = vmul.f32 0.5, %v5391_v16  ;;  %v10717_v16 = vld [vmem:[#allocation28_spill] sm:$0xff]  ;;  %v10721_v26 = vld [vmem:[#allocation29_spill] sm:$0xff] }
 0xfcd   :  { %v4141_v25 = vmul.f32 0.5, %v5393_v14  ;;  %5396 = vtanh.f32 %v4134_v57  ;;  %v10718_v14 = vld [vmem:[#allocation26_spill] sm:$0xff]  ;;  %v10722_v57 = vld [vmem:[#allocation32_spill] sm:$0xff] }
 0xfce   :  { %v4140_v43 = vadd.f32 0.5, %v4139_v34  ;;  %v10713_v34 = vld [vmem:[#allocation50_spill] sm:$0xff] }
 0xfcf   :  { %v4142_v18 = vadd.f32 0.5, %v4141_v25  ;;  %v10723_v25 = vld [vmem:[#allocation33_spill] sm:$0xff] }
 0xfd1   :  { %v4145_v39 = vmul.f32 0.0, %v4142_v18  ;;  %v10724_v18 = vld [vmem:[#allocation41_spill] sm:$0xff] }
 0xfd2   :  { %v5395_v40 = vpop.eup %5394 }
 0xfd3   :  { %v4146_v47 = vmul.f32 %v5395_v40, %v4140_v43  ;;  %v5397_v52 = vpop.eup %5396  ;;  %v10712_v43 = vld [vmem:[#allocation37_spill] sm:$0xff]  ;;  %v10725_v40 = vld [vmem:[#allocation24_spill] sm:$0xff] }
 0xfd4   :  { %v4143_v12 = vmul.f32 0.5, %v5397_v52  ;;  %v10719_v52 = vld [vmem:[#allocation27_spill] sm:$0xff] }
 0xfd5   :  { %v9234_v32 = vadd.f32 %v4146_v47, %v4145_v39  ;;  %v10714_v47 = vld [vmem:[#allocation22_spill] sm:$0xff]  ;;  %v10716_v39 = vld [vmem:[#allocation25_spill] sm:$0xff] }
 0xfd6   :  { %v4144_v63 = vadd.f32 0.5, %v4143_v12  ;;  %v10715_v12 = vld [vmem:[#allocation38_spill] sm:$0xff] }
 0xfd7   :  { %5398 = vtanh.f32 %v9234_v32 }
 0xfdd   :  { %v5399_v50 = vpop.eup %5398 }
 0xfde   :  { %v9237_v53 = vmul.f32 %v5399_v50, %v4144_v63  ;;  %v10720_v50 = vld [vmem:[#allocation46_spill] sm:$0xff]  ;;  %v10726_v63 = vld [vmem:[#allocation48_spill] sm:$0xff] }
 0xfe0   :  { %10710 = vst [vmem:[#allocation23_spill] sm:$0xff] %v9237_v53  ;;  %4166 = vmatmul.f32.vlgmr.msra.gmra.mxu0 %v9237_v53  ;;  %4186 = vmatmul.f32.vlgmr.msrb.gmra.mxu1 %v9237_v53 }
 0xfe1   :  { %4206 = vmatmul.f32.vlgmr.msra.gmra.mxu2 %v9237_v53  ;;  %4226 = vmatmul.f32.vlgmr.msrb.gmra.mxu3 %v9237_v53  ;;  %v10727_v53 = vld [vmem:[#allocation49_spill] sm:$0xff] }
 0xfe2   :  { %4384 = vmatpush.msra.mxu0 %v8866_v7  ;;  %4404 = vmatpush.msrb.mxu1 %v8868_v22 }
 0xfe3   :  { %4424 = vmatpush.msra.mxu2 %v8870_v3  ;;  %4444 = vmatpush.msrb.mxu3 %v8874_v29 }
 0xfe4   :  { %4385 = vmatpush.msra.mxu0 %v8878_v62  ;;  %4405 = vmatpush.msrb.mxu1 %v8880_v59 }
 0xfe5   :  { %4425 = vmatpush.msra.mxu2 %v8882_v30  ;;  %4445 = vmatpush.msrb.mxu3 %v8886_v61 }
 0xfe6   :  { %4386 = vmatpush.msra.mxu0 %v8890_v49  ;;  %4406 = vmatpush.msrb.mxu1 %v8892_v60 }
 0xfe7   :  { %4426 = vmatpush.msra.mxu2 %v8894_v37  ;;  %4446 = vmatpush.msrb.mxu3 %v8898_v5 }
 0xfe8   :  { %4387 = vmatpush.msra.mxu0 %v8902_v54  ;;  %4407 = vmatpush.msrb.mxu1 %v8904_v28 }
 0xfe9   :  { %4427 = vmatpush.msra.mxu2 %v8906_v42  ;;  %4447 = vmatpush.msrb.mxu3 %v8910_v45 }
 0xfea   :  { %4388 = vmatpush.msra.mxu0 %v8914_v17  ;;  %4408 = vmatpush.msrb.mxu1 %v8916_v19 }
 0xfeb   :  { %4428 = vmatpush.msra.mxu2 %v8918_v4  ;;  %4448 = vmatpush.msrb.mxu3 %v8922_v51 }
 0xfec   :  { %4389 = vmatpush.msra.mxu0 %v8926_v8  ;;  %4409 = vmatpush.msrb.mxu1 %v8928_v44 }
 0xfed   :  { %4429 = vmatpush.msra.mxu2 %v8930_v21  ;;  %4449 = vmatpush.msrb.mxu3 %v8934_v23 }
 0xfee   :  { %4390 = vmatpush.msra.mxu0 %v8938_v6  ;;  %4410 = vmatpush.msrb.mxu1 %v8940_v10 }
 0xfef   :  { %4430 = vmatpush.msra.mxu2 %v8942_v36  ;;  %4450 = vmatpush.msrb.mxu3 %v8946_v33 }
 0xff0   :  { %4391 = vmatpush.msra.mxu0 %v8950_v2  ;;  %4411 = vmatpush.msrb.mxu1 %v8952_v13 }
 0xff1   :  { %4431 = vmatpush.msra.mxu2 %v8954_v56  ;;  %4451 = vmatpush.msrb.mxu3 %v8958_v9 }
 0xff2   :  { %4392 = vmatpush.msra.mxu0 %v8962_v20  ;;  %4412 = vmatpush.msrb.mxu1 %v8964_v27 }
 0xff3   :  { %4432 = vmatpush.msra.mxu2 %v8966_v15  ;;  %4452 = vmatpush.msrb.mxu3 %v8970_v48 }
 0xff4   :  { %4393 = vmatpush.msra.mxu0 %v8974_v31  ;;  %4413 = vmatpush.msrb.mxu1 %v8976_v41 }
 0xff5   :  { %4433 = vmatpush.msra.mxu2 %v8978_v38  ;;  %4453 = vmatpush.msrb.mxu3 %v8982_v1 }
 0xff6   :  { %4394 = vmatpush.msra.mxu0 %v8986_v11  ;;  %4414 = vmatpush.msrb.mxu1 %v8988_v55 }
 0xff7   :  { %4434 = vmatpush.msra.mxu2 %v8990_v58  ;;  %4454 = vmatpush.msrb.mxu3 %v8994_v0 }
 0xff8   :  { %4395 = vmatpush.msra.mxu0 %v8996_v46  ;;  %4415 = vmatpush.msrb.mxu1 %v10711_v24 }
 0xff9   :  { %4435 = vmatpush.msra.mxu2 %v10712_v43  ;;  %4455 = vmatpush.msrb.mxu3 %v10713_v34  ;;  %v10732_v43 = vld [vmem:[#allocation42_spill] sm:$0xff] }
 0xffa   :  { %4396 = vmatpush.msra.mxu0 %v10714_v47  ;;  %4416 = vmatpush.msrb.mxu1 %v10715_v12  ;;  %v10730_v12 = vld [vmem:[#allocation40_spill] sm:$0xff]  ;;  %v10731_v47 = vld [vmem:[#allocation43_spill] sm:$0xff] }
 0xffb   :  { %4436 = vmatpush.msra.mxu2 %v10716_v39  ;;  %4456 = vmatpush.msrb.mxu3 %v10717_v16  ;;  %v10728_v16 = vld [vmem:[#allocation34_spill] sm:$0xff] }
 0xffc   :  { %4397 = vmatpush.msra.mxu0 %v10718_v14  ;;  %4417 = vmatpush.msrb.mxu1 %v10719_v52  ;;  %v10729_v14 = vld [vmem:[#allocation39_spill] sm:$0xff] }
 0xffd   :  { %4437 = vmatpush.msra.mxu2 %v10720_v50  ;;  %4457 = vmatpush.msrb.mxu3 %v10721_v26 }
 0xffe   :  { %4398 = vmatpush.msra.mxu0 %v10722_v57  ;;  %4418 = vmatpush.msrb.mxu1 %v10723_v25 }
 0xfff   :  { %4438 = vmatpush.msra.mxu2 %v10724_v18  ;;  %4458 = vmatpush.msrb.mxu3 %v10725_v40 }
0x1000   :  { %4399 = vmatpush.msra.mxu0 %v10726_v63  ;;  %4419 = vmatpush.msrb.mxu1 %v10727_v53 }
0x1001   :  { %4439 = vmatpush.msra.mxu2 %v10728_v16  ;;  %4459 = vmatpush.msrb.mxu3 %v10729_v14 }
0x105d   :  { %v4167_v52 = vpop.f32.mrf.mxu0  ;;  %v4187_v50 = vpop.f32.mrf.mxu1 }
0x105e   :  { %v4234_v39 = vrot.slane %v4167_v52, 6  ;;  %v4235_v26 = vrot.slane %v4187_v50, 6 }
0x1060   :  { %v4242_v57 = vadd.f32 %v4234_v39, %v10730_v12  ;;  %v4243_v25 = vadd.f32 %v4235_v26, %v10731_v47  ;;  %v4257_v26 = vrot.slane %v9234_v32, 6 }
0x1062   :  { %5400 = vtanh.f32 %v4242_v57 }
0x1063   :  { %5402 = vtanh.f32 %v4243_v25 }
0x1064   :  { %v4207_v18 = vpop.f32.mrf.mxu2  ;;  %v4227_v40 = vpop.f32.mrf.mxu3 }
0x1065   :  { %v4236_v34 = vrot.slane %v4207_v18, 6  ;;  %v4237_v63 = vrot.slane %v4227_v40, 6 }
0x1067   :  { %v4244_v53 = vadd.f32 %v4236_v34, %v10732_v43  ;;  %v4245_v16 = vadd.f32 %v4237_v63, %v9230_v35 }
0x1068   :  { %v5401_v24 = vpop.eup %5400 }
0x1069   :  { %v5403_v14 = vpop.eup %5402  ;;  %5404 = vtanh.f32 %v4244_v53  ;;  %v4250_v46 = vmul.f32 0.5, %v5401_v24 }
0x106a   :  { %v4252_v52 = vmul.f32 0.5, %v5403_v14  ;;  %5406 = vtanh.f32 %v4245_v16 }
0x106b   :  { %v4251_v39 = vadd.f32 0.5, %v4250_v46 }
0x106c   :  { %v4253_v50 = vadd.f32 0.5, %v4252_v52 }
0x106e   :  { %v4259_v25 = vmul.f32 %v4257_v26, %v4253_v50  ;;  %v10756_v50 = vld [vmem:[#allocation23_spill] sm:$0xff] }
0x106f   :  { %v5405_v57 = vpop.eup %5404 }
0x1070   :  { %v4260_v47 = vmul.f32 %v5405_v57, %v4251_v39  ;;  %v5407_v12 = vpop.eup %5406 }
0x1071   :  { %v4254_v34 = vmul.f32 0.5, %v5407_v12 }
0x1072   :  { %v9312_v18 = vadd.f32 %v4260_v47, %v4259_v25  ;;  %v9396_v25 = vld [vmem:[#allocation14 + $0x1e0] sm:$0xff] }
0x1073   :  { %v4255_v40 = vadd.f32 0.5, %v4254_v34  ;;  %v9402_v34 = vld [vmem:[#allocation14 + $0x1f0] sm:$0xff] }
0x1074   :  { %5408 = vtanh.f32 %v9312_v18 }
0x107a   :  { %v5409_v63 = vpop.eup %5408 }
0x107b   :  { %v9315_v35 = vmul.f32 %v5409_v63, %v4255_v40  ;;  %v9408_v40 = vld [vmem:[#allocation14 + $0x1c0] sm:$0xff]  ;;  %v9411_v63 = vld [vmem:[#allocation14 + $0x1c8] sm:$0xff] }
0x107d   :  { %v4265_v53 = vrot.slane %v9315_v35, 2  ;;  %v4498_v39 = vsel %vm832_vm2, %v10756_v50, %v9315_v35  ;;  %v9405_v35 = vld [vmem:[#allocation14 + $0x1f8] sm:$0xff]  ;;  %v9498_v50 = vld [vmem:[#allocation14 + $0xf0] sm:$0xff] }
0x107f   :  { %4283 = vmatmul.f32.vlgmr.msrb.gmra.mxu0 %v4265_v53  ;;  %4303 = vmatmul.f32.vlgmr.msra.gmra.mxu1 %v4265_v53 }
0x1080   :  { %4323 = vmatmul.f32.vlgmr.msrb.gmra.mxu2 %v4265_v53  ;;  %4343 = vmatmul.f32.vlgmr.msra.gmra.mxu3 %v4265_v53  ;;  %v9414_v53 = vld [vmem:[#allocation14 + $0x1d0] sm:$0xff] }
0x1081   :  { %4573 = vmatpush.msrb.mxu0 %v8866_v7  ;;  %4593 = vmatpush.msra.mxu1 %v8868_v22  ;;  %v10733_v7 = vld [vmem:[#allocation47_spill] sm:$0xff]  ;;  %v10734_v22 = vld [vmem:[#allocation44_spill] sm:$0xff] }
0x1082   :  { %4613 = vmatpush.msrb.mxu2 %v8870_v3  ;;  %4633 = vmatpush.msra.mxu3 %v8874_v29  ;;  %v10735_v3 = vld [vmem:[#allocation37_spill] sm:$0xff]  ;;  %v10736_v29 = vld [vmem:[#allocation50_spill] sm:$0xff] }
0x1083   :  { %4574 = vmatpush.msrb.mxu0 %v8878_v62  ;;  %4594 = vmatpush.msra.mxu1 %v8880_v59  ;;  %v10737_v62 = vld [vmem:[#allocation22_spill] sm:$0xff]  ;;  %10760 = vst [vmem:[#allocation37_spill] sm:$0xff] %v9498_v50 }
0x1084   :  { %4614 = vmatpush.msrb.mxu2 %v8882_v30  ;;  %4634 = vmatpush.msra.mxu3 %v8886_v61  ;;  %v10738_v59 = vld [vmem:[#allocation38_spill] sm:$0xff]  ;;  %v10739_v30 = vld [vmem:[#allocation25_spill] sm:$0xff]  ;;  %v10740_v61 = vld [vmem:[#allocation28_spill] sm:$0xff] }
0x1085   :  { %4575 = vmatpush.msrb.mxu0 %v8890_v49  ;;  %4595 = vmatpush.msra.mxu1 %v8892_v60  ;;  %v10741_v49 = vld [vmem:[#allocation26_spill] sm:$0xff]  ;;  %v10742_v60 = vld [vmem:[#allocation27_spill] sm:$0xff] }
0x1086   :  { %4615 = vmatpush.msrb.mxu2 %v8894_v37  ;;  %4635 = vmatpush.msra.mxu3 %v8898_v5  ;;  %v10743_v37 = vld [vmem:[#allocation46_spill] sm:$0xff]  ;;  %v10744_v5 = vld [vmem:[#allocation29_spill] sm:$0xff] }
0x1087   :  { %4576 = vmatpush.msrb.mxu0 %v8902_v54  ;;  %4596 = vmatpush.msra.mxu1 %v8904_v28  ;;  %v10745_v54 = vld [vmem:[#allocation32_spill] sm:$0xff]  ;;  %v10746_v28 = vld [vmem:[#allocation33_spill] sm:$0xff] }
0x1088   :  { %4616 = vmatpush.msrb.mxu2 %v8906_v42  ;;  %4636 = vmatpush.msra.mxu3 %v8910_v45  ;;  %v10747_v42 = vld [vmem:[#allocation41_spill] sm:$0xff]  ;;  %v10748_v45 = vld [vmem:[#allocation24_spill] sm:$0xff] }
0x1089   :  { %4577 = vmatpush.msrb.mxu0 %v8914_v17  ;;  %4597 = vmatpush.msra.mxu1 %v8916_v19  ;;  %v10749_v17 = vld [vmem:[#allocation48_spill] sm:$0xff]  ;;  %v10750_v19 = vld [vmem:[#allocation49_spill] sm:$0xff] }
0x108a   :  { %4617 = vmatpush.msrb.mxu2 %v8918_v4  ;;  %4637 = vmatpush.msra.mxu3 %v8922_v51  ;;  %v10751_v4 = vld [vmem:[#allocation34_spill] sm:$0xff]  ;;  %v10752_v51 = vld [vmem:[#allocation39_spill] sm:$0xff] }
0x108b   :  { %4578 = vmatpush.msrb.mxu0 %v8926_v8  ;;  %4598 = vmatpush.msra.mxu1 %v8928_v44 }
0x108c   :  { %4618 = vmatpush.msrb.mxu2 %v8930_v21  ;;  %4638 = vmatpush.msra.mxu3 %v8934_v23 }
0x108d   :  { %4579 = vmatpush.msrb.mxu0 %v8938_v6  ;;  %4599 = vmatpush.msra.mxu1 %v8940_v10  ;;  %v10753_v6 = vld [vmem:[#allocation40_spill] sm:$0xff] }
0x108e   :  { %4619 = vmatpush.msrb.mxu2 %v8942_v36  ;;  %4639 = vmatpush.msra.mxu3 %v8946_v33  ;;  %v10754_v36 = vld [vmem:[#allocation43_spill] sm:$0xff] }
0x108f   :  { %4580 = vmatpush.msrb.mxu0 %v8950_v2  ;;  %4600 = vmatpush.msra.mxu1 %v8952_v13 }
0x1090   :  { %4620 = vmatpush.msrb.mxu2 %v8954_v56  ;;  %4640 = vmatpush.msra.mxu3 %v8958_v9 }
0x1091   :  { %4581 = vmatpush.msrb.mxu0 %v8962_v20  ;;  %4601 = vmatpush.msra.mxu1 %v8964_v27 }
0x1092   :  { %4621 = vmatpush.msrb.mxu2 %v8966_v15  ;;  %4641 = vmatpush.msra.mxu3 %v8970_v48  ;;  %v10755_v15 = vld [vmem:[#allocation36_spill] sm:$0xff] }
0x1093   :  { %4582 = vmatpush.msrb.mxu0 %v8974_v31  ;;  %4602 = vmatpush.msra.mxu1 %v8976_v41 }
0x1094   :  { %4622 = vmatpush.msrb.mxu2 %v8978_v38  ;;  %4642 = vmatpush.msra.mxu3 %v8982_v1 }
0x1095   :  { %4583 = vmatpush.msrb.mxu0 %v8986_v11  ;;  %4603 = vmatpush.msra.mxu1 %v8988_v55  ;;  %v4374_v55 = vrot.slane %v9312_v18, 6  ;;  %v9399_v18 = vld [vmem:[#allocation14 + $0x1e8] sm:$0xff] }
0x1096   :  { %4623 = vmatpush.msrb.mxu2 %v8990_v58  ;;  %4643 = vmatpush.msra.mxu3 %v8994_v0 }
0x1097   :  { %4584 = vmatpush.msrb.mxu0 %v10733_v7  ;;  %4604 = vmatpush.msra.mxu1 %v10734_v22 }
0x1098   :  { %4624 = vmatpush.msrb.mxu2 %v10735_v3  ;;  %4644 = vmatpush.msra.mxu3 %v10736_v29 }
0x1099   :  { %4585 = vmatpush.msrb.mxu0 %v10737_v62  ;;  %4605 = vmatpush.msra.mxu1 %v10738_v59 }
0x109a   :  { %4625 = vmatpush.msrb.mxu2 %v10739_v30  ;;  %4645 = vmatpush.msra.mxu3 %v10740_v61 }
0x109b   :  { %4586 = vmatpush.msrb.mxu0 %v10741_v49  ;;  %4606 = vmatpush.msra.mxu1 %v10742_v60 }
0x109c   :  { %4626 = vmatpush.msrb.mxu2 %v10743_v37  ;;  %4646 = vmatpush.msra.mxu3 %v10744_v5 }
0x109d   :  { %4587 = vmatpush.msrb.mxu0 %v10745_v54  ;;  %4607 = vmatpush.msra.mxu1 %v10746_v28 }
0x109e   :  { %4627 = vmatpush.msrb.mxu2 %v10747_v42  ;;  %4647 = vmatpush.msra.mxu3 %v10748_v45 }
0x109f   :  { %4588 = vmatpush.msrb.mxu0 %v10749_v17  ;;  %4608 = vmatpush.msra.mxu1 %v10750_v19 }
0x10a0   :  { %4628 = vmatpush.msrb.mxu2 %v10751_v4  ;;  %4648 = vmatpush.msra.mxu3 %v10752_v51 }
0x10fc   :  { %v4284_v8 = vpop.f32.mrf.mxu0  ;;  %v4304_v44 = vpop.f32.mrf.mxu1 }
0x10fd   :  { %v4351_v21 = vrot.slane %v4284_v8, 4  ;;  %v4352_v23 = vrot.slane %v4304_v44, 4  ;;  %v9417_v8 = vld [vmem:[#allocation14 + $0x1d8] sm:$0xff]  ;;  %v9420_v44 = vld [vmem:[#allocation14 + $0x1a0] sm:$0xff] }
0x10ff   :  { %v4359_v10 = vadd.f32 %v4351_v21, %v10753_v6  ;;  %v4360_v33 = vadd.f32 %v4352_v23, %v10754_v36  ;;  %v9423_v21 = vld [vmem:[#allocation14 + $0x1a8] sm:$0xff]  ;;  %v9426_v23 = vld [vmem:[#allocation14 + $0x1b0] sm:$0xff] }
0x1101   :  { %5410 = vtanh.f32 %v4359_v10  ;;  %v9429_v10 = vld [vmem:[#allocation14 + $0x1b8] sm:$0xff] }
0x1102   :  { %5412 = vtanh.f32 %v4360_v33  ;;  %v9432_v33 = vld [vmem:[#allocation14 + $0x180] sm:$0xff] }
0x1103   :  { %v4324_v2 = vpop.f32.mrf.mxu2  ;;  %v4344_v13 = vpop.f32.mrf.mxu3 }
0x1104   :  { %v4353_v56 = vrot.slane %v4324_v2, 4  ;;  %v4354_v9 = vrot.slane %v4344_v13, 4  ;;  %v9435_v2 = vld [vmem:[#allocation14 + $0x188] sm:$0xff]  ;;  %v9438_v13 = vld [vmem:[#allocation14 + $0x190] sm:$0xff] }
0x1106   :  { %v4361_v20 = vadd.f32 %v4353_v56, %v10732_v43  ;;  %v4362_v48 = vadd.f32 %v4354_v9, %v10755_v15  ;;  %v9441_v56 = vld [vmem:[#allocation14 + $0x198] sm:$0xff]  ;;  %v9444_v9 = vld [vmem:[#allocation14 + $0x160] sm:$0xff] }
0x1107   :  { %v5411_v27 = vpop.eup %5410 }
0x1108   :  { %v5413_v31 = vpop.eup %5412  ;;  %5414 = vtanh.f32 %v4361_v20  ;;  %v4367_v41 = vmul.f32 0.5, %v5411_v27  ;;  %v9447_v20 = vld [vmem:[#allocation14 + $0x168] sm:$0xff]  ;;  %v9450_v27 = vld [vmem:[#allocation14 + $0x170] sm:$0xff] }
0x1109   :  { %v4369_v38 = vmul.f32 0.5, %v5413_v31  ;;  %5416 = vtanh.f32 %v4362_v48  ;;  %v9453_v48 = vld [vmem:[#allocation14 + $0x178] sm:$0xff]  ;;  %v9456_v31 = vld [vmem:[#allocation14 + $0x140] sm:$0xff] }
0x110a   :  { %v4368_v11 = vadd.f32 0.5, %v4367_v41  ;;  %v9459_v41 = vld [vmem:[#allocation14 + $0x148] sm:$0xff] }
0x110b   :  { %v4370_v1 = vadd.f32 0.5, %v4369_v38  ;;  %v9462_v38 = vld [vmem:[#allocation14 + $0x150] sm:$0xff] }
0x110d   :  { %v4376_v46 = vmul.f32 %v4374_v55, %v4370_v1  ;;  %v9465_v1 = vld [vmem:[#allocation14 + $0x158] sm:$0xff]  ;;  %v9471_v55 = vld [vmem:[#allocation14 + $0x128] sm:$0xff] }
0x110e   :  { %v5415_v58 = vpop.eup %5414 }
0x110f   :  { %v4377_v32 = vmul.f32 %v5415_v58, %v4368_v11  ;;  %v5417_v24 = vpop.eup %5416  ;;  %v9468_v11 = vld [vmem:[#allocation14 + $0x120] sm:$0xff]  ;;  %v9474_v58 = vld [vmem:[#allocation14 + $0x130] sm:$0xff] }
0x1110   :  { %v4371_v12 = vmul.f32 0.5, %v5417_v24  ;;  %v9483_v24 = vld [vmem:[#allocation14 + $0x108] sm:$0xff] }
0x1111   :  { %v9387_v47 = vadd.f32 %v4377_v32, %v4376_v46  ;;  %v9477_v46 = vld [vmem:[#allocation14 + $0x138] sm:$0xff]  ;;  %v9480_v32 = vld [vmem:[#allocation14 + $0x100] sm:$0xff] }
0x1112   :  { %v4372_v16 = vadd.f32 0.5, %v4371_v12  ;;  %v9486_v12 = vld [vmem:[#allocation14 + $0x110] sm:$0xff] }
0x1113   :  { %5418 = vtanh.f32 %v9387_v47 }
0x1119   :  { %v5419_v14 = vpop.eup %5418 }
0x111a   :  { %v4380_v52 = vmul.f32 %v5419_v14, %v4372_v16  ;;  %v9489_v16 = vld [vmem:[#allocation14 + $0x118] sm:$0xff]  ;;  %v9492_v14 = vld [vmem:[#allocation14 + $0xe0] sm:$0xff] }
0x111b   :  { %10757 = vst [vmem:[#allocation42_spill] sm:$0xff] %v9489_v16 }
0x111c   :  { %v4382_v26 = vrot.slane %v4380_v52, 4  ;;  %v9394_v57 = vsel %vm205_vm0, %v4498_v39, %v4380_v52  ;;  %10758 = vst [vmem:[#allocation47_spill] sm:$0xff] %v9492_v14  ;;  %v9495_v52 = vld [vmem:[#allocation14 + $0xe8] sm:$0xff]  ;;  %v9501_v39 = vld [vmem:[#allocation14 + $0xf8] sm:$0xff] }
0x111d   :  { %10759 = vst [vmem:[#allocation44_spill] sm:$0xff] %v9495_v52 }
0x111e   :  { %4400 = vmatmul.f32.vlgmr.msra.gmra.mxu0 %v4382_v26  ;;  %4420 = vmatmul.f32.vlgmr.msrb.gmra.mxu1 %v4382_v26  ;;  %10761 = vst [vmem:[#allocation50_spill] sm:$0xff] %v9501_v39 }
0x111f   :  { %4440 = vmatmul.f32.vlgmr.msra.gmra.mxu2 %v4382_v26  ;;  %4460 = vmatmul.f32.vlgmr.msrb.gmra.mxu3 %v4382_v26  ;;  %v9504_v26 = vld [vmem:[#allocation14 + $0xc0] sm:$0xff] }
0x1120   :  { %4675 = vmatpush.msra.mxu0 %v9396_v25  ;;  %4695 = vmatpush.msrb.mxu1 %v9399_v18  ;;  %10762 = vst [vmem:[#allocation22_spill] sm:$0xff] %v9504_v26 }
0x1121   :  { %4715 = vmatpush.msra.mxu2 %v9402_v34  ;;  %4735 = vmatpush.msrb.mxu3 %v9405_v35 }
0x1122   :  { %4676 = vmatpush.msra.mxu0 %v9408_v40  ;;  %4696 = vmatpush.msrb.mxu1 %v9411_v63 }
0x1123   :  { %4716 = vmatpush.msra.mxu2 %v9414_v53  ;;  %4736 = vmatpush.msrb.mxu3 %v9417_v8 }
0x1124   :  { %4677 = vmatpush.msra.mxu0 %v9420_v44  ;;  %4697 = vmatpush.msrb.mxu1 %v9423_v21 }
0x1125   :  { %4717 = vmatpush.msra.mxu2 %v9426_v23  ;;  %4737 = vmatpush.msrb.mxu3 %v9429_v10 }
0x1126   :  { %4678 = vmatpush.msra.mxu0 %v9432_v33  ;;  %4698 = vmatpush.msrb.mxu1 %v9435_v2 }
0x1127   :  { %4718 = vmatpush.msra.mxu2 %v9438_v13  ;;  %4738 = vmatpush.msrb.mxu3 %v9441_v56 }
0x1128   :  { %4679 = vmatpush.msra.mxu0 %v9444_v9  ;;  %4699 = vmatpush.msrb.mxu1 %v9447_v20 }
0x1129   :  { %4719 = vmatpush.msra.mxu2 %v9450_v27  ;;  %4739 = vmatpush.msrb.mxu3 %v9453_v48 }
0x112a   :  { %4680 = vmatpush.msra.mxu0 %v9456_v31  ;;  %4700 = vmatpush.msrb.mxu1 %v9459_v41 }
0x112b   :  { %4720 = vmatpush.msra.mxu2 %v9462_v38  ;;  %4740 = vmatpush.msrb.mxu3 %v9465_v1 }
0x112c   :  { %4681 = vmatpush.msra.mxu0 %v9468_v11  ;;  %4701 = vmatpush.msrb.mxu1 %v9471_v55 }
0x112d   :  { %4721 = vmatpush.msra.mxu2 %v9474_v58  ;;  %4741 = vmatpush.msrb.mxu3 %v9477_v46 }
0x112e   :  { %4682 = vmatpush.msra.mxu0 %v9480_v32  ;;  %4702 = vmatpush.msrb.mxu1 %v9483_v24 }
0x112f   :  { %4722 = vmatpush.msra.mxu2 %v9486_v12  ;;  %4742 = vmatpush.msrb.mxu3 %v9489_v16  ;;  %v9507_v16 = vld [vmem:[#allocation14 + $0xc8] sm:$0xff] }
0x1130   :  { %4683 = vmatpush.msra.mxu0 %v9492_v14  ;;  %4703 = vmatpush.msrb.mxu1 %v9495_v52  ;;  %v9510_v14 = vld [vmem:[#allocation14 + $0xd0] sm:$0xff]  ;;  %v9513_v52 = vld [vmem:[#allocation14 + $0xd8] sm:$0xff] }
0x1131   :  { %4723 = vmatpush.msra.mxu2 %v9498_v50  ;;  %4743 = vmatpush.msrb.mxu3 %v9501_v39  ;;  %v9516_v50 = vld [vmem:[#allocation14 + $0xa0] sm:$0xff]  ;;  %v9519_v39 = vld [vmem:[#allocation14 + $0xa8] sm:$0xff] }
0x1132   :  { %4684 = vmatpush.msra.mxu0 %v9504_v26  ;;  %4704 = vmatpush.msrb.mxu1 %v9507_v16  ;;  %v9522_v26 = vld [vmem:[#allocation14 + $0xb0] sm:$0xff] }
0x1133   :  { %4724 = vmatpush.msra.mxu2 %v9510_v14  ;;  %4744 = vmatpush.msrb.mxu3 %v9513_v52 }
0x1134   :  { %4685 = vmatpush.msra.mxu0 %v9516_v50  ;;  %4705 = vmatpush.msrb.mxu1 %v9519_v39 }
0x1135   :  { %4725 = vmatpush.msra.mxu2 %v9522_v26  ;;  %4745 = vmatpush.msrb.mxu3 %v8994_v0 }
0x1136   :  { %4686 = vmatpush.msra.mxu0 %v10733_v7  ;;  %4706 = vmatpush.msrb.mxu1 %v10734_v22 }
0x1137   :  { %4726 = vmatpush.msra.mxu2 %v10735_v3  ;;  %4746 = vmatpush.msrb.mxu3 %v10736_v29 }
0x1138   :  { %4687 = vmatpush.msra.mxu0 %v10737_v62  ;;  %4707 = vmatpush.msrb.mxu1 %v10738_v59 }
0x1139   :  { %4727 = vmatpush.msra.mxu2 %v10739_v30  ;;  %4747 = vmatpush.msrb.mxu3 %v10740_v61 }
0x113a   :  { %4688 = vmatpush.msra.mxu0 %v10741_v49  ;;  %4708 = vmatpush.msrb.mxu1 %v10742_v60 }
0x113b   :  { %4728 = vmatpush.msra.mxu2 %v10743_v37  ;;  %4748 = vmatpush.msrb.mxu3 %v10744_v5 }
0x113c   :  { %4689 = vmatpush.msra.mxu0 %v10745_v54  ;;  %4709 = vmatpush.msrb.mxu1 %v10746_v28 }
0x113d   :  { %4729 = vmatpush.msra.mxu2 %v10747_v42  ;;  %4749 = vmatpush.msrb.mxu3 %v10748_v45 }
0x113e   :  { %4690 = vmatpush.msra.mxu0 %v10749_v17  ;;  %4710 = vmatpush.msrb.mxu1 %v10750_v19  ;;  %v4491_v19 = vrot.slane %v9387_v47, 6  ;;  %v10764_v47 = vld [vmem:[#allocation42_spill] sm:$0xff] }
0x113f   :  { %4730 = vmatpush.msra.mxu2 %v10751_v4  ;;  %4750 = vmatpush.msrb.mxu3 %v10752_v51 }
0x119b   :  { %v4401_v0 = vpop.f32.mrf.mxu0  ;;  %v4421_v7 = vpop.f32.mrf.mxu1 }
0x119c   :  { %v4468_v22 = vrot.slane %v4401_v0, 2  ;;  %v4469_v3 = vrot.slane %v4421_v7, 2 }
0x119e   :  { %v4476_v29 = vadd.f32 %v4468_v22, %v10753_v6  ;;  %v4477_v62 = vadd.f32 %v4469_v3, %v10754_v36 }
0x11a0   :  { %5420 = vtanh.f32 %v4476_v29 }
0x11a1   :  { %5422 = vtanh.f32 %v4477_v62  ;;  %v10766_v62 = vld [vmem:[#allocation44_spill] sm:$0xff] }
0x11a2   :  { %v4441_v59 = vpop.f32.mrf.mxu2  ;;  %v4461_v30 = vpop.f32.mrf.mxu3 }
0x11a3   :  { %v4470_v61 = vrot.slane %v4441_v59, 2  ;;  %v4471_v49 = vrot.slane %v4461_v30, 2  ;;  %v10767_v59 = vld [vmem:[#allocation37_spill] sm:$0xff]  ;;  %v10768_v30 = vld [vmem:[#allocation50_spill] sm:$0xff] }
0x11a5   :  { %v4478_v60 = vadd.f32 %v4470_v61, %v10732_v43  ;;  %v4479_v5 = vadd.f32 %v4471_v49, %v10755_v15  ;;  %v10769_v61 = vld [vmem:[#allocation22_spill] sm:$0xff]  ;;  %v9601_v49 = vld [vmem:[#allocation14 + $0xb8] sm:$0xff] }
0x11a6   :  { %v5421_v37 = vpop.eup %5420 }
0x11a7   :  { %v5423_v54 = vpop.eup %5422  ;;  %5424 = vtanh.f32 %v4478_v60  ;;  %v4484_v28 = vmul.f32 0.5, %v5421_v37  ;;  %v9604_v60 = vld [vmem:[#allocation14 + $0x80] sm:$0xff]  ;;  %v9607_v37 = vld [vmem:[#allocation14 + $0x88] sm:$0xff] }
0x11a8   :  { %v4486_v42 = vmul.f32 0.5, %v5423_v54  ;;  %5426 = vtanh.f32 %v4479_v5  ;;  %10770 = vst [vmem:[#allocation25_spill] sm:$0xff] %v9607_v37  ;;  %v9610_v5 = vld [vmem:[#allocation14 + $0x90] sm:$0xff]  ;;  %v9613_v54 = vld [vmem:[#allocation14 + $0x98] sm:$0xff] }
0x11a9   :  { %v4485_v17 = vadd.f32 0.5, %v4484_v28  ;;  %10771 = vst [vmem:[#allocation28_spill] sm:$0xff] %v9610_v5  ;;  %v9616_v28 = vld [vmem:[#allocation14 + $0x60] sm:$0xff] }
0x11aa   :  { %v4487_v45 = vadd.f32 0.5, %v4486_v42  ;;  %10772 = vst [vmem:[#allocation26_spill] sm:$0xff] %v9613_v54  ;;  %v9619_v42 = vld [vmem:[#allocation14 + $0x68] sm:$0xff] }
0x11ab   :  { %10773 = vst [vmem:[#allocation27_spill] sm:$0xff] %v9616_v28 }
0x11ac   :  { %v4493_v51 = vmul.f32 %v4491_v19, %v4487_v45  ;;  %10774 = vst [vmem:[#allocation46_spill] sm:$0xff] %v9619_v42  ;;  %v9622_v45 = vld [vmem:[#allocation14 + $0x70] sm:$0xff]  ;;  %v9628_v19 = vld [vmem:[#allocation14 + $0x40] sm:$0xff] }
0x11ad   :  { %v5425_v4 = vpop.eup %5424  ;;  %10775 = vst [vmem:[#allocation29_spill] sm:$0xff] %v9622_v45 }
0x11ae   :  { %v4494_v6 = vmul.f32 %v5425_v4, %v4485_v17  ;;  %v5427_v36 = vpop.eup %5426  ;;  %v9625_v17 = vld [vmem:[#allocation14 + $0x78] sm:$0xff]  ;;  %10777 = vst [vmem:[#allocation33_spill] sm:$0xff] %v9628_v19  ;;  %v9631_v4 = vld [vmem:[#allocation14 + $0x48] sm:$0xff] }
0x11af   :  { %v4488_v43 = vmul.f32 0.5, %v5427_v36  ;;  %10776 = vst [vmem:[#allocation32_spill] sm:$0xff] %v9625_v17  ;;  %v9640_v36 = vld [vmem:[#allocation14 + $0x20] sm:$0xff] }
0x11b0   :  { %v9551_v0 = vadd.f32 %v4494_v6, %v4493_v51  ;;  %10778 = vst [vmem:[#allocation41_spill] sm:$0xff] %v9631_v4  ;;  %v9634_v51 = vld [vmem:[#allocation14 + $0x50] sm:$0xff]  ;;  %v9637_v6 = vld [vmem:[#allocation14 + $0x58] sm:$0xff] }
0x11b1   :  { %v4489_v7 = vadd.f32 0.5, %v4488_v43  ;;  %10779 = vst [vmem:[#allocation24_spill] sm:$0xff] %v9634_v51  ;;  %v9643_v43 = vld [vmem:[#allocation14 + $0x28] sm:$0xff] }
0x11b2   :  { %5428 = vtanh.f32 %v9551_v0  ;;  %10780 = vst [vmem:[#allocation48_spill] sm:$0xff] %v9637_v6 }
0x11b3   :  { %10781 = vst [vmem:[#allocation49_spill] sm:$0xff] %v9640_v36 }
0x11b4   :  { %10782 = vst [vmem:[#allocation34_spill] sm:$0xff] %v9643_v43 }
0x11b8   :  { %v5429_v15 = vpop.eup %5428 }
0x11b9   :  { %v4497_v22 = vmul.f32 %v5429_v15, %v4489_v7  ;;  %v9646_v7 = vld [vmem:[#allocation14 + $0x30] sm:$0xff]  ;;  %v9649_v15 = vld [vmem:[#allocation14 + $0x38] sm:$0xff] }
0x11ba   :  { %10783 = vst [vmem:[#allocation39_spill] sm:$0xff] %v9646_v7 }
0x11bb   :  { %v4571_v3 = vrot.slane %v4497_v22, 6  ;;  %v9556_v29 = vsel %vm835_vm3, %v9394_v57, %v4497_v22  ;;  %v10765_v57 = vld [vmem:[#allocation47_spill] sm:$0xff]  ;;  %10784 = vst [vmem:[#allocation40_spill] sm:$0xff] %v9649_v15  ;;  %v9652_v22 = vld [vmem:[#allocation14] sm:$0xff] }
0x11bc   :  { %10763 = vst [vmem:[#allocation38_spill] sm:$0xff] %v9556_v29  ;;  %v9658_v29 = vld [vmem:[#allocation14 + $0x10] sm:$0xff] }
0x11bd   :  { %4589 = vmatmul.f32.vlgmr.msrb.gmra.mxu0 %v4571_v3  ;;  %4609 = vmatmul.f32.vlgmr.msra.gmra.mxu1 %v4571_v3  ;;  %10785 = vst [vmem:[#allocation43_spill] sm:$0xff] %v9652_v22 }
0x11be   :  { %4629 = vmatmul.f32.vlgmr.msrb.gmra.mxu2 %v4571_v3  ;;  %4649 = vmatmul.f32.vlgmr.msra.gmra.mxu3 %v4571_v3  ;;  %v9655_v3 = vld [vmem:[#allocation14 + $0x8] sm:$0xff]  ;;  %10787 = vst [vmem:[#allocation23_spill] sm:$0xff] %v9658_v29 }
0x11bf   :  { %4792 = vmatpush.msrb.mxu0 %v9396_v25  ;;  %4812 = vmatpush.msra.mxu1 %v9399_v18  ;;  %10786 = vst [vmem:[#allocation36_spill] sm:$0xff] %v9655_v3 }
0x11c0   :  { %4832 = vmatpush.msrb.mxu2 %v9402_v34  ;;  %4852 = vmatpush.msra.mxu3 %v9405_v35 }
0x11c1   :  { %4793 = vmatpush.msrb.mxu0 %v9408_v40  ;;  %4813 = vmatpush.msra.mxu1 %v9411_v63 }
0x11c2   :  { %4833 = vmatpush.msrb.mxu2 %v9414_v53  ;;  %4853 = vmatpush.msra.mxu3 %v9417_v8 }
0x11c3   :  { %4794 = vmatpush.msrb.mxu0 %v9420_v44  ;;  %4814 = vmatpush.msra.mxu1 %v9423_v21 }
0x11c4   :  { %4834 = vmatpush.msrb.mxu2 %v9426_v23  ;;  %4854 = vmatpush.msra.mxu3 %v9429_v10 }
0x11c5   :  { %4795 = vmatpush.msrb.mxu0 %v9432_v33  ;;  %4815 = vmatpush.msra.mxu1 %v9435_v2 }
0x11c6   :  { %4835 = vmatpush.msrb.mxu2 %v9438_v13  ;;  %4855 = vmatpush.msra.mxu3 %v9441_v56 }
0x11c7   :  { %4796 = vmatpush.msrb.mxu0 %v9444_v9  ;;  %4816 = vmatpush.msra.mxu1 %v9447_v20 }
0x11c8   :  { %4836 = vmatpush.msrb.mxu2 %v9450_v27  ;;  %4856 = vmatpush.msra.mxu3 %v9453_v48 }
0x11c9   :  { %4797 = vmatpush.msrb.mxu0 %v9456_v31  ;;  %4817 = vmatpush.msra.mxu1 %v9459_v41 }
0x11ca   :  { %4837 = vmatpush.msrb.mxu2 %v9462_v38  ;;  %4857 = vmatpush.msra.mxu3 %v9465_v1 }
0x11cb   :  { %4798 = vmatpush.msrb.mxu0 %v9468_v11  ;;  %4818 = vmatpush.msra.mxu1 %v9471_v55 }
0x11cc   :  { %4838 = vmatpush.msrb.mxu2 %v9474_v58  ;;  %4858 = vmatpush.msra.mxu3 %v9477_v46 }
0x11cd   :  { %4799 = vmatpush.msrb.mxu0 %v9480_v32  ;;  %4819 = vmatpush.msra.mxu1 %v9483_v24 }
0x11ce   :  { %4839 = vmatpush.msrb.mxu2 %v9486_v12  ;;  %4859 = vmatpush.msra.mxu3 %v10764_v47 }
0x11cf   :  { %4800 = vmatpush.msrb.mxu0 %v10765_v57  ;;  %4820 = vmatpush.msra.mxu1 %v10766_v62 }
0x11d0   :  { %4840 = vmatpush.msrb.mxu2 %v10767_v59  ;;  %4860 = vmatpush.msra.mxu3 %v10768_v30 }
0x11d1   :  { %4801 = vmatpush.msrb.mxu0 %v10769_v61  ;;  %4821 = vmatpush.msra.mxu1 %v9507_v16 }
0x11d2   :  { %4841 = vmatpush.msrb.mxu2 %v9510_v14  ;;  %4861 = vmatpush.msra.mxu3 %v9513_v52 }
0x11d3   :  { %4802 = vmatpush.msrb.mxu0 %v9516_v50  ;;  %4822 = vmatpush.msra.mxu1 %v9519_v39 }
0x11d4   :  { %4842 = vmatpush.msrb.mxu2 %v9522_v26  ;;  %4862 = vmatpush.msra.mxu3 %v9601_v49 }
0x11d5   :  { %4803 = vmatpush.msrb.mxu0 %v9604_v60  ;;  %4823 = vmatpush.msra.mxu1 %v9607_v37 }
0x11d6   :  { %4843 = vmatpush.msrb.mxu2 %v9610_v5  ;;  %4863 = vmatpush.msra.mxu3 %v9613_v54 }
0x11d7   :  { %4804 = vmatpush.msrb.mxu0 %v9616_v28  ;;  %4824 = vmatpush.msra.mxu1 %v9619_v42 }
0x11d8   :  { %4844 = vmatpush.msrb.mxu2 %v9622_v45  ;;  %4864 = vmatpush.msra.mxu3 %v9625_v17  ;;  %v10797_v45 = vld [vmem:[#allocation31_spill] sm:$0xff] }
0x11d9   :  { %4805 = vmatpush.msrb.mxu0 %v9628_v19  ;;  %4825 = vmatpush.msra.mxu1 %v9631_v4 }
0x11da   :  { %4845 = vmatpush.msrb.mxu2 %v9634_v51  ;;  %4865 = vmatpush.msra.mxu3 %v9637_v6  ;;  %v10791_v6 = vld [vmem:[#allocation30_spill] sm:$0xff] }
0x11db   :  { %4806 = vmatpush.msrb.mxu0 %v9640_v36  ;;  %4826 = vmatpush.msra.mxu1 %v9643_v43  ;;  %v9661_v43 = vld [vmem:[#allocation14 + $0x18] sm:$0xff] }
0x11dc   :  { %4846 = vmatpush.msrb.mxu2 %v9646_v7  ;;  %4866 = vmatpush.msra.mxu3 %v9649_v15  ;;  %10788 = vst [vmem:[#allocation42_spill] sm:$0xff] %v9661_v43  ;;  %v10789_v7 = vld [vmem:[#allocation51_spill] sm:$0xff] }
0x11dd   :  { %4807 = vmatpush.msrb.mxu0 %v9652_v22  ;;  %4827 = vmatpush.msra.mxu1 %v9655_v3  ;;  %v10790_v36 = vperm.slane %v10789_v7, 0  ;;  %v10793_v51 = vperm.slane %v10789_v7, 1  ;;  %v10794_v22 = vld [vmem:[#allocation45_spill] sm:$0xff] }
0x11de   :  { %4847 = vmatpush.msrb.mxu2 %v9658_v29  ;;  %4867 = vmatpush.msra.mxu3 %v9661_v43  ;;  %v10796_v43 = vperm.slane %v10789_v7, 2 }
0x11df   :  { %v9667_v15 = vadd.f32 %v10791_v6, %v10790_v36  ;;  %v9672_v4 = vadd.f32 %v10794_v22, %v10793_v51  ;;  %v10799_v6 = vperm.slane %v10789_v7, 3  ;;  %v10800_v36 = vld [vmem:[#allocation35_spill] sm:$0xff] }
0x11e0   :  { %v9679_v42 = vadd.f32 %v10797_v45, %v10796_v43  ;;  %v4668_v43 = vrot.slane %v9551_v0, 6 }
0x11e1   :  { %10792 = vst [vmem:[#allocation47_spill] sm:$0xff] %v9667_v15  ;;  %v9684_v28 = vadd.f32 %v10800_v36, %v10799_v6 }
0x11e2   :  { %10795 = vst [vmem:[#allocation44_spill] sm:$0xff] %v9672_v4 }
0x11e3   :  { %10798 = vst [vmem:[#allocation37_spill] sm:$0xff] %v9679_v42 }
0x11e4   :  { %10801 = vst [vmem:[#allocation50_spill] sm:$0xff] %v9684_v28 }
0x123a   :  { %v4590_v19 = vpop.f32.mrf.mxu0  ;;  %v4610_v3 = vpop.f32.mrf.mxu1 }
0x123b   :  { %v4653_v17 = vadd.f32 %v4590_v19, %v9667_v15  ;;  %v4654_v29 = vadd.f32 %v4610_v3, %v9672_v4 }
0x123d   :  { %5430 = vtanh.f32 %v4653_v17 }
0x123e   :  { %5432 = vtanh.f32 %v4654_v29 }
0x1241   :  { %v4630_v51 = vpop.f32.mrf.mxu2  ;;  %v4650_v22 = vpop.f32.mrf.mxu3 }
0x1242   :  { %v4655_v54 = vadd.f32 %v4630_v51, %v9679_v42  ;;  %v4656_v19 = vadd.f32 %v4650_v22, %v9684_v28 }
0x1243   :  { %v5431_v5 = vpop.eup %5430 }
0x1244   :  { %v5433_v3 = vpop.eup %5432  ;;  %5434 = vtanh.f32 %v4655_v54  ;;  %v4661_v29 = vmul.f32 0.5, %v5431_v5 }
0x1245   :  { %v4663_v17 = vmul.f32 0.5, %v5433_v3  ;;  %5436 = vtanh.f32 %v4656_v19  ;;  %v5043_v3 = vld [vmem:[#allocation15 + $0x70] sm:$0xff] }
0x1246   :  { %v4662_v45 = vadd.f32 0.5, %v4661_v29  ;;  %v5042_v29 = vld [vmem:[#allocation15 + $0x68] sm:$0xff] }
0x1247   :  { %v4664_v4 = vadd.f32 0.5, %v4663_v17  ;;  %v5041_v17 = vld [vmem:[#allocation15 + $0x60] sm:$0xff] }
0x1249   :  { %v4670_v15 = vmul.f32 %v4668_v43, %v4664_v4  ;;  %v5039_v43 = vld [vmem:[#allocation15 + $0x50] sm:$0xff] }
0x124a   :  { %v5435_v7 = vpop.eup %5434 }
0x124b   :  { %v4671_v6 = vmul.f32 %v5435_v7, %v4662_v45  ;;  %v5437_v36 = vpop.eup %5436  ;;  %v5040_v45 = vld [vmem:[#allocation15 + $0x58] sm:$0xff]  ;;  %v5038_v7 = vld [vmem:[#allocation15 + $0x48] sm:$0xff] }
0x124c   :  { %v4665_v51 = vmul.f32 0.5, %v5437_v36  ;;  %v5036_v36 = vld [vmem:[#allocation15 + $0x38] sm:$0xff] }
0x124d   :  { %v9689_v37 = vadd.f32 %v4671_v6, %v4670_v15  ;;  %v5037_v6 = vld [vmem:[#allocation15 + $0x40] sm:$0xff] }
0x124e   :  { %v4666_v42 = vadd.f32 0.5, %v4665_v51  ;;  %v5035_v51 = vld [vmem:[#allocation15 + $0x30] sm:$0xff] }
0x124f   :  { %5438 = vtanh.f32 %v9689_v37 }
0x1255   :  { %v5439_v22 = vpop.eup %5438 }
0x1256   :  { %v9692_v28 = vmul.f32 %v5439_v22, %v4666_v42  ;;  %v5034_v22 = vld [vmem:[#allocation15 + $0x28] sm:$0xff] }
0x1258   :  { %4691 = vmatmul.f32.vlgmr.msra.gmra.mxu0 %v9692_v28  ;;  %4711 = vmatmul.f32.vlgmr.msrb.gmra.mxu1 %v9692_v28 }
0x1259   :  { %4731 = vmatmul.f32.vlgmr.msra.gmra.mxu2 %v9692_v28  ;;  %4751 = vmatmul.f32.vlgmr.msrb.gmra.mxu3 %v9692_v28 }
0x125a   :  { %4909 = vmatpush.msra.mxu0 %v9396_v25  ;;  %4929 = vmatpush.msrb.mxu1 %v9399_v18  ;;  %v10802_v25 = vld [vmem:[#allocation25_spill] sm:$0xff]  ;;  %v10803_v18 = vld [vmem:[#allocation28_spill] sm:$0xff] }
0x125b   :  { %4949 = vmatpush.msra.mxu2 %v9402_v34  ;;  %4969 = vmatpush.msrb.mxu3 %v9405_v35  ;;  %v10804_v34 = vld [vmem:[#allocation26_spill] sm:$0xff]  ;;  %v10805_v35 = vld [vmem:[#allocation27_spill] sm:$0xff] }
0x125c   :  { %4910 = vmatpush.msra.mxu0 %v9408_v40  ;;  %4930 = vmatpush.msrb.mxu1 %v9411_v63  ;;  %v10806_v40 = vld [vmem:[#allocation46_spill] sm:$0xff]  ;;  %v10807_v63 = vld [vmem:[#allocation29_spill] sm:$0xff] }
0x125d   :  { %4950 = vmatpush.msra.mxu2 %v9414_v53  ;;  %4970 = vmatpush.msrb.mxu3 %v9417_v8  ;;  %v10808_v53 = vld [vmem:[#allocation32_spill] sm:$0xff]  ;;  %v10809_v8 = vld [vmem:[#allocation33_spill] sm:$0xff] }
0x125e   :  { %4911 = vmatpush.msra.mxu0 %v9420_v44  ;;  %4931 = vmatpush.msrb.mxu1 %v9423_v21  ;;  %v10810_v44 = vld [vmem:[#allocation41_spill] sm:$0xff]  ;;  %v10811_v21 = vld [vmem:[#allocation24_spill] sm:$0xff] }
0x125f   :  { %4951 = vmatpush.msra.mxu2 %v9426_v23  ;;  %4971 = vmatpush.msrb.mxu3 %v9429_v10  ;;  %v10812_v23 = vld [vmem:[#allocation48_spill] sm:$0xff]  ;;  %v10813_v10 = vld [vmem:[#allocation49_spill] sm:$0xff] }
0x1260   :  { %4912 = vmatpush.msra.mxu0 %v9432_v33  ;;  %4932 = vmatpush.msrb.mxu1 %v9435_v2  ;;  %v10814_v33 = vld [vmem:[#allocation34_spill] sm:$0xff]  ;;  %v10815_v2 = vld [vmem:[#allocation39_spill] sm:$0xff] }
0x1261   :  { %4952 = vmatpush.msra.mxu2 %v9438_v13  ;;  %4972 = vmatpush.msrb.mxu3 %v9441_v56  ;;  %v10816_v13 = vld [vmem:[#allocation40_spill] sm:$0xff]  ;;  %v10817_v56 = vld [vmem:[#allocation43_spill] sm:$0xff] }
0x1262   :  { %4913 = vmatpush.msra.mxu0 %v9444_v9  ;;  %4933 = vmatpush.msrb.mxu1 %v9447_v20  ;;  %v10818_v9 = vld [vmem:[#allocation36_spill] sm:$0xff]  ;;  %v10819_v20 = vld [vmem:[#allocation23_spill] sm:$0xff] }
0x1263   :  { %4953 = vmatpush.msra.mxu2 %v9450_v27  ;;  %4973 = vmatpush.msrb.mxu3 %v9453_v48  ;;  %v10820_v27 = vld [vmem:[#allocation42_spill] sm:$0xff] }
0x1264   :  { %4914 = vmatpush.msra.mxu0 %v9456_v31  ;;  %4934 = vmatpush.msrb.mxu1 %v9459_v41 }
0x1265   :  { %4954 = vmatpush.msra.mxu2 %v9462_v38  ;;  %4974 = vmatpush.msrb.mxu3 %v9465_v1  ;;  %v10821_v1 = vld [vmem:[#allocation47_spill] sm:$0xff] }
0x1266   :  { %4915 = vmatpush.msra.mxu0 %v9468_v11  ;;  %4935 = vmatpush.msrb.mxu1 %v9471_v55  ;;  %v10822_v55 = vld [vmem:[#allocation44_spill] sm:$0xff] }
0x1267   :  { %4955 = vmatpush.msra.mxu2 %v9474_v58  ;;  %4975 = vmatpush.msrb.mxu3 %v9477_v46 }
0x1268   :  { %4916 = vmatpush.msra.mxu0 %v9480_v32  ;;  %4936 = vmatpush.msrb.mxu1 %v9483_v24 }
0x1269   :  { %4956 = vmatpush.msra.mxu2 %v9486_v12  ;;  %4976 = vmatpush.msrb.mxu3 %v10764_v47 }
0x126a   :  { %4917 = vmatpush.msra.mxu0 %v10765_v57  ;;  %4937 = vmatpush.msrb.mxu1 %v10766_v62 }
0x126b   :  { %4957 = vmatpush.msra.mxu2 %v10767_v59  ;;  %4977 = vmatpush.msrb.mxu3 %v10768_v30  ;;  %v4782_v59 = vrot.slane %v9689_v37, 6  ;;  %v5044_v37 = vld [vmem:[#allocation15 + $0x78] sm:$0xff] }
0x126c   :  { %4918 = vmatpush.msra.mxu0 %v10769_v61  ;;  %4938 = vmatpush.msrb.mxu1 %v9507_v16  ;;  %v10823_v16 = vld [vmem:[#allocation37_spill] sm:$0xff] }
0x126d   :  { %4958 = vmatpush.msra.mxu2 %v9510_v14  ;;  %4978 = vmatpush.msrb.mxu3 %v9513_v52 }
0x126e   :  { %4919 = vmatpush.msra.mxu0 %v9516_v50  ;;  %4939 = vmatpush.msrb.mxu1 %v9519_v39  ;;  %v10824_v50 = vld [vmem:[#allocation50_spill] sm:$0xff] }
0x126f   :  { %4959 = vmatpush.msra.mxu2 %v9522_v26  ;;  %4979 = vmatpush.msrb.mxu3 %v9601_v49 }
0x1270   :  { %4920 = vmatpush.msra.mxu0 %v9604_v60  ;;  %4940 = vmatpush.msrb.mxu1 %v10802_v25 }
0x1271   :  { %4960 = vmatpush.msra.mxu2 %v10803_v18  ;;  %4980 = vmatpush.msrb.mxu3 %v10804_v34  ;;  %v5033_v34 = vld [vmem:[#allocation15 + $0x20] sm:$0xff] }
0x1272   :  { %4921 = vmatpush.msra.mxu0 %v10805_v35  ;;  %4941 = vmatpush.msrb.mxu1 %v10806_v40 }
0x1273   :  { %4961 = vmatpush.msra.mxu2 %v10807_v63  ;;  %4981 = vmatpush.msrb.mxu3 %v10808_v53 }
0x1274   :  { %4922 = vmatpush.msra.mxu0 %v10809_v8  ;;  %4942 = vmatpush.msrb.mxu1 %v10810_v44  ;;  %v5032_v8 = vld [vmem:[#allocation15 + $0x18] sm:$0xff]  ;;  %v5031_v44 = vld [vmem:[#allocation15 + $0x10] sm:$0xff] }
0x1275   :  { %4962 = vmatpush.msra.mxu2 %v10811_v21  ;;  %4982 = vmatpush.msrb.mxu3 %v10812_v23  ;;  %v5030_v21 = vld [vmem:[#allocation15 + $0x8] sm:$0xff] }
0x1276   :  { %4923 = vmatpush.msra.mxu0 %v10813_v10  ;;  %4943 = vmatpush.msrb.mxu1 %v10814_v33  ;;  %v5029_v33 = vld [vmem:[#allocation15] sm:$0xff] }
0x1277   :  { %4963 = vmatpush.msra.mxu2 %v10815_v2  ;;  %4983 = vmatpush.msrb.mxu3 %v10816_v13 }
0x1278   :  { %4924 = vmatpush.msra.mxu0 %v10817_v56  ;;  %4944 = vmatpush.msrb.mxu1 %v10818_v9 }
0x1279   :  { %4964 = vmatpush.msra.mxu2 %v10819_v20  ;;  %4984 = vmatpush.msrb.mxu3 %v10820_v27 }
0x12d5   :  { %v4692_v48 = vpop.f32.mrf.mxu0  ;;  %v4712_v31 = vpop.f32.mrf.mxu1 }
0x12d6   :  { %v4759_v41 = vrot.slane %v4692_v48, 6  ;;  %v4760_v38 = vrot.slane %v4712_v31, 6 }
0x12d8   :  { %v4767_v11 = vadd.f32 %v4759_v41, %v10821_v1  ;;  %v4768_v58 = vadd.f32 %v4760_v38, %v10822_v55 }
0x12da   :  { %5440 = vtanh.f32 %v4767_v11 }
0x12db   :  { %5442 = vtanh.f32 %v4768_v58 }
0x12dc   :  { %v4732_v46 = vpop.f32.mrf.mxu2  ;;  %v4752_v32 = vpop.f32.mrf.mxu3 }
0x12dd   :  { %v4761_v24 = vrot.slane %v4732_v46, 6  ;;  %v4762_v12 = vrot.slane %v4752_v32, 6 }
0x12df   :  { %v4769_v14 = vadd.f32 %v4761_v24, %v10823_v16  ;;  %v4770_v39 = vadd.f32 %v4762_v12, %v10824_v50 }
0x12e0   :  { %v5441_v52 = vpop.eup %5440 }
0x12e1   :  { %v5443_v26 = vpop.eup %5442  ;;  %5444 = vtanh.f32 %v4769_v14  ;;  %v4775_v0 = vmul.f32 0.5, %v5441_v52 }
0x12e2   :  { %v4777_v47 = vmul.f32 0.5, %v5443_v26  ;;  %5446 = vtanh.f32 %v4770_v39 }
0x12e3   :  { %v4776_v62 = vadd.f32 0.5, %v4775_v0 }
0x12e4   :  { %v4778_v57 = vadd.f32 0.5, %v4777_v47 }
0x12e6   :  { %v4784_v61 = vmul.f32 %v4782_v59, %v4778_v57 }
0x12e7   :  { %v5445_v30 = vpop.eup %5444 }
0x12e8   :  { %v4785_v49 = vmul.f32 %v5445_v30, %v4776_v62  ;;  %v5447_v60 = vpop.eup %5446  ;;  %v10825_v62 = vld [vmem:[#allocation38_spill] sm:$0xff] }
0x12e9   :  { %v4779_v54 = vmul.f32 0.5, %v5447_v60 }
0x12ea   :  { %v9767_v5 = vadd.f32 %v4785_v49, %v4784_v61 }
0x12eb   :  { %v4780_v42 = vadd.f32 0.5, %v4779_v54 }
0x12ec   :  { %5448 = vtanh.f32 %v9767_v5  ;;  %v4899_v11 = vrot.slane %v9767_v5, 6 }
0x12f2   :  { %v5449_v4 = vpop.eup %5448 }
0x12f3   :  { %v9770_v15 = vmul.f32 %v5449_v4, %v4780_v42 }
0x12f5   :  { %v4790_v19 = vrot.slane %v9770_v15, 2  ;;  %v5023_v0 = vsel %vm832_vm2, %v9692_v28, %v9770_v15  ;;  %v5149_v28 = vld [vmem:[%s9811_s14] ss:$0 sm:$0xff] }
0x12f7   :  { %4808 = vmatmul.f32.vlgmr.msrb.gmra.mxu0 %v4790_v19  ;;  %4828 = vmatmul.f32.vlgmr.msra.gmra.mxu1 %v4790_v19 }
0x12f8   :  { %4848 = vmatmul.f32.vlgmr.msrb.gmra.mxu2 %v4790_v19  ;;  %4868 = vmatmul.f32.vlgmr.msra.gmra.mxu3 %v4790_v19 }
0x12f9   :  { %5049 = vmatpush.msrb.mxu0 %v5044_v37 }
0x12fb   :  { %5050 = vmatpush.msrb.mxu0 %v5043_v3 }
0x12fd   :  { %5051 = vmatpush.msrb.mxu0 %v5042_v29 }
0x12ff   :  { %5052 = vmatpush.msrb.mxu0 %v5041_v17 }
0x1301   :  { %5053 = vmatpush.msrb.mxu0 %v5040_v45 }
0x1303   :  { %5054 = vmatpush.msrb.mxu0 %v5039_v43 }
0x1305   :  { %5055 = vmatpush.msrb.mxu0 %v5038_v7 }
0x1307   :  { %5056 = vmatpush.msrb.mxu0 %v5037_v6 }
0x1309   :  { %5057 = vmatpush.msrb.mxu0 %v5036_v36 }
0x130b   :  { %5058 = vmatpush.msrb.mxu0 %v5035_v51 }
0x130d   :  { %5059 = vmatpush.msrb.mxu0 %v5034_v22 }
0x130f   :  { %5060 = vmatpush.msrb.mxu0 %v5033_v34 }
0x1311   :  { %5061 = vmatpush.msrb.mxu0 %v5032_v8 }
0x1313   :  { %5062 = vmatpush.msrb.mxu0 %v5031_v44 }
0x1315   :  { %5063 = vmatpush.msrb.mxu0 %v5030_v21 }
0x1317   :  { %5064 = vmatpush.msrb.mxu0 %v5029_v33 }
0x1374   :  { %v4809_v25 = vpop.f32.mrf.mxu0  ;;  %v4829_v18 = vpop.f32.mrf.mxu1 }
0x1375   :  { %v4876_v35 = vrot.slane %v4809_v25, 4  ;;  %v4877_v40 = vrot.slane %v4829_v18, 4 }
0x1377   :  { %v4884_v63 = vadd.f32 %v4876_v35, %v10821_v1  ;;  %v4885_v53 = vadd.f32 %v4877_v40, %v10822_v55 }
0x1379   :  { %5450 = vtanh.f32 %v4884_v63 }
0x137a   :  { %5452 = vtanh.f32 %v4885_v53 }
0x137b   :  { %v4849_v23 = vpop.f32.mrf.mxu2  ;;  %v4869_v10 = vpop.f32.mrf.mxu3 }
0x137c   :  { %v4878_v2 = vrot.slane %v4849_v23, 4  ;;  %v4879_v13 = vrot.slane %v4869_v10, 4 }
0x137e   :  { %v4886_v56 = vadd.f32 %v4878_v2, %v10823_v16  ;;  %v4887_v20 = vadd.f32 %v4879_v13, %v10824_v50 }
0x137f   :  { %v5451_v9 = vpop.eup %5450 }
0x1380   :  { %v5453_v27 = vpop.eup %5452  ;;  %5454 = vtanh.f32 %v4886_v56  ;;  %v4892_v48 = vmul.f32 0.5, %v5451_v9 }
0x1381   :  { %v4894_v31 = vmul.f32 0.5, %v5453_v27  ;;  %5456 = vtanh.f32 %v4887_v20 }
0x1382   :  { %v4893_v38 = vadd.f32 0.5, %v4892_v48 }
0x1383   :  { %v4895_v41 = vadd.f32 0.5, %v4894_v31 }
0x1385   :  { %v4901_v46 = vmul.f32 %v4899_v11, %v4895_v41 }
0x1386   :  { %v5455_v58 = vpop.eup %5454 }
0x1387   :  { %v4902_v32 = vmul.f32 %v5455_v58, %v4893_v38  ;;  %v5457_v24 = vpop.eup %5456 }
0x1388   :  { %v4896_v14 = vmul.f32 0.5, %v5457_v24 }
0x1389   :  { %v4903_v12 = vadd.f32 %v4902_v32, %v4901_v46 }
0x138a   :  { %v4897_v52 = vadd.f32 0.5, %v4896_v14 }
0x138b   :  { %5458 = vtanh.f32 %v4903_v12  ;;  %v5016_v36 = vrot.slane %v4903_v12, 6 }
0x1391   :  { %v5459_v39 = vpop.eup %5458 }
0x1392   :  { %v4905_v26 = vmul.f32 %v5459_v39, %v4897_v52 }
0x1394   :  { %v4907_v47 = vrot.slane %v4905_v26, 4  ;;  %v5024_v57 = vsel %vm205_vm0, %v5023_v0, %v4905_v26 }
0x1396   :  { %4925 = vmatmul.f32.vlgmr.msra.gmra.mxu0 %v4907_v47  ;;  %4945 = vmatmul.f32.vlgmr.msrb.gmra.mxu1 %v4907_v47 }
0x1397   :  { %4965 = vmatmul.f32.vlgmr.msra.gmra.mxu2 %v4907_v47  ;;  %4985 = vmatmul.f32.vlgmr.msrb.gmra.mxu3 %v4907_v47 }
0x139e   :  { %5065 = vmatmul.f32.vlgmr.msrb.gmra.mxu0 %v10825_v62 }
0x1413   :  { %v4926_v59 = vpop.f32.mrf.mxu0  ;;  %v4946_v30 = vpop.f32.mrf.mxu1 }
0x1414   :  { %v4993_v61 = vrot.slane %v4926_v59, 2  ;;  %v4994_v49 = vrot.slane %v4946_v30, 2 }
0x1416   :  { %v5001_v60 = vadd.f32 %v4993_v61, %v10821_v1  ;;  %v5002_v5 = vadd.f32 %v4994_v49, %v10822_v55 }
0x1418   :  { %5460 = vtanh.f32 %v5001_v60 }
0x1419   :  { %5462 = vtanh.f32 %v5002_v5 }
0x141a   :  { %v4966_v54 = vpop.f32.mrf.mxu2  ;;  %v4986_v42 = vpop.f32.mrf.mxu3 }
0x141b   :  { %v4995_v4 = vrot.slane %v4966_v54, 2  ;;  %v4996_v15 = vrot.slane %v4986_v42, 2  ;;  %v5066_v19 = vpop.f32.mrf.mxu0 }
0x141c   :  { %v5067_v37 = vadd.f32 %v5149_v28, %v5066_v19 }
0x141d   :  { %v5003_v3 = vadd.f32 %v4995_v4, %v10823_v16  ;;  %v5004_v17 = vadd.f32 %v4996_v15, %v10824_v50 }
0x141e   :  { %v5461_v29 = vpop.eup %5460  ;;  %v5134_v1 = vmul.f32 -1.442695, %v5067_v37 }
0x141f   :  { %v5463_v45 = vpop.eup %5462  ;;  %5464 = vtanh.f32 %v5003_v3  ;;  %v5009_v55 = vmul.f32 0.5, %v5461_v29 }
0x1420   :  { %v5011_v43 = vmul.f32 0.5, %v5463_v45  ;;  %5466 = vpow2.f32 %v5134_v1 }
0x1421   :  { %5468 = vtanh.f32 %v5004_v17  ;;  %v5010_v6 = vadd.f32 0.5, %v5009_v55 }
0x1422   :  { %v5012_v7 = vadd.f32 0.5, %v5011_v43 }
0x1424   :  { %v5018_v22 = vmul.f32 %v5016_v36, %v5012_v7 }
0x1425   :  { %v5465_v51 = vpop.eup %5464 }
0x1426   :  { %v5019_v25 = vmul.f32 %v5465_v51, %v5010_v6  ;;  %v5467_v18 = vpop.eup %5466 }
0x1427   :  { %v5469_v34 = vpop.eup %5468  ;;  %v5078_v16 = vadd.f32 1.0, %v5467_v18 }
0x1428   :  { %v5020_v35 = vadd.f32 %v5019_v25, %v5018_v22  ;;  %v5013_v40 = vmul.f32 0.5, %v5469_v34 }
0x1429   :  { %v5091_v10 = vand.u32 2147483648, %v5078_v16  ;;  %v5089_v2 = vand.u32 2147483647, %v5078_v16  ;;  %vm5085_vm5 = vweird.f32 %v5078_v16 }
0x142a   :  { %5470 = vtanh.f32 %v5020_v35  ;;  %v5014_v50 = vadd.f32 0.5, %v5013_v40 }
0x142b   :  { %5472 = vrcp.f32 %v5078_v16  ;;  %v5092_v56 = vor.u32 1.1754944e-38, %v5091_v10  ;;  %vm5090_vm7 = vcmp.eq.f32.partialorder %v5089_v2, 8.507059e+37 }
0x1430   :  { %v5471_v63 = vpop.eup %5470 }
0x1431   :  { %v5473_v53 = vpop.eup %5472  ;;  %v5022_v8 = vmul.f32 %v5471_v63, %v5014_v50 }
0x1432   :  { %v5081_v44 = vmul.f32 %v5473_v53, %v5078_v16  ;;  %vm5086_vm4 = vweird.f32 %v5473_v53 }
0x1433   :  { %v5025_v21 = vsel %vm835_vm3, %v5024_v57, %v5022_v8  ;;  %vm5087_vm6 = vmor %vm5085_vm5, %vm5086_vm4 }
0x1434   :  { %v5082_v23 = vsub.f32 1.0, %v5081_v44  ;;  %5068 = vmatmul.f32.gmra.mxu0 %v5025_v21 }
0x1436   :  { %v5083_v33 = vmul.f32 %v5473_v53, %v5082_v23 }
0x1438   :  { %v5084_v13 = vadd.f32 %v5473_v53, %v5083_v33 }
0x143a   :  { %v5088_v9 = vsel %vm5087_vm6, %v5473_v53, %v5084_v13 }
0x143b   :  { %v5093_v20 = vsel %vm5090_vm7, %v5092_v56, %v5088_v9 }
0x143c   :  { %5110 = vst [vmem:[%s9812_s15] sm:$0xff] %v5093_v20 }
0x14b1   :  { %v5069_v27 = vpop.f32.mrf.mxu0 }
0x14b2   :  { %v5070_v48 = vadd.f32 %v5149_v28, %v5069_v27 }
0x14b4   :  { %v5135_v31 = vmul.f32 -1.442695, %v5070_v48 }
0x14b6   :  { %5474 = vpow2.f32 %v5135_v31 }
0x14bc   :  { %v5475_v41 = vpop.eup %5474 }
0x14bd   :  { %v5079_v38 = vadd.f32 1.0, %v5475_v41 }
0x14bf   :  { %5476 = vrcp.f32 %v5079_v38  ;;  %v5106_v32 = vand.u32 2147483648, %v5079_v38  ;;  %v5104_v12 = vand.u32 2147483647, %v5079_v38  ;;  %vm5100_vm9 = vweird.f32 %v5079_v38 }
0x14c1   :  { %v5107_v52 = vor.u32 1.1754944e-38, %v5106_v32  ;;  %vm5105_vm11 = vcmp.eq.f32.partialorder %v5104_v12, 8.507059e+37 }
0x14c5   :  { %v5477_v11 = vpop.eup %5476 }
0x14c6   :  { %v5096_v58 = vmul.f32 %v5477_v11, %v5079_v38  ;;  %vm5101_vm8 = vweird.f32 %v5477_v11 }
0x14c7   :  { %vm5102_vm10 = vmor %vm5100_vm9, %vm5101_vm8 }
0x14c8   :  { %v5097_v46 = vsub.f32 1.0, %v5096_v58 }
0x14ca   :  { %v5098_v24 = vmul.f32 %v5477_v11, %v5097_v46 }
0x14cc   :  { %v5099_v14 = vadd.f32 %v5477_v11, %v5098_v24 }
0x14ce   :  { %v5103_v39 = vsel %vm5102_vm10, %v5477_v11, %v5099_v14 }
0x14cf   :  { %v5108_v26 = vsel %vm5105_vm11, %v5107_v52, %v5103_v39 }
0x14d0   :  { %5111 = vst [vmem:[%s9812_s15 + $0x8] sm:$0xff] %v5108_v26 }
0x14d1   :  { %5116 = vsyncpa [#allocation5], 1 }
0x14d2   :  { %5117 = vsyncpa [#allocation7], 1 }
0x14d3   :  { %5118 = vsyncpa [#allocation10], 1 }
0x14d4   :  { %5119 = vsyncpa [#allocation13], 1 }
0x14d5   :  { %5120 = vsyncpa [#allocation16], 1 }

</bundles_post_ra>
